<compile_context>
chip_gen: v6e
topology: v6e:2x2x1
jax: 0.10.0
libtpu: 0.0.40
codegen_flags: <defaults>
</compile_context>

<pallas_src>
import functools
import numpy as np
import jax
import jax.numpy as jnp
from jax import lax
from jax.experimental import pallas as pl
from jax.experimental.pallas import tpu as pltpu

V_TH = 1.0       # spikingjelly IFNode default v_threshold (v_reset = 0 -> hard reset)
BN_EPS = 1e-5


# ---------------------------------------------------------------------------
# Pallas kernel
# ---------------------------------------------------------------------------
def snn_kernel(x_ref, seg_ref, w1_ref, b1_ref, w2_ref, b2_ref, w3_ref, b3_ref,
               wfc_ref, bfc_ref, out_ref, s1_ref, s2_ref, a2_ref, a3_ref,
               *, T, B, L):
    BL = x_ref.shape[0]          # B * L rows (one time step)
    TBL = T * BL                 # time-batched rows

    def seam_masks(rows):
        # row = (t*B*L +) b*L + l  ->  row % L == l.  Padding rows of the k=3/pad=1 conv
        # are l == 0 (no left neighbour) and l == L-1 (no right neighbour); the same
        # masks also kill the wrap-around across batch / time-step seams of the roll.
        l_idx = lax.broadcasted_iota(jnp.int32, (rows, 1), 0) % L
        return l_idx != 0, l_idx != (L - 1)

    def conv(h, w_cat, b, not_first, not_last):
        # Fused 3-tap conv: sublane rolls + seam masks, then ONE matmul against the
        # stacked (3*Cin, Cout) weights.  Slab is cast to the weight dtype (bf16 for
        # conv2/conv3, where it holds exact 0/1 spikes); accumulation stays f32.
        rows = h.shape[0]
        h_prev = jnp.where(not_first, pltpu.roll(h, 1, 0), 0.0)         # row l-1
        h_next = jnp.where(not_last, pltpu.roll(h, rows - 1, 0), 0.0)   # row l+1
        slab = jnp.concatenate([h_prev, h, h_next], axis=-1).astype(w_cat.dtype)
        return jnp.dot(slab, w_cat, preferred_element_type=jnp.float32) + b

    def if_step(v, a):
        # IFNode: charge, fire at threshold, hard reset to 0 (compare + select).
        v = v + a
        spk = v >= V_TH
        return jnp.where(spk, 0.0, v), spk.astype(jnp.float32)

    x = x_ref[...]
    seg = seg_ref[...]                       # (B, BL) selector, 1/(L*T) folded in
    w1, b1 = w1_ref[...], b1_ref[...]        # f32 (analog input path)
    w2, b2 = w2_ref[...], b2_ref[...]        # bf16 weights, f32 bias
    w3, b3 = w3_ref[...], b3_ref[...]
    wfc, bfc = wfc_ref[...], bfc_ref[...]
    C1, C2, C3 = w1.shape[-1], w2.shape[-1], w3.shape[-1]

    nf_bl, nl_bl = seam_masks(BL)            # per-step masks (conv1 only)
    nf_tbl, nl_tbl = seam_masks(TBL)         # time-batched masks (conv2 / conv3)

    # conv1 + bn1: the rate-coded analog input is identical at every time step,
    # so the conv is hoisted out of time entirely.  Kept in f32 (quantizing the analog
    # path shifts layer-1 spike timings).
    a1 = conv(x, w1, b1, nf_bl, nl_bl)       # (BL, C1) f32

    # TODO(synk): Dropout(p=0.2) treated as identity (eval mode); training-mode RNG
    # dropout is not implemented.
    # T is a small static int -> static unroll of the VPU-only scans is fine here.
    # TODO(synk): at production row-tile sizes switch these scans to
    # lax.fori_loop(..., unroll=2..4) to bound live ranges / vreg pressure.

    # ---- layer-1 IF scan (VPU only), materialize the full spike train ----
    v1 = jnp.zeros((BL, C1), jnp.float32)
    for t in range(T):
        v1, s1 = if_step(v1, a1)
        s1_ref[t * BL:(t + 1) * BL, :] = s1

    # ---- conv2 + bn2, batched over all T steps: ONE (T*BL, 3*C1) x (3*C1, C2) matmul ----
    a2_ref[...] = conv(s1_ref[...], w2, b2, nf_tbl, nl_tbl)

    # ---- layer-2 IF scan (VPU only) ----
    v2 = jnp.zeros((BL, C2), jnp.float32)
    for t in range(T):
        v2, s2 = if_step(v2, a2_ref[t * BL:(t + 1) * BL, :])
        s2_ref[t * BL:(t + 1) * BL, :] = s2

    # ---- conv3 + bn3, batched: ONE (T*BL, 3*C2) x (3*C2, C3) matmul ----
    a3_ref[...] = conv(s2_ref[...], w3, b3, nf_tbl, nl_tbl)

    # ---- layer-3 IF scan + spike-count accumulation ----
    v3 = jnp.zeros((BL, C3), jnp.float32)
    acc = jnp.zeros((BL, C3), jnp.float32)
    for t in range(T):
        v3, s3 = if_step(v3, a3_ref[t * BL:(t + 1) * BL, :])
        acc = acc + s3

    # ---- hoisted classifier: GAP + Linear + 1/T average (affine in acc -> exact) ----
    # seg already carries the 1/(L*T) normalization.
    g = jnp.dot(seg, acc, preferred_element_type=jnp.float32)           # (B, C3)
    out_ref[...] = jnp.dot(g, wfc, preferred_element_type=jnp.float32) + bfc


def snn_forward(x, params, T):
    B, L, Cin = x.shape
    C1 = params["w1"].shape[-1]
    C2 = params["w2"].shape[-1]
    C3 = params["w3"].shape[-1]
    NC = params["wfc"].shape[-1]

    # Layout plumbing in the wrapper (once per call, tiny tensors):
    #  * flatten x to rows (B*L, Cin),
    #  * stack the 3 conv taps along the contraction axis: (3, Cin, Cout) -> (3*Cin, Cout),
    #  * cast conv2/conv3 weights to bf16 for the MXU (their activations are exact 0/1
    #    spikes); conv1 sees the analog input, keep its weights f32,
    #  * precompute the GAP batch-selector with the 1/(L*T) normalization folded in.
    x2 = x.reshape(B * L, Cin)
    w1 = params["w1"].reshape(-1, C1)
    w2 = params["w2"].reshape(-1, C2).astype(jnp.bfloat16)
    w3 = params["w3"].reshape(-1, C3).astype(jnp.bfloat16)
    seg = (jnp.arange(B, dtype=jnp.int32)[:, None]
           == (jnp.arange(B * L, dtype=jnp.int32)[None, :] // L)).astype(jnp.float32)
    seg = seg / float(L * T)

    args = (x2, seg, w1, params["b1"], w2, params["b2"], w3, params["b3"],
            params["wfc"], params["bfc"])
    vmem = pl.BlockSpec(memory_space=pltpu.MemorySpace.VMEM)
    # TODO(synk): at production sizes, add a "parallel" grid axis over row tiles aligned
    # to multiples of L (uses both v7x TensorCores; size the per-tile resident set —
    # bf16 slabs + f32 spike trains — against v7x's 64 MiB VMEM via vmem_limit_bytes).
    return pl.pallas_call(
        functools.partial(snn_kernel, T=T, B=B, L=L),
        out_shape=jax.ShapeDtypeStruct((B, NC), jnp.float32),
        in_specs=[vmem] * len(args),
        out_specs=vmem,
        scratch_shapes=[
            pltpu.VMEM((T * B * L, C1), jnp.float32),   # layer-1 spike train
            pltpu.VMEM((T * B * L, C2), jnp.float32),   # layer-2 spike train
            pltpu.VMEM((T * B * L, C2), jnp.float32),   # conv2 pre-activations
            pltpu.VMEM((T * B * L, C3), jnp.float32),   # conv3 pre-activations
        ],
    )(*args)


# ---------------------------------------------------------------------------
# Pure-JAX reference (f32 everywhere, per-step head exactly like the PyTorch loop)
# ---------------------------------------------------------------------------
def snn_reference(x, params, T):
    def conv(h, w, b):
        L = h.shape[1]
        hp = jnp.pad(h, ((0, 0), (1, 1), (0, 0)))
        out = sum(jnp.einsum('blc,cd->bld', hp[:, k:k + L, :], w[k],
                             preferred_element_type=jnp.float32) for k in range(3))
        return out + b

    def ifs(v, a):
        v = v + a
        s = (v >= V_TH).astype(jnp.float32)
        return v * (1.0 - s), s

    B, L, _ = x.shape
    v1 = jnp.zeros((B, L, params["w1"].shape[-1]), jnp.float32)
    v2 = jnp.zeros((B, L, params["w2"].shape[-1]), jnp.float32)
    v3 = jnp.zeros((B, L, params["w3"].shape[-1]), jnp.float32)
    acc = jnp.zeros((B, params["wfc"].shape[-1]), jnp.float32)
    a1 = conv(x, params["w1"], params["b1"])
    for _ in range(T):
        v1, s1 = ifs(v1, a1)
        v2, s2 = ifs(v2, conv(s1, params["w2"], params["b2"]))
        v3, s3 = ifs(v3, conv(s2, params["w3"], params["b3"]))
        g = jnp.mean(s3, axis=1)
        acc = acc + jnp.dot(g, params["wfc"],
                            preferred_element_type=jnp.float32) + params["bfc"]
    return acc / T


# ---------------------------------------------------------------------------
# Deterministic synthetic parameters (eval-mode BN folded into conv weights)
# ---------------------------------------------------------------------------
def init_params(key, c_in=3, num_classes=3):
    keys = iter(jax.random.split(key, 20))

    def conv_bn(cin, cout):
        w = jax.random.normal(next(keys), (3, cin, cout), jnp.float32) / np.sqrt(3 * cin)
        b = 0.1 * jax.random.normal(next(keys), (cout,), jnp.float32)
        gamma = 1.0 + 0.1 * jax.random.normal(next(keys), (cout,), jnp.float32)
        beta = 0.1 * jax.random.normal(next(keys), (cout,), jnp.float32)
        running_mean = 0.1 * jax.random.normal(next(keys), (cout,), jnp.float32)
        running_var = 0.5 + jnp.abs(jax.random.normal(next(keys), (cout,), jnp.float32))
        scale = gamma / jnp.sqrt(running_var + BN_EPS)
        w_eff = w * scale[None, None, :]
        b_eff = (b - running_mean) * scale + beta
        return w_eff, b_eff.reshape(1, cout)

    w1, b1 = conv_bn(c_in, 32)
    w2, b2 = conv_bn(32, 64)
    w3, b3 = conv_bn(64, 32)
    wfc = jax.random.normal(next(keys), (32, num_classes), jnp.float32) / np.sqrt(32)
    bfc = (0.1 * jax.random.normal(next(keys), (num_classes,), jnp.float32)
           ).reshape(1, num_classes)
    return dict(w1=w1, b1=b1, w2=w2, b2=b2, w3=w3, b3=b3, wfc=wfc, bfc=bfc)


if __name__ == "__main__":
    key = jax.random.PRNGKey(0)
    kx, kp = jax.random.split(key)

    B, L, C_IN, NUM_CLASSES, T = 2, 16, 3, 3, 16
    # x is the module's input: (B, T_len, C_in)
    x = jax.random.normal(kx, (B, L, C_IN), jnp.float32)
    params = init_params(kp, C_IN, NUM_CLASSES)

    out = jax.block_until_ready(snn_forward(x, params, T))

    assert out.shape == (B, NUM_CLASSES)
    assert bool(jnp.all(jnp.isfinite(out)))

    # Loose check vs. the f32 pure-JAX reference: thresholded spikes can flip on tiny
    # fp differences (MXU vs XLA accumulation order, bf16 MXU weights for conv2/3);
    # each flip moves a logit by only |wfc| / (L*T), so the aggregate stays small.
    ref = jax.block_until_ready(snn_reference(x, params, T))
    assert float(jnp.max(jnp.abs(out - ref))) < 0.3

    print("KERNEL_OK")
</pallas_src>

<mosaic_0001>
module attributes {stable_mosaic.version = 11 : i64} {
  func.func @snn_kernel(%arg0: memref<32x3xf32, #tpu.memory_space<vmem>>, %arg1: memref<2x32xf32, #tpu.memory_space<vmem>>, %arg2: memref<9x32xf32, #tpu.memory_space<vmem>>, %arg3: memref<1x32xf32, #tpu.memory_space<vmem>>, %arg4: memref<96x64xbf16, #tpu.memory_space<vmem>>, %arg5: memref<1x64xf32, #tpu.memory_space<vmem>>, %arg6: memref<192x32xbf16, #tpu.memory_space<vmem>>, %arg7: memref<1x32xf32, #tpu.memory_space<vmem>>, %arg8: memref<32x3xf32, #tpu.memory_space<vmem>>, %arg9: memref<1x3xf32, #tpu.memory_space<vmem>>, %arg10: memref<2x3xf32, #tpu.memory_space<vmem>>, %arg11: memref<512x32xf32, #tpu.memory_space<vmem>>, %arg12: memref<512x64xf32, #tpu.memory_space<vmem>>, %arg13: memref<512x64xf32, #tpu.memory_space<vmem>>, %arg14: memref<512x32xf32, #tpu.memory_space<vmem>>) attributes {dimension_semantics = [], scalar_prefetch = 0 : i64, scratch_operands = 4 : i64, tpu.core_type = #tpu.core_type<tc>} {
    %c0 = arith.constant 0 : index
    %c0_0 = arith.constant 0 : index
    %0 = vector.load %arg0[%c0, %c0_0] : memref<32x3xf32, #tpu.memory_space<vmem>>, vector<32x3xf32>
    %c0_1 = arith.constant 0 : index
    %c0_2 = arith.constant 0 : index
    %1 = vector.load %arg1[%c0_1, %c0_2] : memref<2x32xf32, #tpu.memory_space<vmem>>, vector<2x32xf32>
    %c0_3 = arith.constant 0 : index
    %c0_4 = arith.constant 0 : index
    %2 = vector.load %arg2[%c0_3, %c0_4] : memref<9x32xf32, #tpu.memory_space<vmem>>, vector<9x32xf32>
    %c0_5 = arith.constant 0 : index
    %c0_6 = arith.constant 0 : index
    %3 = vector.load %arg3[%c0_5, %c0_6] : memref<1x32xf32, #tpu.memory_space<vmem>>, vector<1x32xf32>
    %c0_7 = arith.constant 0 : index
    %c0_8 = arith.constant 0 : index
    %4 = vector.load %arg4[%c0_7, %c0_8] : memref<96x64xbf16, #tpu.memory_space<vmem>>, vector<96x64xbf16>
    %c0_9 = arith.constant 0 : index
    %c0_10 = arith.constant 0 : index
    %5 = vector.load %arg5[%c0_9, %c0_10] : memref<1x64xf32, #tpu.memory_space<vmem>>, vector<1x64xf32>
    %c0_11 = arith.constant 0 : index
    %c0_12 = arith.constant 0 : index
    %6 = vector.load %arg6[%c0_11, %c0_12] : memref<192x32xbf16, #tpu.memory_space<vmem>>, vector<192x32xbf16>
    %c0_13 = arith.constant 0 : index
    %c0_14 = arith.constant 0 : index
    %7 = vector.load %arg7[%c0_13, %c0_14] : memref<1x32xf32, #tpu.memory_space<vmem>>, vector<1x32xf32>
    %c0_15 = arith.constant 0 : index
    %c0_16 = arith.constant 0 : index
    %8 = vector.load %arg8[%c0_15, %c0_16] : memref<32x3xf32, #tpu.memory_space<vmem>>, vector<32x3xf32>
    %c0_17 = arith.constant 0 : index
    %c0_18 = arith.constant 0 : index
    %9 = vector.load %arg9[%c0_17, %c0_18] : memref<1x3xf32, #tpu.memory_space<vmem>>, vector<1x3xf32>
    %10 = tpu.iota {dimensions = array<i32: 0>} : vector<32x1xi32>
    %c16_i32 = arith.constant 16 : i32
    %c0_i32 = arith.constant 0 : i32
    %11 = arith.cmpi eq, %c16_i32, %c0_i32 : i32
    %c1_i32 = arith.constant 1 : i32
    %12 = arith.select %11, %c1_i32, %c16_i32 : i32
    %13 = vector.broadcast %12 : i32 to vector<32x1xi32>
    %14 = arith.remsi %10, %13 : vector<32x1xi32>
    %c0_i32_19 = arith.constant 0 : i32
    %15 = vector.broadcast %c0_i32_19 : i32 to vector<32x1xi32>
    %16 = arith.cmpi ne, %14, %15 : vector<32x1xi32>
    %c0_i32_20 = arith.constant 0 : i32
    %17 = vector.broadcast %c0_i32_20 : i32 to vector<32x1xi32>
    %18 = arith.cmpi slt, %14, %17 : vector<32x1xi32>
    %c0_i32_21 = arith.constant 0 : i32
    %19 = arith.cmpi slt, %12, %c0_i32_21 : i32
    %20 = vector.broadcast %19 : i1 to vector<32x1xi1>
    %21 = vector.broadcast %20 : vector<32x1xi1> to vector<32x1xi1>
    %22 = arith.xori %18, %21 : vector<32x1xi1>
    %23 = arith.andi %22, %16 : vector<32x1xi1>
    %24 = vector.broadcast %12 : i32 to vector<32x1xi32>
    %25 = arith.addi %14, %24 : vector<32x1xi32>
    %26 = arith.select %23, %25, %14 : vector<32x1xi1>, vector<32x1xi32>
    %c0_i32_22 = arith.constant 0 : i32
    %27 = vector.broadcast %c0_i32_22 : i32 to vector<32x1xi32>
    %28 = arith.cmpi ne, %26, %27 : vector<32x1xi32>
    %c15_i32 = arith.constant 15 : i32
    %29 = vector.broadcast %c15_i32 : i32 to vector<32x1xi32>
    %30 = arith.cmpi ne, %26, %29 : vector<32x1xi32>
    %31 = tpu.iota {dimensions = array<i32: 0>} : vector<512x1xi32>
    %c16_i32_23 = arith.constant 16 : i32
    %c0_i32_24 = arith.constant 0 : i32
    %32 = arith.cmpi eq, %c16_i32_23, %c0_i32_24 : i32
    %c1_i32_25 = arith.constant 1 : i32
    %33 = arith.select %32, %c1_i32_25, %c16_i32_23 : i32
    %34 = vector.broadcast %33 : i32 to vector<512x1xi32>
    %35 = arith.remsi %31, %34 : vector<512x1xi32>
    %c0_i32_26 = arith.constant 0 : i32
    %36 = vector.broadcast %c0_i32_26 : i32 to vector<512x1xi32>
    %37 = arith.cmpi ne, %35, %36 : vector<512x1xi32>
    %c0_i32_27 = arith.constant 0 : i32
    %38 = vector.broadcast %c0_i32_27 : i32 to vector<512x1xi32>
    %39 = arith.cmpi slt, %35, %38 : vector<512x1xi32>
    %c0_i32_28 = arith.constant 0 : i32
    %40 = arith.cmpi slt, %33, %c0_i32_28 : i32
    %41 = vector.broadcast %40 : i1 to vector<512x1xi1>
    %42 = vector.broadcast %41 : vector<512x1xi1> to vector<512x1xi1>
    %43 = arith.xori %39, %42 : vector<512x1xi1>
    %44 = arith.andi %43, %37 : vector<512x1xi1>
    %45 = vector.broadcast %33 : i32 to vector<512x1xi32>
    %46 = arith.addi %35, %45 : vector<512x1xi32>
    %47 = arith.select %44, %46, %35 : vector<512x1xi1>, vector<512x1xi32>
    %c0_i32_29 = arith.constant 0 : i32
    %48 = vector.broadcast %c0_i32_29 : i32 to vector<512x1xi32>
    %49 = arith.cmpi ne, %47, %48 : vector<512x1xi32>
    %c15_i32_30 = arith.constant 15 : i32
    %50 = vector.broadcast %c15_i32_30 : i32 to vector<512x1xi32>
    %51 = arith.cmpi ne, %47, %50 : vector<512x1xi32>
    %c1_i32_31 = arith.constant 1 : i32
    %52 = tpu.dynamic_rotate %0 by %c1_i32_31 dim 0 : vector<32x3xf32>, i32 -> vector<32x3xf32>
    %cst = arith.constant 0.000000e+00 : f32
    %53 = vector.shape_cast %28 : vector<32x1xi1> to vector<32x1xi1>
    %54 = vector.broadcast %53 : vector<32x1xi1> to vector<32x3xi1>
    %55 = vector.broadcast %cst : f32 to vector<32x3xf32>
    %56 = arith.select %54, %52, %55 : vector<32x3xi1>, vector<32x3xf32>
    %c31_i32 = arith.constant 31 : i32
    %57 = tpu.dynamic_rotate %0 by %c31_i32 dim 0 : vector<32x3xf32>, i32 -> vector<32x3xf32>
    %cst_32 = arith.constant 0.000000e+00 : f32
    %58 = vector.shape_cast %30 : vector<32x1xi1> to vector<32x1xi1>
    %59 = vector.broadcast %58 : vector<32x1xi1> to vector<32x3xi1>
    %60 = vector.broadcast %cst_32 : f32 to vector<32x3xf32>
    %61 = arith.select %59, %57, %60 : vector<32x3xi1>, vector<32x3xf32>
    %62 = tpu.concatenate %56, %0, %61 in 1 : vector<32x3xf32>, vector<32x3xf32>, vector<32x3xf32> -> vector<32x9xf32>
    %cst_33 = arith.constant dense<0.000000e+00> : vector<32x32xf32>
    %63 = tpu.matmul %62, %2, %cst_33 {dimension_numbers = #tpu.dot_dimension_numbers<[1], [0], [0], [1], [0, 0, 1, 1], [], []>} : vector<32x9xf32>, vector<9x32xf32>, vector<32x32xf32> -> vector<32x32xf32>
    %64 = vector.broadcast %3 : vector<1x32xf32> to vector<32x32xf32>
    %65 = arith.addf %63, %64 : vector<32x32xf32>
    %cst_34 = arith.constant 0.000000e+00 : f32
    %66 = vector.broadcast %cst_34 : f32 to vector<32x32xf32>
    %67 = arith.addf %66, %65 : vector<32x32xf32>
    %cst_35 = arith.constant 1.000000e+00 : f32
    %68 = vector.broadcast %cst_35 : f32 to vector<32x32xf32>
    %69 = arith.cmpf oge, %67, %68 : vector<32x32xf32>
    %cst_36 = arith.constant 0.000000e+00 : f32
    %70 = vector.broadcast %cst_36 : f32 to vector<32x32xf32>
    %71 = arith.select %69, %70, %67 : vector<32x32xi1>, vector<32x32xf32>
    %72 = arith.extui %69 : vector<32x32xi1> to vector<32x32xi32>
    %73 = arith.sitofp %72 : vector<32x32xi32> to vector<32x32xf32>
    %c0_37 = arith.constant 0 : index
    %c0_38 = arith.constant 0 : index
    %74 = vector.load %arg11[%c0_37, %c0_38] : memref<512x32xf32, #tpu.memory_space<vmem>>, vector<32x32xf32>
    tpu.vector_store %arg11[%c0_37, %c0_38], %73 {strides = array<i32>} : memref<512x32xf32, #tpu.memory_space<vmem>>, vector<32x32xf32>,
    %75 = arith.addf %71, %65 : vector<32x32xf32>
    %cst_39 = arith.constant 1.000000e+00 : f32
    %76 = vector.broadcast %cst_39 : f32 to vector<32x32xf32>
    %77 = arith.cmpf oge, %75, %76 : vector<32x32xf32>
    %cst_40 = arith.constant 0.000000e+00 : f32
    %78 = vector.broadcast %cst_40 : f32 to vector<32x32xf32>
    %79 = arith.select %77, %78, %75 : vector<32x32xi1>, vector<32x32xf32>
    %80 = arith.extui %77 : vector<32x32xi1> to vector<32x32xi32>
    %81 = arith.sitofp %80 : vector<32x32xi32> to vector<32x32xf32>
    %c32 = arith.constant 32 : index
    %c0_41 = arith.constant 0 : index
    %82 = vector.load %arg11[%c32, %c0_41] : memref<512x32xf32, #tpu.memory_space<vmem>>, vector<32x32xf32>
    tpu.vector_store %arg11[%c32, %c0_41], %81 {strides = array<i32>} : memref<512x32xf32, #tpu.memory_space<vmem>>, vector<32x32xf32>,
    %83 = arith.addf %79, %65 : vector<32x32xf32>
    %cst_42 = arith.constant 1.000000e+00 : f32
    %84 = vector.broadcast %cst_42 : f32 to vector<32x32xf32>
    %85 = arith.cmpf oge, %83, %84 : vector<32x32xf32>
    %cst_43 = arith.constant 0.000000e+00 : f32
    %86 = vector.broadcast %cst_43 : f32 to vector<32x32xf32>
    %87 = arith.select %85, %86, %83 : vector<32x32xi1>, vector<32x32xf32>
    %88 = arith.extui %85 : vector<32x32xi1> to vector<32x32xi32>
    %89 = arith.sitofp %88 : vector<32x32xi32> to vector<32x32xf32>
    %c64 = arith.constant 64 : index
    %c0_44 = arith.constant 0 : index
    %90 = vector.load %arg11[%c64, %c0_44] : memref<512x32xf32, #tpu.memory_space<vmem>>, vector<32x32xf32>
    tpu.vector_store %arg11[%c64, %c0_44], %89 {strides = array<i32>} : memref<512x32xf32, #tpu.memory_space<vmem>>, vector<32x32xf32>,
    %91 = arith.addf %87, %65 : vector<32x32xf32>
    %cst_45 = arith.constant 1.000000e+00 : f32
    %92 = vector.broadcast %cst_45 : f32 to vector<32x32xf32>
    %93 = arith.cmpf oge, %91, %92 : vector<32x32xf32>
    %cst_46 = arith.constant 0.000000e+00 : f32
    %94 = vector.broadcast %cst_46 : f32 to vector<32x32xf32>
    %95 = arith.select %93, %94, %91 : vector<32x32xi1>, vector<32x32xf32>
    %96 = arith.extui %93 : vector<32x32xi1> to vector<32x32xi32>
    %97 = arith.sitofp %96 : vector<32x32xi32> to vector<32x32xf32>
    %c96 = arith.constant 96 : index
    %c0_47 = arith.constant 0 : index
    %98 = vector.load %arg11[%c96, %c0_47] : memref<512x32xf32, #tpu.memory_space<vmem>>, vector<32x32xf32>
    tpu.vector_store %arg11[%c96, %c0_47], %97 {strides = array<i32>} : memref<512x32xf32, #tpu.memory_space<vmem>>, vector<32x32xf32>,
    %99 = arith.addf %95, %65 : vector<32x32xf32>
    %cst_48 = arith.constant 1.000000e+00 : f32
    %100 = vector.broadcast %cst_48 : f32 to vector<32x32xf32>
    %101 = arith.cmpf oge, %99, %100 : vector<32x32xf32>
    %cst_49 = arith.constant 0.000000e+00 : f32
    %102 = vector.broadcast %cst_49 : f32 to vector<32x32xf32>
    %103 = arith.select %101, %102, %99 : vector<32x32xi1>, vector<32x32xf32>
    %104 = arith.extui %101 : vector<32x32xi1> to vector<32x32xi32>
    %105 = arith.sitofp %104 : vector<32x32xi32> to vector<32x32xf32>
    %c128 = arith.constant 128 : index
    %c0_50 = arith.constant 0 : index
    %106 = vector.load %arg11[%c128, %c0_50] : memref<512x32xf32, #tpu.memory_space<vmem>>, vector<32x32xf32>
    tpu.vector_store %arg11[%c128, %c0_50], %105 {strides = array<i32>} : memref<512x32xf32, #tpu.memory_space<vmem>>, vector<32x32xf32>,
    %107 = arith.addf %103, %65 : vector<32x32xf32>
    %cst_51 = arith.constant 1.000000e+00 : f32
    %108 = vector.broadcast %cst_51 : f32 to vector<32x32xf32>
    %109 = arith.cmpf oge, %107, %108 : vector<32x32xf32>
    %cst_52 = arith.constant 0.000000e+00 : f32
    %110 = vector.broadcast %cst_52 : f32 to vector<32x32xf32>
    %111 = arith.select %109, %110, %107 : vector<32x32xi1>, vector<32x32xf32>
    %112 = arith.extui %109 : vector<32x32xi1> to vector<32x32xi32>
    %113 = arith.sitofp %112 : vector<32x32xi32> to vector<32x32xf32>
    %c160 = arith.constant 160 : index
    %c0_53 = arith.constant 0 : index
    %114 = vector.load %arg11[%c160, %c0_53] : memref<512x32xf32, #tpu.memory_space<vmem>>, vector<32x32xf32>
    tpu.vector_store %arg11[%c160, %c0_53], %113 {strides = array<i32>} : memref<512x32xf32, #tpu.memory_space<vmem>>, vector<32x32xf32>,
    %115 = arith.addf %111, %65 : vector<32x32xf32>
    %cst_54 = arith.constant 1.000000e+00 : f32
    %116 = vector.broadcast %cst_54 : f32 to vector<32x32xf32>
    %117 = arith.cmpf oge, %115, %116 : vector<32x32xf32>
    %cst_55 = arith.constant 0.000000e+00 : f32
    %118 = vector.broadcast %cst_55 : f32 to vector<32x32xf32>
    %119 = arith.select %117, %118, %115 : vector<32x32xi1>, vector<32x32xf32>
    %120 = arith.extui %117 : vector<32x32xi1> to vector<32x32xi32>
    %121 = arith.sitofp %120 : vector<32x32xi32> to vector<32x32xf32>
    %c192 = arith.constant 192 : index
    %c0_56 = arith.constant 0 : index
    %122 = vector.load %arg11[%c192, %c0_56] : memref<512x32xf32, #tpu.memory_space<vmem>>, vector<32x32xf32>
    tpu.vector_store %arg11[%c192, %c0_56], %121 {strides = array<i32>} : memref<512x32xf32, #tpu.memory_space<vmem>>, vector<32x32xf32>,
    %123 = arith.addf %119, %65 : vector<32x32xf32>
    %cst_57 = arith.constant 1.000000e+00 : f32
    %124 = vector.broadcast %cst_57 : f32 to vector<32x32xf32>
    %125 = arith.cmpf oge, %123, %124 : vector<32x32xf32>
    %cst_58 = arith.constant 0.000000e+00 : f32
    %126 = vector.broadcast %cst_58 : f32 to vector<32x32xf32>
    %127 = arith.select %125, %126, %123 : vector<32x32xi1>, vector<32x32xf32>
    %128 = arith.extui %125 : vector<32x32xi1> to vector<32x32xi32>
    %129 = arith.sitofp %128 : vector<32x32xi32> to vector<32x32xf32>
    %c224 = arith.constant 224 : index
    %c0_59 = arith.constant 0 : index
    %130 = vector.load %arg11[%c224, %c0_59] : memref<512x32xf32, #tpu.memory_space<vmem>>, vector<32x32xf32>
    tpu.vector_store %arg11[%c224, %c0_59], %129 {strides = array<i32>} : memref<512x32xf32, #tpu.memory_space<vmem>>, vector<32x32xf32>,
    %131 = arith.addf %127, %65 : vector<32x32xf32>
    %cst_60 = arith.constant 1.000000e+00 : f32
    %132 = vector.broadcast %cst_60 : f32 to vector<32x32xf32>
    %133 = arith.cmpf oge, %131, %132 : vector<32x32xf32>
    %cst_61 = arith.constant 0.000000e+00 : f32
    %134 = vector.broadcast %cst_61 : f32 to vector<32x32xf32>
    %135 = arith.select %133, %134, %131 : vector<32x32xi1>, vector<32x32xf32>
    %136 = arith.extui %133 : vector<32x32xi1> to vector<32x32xi32>
    %137 = arith.sitofp %136 : vector<32x32xi32> to vector<32x32xf32>
    %c256 = arith.constant 256 : index
    %c0_62 = arith.constant 0 : index
    %138 = vector.load %arg11[%c256, %c0_62] : memref<512x32xf32, #tpu.memory_space<vmem>>, vector<32x32xf32>
    tpu.vector_store %arg11[%c256, %c0_62], %137 {strides = array<i32>} : memref<512x32xf32, #tpu.memory_space<vmem>>, vector<32x32xf32>,
    %139 = arith.addf %135, %65 : vector<32x32xf32>
    %cst_63 = arith.constant 1.000000e+00 : f32
    %140 = vector.broadcast %cst_63 : f32 to vector<32x32xf32>
    %141 = arith.cmpf oge, %139, %140 : vector<32x32xf32>
    %cst_64 = arith.constant 0.000000e+00 : f32
    %142 = vector.broadcast %cst_64 : f32 to vector<32x32xf32>
    %143 = arith.select %141, %142, %139 : vector<32x32xi1>, vector<32x32xf32>
    %144 = arith.extui %141 : vector<32x32xi1> to vector<32x32xi32>
    %145 = arith.sitofp %144 : vector<32x32xi32> to vector<32x32xf32>
    %c288 = arith.constant 288 : index
    %c0_65 = arith.constant 0 : index
    %146 = vector.load %arg11[%c288, %c0_65] : memref<512x32xf32, #tpu.memory_space<vmem>>, vector<32x32xf32>
    tpu.vector_store %arg11[%c288, %c0_65], %145 {strides = array<i32>} : memref<512x32xf32, #tpu.memory_space<vmem>>, vector<32x32xf32>,
    %147 = arith.addf %143, %65 : vector<32x32xf32>
    %cst_66 = arith.constant 1.000000e+00 : f32
    %148 = vector.broadcast %cst_66 : f32 to vector<32x32xf32>
    %149 = arith.cmpf oge, %147, %148 : vector<32x32xf32>
    %cst_67 = arith.constant 0.000000e+00 : f32
    %150 = vector.broadcast %cst_67 : f32 to vector<32x32xf32>
    %151 = arith.select %149, %150, %147 : vector<32x32xi1>, vector<32x32xf32>
    %152 = arith.extui %149 : vector<32x32xi1> to vector<32x32xi32>
    %153 = arith.sitofp %152 : vector<32x32xi32> to vector<32x32xf32>
    %c320 = arith.constant 320 : index
    %c0_68 = arith.constant 0 : index
    %154 = vector.load %arg11[%c320, %c0_68] : memref<512x32xf32, #tpu.memory_space<vmem>>, vector<32x32xf32>
    tpu.vector_store %arg11[%c320, %c0_68], %153 {strides = array<i32>} : memref<512x32xf32, #tpu.memory_space<vmem>>, vector<32x32xf32>,
    %155 = arith.addf %151, %65 : vector<32x32xf32>
    %cst_69 = arith.constant 1.000000e+00 : f32
    %156 = vector.broadcast %cst_69 : f32 to vector<32x32xf32>
    %157 = arith.cmpf oge, %155, %156 : vector<32x32xf32>
    %cst_70 = arith.constant 0.000000e+00 : f32
    %158 = vector.broadcast %cst_70 : f32 to vector<32x32xf32>
    %159 = arith.select %157, %158, %155 : vector<32x32xi1>, vector<32x32xf32>
    %160 = arith.extui %157 : vector<32x32xi1> to vector<32x32xi32>
    %161 = arith.sitofp %160 : vector<32x32xi32> to vector<32x32xf32>
    %c352 = arith.constant 352 : index
    %c0_71 = arith.constant 0 : index
    %162 = vector.load %arg11[%c352, %c0_71] : memref<512x32xf32, #tpu.memory_space<vmem>>, vector<32x32xf32>
    tpu.vector_store %arg11[%c352, %c0_71], %161 {strides = array<i32>} : memref<512x32xf32, #tpu.memory_space<vmem>>, vector<32x32xf32>,
    %163 = arith.addf %159, %65 : vector<32x32xf32>
    %cst_72 = arith.constant 1.000000e+00 : f32
    %164 = vector.broadcast %cst_72 : f32 to vector<32x32xf32>
    %165 = arith.cmpf oge, %163, %164 : vector<32x32xf32>
    %cst_73 = arith.constant 0.000000e+00 : f32
    %166 = vector.broadcast %cst_73 : f32 to vector<32x32xf32>
    %167 = arith.select %165, %166, %163 : vector<32x32xi1>, vector<32x32xf32>
    %168 = arith.extui %165 : vector<32x32xi1> to vector<32x32xi32>
    %169 = arith.sitofp %168 : vector<32x32xi32> to vector<32x32xf32>
    %c384 = arith.constant 384 : index
    %c0_74 = arith.constant 0 : index
    %170 = vector.load %arg11[%c384, %c0_74] : memref<512x32xf32, #tpu.memory_space<vmem>>, vector<32x32xf32>
    tpu.vector_store %arg11[%c384, %c0_74], %169 {strides = array<i32>} : memref<512x32xf32, #tpu.memory_space<vmem>>, vector<32x32xf32>,
    %171 = arith.addf %167, %65 : vector<32x32xf32>
    %cst_75 = arith.constant 1.000000e+00 : f32
    %172 = vector.broadcast %cst_75 : f32 to vector<32x32xf32>
    %173 = arith.cmpf oge, %171, %172 : vector<32x32xf32>
    %cst_76 = arith.constant 0.000000e+00 : f32
    %174 = vector.broadcast %cst_76 : f32 to vector<32x32xf32>
    %175 = arith.select %173, %174, %171 : vector<32x32xi1>, vector<32x32xf32>
    %176 = arith.extui %173 : vector<32x32xi1> to vector<32x32xi32>
    %177 = arith.sitofp %176 : vector<32x32xi32> to vector<32x32xf32>
    %c416 = arith.constant 416 : index
    %c0_77 = arith.constant 0 : index
    %178 = vector.load %arg11[%c416, %c0_77] : memref<512x32xf32, #tpu.memory_space<vmem>>, vector<32x32xf32>
    tpu.vector_store %arg11[%c416, %c0_77], %177 {strides = array<i32>} : memref<512x32xf32, #tpu.memory_space<vmem>>, vector<32x32xf32>,
    %179 = arith.addf %175, %65 : vector<32x32xf32>
    %cst_78 = arith.constant 1.000000e+00 : f32
    %180 = vector.broadcast %cst_78 : f32 to vector<32x32xf32>
    %181 = arith.cmpf oge, %179, %180 : vector<32x32xf32>
    %cst_79 = arith.constant 0.000000e+00 : f32
    %182 = vector.broadcast %cst_79 : f32 to vector<32x32xf32>
    %183 = arith.select %181, %182, %179 : vector<32x32xi1>, vector<32x32xf32>
    %184 = arith.extui %181 : vector<32x32xi1> to vector<32x32xi32>
    %185 = arith.sitofp %184 : vector<32x32xi32> to vector<32x32xf32>
    %c448 = arith.constant 448 : index
    %c0_80 = arith.constant 0 : index
    %186 = vector.load %arg11[%c448, %c0_80] : memref<512x32xf32, #tpu.memory_space<vmem>>, vector<32x32xf32>
    tpu.vector_store %arg11[%c448, %c0_80], %185 {strides = array<i32>} : memref<512x32xf32, #tpu.memory_space<vmem>>, vector<32x32xf32>,
    %187 = arith.addf %183, %65 : vector<32x32xf32>
    %cst_81 = arith.constant 1.000000e+00 : f32
    %188 = vector.broadcast %cst_81 : f32 to vector<32x32xf32>
    %189 = arith.cmpf oge, %187, %188 : vector<32x32xf32>
    %190 = arith.extui %189 : vector<32x32xi1> to vector<32x32xi32>
    %191 = arith.sitofp %190 : vector<32x32xi32> to vector<32x32xf32>
    %c480 = arith.constant 480 : index
    %c0_82 = arith.constant 0 : index
    %192 = vector.load %arg11[%c480, %c0_82] : memref<512x32xf32, #tpu.memory_space<vmem>>, vector<32x32xf32>
    tpu.vector_store %arg11[%c480, %c0_82], %191 {strides = array<i32>} : memref<512x32xf32, #tpu.memory_space<vmem>>, vector<32x32xf32>,
    %c0_83 = arith.constant 0 : index
    %c0_84 = arith.constant 0 : index
    %193 = vector.load %arg11[%c0_83, %c0_84] : memref<512x32xf32, #tpu.memory_space<vmem>>, vector<512x32xf32>
    %c1_i32_85 = arith.constant 1 : i32
    %194 = tpu.dynamic_rotate %193 by %c1_i32_85 dim 0 : vector<512x32xf32>, i32 -> vector<512x32xf32>
    %cst_86 = arith.constant 0.000000e+00 : f32
    %195 = vector.shape_cast %49 : vector<512x1xi1> to vector<512x1xi1>
    %196 = vector.broadcast %195 : vector<512x1xi1> to vector<512x32xi1>
    %197 = vector.broadcast %cst_86 : f32 to vector<512x32xf32>
    %198 = arith.select %196, %194, %197 : vector<512x32xi1>, vector<512x32xf32>
    %c511_i32 = arith.constant 511 : i32
    %199 = tpu.dynamic_rotate %193 by %c511_i32 dim 0 : vector<512x32xf32>, i32 -> vector<512x32xf32>
    %cst_87 = arith.constant 0.000000e+00 : f32
    %200 = vector.shape_cast %51 : vector<512x1xi1> to vector<512x1xi1>
    %201 = vector.broadcast %200 : vector<512x1xi1> to vector<512x32xi1>
    %202 = vector.broadcast %cst_87 : f32 to vector<512x32xf32>
    %203 = arith.select %201, %199, %202 : vector<512x32xi1>, vector<512x32xf32>
    %204 = tpu.concatenate %198, %193, %203 in 1 : vector<512x32xf32>, vector<512x32xf32>, vector<512x32xf32> -> vector<512x96xf32>
    %205 = arith.truncf %204 : vector<512x96xf32> to vector<512x96xbf16>
    %cst_88 = arith.constant dense<0.000000e+00> : vector<512x64xf32>
    %206 = tpu.matmul %205, %4, %cst_88 {dimension_numbers = #tpu.dot_dimension_numbers<[1], [0], [0], [1], [0, 0, 1, 1], [], []>} : vector<512x96xbf16>, vector<96x64xbf16>, vector<512x64xf32> -> vector<512x64xf32>
    %207 = vector.broadcast %5 : vector<1x64xf32> to vector<512x64xf32>
    %208 = arith.addf %206, %207 : vector<512x64xf32>
    %c0_89 = arith.constant 0 : index
    %c0_90 = arith.constant 0 : index
    %209 = vector.load %arg13[%c0_89, %c0_90] : memref<512x64xf32, #tpu.memory_space<vmem>>, vector<512x64xf32>
    tpu.vector_store %arg13[%c0_89, %c0_90], %208 {strides = array<i32>} : memref<512x64xf32, #tpu.memory_space<vmem>>, vector<512x64xf32>,
    %cst_91 = arith.constant 0.000000e+00 : f32
    %210 = vector.broadcast %cst_91 : f32 to vector<32x64xf32>
    %c0_92 = arith.constant 0 : index
    %c0_93 = arith.constant 0 : index
    %211 = vector.load %arg13[%c0_92, %c0_93] : memref<512x64xf32, #tpu.memory_space<vmem>>, vector<32x64xf32>
    %212 = arith.addf %210, %211 : vector<32x64xf32>
    %cst_94 = arith.constant 1.000000e+00 : f32
    %213 = vector.broadcast %cst_94 : f32 to vector<32x64xf32>
    %214 = arith.cmpf oge, %212, %213 : vector<32x64xf32>
    %cst_95 = arith.constant 0.000000e+00 : f32
    %215 = vector.broadcast %cst_95 : f32 to vector<32x64xf32>
    %216 = arith.select %214, %215, %212 : vector<32x64xi1>, vector<32x64xf32>
    %217 = arith.extui %214 : vector<32x64xi1> to vector<32x64xi32>
    %218 = arith.sitofp %217 : vector<32x64xi32> to vector<32x64xf32>
    %c0_96 = arith.constant 0 : index
    %c0_97 = arith.constant 0 : index
    %219 = vector.load %arg12[%c0_96, %c0_97] : memref<512x64xf32, #tpu.memory_space<vmem>>, vector<32x64xf32>
    tpu.vector_store %arg12[%c0_96, %c0_97], %218 {strides = array<i32>} : memref<512x64xf32, #tpu.memory_space<vmem>>, vector<32x64xf32>,
    %c32_98 = arith.constant 32 : index
    %c0_99 = arith.constant 0 : index
    %220 = vector.load %arg13[%c32_98, %c0_99] : memref<512x64xf32, #tpu.memory_space<vmem>>, vector<32x64xf32>
    %221 = arith.addf %216, %220 : vector<32x64xf32>
    %cst_100 = arith.constant 1.000000e+00 : f32
    %222 = vector.broadcast %cst_100 : f32 to vector<32x64xf32>
    %223 = arith.cmpf oge, %221, %222 : vector<32x64xf32>
    %cst_101 = arith.constant 0.000000e+00 : f32
    %224 = vector.broadcast %cst_101 : f32 to vector<32x64xf32>
    %225 = arith.select %223, %224, %221 : vector<32x64xi1>, vector<32x64xf32>
    %226 = arith.extui %223 : vector<32x64xi1> to vector<32x64xi32>
    %227 = arith.sitofp %226 : vector<32x64xi32> to vector<32x64xf32>
    %c32_102 = arith.constant 32 : index
    %c0_103 = arith.constant 0 : index
    %228 = vector.load %arg12[%c32_102, %c0_103] : memref<512x64xf32, #tpu.memory_space<vmem>>, vector<32x64xf32>
    tpu.vector_store %arg12[%c32_102, %c0_103], %227 {strides = array<i32>} : memref<512x64xf32, #tpu.memory_space<vmem>>, vector<32x64xf32>,
    %c64_104 = arith.constant 64 : index
    %c0_105 = arith.constant 0 : index
    %229 = vector.load %arg13[%c64_104, %c0_105] : memref<512x64xf32, #tpu.memory_space<vmem>>, vector<32x64xf32>
    %230 = arith.addf %225, %229 : vector<32x64xf32>
    %cst_106 = arith.constant 1.000000e+00 : f32
    %231 = vector.broadcast %cst_106 : f32 to vector<32x64xf32>
    %232 = arith.cmpf oge, %230, %231 : vector<32x64xf32>
    %cst_107 = arith.constant 0.000000e+00 : f32
    %233 = vector.broadcast %cst_107 : f32 to vector<32x64xf32>
    %234 = arith.select %232, %233, %230 : vector<32x64xi1>, vector<32x64xf32>
    %235 = arith.extui %232 : vector<32x64xi1> to vector<32x64xi32>
    %236 = arith.sitofp %235 : vector<32x64xi32> to vector<32x64xf32>
    %c64_108 = arith.constant 64 : index
    %c0_109 = arith.constant 0 : index
    %237 = vector.load %arg12[%c64_108, %c0_109] : memref<512x64xf32, #tpu.memory_space<vmem>>, vector<32x64xf32>
    tpu.vector_store %arg12[%c64_108, %c0_109], %236 {strides = array<i32>} : memref<512x64xf32, #tpu.memory_space<vmem>>, vector<32x64xf32>,
    %c96_110 = arith.constant 96 : index
    %c0_111 = arith.constant 0 : index
    %238 = vector.load %arg13[%c96_110, %c0_111] : memref<512x64xf32, #tpu.memory_space<vmem>>, vector<32x64xf32>
    %239 = arith.addf %234, %238 : vector<32x64xf32>
    %cst_112 = arith.constant 1.000000e+00 : f32
    %240 = vector.broadcast %cst_112 : f32 to vector<32x64xf32>
    %241 = arith.cmpf oge, %239, %240 : vector<32x64xf32>
    %cst_113 = arith.constant 0.000000e+00 : f32
    %242 = vector.broadcast %cst_113 : f32 to vector<32x64xf32>
    %243 = arith.select %241, %242, %239 : vector<32x64xi1>, vector<32x64xf32>
    %244 = arith.extui %241 : vector<32x64xi1> to vector<32x64xi32>
    %245 = arith.sitofp %244 : vector<32x64xi32> to vector<32x64xf32>
    %c96_114 = arith.constant 96 : index
    %c0_115 = arith.constant 0 : index
    %246 = vector.load %arg12[%c96_114, %c0_115] : memref<512x64xf32, #tpu.memory_space<vmem>>, vector<32x64xf32>
    tpu.vector_store %arg12[%c96_114, %c0_115], %245 {strides = array<i32>} : memref<512x64xf32, #tpu.memory_space<vmem>>, vector<32x64xf32>,
    %c128_116 = arith.constant 128 : index
    %c0_117 = arith.constant 0 : index
    %247 = vector.load %arg13[%c128_116, %c0_117] : memref<512x64xf32, #tpu.memory_space<vmem>>, vector<32x64xf32>
    %248 = arith.addf %243, %247 : vector<32x64xf32>
    %cst_118 = arith.constant 1.000000e+00 : f32
    %249 = vector.broadcast %cst_118 : f32 to vector<32x64xf32>
    %250 = arith.cmpf oge, %248, %249 : vector<32x64xf32>
    %cst_119 = arith.constant 0.000000e+00 : f32
    %251 = vector.broadcast %cst_119 : f32 to vector<32x64xf32>
    %252 = arith.select %250, %251, %248 : vector<32x64xi1>, vector<32x64xf32>
    %253 = arith.extui %250 : vector<32x64xi1> to vector<32x64xi32>
    %254 = arith.sitofp %253 : vector<32x64xi32> to vector<32x64xf32>
    %c128_120 = arith.constant 128 : index
    %c0_121 = arith.constant 0 : index
    %255 = vector.load %arg12[%c128_120, %c0_121] : memref<512x64xf32, #tpu.memory_space<vmem>>, vector<32x64xf32>
    tpu.vector_store %arg12[%c128_120, %c0_121], %254 {strides = array<i32>} : memref<512x64xf32, #tpu.memory_space<vmem>>, vector<32x64xf32>,
    %c160_122 = arith.constant 160 : index
    %c0_123 = arith.constant 0 : index
    %256 = vector.load %arg13[%c160_122, %c0_123] : memref<512x64xf32, #tpu.memory_space<vmem>>, vector<32x64xf32>
    %257 = arith.addf %252, %256 : vector<32x64xf32>
    %cst_124 = arith.constant 1.000000e+00 : f32
    %258 = vector.broadcast %cst_124 : f32 to vector<32x64xf32>
    %259 = arith.cmpf oge, %257, %258 : vector<32x64xf32>
    %cst_125 = arith.constant 0.000000e+00 : f32
    %260 = vector.broadcast %cst_125 : f32 to vector<32x64xf32>
    %261 = arith.select %259, %260, %257 : vector<32x64xi1>, vector<32x64xf32>
    %262 = arith.extui %259 : vector<32x64xi1> to vector<32x64xi32>
    %263 = arith.sitofp %262 : vector<32x64xi32> to vector<32x64xf32>
    %c160_126 = arith.constant 160 : index
    %c0_127 = arith.constant 0 : index
    %264 = vector.load %arg12[%c160_126, %c0_127] : memref<512x64xf32, #tpu.memory_space<vmem>>, vector<32x64xf32>
    tpu.vector_store %arg12[%c160_126, %c0_127], %263 {strides = array<i32>} : memref<512x64xf32, #tpu.memory_space<vmem>>, vector<32x64xf32>,
    %c192_128 = arith.constant 192 : index
    %c0_129 = arith.constant 0 : index
    %265 = vector.load %arg13[%c192_128, %c0_129] : memref<512x64xf32, #tpu.memory_space<vmem>>, vector<32x64xf32>
    %266 = arith.addf %261, %265 : vector<32x64xf32>
    %cst_130 = arith.constant 1.000000e+00 : f32
    %267 = vector.broadcast %cst_130 : f32 to vector<32x64xf32>
    %268 = arith.cmpf oge, %266, %267 : vector<32x64xf32>
    %cst_131 = arith.constant 0.000000e+00 : f32
    %269 = vector.broadcast %cst_131 : f32 to vector<32x64xf32>
    %270 = arith.select %268, %269, %266 : vector<32x64xi1>, vector<32x64xf32>
    %271 = arith.extui %268 : vector<32x64xi1> to vector<32x64xi32>
    %272 = arith.sitofp %271 : vector<32x64xi32> to vector<32x64xf32>
    %c192_132 = arith.constant 192 : index
    %c0_133 = arith.constant 0 : index
    %273 = vector.load %arg12[%c192_132, %c0_133] : memref<512x64xf32, #tpu.memory_space<vmem>>, vector<32x64xf32>
    tpu.vector_store %arg12[%c192_132, %c0_133], %272 {strides = array<i32>} : memref<512x64xf32, #tpu.memory_space<vmem>>, vector<32x64xf32>,
    %c224_134 = arith.constant 224 : index
    %c0_135 = arith.constant 0 : index
    %274 = vector.load %arg13[%c224_134, %c0_135] : memref<512x64xf32, #tpu.memory_space<vmem>>, vector<32x64xf32>
    %275 = arith.addf %270, %274 : vector<32x64xf32>
    %cst_136 = arith.constant 1.000000e+00 : f32
    %276 = vector.broadcast %cst_136 : f32 to vector<32x64xf32>
    %277 = arith.cmpf oge, %275, %276 : vector<32x64xf32>
    %cst_137 = arith.constant 0.000000e+00 : f32
    %278 = vector.broadcast %cst_137 : f32 to vector<32x64xf32>
    %279 = arith.select %277, %278, %275 : vector<32x64xi1>, vector<32x64xf32>
    %280 = arith.extui %277 : vector<32x64xi1> to vector<32x64xi32>
    %281 = arith.sitofp %280 : vector<32x64xi32> to vector<32x64xf32>
    %c224_138 = arith.constant 224 : index
    %c0_139 = arith.constant 0 : index
    %282 = vector.load %arg12[%c224_138, %c0_139] : memref<512x64xf32, #tpu.memory_space<vmem>>, vector<32x64xf32>
    tpu.vector_store %arg12[%c224_138, %c0_139], %281 {strides = array<i32>} : memref<512x64xf32, #tpu.memory_space<vmem>>, vector<32x64xf32>,
    %c256_140 = arith.constant 256 : index
    %c0_141 = arith.constant 0 : index
    %283 = vector.load %arg13[%c256_140, %c0_141] : memref<512x64xf32, #tpu.memory_space<vmem>>, vector<32x64xf32>
    %284 = arith.addf %279, %283 : vector<32x64xf32>
    %cst_142 = arith.constant 1.000000e+00 : f32
    %285 = vector.broadcast %cst_142 : f32 to vector<32x64xf32>
    %286 = arith.cmpf oge, %284, %285 : vector<32x64xf32>
    %cst_143 = arith.constant 0.000000e+00 : f32
    %287 = vector.broadcast %cst_143 : f32 to vector<32x64xf32>
    %288 = arith.select %286, %287, %284 : vector<32x64xi1>, vector<32x64xf32>
    %289 = arith.extui %286 : vector<32x64xi1> to vector<32x64xi32>
    %290 = arith.sitofp %289 : vector<32x64xi32> to vector<32x64xf32>
    %c256_144 = arith.constant 256 : index
    %c0_145 = arith.constant 0 : index
    %291 = vector.load %arg12[%c256_144, %c0_145] : memref<512x64xf32, #tpu.memory_space<vmem>>, vector<32x64xf32>
    tpu.vector_store %arg12[%c256_144, %c0_145], %290 {strides = array<i32>} : memref<512x64xf32, #tpu.memory_space<vmem>>, vector<32x64xf32>,
    %c288_146 = arith.constant 288 : index
    %c0_147 = arith.constant 0 : index
    %292 = vector.load %arg13[%c288_146, %c0_147] : memref<512x64xf32, #tpu.memory_space<vmem>>, vector<32x64xf32>
    %293 = arith.addf %288, %292 : vector<32x64xf32>
    %cst_148 = arith.constant 1.000000e+00 : f32
    %294 = vector.broadcast %cst_148 : f32 to vector<32x64xf32>
    %295 = arith.cmpf oge, %293, %294 : vector<32x64xf32>
    %cst_149 = arith.constant 0.000000e+00 : f32
    %296 = vector.broadcast %cst_149 : f32 to vector<32x64xf32>
    %297 = arith.select %295, %296, %293 : vector<32x64xi1>, vector<32x64xf32>
    %298 = arith.extui %295 : vector<32x64xi1> to vector<32x64xi32>
    %299 = arith.sitofp %298 : vector<32x64xi32> to vector<32x64xf32>
    %c288_150 = arith.constant 288 : index
    %c0_151 = arith.constant 0 : index
    %300 = vector.load %arg12[%c288_150, %c0_151] : memref<512x64xf32, #tpu.memory_space<vmem>>, vector<32x64xf32>
    tpu.vector_store %arg12[%c288_150, %c0_151], %299 {strides = array<i32>} : memref<512x64xf32, #tpu.memory_space<vmem>>, vector<32x64xf32>,
    %c320_152 = arith.constant 320 : index
    %c0_153 = arith.constant 0 : index
    %301 = vector.load %arg13[%c320_152, %c0_153] : memref<512x64xf32, #tpu.memory_space<vmem>>, vector<32x64xf32>
    %302 = arith.addf %297, %301 : vector<32x64xf32>
    %cst_154 = arith.constant 1.000000e+00 : f32
    %303 = vector.broadcast %cst_154 : f32 to vector<32x64xf32>
    %304 = arith.cmpf oge, %302, %303 : vector<32x64xf32>
    %cst_155 = arith.constant 0.000000e+00 : f32
    %305 = vector.broadcast %cst_155 : f32 to vector<32x64xf32>
    %306 = arith.select %304, %305, %302 : vector<32x64xi1>, vector<32x64xf32>
    %307 = arith.extui %304 : vector<32x64xi1> to vector<32x64xi32>
    %308 = arith.sitofp %307 : vector<32x64xi32> to vector<32x64xf32>
    %c320_156 = arith.constant 320 : index
    %c0_157 = arith.constant 0 : index
    %309 = vector.load %arg12[%c320_156, %c0_157] : memref<512x64xf32, #tpu.memory_space<vmem>>, vector<32x64xf32>
    tpu.vector_store %arg12[%c320_156, %c0_157], %308 {strides = array<i32>} : memref<512x64xf32, #tpu.memory_space<vmem>>, vector<32x64xf32>,
    %c352_158 = arith.constant 352 : index
    %c0_159 = arith.constant 0 : index
    %310 = vector.load %arg13[%c352_158, %c0_159] : memref<512x64xf32, #tpu.memory_space<vmem>>, vector<32x64xf32>
    %311 = arith.addf %306, %310 : vector<32x64xf32>
    %cst_160 = arith.constant 1.000000e+00 : f32
    %312 = vector.broadcast %cst_160 : f32 to vector<32x64xf32>
    %313 = arith.cmpf oge, %311, %312 : vector<32x64xf32>
    %cst_161 = arith.constant 0.000000e+00 : f32
    %314 = vector.broadcast %cst_161 : f32 to vector<32x64xf32>
    %315 = arith.select %313, %314, %311 : vector<32x64xi1>, vector<32x64xf32>
    %316 = arith.extui %313 : vector<32x64xi1> to vector<32x64xi32>
    %317 = arith.sitofp %316 : vector<32x64xi32> to vector<32x64xf32>
    %c352_162 = arith.constant 352 : index
    %c0_163 = arith.constant 0 : index
    %318 = vector.load %arg12[%c352_162, %c0_163] : memref<512x64xf32, #tpu.memory_space<vmem>>, vector<32x64xf32>
    tpu.vector_store %arg12[%c352_162, %c0_163], %317 {strides = array<i32>} : memref<512x64xf32, #tpu.memory_space<vmem>>, vector<32x64xf32>,
    %c384_164 = arith.constant 384 : index
    %c0_165 = arith.constant 0 : index
    %319 = vector.load %arg13[%c384_164, %c0_165] : memref<512x64xf32, #tpu.memory_space<vmem>>, vector<32x64xf32>
    %320 = arith.addf %315, %319 : vector<32x64xf32>
    %cst_166 = arith.constant 1.000000e+00 : f32
    %321 = vector.broadcast %cst_166 : f32 to vector<32x64xf32>
    %322 = arith.cmpf oge, %320, %321 : vector<32x64xf32>
    %cst_167 = arith.constant 0.000000e+00 : f32
    %323 = vector.broadcast %cst_167 : f32 to vector<32x64xf32>
    %324 = arith.select %322, %323, %320 : vector<32x64xi1>, vector<32x64xf32>
    %325 = arith.extui %322 : vector<32x64xi1> to vector<32x64xi32>
    %326 = arith.sitofp %325 : vector<32x64xi32> to vector<32x64xf32>
    %c384_168 = arith.constant 384 : index
    %c0_169 = arith.constant 0 : index
    %327 = vector.load %arg12[%c384_168, %c0_169] : memref<512x64xf32, #tpu.memory_space<vmem>>, vector<32x64xf32>
    tpu.vector_store %arg12[%c384_168, %c0_169], %326 {strides = array<i32>} : memref<512x64xf32, #tpu.memory_space<vmem>>, vector<32x64xf32>,
    %c416_170 = arith.constant 416 : index
    %c0_171 = arith.constant 0 : index
    %328 = vector.load %arg13[%c416_170, %c0_171] : memref<512x64xf32, #tpu.memory_space<vmem>>, vector<32x64xf32>
    %329 = arith.addf %324, %328 : vector<32x64xf32>
    %cst_172 = arith.constant 1.000000e+00 : f32
    %330 = vector.broadcast %cst_172 : f32 to vector<32x64xf32>
    %331 = arith.cmpf oge, %329, %330 : vector<32x64xf32>
    %cst_173 = arith.constant 0.000000e+00 : f32
    %332 = vector.broadcast %cst_173 : f32 to vector<32x64xf32>
    %333 = arith.select %331, %332, %329 : vector<32x64xi1>, vector<32x64xf32>
    %334 = arith.extui %331 : vector<32x64xi1> to vector<32x64xi32>
    %335 = arith.sitofp %334 : vector<32x64xi32> to vector<32x64xf32>
    %c416_174 = arith.constant 416 : index
    %c0_175 = arith.constant 0 : index
    %336 = vector.load %arg12[%c416_174, %c0_175] : memref<512x64xf32, #tpu.memory_space<vmem>>, vector<32x64xf32>
    tpu.vector_store %arg12[%c416_174, %c0_175], %335 {strides = array<i32>} : memref<512x64xf32, #tpu.memory_space<vmem>>, vector<32x64xf32>,
    %c448_176 = arith.constant 448 : index
    %c0_177 = arith.constant 0 : index
    %337 = vector.load %arg13[%c448_176, %c0_177] : memref<512x64xf32, #tpu.memory_space<vmem>>, vector<32x64xf32>
    %338 = arith.addf %333, %337 : vector<32x64xf32>
    %cst_178 = arith.constant 1.000000e+00 : f32
    %339 = vector.broadcast %cst_178 : f32 to vector<32x64xf32>
    %340 = arith.cmpf oge, %338, %339 : vector<32x64xf32>
    %cst_179 = arith.constant 0.000000e+00 : f32
    %341 = vector.broadcast %cst_179 : f32 to vector<32x64xf32>
    %342 = arith.select %340, %341, %338 : vector<32x64xi1>, vector<32x64xf32>
    %343 = arith.extui %340 : vector<32x64xi1> to vector<32x64xi32>
    %344 = arith.sitofp %343 : vector<32x64xi32> to vector<32x64xf32>
    %c448_180 = arith.constant 448 : index
    %c0_181 = arith.constant 0 : index
    %345 = vector.load %arg12[%c448_180, %c0_181] : memref<512x64xf32, #tpu.memory_space<vmem>>, vector<32x64xf32>
    tpu.vector_store %arg12[%c448_180, %c0_181], %344 {strides = array<i32>} : memref<512x64xf32, #tpu.memory_space<vmem>>, vector<32x64xf32>,
    %c480_182 = arith.constant 480 : index
    %c0_183 = arith.constant 0 : index
    %346 = vector.load %arg13[%c480_182, %c0_183] : memref<512x64xf32, #tpu.memory_space<vmem>>, vector<32x64xf32>
    %347 = arith.addf %342, %346 : vector<32x64xf32>
    %cst_184 = arith.constant 1.000000e+00 : f32
    %348 = vector.broadcast %cst_184 : f32 to vector<32x64xf32>
    %349 = arith.cmpf oge, %347, %348 : vector<32x64xf32>
    %350 = arith.extui %349 : vector<32x64xi1> to vector<32x64xi32>
    %351 = arith.sitofp %350 : vector<32x64xi32> to vector<32x64xf32>
    %c480_185 = arith.constant 480 : index
    %c0_186 = arith.constant 0 : index
    %352 = vector.load %arg12[%c480_185, %c0_186] : memref<512x64xf32, #tpu.memory_space<vmem>>, vector<32x64xf32>
    tpu.vector_store %arg12[%c480_185, %c0_186], %351 {strides = array<i32>} : memref<512x64xf32, #tpu.memory_space<vmem>>, vector<32x64xf32>,
    %c0_187 = arith.constant 0 : index
    %c0_188 = arith.constant 0 : index
    %353 = vector.load %arg12[%c0_187, %c0_188] : memref<512x64xf32, #tpu.memory_space<vmem>>, vector<512x64xf32>
    %c1_i32_189 = arith.constant 1 : i32
    %354 = tpu.dynamic_rotate %353 by %c1_i32_189 dim 0 : vector<512x64xf32>, i32 -> vector<512x64xf32>
    %cst_190 = arith.constant 0.000000e+00 : f32
    %355 = vector.shape_cast %49 : vector<512x1xi1> to vector<512x1xi1>
    %356 = vector.broadcast %355 : vector<512x1xi1> to vector<512x64xi1>
    %357 = vector.broadcast %cst_190 : f32 to vector<512x64xf32>
    %358 = arith.select %356, %354, %357 : vector<512x64xi1>, vector<512x64xf32>
    %c511_i32_191 = arith.constant 511 : i32
    %359 = tpu.dynamic_rotate %353 by %c511_i32_191 dim 0 : vector<512x64xf32>, i32 -> vector<512x64xf32>
    %cst_192 = arith.constant 0.000000e+00 : f32
    %360 = vector.shape_cast %51 : vector<512x1xi1> to vector<512x1xi1>
    %361 = vector.broadcast %360 : vector<512x1xi1> to vector<512x64xi1>
    %362 = vector.broadcast %cst_192 : f32 to vector<512x64xf32>
    %363 = arith.select %361, %359, %362 : vector<512x64xi1>, vector<512x64xf32>
    %364 = tpu.concatenate %358, %353, %363 in 1 : vector<512x64xf32>, vector<512x64xf32>, vector<512x64xf32> -> vector<512x192xf32>
    %365 = arith.truncf %364 : vector<512x192xf32> to vector<512x192xbf16>
    %cst_193 = arith.constant dense<0.000000e+00> : vector<512x32xf32>
    %366 = tpu.matmul %365, %6, %cst_193 {dimension_numbers = #tpu.dot_dimension_numbers<[1], [0], [0], [1], [0, 0, 1, 1], [], []>} : vector<512x192xbf16>, vector<192x32xbf16>, vector<512x32xf32> -> vector<512x32xf32>
    %367 = vector.broadcast %7 : vector<1x32xf32> to vector<512x32xf32>
    %368 = arith.addf %366, %367 : vector<512x32xf32>
    %c0_194 = arith.constant 0 : index
    %c0_195 = arith.constant 0 : index
    %369 = vector.load %arg14[%c0_194, %c0_195] : memref<512x32xf32, #tpu.memory_space<vmem>>, vector<512x32xf32>
    tpu.vector_store %arg14[%c0_194, %c0_195], %368 {strides = array<i32>} : memref<512x32xf32, #tpu.memory_space<vmem>>, vector<512x32xf32>,
    %cst_196 = arith.constant 0.000000e+00 : f32
    %370 = vector.broadcast %cst_196 : f32 to vector<32x32xf32>
    %cst_197 = arith.constant 0.000000e+00 : f32
    %371 = vector.broadcast %cst_197 : f32 to vector<32x32xf32>
    %c0_198 = arith.constant 0 : index
    %c0_199 = arith.constant 0 : index
    %372 = vector.load %arg14[%c0_198, %c0_199] : memref<512x32xf32, #tpu.memory_space<vmem>>, vector<32x32xf32>
    %373 = arith.addf %370, %372 : vector<32x32xf32>
    %cst_200 = arith.constant 1.000000e+00 : f32
    %374 = vector.broadcast %cst_200 : f32 to vector<32x32xf32>
    %375 = arith.cmpf oge, %373, %374 : vector<32x32xf32>
    %cst_201 = arith.constant 0.000000e+00 : f32
    %376 = vector.broadcast %cst_201 : f32 to vector<32x32xf32>
    %377 = arith.select %375, %376, %373 : vector<32x32xi1>, vector<32x32xf32>
    %378 = arith.extui %375 : vector<32x32xi1> to vector<32x32xi32>
    %379 = arith.sitofp %378 : vector<32x32xi32> to vector<32x32xf32>
    %380 = arith.addf %371, %379 : vector<32x32xf32>
    %c32_202 = arith.constant 32 : index
    %c0_203 = arith.constant 0 : index
    %381 = vector.load %arg14[%c32_202, %c0_203] : memref<512x32xf32, #tpu.memory_space<vmem>>, vector<32x32xf32>
    %382 = arith.addf %377, %381 : vector<32x32xf32>
    %cst_204 = arith.constant 1.000000e+00 : f32
    %383 = vector.broadcast %cst_204 : f32 to vector<32x32xf32>
    %384 = arith.cmpf oge, %382, %383 : vector<32x32xf32>
    %cst_205 = arith.constant 0.000000e+00 : f32
    %385 = vector.broadcast %cst_205 : f32 to vector<32x32xf32>
    %386 = arith.select %384, %385, %382 : vector<32x32xi1>, vector<32x32xf32>
    %387 = arith.extui %384 : vector<32x32xi1> to vector<32x32xi32>
    %388 = arith.sitofp %387 : vector<32x32xi32> to vector<32x32xf32>
    %389 = arith.addf %380, %388 : vector<32x32xf32>
    %c64_206 = arith.constant 64 : index
    %c0_207 = arith.constant 0 : index
    %390 = vector.load %arg14[%c64_206, %c0_207] : memref<512x32xf32, #tpu.memory_space<vmem>>, vector<32x32xf32>
    %391 = arith.addf %386, %390 : vector<32x32xf32>
    %cst_208 = arith.constant 1.000000e+00 : f32
    %392 = vector.broadcast %cst_208 : f32 to vector<32x32xf32>
    %393 = arith.cmpf oge, %391, %392 : vector<32x32xf32>
    %cst_209 = arith.constant 0.000000e+00 : f32
    %394 = vector.broadcast %cst_209 : f32 to vector<32x32xf32>
    %395 = arith.select %393, %394, %391 : vector<32x32xi1>, vector<32x32xf32>
    %396 = arith.extui %393 : vector<32x32xi1> to vector<32x32xi32>
    %397 = arith.sitofp %396 : vector<32x32xi32> to vector<32x32xf32>
    %398 = arith.addf %389, %397 : vector<32x32xf32>
    %c96_210 = arith.constant 96 : index
    %c0_211 = arith.constant 0 : index
    %399 = vector.load %arg14[%c96_210, %c0_211] : memref<512x32xf32, #tpu.memory_space<vmem>>, vector<32x32xf32>
    %400 = arith.addf %395, %399 : vector<32x32xf32>
    %cst_212 = arith.constant 1.000000e+00 : f32
    %401 = vector.broadcast %cst_212 : f32 to vector<32x32xf32>
    %402 = arith.cmpf oge, %400, %401 : vector<32x32xf32>
    %cst_213 = arith.constant 0.000000e+00 : f32
    %403 = vector.broadcast %cst_213 : f32 to vector<32x32xf32>
    %404 = arith.select %402, %403, %400 : vector<32x32xi1>, vector<32x32xf32>
    %405 = arith.extui %402 : vector<32x32xi1> to vector<32x32xi32>
    %406 = arith.sitofp %405 : vector<32x32xi32> to vector<32x32xf32>
    %407 = arith.addf %398, %406 : vector<32x32xf32>
    %c128_214 = arith.constant 128 : index
    %c0_215 = arith.constant 0 : index
    %408 = vector.load %arg14[%c128_214, %c0_215] : memref<512x32xf32, #tpu.memory_space<vmem>>, vector<32x32xf32>
    %409 = arith.addf %404, %408 : vector<32x32xf32>
    %cst_216 = arith.constant 1.000000e+00 : f32
    %410 = vector.broadcast %cst_216 : f32 to vector<32x32xf32>
    %411 = arith.cmpf oge, %409, %410 : vector<32x32xf32>
    %cst_217 = arith.constant 0.000000e+00 : f32
    %412 = vector.broadcast %cst_217 : f32 to vector<32x32xf32>
    %413 = arith.select %411, %412, %409 : vector<32x32xi1>, vector<32x32xf32>
    %414 = arith.extui %411 : vector<32x32xi1> to vector<32x32xi32>
    %415 = arith.sitofp %414 : vector<32x32xi32> to vector<32x32xf32>
    %416 = arith.addf %407, %415 : vector<32x32xf32>
    %c160_218 = arith.constant 160 : index
    %c0_219 = arith.constant 0 : index
    %417 = vector.load %arg14[%c160_218, %c0_219] : memref<512x32xf32, #tpu.memory_space<vmem>>, vector<32x32xf32>
    %418 = arith.addf %413, %417 : vector<32x32xf32>
    %cst_220 = arith.constant 1.000000e+00 : f32
    %419 = vector.broadcast %cst_220 : f32 to vector<32x32xf32>
    %420 = arith.cmpf oge, %418, %419 : vector<32x32xf32>
    %cst_221 = arith.constant 0.000000e+00 : f32
    %421 = vector.broadcast %cst_221 : f32 to vector<32x32xf32>
    %422 = arith.select %420, %421, %418 : vector<32x32xi1>, vector<32x32xf32>
    %423 = arith.extui %420 : vector<32x32xi1> to vector<32x32xi32>
    %424 = arith.sitofp %423 : vector<32x32xi32> to vector<32x32xf32>
    %425 = arith.addf %416, %424 : vector<32x32xf32>
    %c192_222 = arith.constant 192 : index
    %c0_223 = arith.constant 0 : index
    %426 = vector.load %arg14[%c192_222, %c0_223] : memref<512x32xf32, #tpu.memory_space<vmem>>, vector<32x32xf32>
    %427 = arith.addf %422, %426 : vector<32x32xf32>
    %cst_224 = arith.constant 1.000000e+00 : f32
    %428 = vector.broadcast %cst_224 : f32 to vector<32x32xf32>
    %429 = arith.cmpf oge, %427, %428 : vector<32x32xf32>
    %cst_225 = arith.constant 0.000000e+00 : f32
    %430 = vector.broadcast %cst_225 : f32 to vector<32x32xf32>
    %431 = arith.select %429, %430, %427 : vector<32x32xi1>, vector<32x32xf32>
    %432 = arith.extui %429 : vector<32x32xi1> to vector<32x32xi32>
    %433 = arith.sitofp %432 : vector<32x32xi32> to vector<32x32xf32>
    %434 = arith.addf %425, %433 : vector<32x32xf32>
    %c224_226 = arith.constant 224 : index
    %c0_227 = arith.constant 0 : index
    %435 = vector.load %arg14[%c224_226, %c0_227] : memref<512x32xf32, #tpu.memory_space<vmem>>, vector<32x32xf32>
    %436 = arith.addf %431, %435 : vector<32x32xf32>
    %cst_228 = arith.constant 1.000000e+00 : f32
    %437 = vector.broadcast %cst_228 : f32 to vector<32x32xf32>
    %438 = arith.cmpf oge, %436, %437 : vector<32x32xf32>
    %cst_229 = arith.constant 0.000000e+00 : f32
    %439 = vector.broadcast %cst_229 : f32 to vector<32x32xf32>
    %440 = arith.select %438, %439, %436 : vector<32x32xi1>, vector<32x32xf32>
    %441 = arith.extui %438 : vector<32x32xi1> to vector<32x32xi32>
    %442 = arith.sitofp %441 : vector<32x32xi32> to vector<32x32xf32>
    %443 = arith.addf %434, %442 : vector<32x32xf32>
    %c256_230 = arith.constant 256 : index
    %c0_231 = arith.constant 0 : index
    %444 = vector.load %arg14[%c256_230, %c0_231] : memref<512x32xf32, #tpu.memory_space<vmem>>, vector<32x32xf32>
    %445 = arith.addf %440, %444 : vector<32x32xf32>
    %cst_232 = arith.constant 1.000000e+00 : f32
    %446 = vector.broadcast %cst_232 : f32 to vector<32x32xf32>
    %447 = arith.cmpf oge, %445, %446 : vector<32x32xf32>
    %cst_233 = arith.constant 0.000000e+00 : f32
    %448 = vector.broadcast %cst_233 : f32 to vector<32x32xf32>
    %449 = arith.select %447, %448, %445 : vector<32x32xi1>, vector<32x32xf32>
    %450 = arith.extui %447 : vector<32x32xi1> to vector<32x32xi32>
    %451 = arith.sitofp %450 : vector<32x32xi32> to vector<32x32xf32>
    %452 = arith.addf %443, %451 : vector<32x32xf32>
    %c288_234 = arith.constant 288 : index
    %c0_235 = arith.constant 0 : index
    %453 = vector.load %arg14[%c288_234, %c0_235] : memref<512x32xf32, #tpu.memory_space<vmem>>, vector<32x32xf32>
    %454 = arith.addf %449, %453 : vector<32x32xf32>
    %cst_236 = arith.constant 1.000000e+00 : f32
    %455 = vector.broadcast %cst_236 : f32 to vector<32x32xf32>
    %456 = arith.cmpf oge, %454, %455 : vector<32x32xf32>
    %cst_237 = arith.constant 0.000000e+00 : f32
    %457 = vector.broadcast %cst_237 : f32 to vector<32x32xf32>
    %458 = arith.select %456, %457, %454 : vector<32x32xi1>, vector<32x32xf32>
    %459 = arith.extui %456 : vector<32x32xi1> to vector<32x32xi32>
    %460 = arith.sitofp %459 : vector<32x32xi32> to vector<32x32xf32>
    %461 = arith.addf %452, %460 : vector<32x32xf32>
    %c320_238 = arith.constant 320 : index
    %c0_239 = arith.constant 0 : index
    %462 = vector.load %arg14[%c320_238, %c0_239] : memref<512x32xf32, #tpu.memory_space<vmem>>, vector<32x32xf32>
    %463 = arith.addf %458, %462 : vector<32x32xf32>
    %cst_240 = arith.constant 1.000000e+00 : f32
    %464 = vector.broadcast %cst_240 : f32 to vector<32x32xf32>
    %465 = arith.cmpf oge, %463, %464 : vector<32x32xf32>
    %cst_241 = arith.constant 0.000000e+00 : f32
    %466 = vector.broadcast %cst_241 : f32 to vector<32x32xf32>
    %467 = arith.select %465, %466, %463 : vector<32x32xi1>, vector<32x32xf32>
    %468 = arith.extui %465 : vector<32x32xi1> to vector<32x32xi32>
    %469 = arith.sitofp %468 : vector<32x32xi32> to vector<32x32xf32>
    %470 = arith.addf %461, %469 : vector<32x32xf32>
    %c352_242 = arith.constant 352 : index
    %c0_243 = arith.constant 0 : index
    %471 = vector.load %arg14[%c352_242, %c0_243] : memref<512x32xf32, #tpu.memory_space<vmem>>, vector<32x32xf32>
    %472 = arith.addf %467, %471 : vector<32x32xf32>
    %cst_244 = arith.constant 1.000000e+00 : f32
    %473 = vector.broadcast %cst_244 : f32 to vector<32x32xf32>
    %474 = arith.cmpf oge, %472, %473 : vector<32x32xf32>
    %cst_245 = arith.constant 0.000000e+00 : f32
    %475 = vector.broadcast %cst_245 : f32 to vector<32x32xf32>
    %476 = arith.select %474, %475, %472 : vector<32x32xi1>, vector<32x32xf32>
    %477 = arith.extui %474 : vector<32x32xi1> to vector<32x32xi32>
    %478 = arith.sitofp %477 : vector<32x32xi32> to vector<32x32xf32>
    %479 = arith.addf %470, %478 : vector<32x32xf32>
    %c384_246 = arith.constant 384 : index
    %c0_247 = arith.constant 0 : index
    %480 = vector.load %arg14[%c384_246, %c0_247] : memref<512x32xf32, #tpu.memory_space<vmem>>, vector<32x32xf32>
    %481 = arith.addf %476, %480 : vector<32x32xf32>
    %cst_248 = arith.constant 1.000000e+00 : f32
    %482 = vector.broadcast %cst_248 : f32 to vector<32x32xf32>
    %483 = arith.cmpf oge, %481, %482 : vector<32x32xf32>
    %cst_249 = arith.constant 0.000000e+00 : f32
    %484 = vector.broadcast %cst_249 : f32 to vector<32x32xf32>
    %485 = arith.select %483, %484, %481 : vector<32x32xi1>, vector<32x32xf32>
    %486 = arith.extui %483 : vector<32x32xi1> to vector<32x32xi32>
    %487 = arith.sitofp %486 : vector<32x32xi32> to vector<32x32xf32>
    %488 = arith.addf %479, %487 : vector<32x32xf32>
    %c416_250 = arith.constant 416 : index
    %c0_251 = arith.constant 0 : index
    %489 = vector.load %arg14[%c416_250, %c0_251] : memref<512x32xf32, #tpu.memory_space<vmem>>, vector<32x32xf32>
    %490 = arith.addf %485, %489 : vector<32x32xf32>
    %cst_252 = arith.constant 1.000000e+00 : f32
    %491 = vector.broadcast %cst_252 : f32 to vector<32x32xf32>
    %492 = arith.cmpf oge, %490, %491 : vector<32x32xf32>
    %cst_253 = arith.constant 0.000000e+00 : f32
    %493 = vector.broadcast %cst_253 : f32 to vector<32x32xf32>
    %494 = arith.select %492, %493, %490 : vector<32x32xi1>, vector<32x32xf32>
    %495 = arith.extui %492 : vector<32x32xi1> to vector<32x32xi32>
    %496 = arith.sitofp %495 : vector<32x32xi32> to vector<32x32xf32>
    %497 = arith.addf %488, %496 : vector<32x32xf32>
    %c448_254 = arith.constant 448 : index
    %c0_255 = arith.constant 0 : index
    %498 = vector.load %arg14[%c448_254, %c0_255] : memref<512x32xf32, #tpu.memory_space<vmem>>, vector<32x32xf32>
    %499 = arith.addf %494, %498 : vector<32x32xf32>
    %cst_256 = arith.constant 1.000000e+00 : f32
    %500 = vector.broadcast %cst_256 : f32 to vector<32x32xf32>
    %501 = arith.cmpf oge, %499, %500 : vector<32x32xf32>
    %cst_257 = arith.constant 0.000000e+00 : f32
    %502 = vector.broadcast %cst_257 : f32 to vector<32x32xf32>
    %503 = arith.select %501, %502, %499 : vector<32x32xi1>, vector<32x32xf32>
    %504 = arith.extui %501 : vector<32x32xi1> to vector<32x32xi32>
    %505 = arith.sitofp %504 : vector<32x32xi32> to vector<32x32xf32>
    %506 = arith.addf %497, %505 : vector<32x32xf32>
    %c480_258 = arith.constant 480 : index
    %c0_259 = arith.constant 0 : index
    %507 = vector.load %arg14[%c480_258, %c0_259] : memref<512x32xf32, #tpu.memory_space<vmem>>, vector<32x32xf32>
    %508 = arith.addf %503, %507 : vector<32x32xf32>
    %cst_260 = arith.constant 1.000000e+00 : f32
    %509 = vector.broadcast %cst_260 : f32 to vector<32x32xf32>
    %510 = arith.cmpf oge, %508, %509 : vector<32x32xf32>
    %511 = arith.extui %510 : vector<32x32xi1> to vector<32x32xi32>
    %512 = arith.sitofp %511 : vector<32x32xi32> to vector<32x32xf32>
    %513 = arith.addf %506, %512 : vector<32x32xf32>
    %cst_261 = arith.constant dense<0.000000e+00> : vector<2x32xf32>
    %514 = tpu.matmul %1, %513, %cst_261 {dimension_numbers = #tpu.dot_dimension_numbers<[1], [0], [0], [1], [0, 0, 1, 1], [], []>} : vector<2x32xf32>, vector<32x32xf32>, vector<2x32xf32> -> vector<2x32xf32>
    %cst_262 = arith.constant dense<0.000000e+00> : vector<2x3xf32>
    %515 = tpu.matmul %514, %8, %cst_262 {dimension_numbers = #tpu.dot_dimension_numbers<[1], [0], [0], [1], [0, 0, 1, 1], [], []>} : vector<2x32xf32>, vector<32x3xf32>, vector<2x3xf32> -> vector<2x3xf32>
    %516 = vector.broadcast %9 : vector<1x3xf32> to vector<2x3xf32>
    %517 = arith.addf %515, %516 : vector<2x3xf32>
    %c0_263 = arith.constant 0 : index
    %c0_264 = arith.constant 0 : index
    %518 = vector.load %arg10[%c0_263, %c0_264] : memref<2x3xf32, #tpu.memory_space<vmem>>, vector<2x3xf32>
    tpu.vector_store %arg10[%c0_263, %c0_264], %517 {strides = array<i32>} : memref<2x3xf32, #tpu.memory_space<vmem>>, vector<2x3xf32>,
    return
  }
}

</mosaic_0001>

<bundles_post_ra>
// kernel: tpu_custom_call.1
= control target key start
LH: loop header
LB: loop body
LE: loop exit
PB: predicated region body
PF: predicated region fallthrough
CT: control target
= control target key end

     0   :  { %v88_v3 = vlaneseq  ;;  %s6919_s19 = smov 3   ;;  %vm1152_vm0 = vcmask 1040384   ;;  %s6920_s25 = smov 6   ;;  %v11866_v25 = vmov 0  ;;  %v11869_v26 = vmov 0  ;;  %s11645_s0 = inlined_call_operand.vmem [shape: f32[32,3], index: 0, kind: input, shape index: {}]   ;;  %s11646_s1 = inlined_call_operand.vmem [shape: f32[2,32], index: 1, kind: input, shape index: {}]   ;;  %s11647_s2 = inlined_call_operand.vmem [shape: f32[9,32], index: 2, kind: input, shape index: {}]   ;;  %s11648_s3 = inlined_call_operand.vmem [shape: f32[1,32], index: 3, kind: input, shape index: {}]   ;;  %s11649_s4 = inlined_call_operand.vmem [shape: bf16[96,64], index: 4, kind: input, shape index: {}]   ;;  %s11650_s5 = inlined_call_operand.vmem [shape: f32[1,64], index: 5, kind: input, shape index: {}]   ;;  %s11651_s6 = inlined_call_operand.vmem [shape: bf16[192,32], index: 6, kind: input, shape index: {}]   ;;  %s11652_s7 = inlined_call_operand.vmem [shape: f32[1,32], index: 7, kind: input, shape index: {}]   ;;  %s11653_s8 = inlined_call_operand.vmem [shape: f32[32,3], index: 8, kind: input, shape index: {}]   ;;  %s11654_s9 = inlined_call_operand.vmem [shape: f32[1,3], index: 9, kind: input, shape index: {}]   ;;  %s11655_s10 = inlined_call_operand.hbm [shape: f32[2,3], index: 10, kind: output, shape index: {}]  }
   0x1   :  { %v37_v0 = vld [vmem:[%s11645_s0] sm:$0xff]  ;;  %v40_v1 = vld [vmem:[%s11645_s0 + $0x18] sm:$0xff]  ;;  %v38_v2 = vld [vmem:[%s11645_s0 + $0x8] sm:$0xff] }
   0x2   :  { %1095 = vrot.lane.b32.xlu0 %v37_v0, %s6919_s19  ;;  %v1049_v4 = vrot.slane %v37_v0, 7  ;;  %v1070_v5 = vrot.slane %v37_v0, 1  ;;  %1101 = vrot.lane.b32.xlu1 %v40_v1, %s6919_s19  ;;  %v39_v6 = vld [vmem:[%s11645_s0 + $0x10] sm:$0xff]  ;;  %v1052_v7 = vrot.slane %v40_v1, 7  ;;  %v1073_v8 = vrot.slane %v40_v1, 1  ;;  %v42_v17 = vld [vmem:[%s11647_s2] sm:$0xff] }
   0x3   :  { %v1071_v9 = vrot.slane %v38_v2, 1  ;;  %v6996_v10 = vshrl.u32 %v88_v3, 7  ;;  %v43_v11 = vld [vmem:[%s11647_s2 + $0x8] sm:$0x1]  ;;  %v1050_v12 = vrot.slane %v38_v2, 7  ;;  %v1051_v13 = vrot.slane %v39_v6, 7 }
   0x4   :  { %v1072_v14 = vrot.slane %v39_v6, 1  ;;  %6229 = vmatprep.subr.msk.mxu0 %vm1152_vm0, %v43_v11 }
   0x5   :  { %vm11677_vm1 = vcmp.lt.s32.totalorder %v6996_v10, 7  ;;  %v90_v15 = vadd.s32 8, %v6996_v10  ;;  %v92_v16 = vadd.s32 24, %v6996_v10  ;;  %vm11665_vm2 = vcmp.lt.s32.totalorder %v6996_v10, 1  ;;  %6230 = vmatpush3.msk.msra.mxu0 %vm1152_vm0, %v43_v11 }
   0x6   :  { %1097 = vrot.lane.b32.xlu0 %v38_v2, %s6919_s19  ;;  %v1077_v18 = vsel %vm11677_vm1, %v1070_v5, %v1071_v9  ;;  %v1076_v20 = vsel %vm11677_vm1, %v1071_v9, %v1072_v14  ;;  %v1057_v22 = vsel %vm11665_vm2, %v1052_v7, %v1049_v4  ;;  %v1054_v23 = vsel %vm11665_vm2, %v1051_v13, %v1052_v7 }
   0x7   :  { %1111 = vrot.lane.b32.xlu1 %v1077_v18, %s6920_s25  ;;  %v104_v19 = vand.u32 15, %v90_v15  ;;  %v118_v21 = vand.u32 15, %v92_v16  ;;  %v1056_v24 = vsel %vm11665_vm2, %v1049_v4, %v1050_v12  ;;  %6231 = vmatprep.subr.mxu0 %v42_v17  ;;  %v1078_v27 = vsel %vm11677_vm1, %v1073_v8, %v1070_v5 }
   0x8   :  { %v1055_v28 = vsel %vm11665_vm2, %v1050_v12, %v1051_v13  ;;  %6232 = vmatpush3.msra.mxu0 %v42_v17  ;;  %v1075_v30 = vsel %vm11677_vm1, %v1072_v14, %v1073_v8 }
   0x9   :  { %vm7019_vm3 = vcmp.ne.s32.totalorder %v104_v19, 15  ;;  %vm7023_vm4 = vcmp.ne.s32.totalorder %v118_v21, 15 }
   0xa   :  { %v11867_v25 = vsel %vm7019_vm3, 4294967295, %v11866_v25  ;;  %v11870_v26 = vsel %vm7023_vm4, 4294967295, %v11869_v26  ;;  %1099 = vrot.lane.b32.xlu0 %v39_v6, %s6919_s19  ;;  %v1088_v29 = vsel %vm7019_vm3, %v1076_v20, 0.0  ;;  %v1090_v31 = vsel %vm7023_vm4, %v1078_v27, 0.0 }
   0xb   :  { %11868 = vst [vmem:[#allocation9_spill] sm:$0xff] %v11867_v25  ;;  %11871 = vst [vmem:[#allocation10_spill] sm:$0xff] %v11870_v26  ;;  %1113 = vrot.lane.b32.xlu1 %v1088_v29, %s6920_s25 }
   0xe   :  { %1115 = vrot.lane.b32.xlu0 %v1075_v30, %s6920_s25 }
   0xf   :  { %1117 = vrot.lane.b32.xlu1 %v1090_v31, %s6920_s25 }
  0x10   :  { %15 = vsyncpa [#allocation7], 0  ;;  %v97_v32 = vand.u32 15, %v6996_v10  ;;  %v91_v33 = vadd.s32 16, %v6996_v10  ;;  %v11872_v34 = vmov 0  ;;  %vm1123_vm6 = vcmask 23552  }
  0x11   :  { %vm1128_vm7 = vcmask 48128   ;;  %vm1139_vm8 = vcmask 72704   ;;  %v7065_v55 = vadd.s32 40, %v6996_v10  ;;  %v7068_v56 = vadd.s32 56, %v6996_v10  ;;  %v6849_v62 = vld [vmem:[%s11649_s4 + $0x28] sm:$0xff]   ;;  %v6850_v17 = vld [vmem:[%s11649_s4 + $0x20] sm:$0xff]  }
  0x12   :  { %vm7040_vm5 = vcmp.ne.s32.totalorder %v97_v32, 0  ;;  %v111_v38 = vand.u32 15, %v91_v33  ;;  %v7071_v57 = vadd.s32 72, %v6996_v10  ;;  %v7074_v58 = vadd.s32 88, %v6996_v10  ;;  %6239 = vmatprep.subr.bf16.mxu1 %v6849_v62  ;;  %v5890_v7 = vld [vmem:[%s11648_s3] ss:$0 sm:$0xff] }
  0x13   :  { %v11873_v34 = vsel %vm7040_vm5, 4294967295, %v11872_v34  ;;  %v1066_v37 = vsel %vm7040_vm5, %v1057_v22, 0.0  ;;  %vm11678_vm10 = vcmask 261120   ;;  %v220_v59 = vand.u32 15, %v7065_v55  ;;  %6240 = vmatpush3.bf16.msra.mxu1 %v6849_v62  ;;  %s6922_s16 = smov 32   ;;  %s6926_s30 = smov [#allocation6]  }
  0x14   :  { %11874 = vst [vmem:[#allocation11_spill] sm:$0xff] %v11873_v34  ;;  %vm7048_vm9 = vcmp.ne.s32.totalorder %v111_v38, 0  ;;  %v7078_v60 = vadd.s32 104, %v6996_v10  ;;  %v7081_v61 = vadd.s32 120, %v6996_v10  ;;  %v234_v63 = vand.u32 15, %v7068_v56  ;;  %6241 = vmatprep.subr.bf16.mxu1 %v6850_v17  ;;  %s5882_s11 = sshll.u32 %s6926_s30, 4  ;;  %s5883_s11 = int_to_ptr.vmem [resolvable:$true] %s5882_s11 }
  0x15   :  { %v1068_v46 = vsel %vm7048_vm9, %v1055_v28, 0.0  ;;  %v248_v0 = vand.u32 15, %v7071_v57  ;;  %v7089_v1 = vadd.s32 136, %v6996_v10  ;;  %v7092_v2 = vadd.s32 152, %v6996_v10  ;;  %s6897_s12 = scalar_lea.vmem %s5883_s11, 32  ;;  %p6902_p1 = scmp.lt.s32.totalorder %s5883_s11, %s5883_s11 }
  0x16   :  { %v7096_v4 = vadd.s32 168, %v6996_v10  ;;  %v7099_v5 = vadd.s32 184, %v6996_v10  ;;  %v7102_v6 = vadd.s32 200, %v6996_v10  ;;  %v7108_v8 = vadd.s32 216, %v6996_v10  ;;  %p6898_p0 = scmp.ne.s32.totalorder %s5883_s11, %s6897_s12  ;;  %p6903_p2 = scmp.lt.s32.totalorder %s6897_s12, %s6897_s12 }
  0x17   :  { %v7111_v9 = vadd.s32 232, %v6996_v10  ;;  %v7114_v11 = vadd.s32 248, %v6996_v10  ;;  %v7117_v12 = vadd.s32 32, %v6996_v10  ;;  %v7122_v15 = vadd.s32 264, %v6996_v10  ;;  %6242 = vmatpush3.bf16.msra.mxu1 %v6850_v17 }
  0x18   :  { %v7125_v16 = vadd.s32 280, %v6996_v10  ;;  %v7133_v21 = vadd.s32 296, %v6996_v10  ;;  %v7136_v22 = vadd.s32 312, %v6996_v10  ;;  %v7276_v28 = vadd.s32 424, %v6996_v10  ;;  %p6904_p3 = por %p6903_p2, %p6902_p1 }
  0x1a   :  { %p6905_p4 = pnand %p6904_p3, %p6898_p0 }
  0x74   :  { %v1096_v35 = vpop.permute.xlu0 %1095  ;;  %v1102_v36 = vpop.permute.xlu1 %1101 }
  0x75   :  { %v1124_v40 = vsel %vm1123_vm6, %v1066_v37, %v1096_v35  ;;  %v1127_v51 = vsel %vm1123_vm6, %v1054_v23, %v1102_v36  ;;  %v11880_v36 = vmov 0 }
  0x78   :  { %v1098_v39 = vpop.permute.xlu0 %1097 }
  0x79   :  { %v1112_v41 = vpop.permute.xlu1 %1111  ;;  %v1125_v45 = vsel %vm1123_vm6, %v1056_v24, %v1098_v39 }
  0x7a   :  { %v1129_v42 = vsel %vm1128_vm7, %v1124_v40, %v1112_v41  ;;  %v11658_v40 = vmov 0.0  }
  0x7b   :  { %6233 = vmatprep.mubr.msk.f32.mxu0 %vm1139_vm8, %v1129_v42 }
  0x7c   :  { %v1100_v44 = vpop.permute.xlu0 %1099 }
  0x7d   :  { %v1114_v47 = vpop.permute.xlu1 %1113  ;;  %v1126_v49 = vsel %vm1123_vm6, %v1068_v46, %v1100_v44 }
  0x7e   :  { %v1130_v48 = vsel %vm1128_vm7, %v1125_v45, %v1114_v47  ;;  %v7162_v47 = vadd.s32 328, %v6996_v10 }
  0x7f   :  { %6234 = vmatmul.mubr.msk.f32.vlgmr.msra.gmra.mxu0 %vm1139_vm8, %v1130_v48  ;;  %v6851_v48 = vld [vmem:[%s11649_s4 + $0x18] sm:$0xff]  }
  0x80   :  { %v1116_v50 = vpop.permute.xlu0 %1115  ;;  %6243 = vmatprep.subr.bf16.mxu1 %v6851_v48 }
  0x81   :  { %v1131_v52 = vsel %vm1128_vm7, %v1126_v49, %v1116_v50  ;;  %v1118_v53 = vpop.permute.xlu1 %1117  ;;  %6244 = vmatpush3.bf16.msra.mxu1 %v6851_v48 }
  0x82   :  { %v1132_v54 = vsel %vm1128_vm7, %v1127_v51, %v1118_v53  ;;  %6236 = vmatprep.mubr.msk.f32.mxu0 %vm1139_vm8, %v1131_v52  ;;  %v7170_v52 = vadd.s32 344, %v6996_v10  ;;  %v7173_v53 = vadd.s32 360, %v6996_v10 }
  0x83   :  { %6237 = vmatmul.mubr.msk.f32.gmra.mxu0 %vm1139_vm8, %v1132_v54 }
 0x13f   :  { %v6235_v18 = vpop.f32.mrf.mxu0 }
 0x140   :  { %v7138_v23 = vadd.f32 %v6235_v18, %v5890_v7 }
 0x141   :  { %v1222_v29 = vpop.f32.mrf.mxu0 }
 0x142   :  { %v7147_v35 = vadd.f32 %v5890_v7, %v1222_v29  ;;  %vm1246_vm11 = vcmp.ge.f32.partialorder %v7138_v23, 1.0 }
 0x143   :  { %v6238_v38 = vpop.f32.mrf.mxu0  ;;  %v1250_v39 = vsel %vm1246_vm11, 0.0, %v7138_v23  ;;  %v5897_v41 = vsel %vm1246_vm11, 1.0, %v11658_v40 }
 0x144   :  { %v7156_v45 = vadd.f32 %v6238_v38, %v5890_v7  ;;  %vm1245_vm12 = vcmp.ge.f32.partialorder %v7147_v35, 1.0  ;;  %1263 = vst.msk [vmem:[#allocation2 + $0x8] sm:$0xff] %vm11678_vm10, %v5897_v41  ;;  %v1267_v46 = vadd.f32 %v1250_v39, %v7138_v23  ;;  %v6852_v41 = vld [vmem:[%s11649_s4 + $0x10] sm:$0xff]  }
 0x145   :  { %v1232_v49 = vpop.f32.mrf.mxu0  ;;  %v5896_v50 = vsel %vm1245_vm12, 1.0, %v11658_v40  ;;  %v1249_v51 = vsel %vm1245_vm12, 0.0, %v7147_v35  ;;  %6245 = vmatprep.subr.bf16.mxu1 %v6852_v41  ;;  %vm7233_vm12 = vcmp.ne.s32.totalorder %v220_v59, 15 }
 0x146   :  { %v7175_v54 = vadd.f32 %v5890_v7, %v1232_v49  ;;  %1262 = vst.msk [vmem:[#allocation2] sm:$0xff] %vm11678_vm10, %v5896_v50  ;;  %v1266_v62 = vadd.f32 %v1249_v51, %v7147_v35  ;;  %vm1248_vm13 = vcmp.ge.f32.partialorder %v7156_v45, 1.0  ;;  %vm1271_vm14 = vcmp.ge.f32.partialorder %v1267_v46, 1.0  ;;  %6246 = vmatpush3.bf16.msra.mxu1 %v6852_v41 }
 0x147   :  { %v1252_v17 = vsel %vm1248_vm13, 0.0, %v7156_v45  ;;  %v5899_v18 = vsel %vm1248_vm13, 1.0, %v11658_v40  ;;  %v1275_v29 = vsel %vm1271_vm14, 0.0, %v1267_v46  ;;  %v5901_v38 = vsel %vm1271_vm14, 1.0, %v11658_v40 }
 0x148   :  { %vm1270_vm15 = vcmp.ge.f32.partialorder %v1266_v62, 1.0  ;;  %vm1247_vm0 = vcmp.ge.f32.partialorder %v7175_v54, 1.0  ;;  %1265 = vst.msk [vmem:[#allocation2 + $0x18] sm:$0xff] %vm11678_vm10, %v5899_v18  ;;  %1287 = vst.msk [vmem:[#allocation2 + $0x28] sm:$0xff] %vm11678_vm10, %v5901_v38  ;;  %v1269_v7 = vadd.f32 %v1252_v17, %v7156_v45  ;;  %v1291_v39 = vadd.f32 %v1275_v29, %v7138_v23 }
 0x149   :  { %v1274_v49 = vsel %vm1270_vm15, 0.0, %v1266_v62  ;;  %v5900_v46 = vsel %vm1270_vm15, 1.0, %v11658_v40  ;;  %v5898_v48 = vsel %vm1247_vm0, 1.0, %v11658_v40  ;;  %v1251_v50 = vsel %vm1247_vm0, 0.0, %v7175_v54 }
 0x14a   :  { %v1290_v51 = vadd.f32 %v1274_v49, %v7147_v35  ;;  %1286 = vst.msk [vmem:[#allocation2 + $0x20] sm:$0xff] %vm11678_vm10, %v5900_v46  ;;  %1264 = vst.msk [vmem:[#allocation2 + $0x10] sm:$0xff] %vm11678_vm10, %v5898_v48  ;;  %v1268_v17 = vadd.f32 %v1251_v50, %v7175_v54  ;;  %vm1273_vm6 = vcmp.ge.f32.partialorder %v1269_v7, 1.0  ;;  %vm1295_vm7 = vcmp.ge.f32.partialorder %v1291_v39, 1.0 }
 0x14b   :  { %v5903_v18 = vsel %vm1273_vm6, 1.0, %v11658_v40  ;;  %v5905_v62 = vsel %vm1295_vm7, 1.0, %v11658_v40  ;;  %v7202_v29 = vadd.s32 376, %v6996_v10  ;;  %v7205_v38 = vadd.s32 392, %v6996_v10  ;;  %v7214_v50 = vld [vmem:[#allocation2 + $0x8] sm:$0xff] }
 0x14c   :  { %vm1272_vm8 = vcmp.ge.f32.partialorder %v1268_v17, 1.0  ;;  %v1277_v49 = vsel %vm1273_vm6, 0.0, %v1269_v7  ;;  %1289 = vst.msk [vmem:[#allocation2 + $0x38] sm:$0xff] %vm11678_vm10, %v5903_v18  ;;  %vm1294_vm11 = vcmp.ge.f32.partialorder %v1290_v51, 1.0  ;;  %1311 = vst.msk [vmem:[#allocation2 + $0x48] sm:$0xff] %vm11678_vm10, %v5905_v62  ;;  %v7210_v46 = vadd.s32 408, %v6996_v10 }
 0x14d   :  { %v7212_v48 = vld [vmem:[#allocation2] sm:$0xff]  ;;  %11878 = vst [vmem:[#allocation13_spill] sm:$0xff] %v7214_v50  ;;  %v5902_v33 = vsel %vm1272_vm8, 1.0, %v11658_v40  ;;  %v1276_v44 = vsel %vm1272_vm8, 0.0, %v1268_v17  ;;  %v5904_v42 = vsel %vm1294_vm11, 1.0, %v11658_v40  ;;  %v6853_v7 = vld [vmem:[%s11649_s4 + $0x8] sm:$0xff]  }
 0x14e   :  { %11877 = vst [vmem:[#allocation12_spill] sm:$0xff] %v7212_v48  ;;  %v6369_v41 = vpack.i.bf16 %v7214_v50, %v7212_v48  ;;  %1288 = vst.msk [vmem:[#allocation2 + $0x30] sm:$0xff] %vm11678_vm10, %v5902_v33  ;;  %v1298_v18 = vsel %vm1294_vm11, 0.0, %v1290_v51  ;;  %v7226_v62 = vadd.f32 %v1276_v44, %v7175_v54  ;;  %v11881_v36 = vsel %vm7233_vm12, 4294967295, %v11880_v36  ;;  %6247 = vmatprep.subr.bf16.mxu1 %v6853_v7 }
 0x14f   :  { %1310 = vst.msk [vmem:[#allocation2 + $0x40] sm:$0xff] %vm11678_vm10, %v5904_v42  ;;  %v7229_v17 = vld [vmem:[#allocation2 + $0x18] sm:$0xff]  ;;  %11882 = vst [vmem:[#allocation15_spill] sm:$0xff] %v11881_v36  ;;  %vm7239_vm13 = vcmp.ne.s32.totalorder %v234_v63, 15  ;;  %v11883_v33 = vmov 0  ;;  %v1293_v42 = vadd.f32 %v1277_v49, %v7156_v45  ;;  %v1999_v55 = vrot.slane %v7214_v50, 1  ;;  %6248 = vmatpush3.bf16.msra.mxu1 %v6853_v7 }
 0x150   :  { %11879 = vst [vmem:[#allocation14_spill] sm:$0xff] %v7229_v17  ;;  %v11884_v33 = vsel %vm7239_vm13, 4294967295, %v11883_v33  ;;  %6370 = vrot.lane.b32.xlu0 %v6369_v41, %s6922_s16  ;;  %v1299_v56 = vsel %vm1295_vm7, 0.0, %v1291_v39  ;;  %v11656_v49 = vrot.slane %v7212_v48, 1  ;;  %vm1296_vm14 = vcmp.ge.f32.partialorder %v7226_v62, 1.0  ;;  %v6854_v63 = vld [vmem:[%s11649_s4] sm:$0xff]  }
 0x151   :  { %11885 = vst [vmem:[#allocation16_spill] sm:$0xff] %v11884_v33  ;;  %v7253_v44 = vld [vmem:[#allocation2 + $0x10] sm:$0xff]  ;;  %v7255_v51 = vld [vmem:[#allocation2 + $0x20] sm:$0xff]  ;;  %vm1297_vm15 = vcmp.ge.f32.partialorder %v1293_v42, 1.0  ;;  %v1314_v37 = vadd.f32 %v1298_v18, %v7147_v35  ;;  %v2001_v41 = vrot.slane %v7229_v17, 1  ;;  %v7267_v32 = vld [vmem:[#allocation2 + $0x28] sm:$0xff]  ;;  %v1315_v30 = vadd.f32 %v1299_v56, %v7138_v23  ;;  %6249 = vmatprep.subr.bf16.mxu1 %v6854_v63 }
 0x152   :  { %v6374_v39 = vpack.i.bf16 %v7229_v17, %v7253_v44  ;;  %v2000_v59 = vrot.slane %v7253_v44, 1  ;;  %v2002_v7 = vrot.slane %v7255_v51, 1  ;;  %v5906_v31 = vsel %vm1296_vm14, 1.0, %v11658_v40  ;;  %s6923_s4 = smov 64  }
 0x153   :  { %v5907_v18 = vsel %vm1297_vm15, 1.0, %v11658_v40  ;;  %v7286_v14 = vld [vmem:[#allocation2 + $0x38] sm:$0xff]  ;;  %1312 = vst.msk [vmem:[#allocation2 + $0x50] sm:$0xff] %vm11678_vm10, %v5906_v31  ;;  %v2124_v56 = vsel %vm11677_vm1, %v11656_v49, %v1999_v55  ;;  %vm1318_vm0 = vcmp.ge.f32.partialorder %v1314_v37, 1.0  ;;  %6250 = vmatpush3.bf16.msra.mxu1 %v6854_v63  ;;  %v2003_v3 = vrot.slane %v7267_v32, 1 }
 0x154   :  { %6375 = vrot.lane.b32.xlu1 %v6374_v39, %s6922_s16  ;;  %v2123_v24 = vsel %vm11677_vm1, %v1999_v55, %v2000_v59  ;;  %v2121_v20 = vsel %vm11677_vm1, %v2001_v41, %v2002_v7  ;;  %v2122_v19 = vsel %vm11677_vm1, %v2000_v59, %v2001_v41  ;;  %1313 = vst.msk [vmem:[#allocation2 + $0x58] sm:$0xff] %vm11678_vm10, %v5907_v18  ;;  %vm7306_vm6 = vcmp.ne.s32.totalorder %v248_v0, 15 }
 0x155   :  { %v2247_v39 = vsel %vm7019_vm3, %v2123_v24, 0.0  ;;  %v2249_v27 = vsel %vm7023_vm4, %v2121_v20, 0.0  ;;  %v7298_v13 = vld [vmem:[#allocation2 + $0x30] sm:$0xff]  ;;  %v11886_v55 = vmov 0  ;;  %v6384_v20 = vpack.i.bf16 %v7267_v32, %v7255_v51 }
 0x156   :  { %v7300_v59 = vld [vmem:[#allocation2 + $0x40] sm:$0xff]  ;;  %v6379_v41 = vpack.i.bf16 %v2247_v39, %v2124_v56  ;;  %v6389_v18 = vpack.i.bf16 %v2249_v27, %v2122_v19  ;;  %v11887_v55 = vsel %vm7306_vm6, 4294967295, %v11886_v55  ;;  %v2005_v24 = vrot.slane %v7286_v14, 1 }
 0x157   :  { %11888 = vst [vmem:[#allocation17_spill] sm:$0xff] %v11887_v55  ;;  %v2004_v49 = vrot.slane %v7298_v13, 1  ;;  %v11657_v63 = vrot.slane %v7300_v59, 1  ;;  %v6394_v57 = vpack.i.bf16 %v7286_v14, %v7298_v13  ;;  %v1301_v0 = vsel %vm1297_vm15, 0.0, %v1293_v42 }
 0x158   :  { %6380 = vrot.lane.b32.xlu0 %v6379_v41, %s6923_s4  ;;  %6390 = vrot.lane.b32.xlu1 %v6389_v18, %s6923_s4  ;;  %v1300_v19 = vsel %vm1296_vm14, 0.0, %v7226_v62  ;;  %v5908_v27 = vsel %vm1318_vm0, 1.0, %v11658_v40  ;;  %v7333_v41 = vld [vmem:[#allocation2 + $0x48] sm:$0xff]  ;;  %v11890_v42 = vand.u32 15, %v7074_v58  ;;  %v11891_v62 = vmov 0 }
 0x159   :  { %v2119_v51 = vsel %vm11677_vm1, %v2003_v3, %v2004_v49  ;;  %v2117_v56 = vsel %vm11677_vm1, %v2005_v24, %v11657_v63  ;;  %v2118_v39 = vsel %vm11677_vm1, %v2004_v49, %v2005_v24  ;;  %11889 = vst [vmem:[#allocation18_spill] sm:$0xff] %v7333_v41  ;;  %1334 = vst.msk [vmem:[#allocation2 + $0x60] sm:$0xff] %vm11678_vm10, %v5908_v27  ;;  %v1322_v18 = vsel %vm1318_vm0, 0.0, %v1314_v37 }
 0x15a   :  { %vm7337_vm7 = vcmp.ne.s32.totalorder %v11890_v42, 15  ;;  %v2251_v31 = vsel %vm7233_vm12, %v2119_v51, 0.0  ;;  %v2253_v63 = vsel %vm7239_vm13, %v2117_v56, 0.0  ;;  %vm1319_vm8 = vcmp.ge.f32.partialorder %v1315_v30, 1.0  ;;  %v7351_v42 = vld [vmem:[#allocation2 + $0x50] sm:$0xff] }
 0x15b   :  { %v11892_v62 = vsel %vm7337_vm7, 4294967295, %v11891_v62  ;;  %v1316_v49 = vadd.f32 %v1300_v19, %v7175_v54  ;;  %v2120_v58 = vsel %vm11677_vm1, %v2002_v7, %v2003_v3  ;;  %v7353_v40 = vld [vmem:[#allocation2 + $0x58] sm:$0xff]  ;;  %v1323_v27 = vsel %vm1319_vm8, 0.0, %v1315_v30 }
 0x15c   :  { %11893 = vst [vmem:[#allocation19_spill] sm:$0xff] %v11892_v62  ;;  %11894 = vst [vmem:[#allocation20_spill] sm:$0xff] %v7353_v40  ;;  %v11895_v37 = vmov 0.0   ;;  %6385 = vrot.lane.b32.xlu0 %v6384_v20, %s6922_s16  ;;  %6395 = vrot.lane.b32.xlu1 %v6394_v57, %s6922_s16  ;;  %v6399_v51 = vpack.i.bf16 %v2251_v31, %v2120_v58  ;;  %v6409_v56 = vpack.i.bf16 %v2253_v63, %v2118_v39  ;;  %v2007_v19 = vrot.slane %v7333_v41, 1 }
 0x15d   :  { %v5909_v26 = vsel %vm1319_vm8, 1.0, %v11895_v37  ;;  %v6404_v24 = vpack.i.bf16 %v7333_v41, %v7300_v59  ;;  %v2008_v3 = vrot.slane %v7351_v42, 1  ;;  %v1317_v7 = vadd.f32 %v1301_v0, %v7156_v45 }
 0x15e   :  { %1335 = vst.msk [vmem:[#allocation2 + $0x68] sm:$0xff] %vm11678_vm10, %v5909_v26  ;;  %vm1320_vm11 = vcmp.ge.f32.partialorder %v1316_v49, 1.0  ;;  %v1338_v30 = vadd.f32 %v1322_v18, %v7147_v35  ;;  %v2009_v20 = vrot.slane %v7353_v40, 1  ;;  %v1339_v31 = vadd.f32 %v1323_v27, %v7138_v23 }
 0x15f   :  { %v5910_v57 = vsel %vm1320_vm11, 1.0, %v11895_v37  ;;  %v11896_v63 = vrot.slane %v7229_v17, 7  ;;  %v11897_v39 = vrot.slane %v7253_v44, 7  ;;  %v2115_v0 = vsel %vm11677_vm1, %v2007_v19, %v2008_v3 }
 0x160   :  { %vm1321_vm14 = vcmp.ge.f32.partialorder %v1317_v7, 1.0  ;;  %1336 = vst.msk [vmem:[#allocation2 + $0x70] sm:$0xff] %vm11678_vm10, %v5910_v57  ;;  %v1324_v18 = vsel %vm1320_vm11, 0.0, %v1316_v49  ;;  %v11899_v58 = vand.u32 15, %v7078_v60  ;;  %v11900_v33 = vmov 0  ;;  %6400 = vrot.lane.b32.xlu0 %v6399_v51, %s6923_s4  ;;  %6410 = vrot.lane.b32.xlu1 %v6409_v56, %s6923_s4 }
 0x161   :  { %v7374_v26 = vsel %vm11665_vm2, %v11897_v39, %v11896_v63  ;;  %vm1342_vm0 = vcmp.ge.f32.partialorder %v1338_v30, 1.0  ;;  %v6414_v27 = vpack.i.bf16 %v7353_v40, %v7351_v42  ;;  %v7389_v63 = vld [vmem:[#allocation2 + $0x60] sm:$0xff]  ;;  %v1325_v39 = vsel %vm1321_vm14, 0.0, %v1317_v7 }
 0x162   :  { %11898 = vst [vmem:[#allocation21_spill] sm:$0xff] %v7374_v26  ;;  %vm7381_vm15 = vcmp.ne.s32.totalorder %v11899_v58, 15  ;;  %v5911_v57 = vsel %vm1321_vm14, 1.0, %v11895_v37  ;;  %v5912_v49 = vsel %vm1342_vm0, 1.0, %v11895_v37  ;;  %v2255_v60 = vsel %vm7306_vm6, %v2115_v0, 0.0 }
 0x163   :  { %v11901_v33 = vsel %vm7381_vm15, 4294967295, %v11900_v33  ;;  %v2010_v58 = vrot.slane %v7389_v63, 1  ;;  %1337 = vst.msk [vmem:[#allocation2 + $0x78] sm:$0xff] %vm11678_vm10, %v5911_v57  ;;  %1358 = vst.msk [vmem:[#allocation2 + $0x80] sm:$0xff] %vm11678_vm10, %v5912_v49  ;;  %v1346_v51 = vsel %vm1342_vm0, 0.0, %v1338_v30  ;;  %vm1343_vm8 = vcmp.ge.f32.partialorder %v1339_v31, 1.0 }
 0x164   :  { %11902 = vst [vmem:[#allocation22_spill] sm:$0xff] %v11901_v33  ;;  %v11903_v56 = vand.u32 15, %v7081_v61  ;;  %v11904_v36 = vmov 0  ;;  %v1347_v7 = vsel %vm1343_vm8, 0.0, %v1339_v31  ;;  %v5913_v25 = vsel %vm1343_vm8, 1.0, %v11895_v37  ;;  %6405 = vrot.lane.b32.xlu0 %v6404_v24, %s6922_s16  ;;  %6415 = vrot.lane.b32.xlu1 %v6414_v27, %s6922_s16 }
 0x165   :  { %v1340_v55 = vadd.f32 %v1324_v18, %v7175_v54  ;;  %v1341_v0 = vadd.f32 %v1325_v39, %v7156_v45  ;;  %v2113_v57 = vsel %vm11677_vm1, %v2009_v20, %v2010_v58  ;;  %v2114_v30 = vsel %vm11677_vm1, %v2008_v3, %v2009_v20  ;;  %1359 = vst.msk [vmem:[#allocation2 + $0x88] sm:$0xff] %vm11678_vm10, %v5913_v25  ;;  %v7429_v20 = vld [vmem:[#allocation2 + $0x68] sm:$0xff] }
 0x166   :  { %vm7400_vm11 = vcmp.ne.s32.totalorder %v11903_v56, 15  ;;  %v1362_v61 = vadd.f32 %v1346_v51, %v7147_v35  ;;  %v11907_v49 = vrot.slane %v7253_v44, 7  ;;  %v11908_v31 = vrot.slane %v7214_v50, 7 }
 0x167   :  { %v11905_v36 = vsel %vm7400_vm11, 4294967295, %v11904_v36  ;;  %v11909_v18 = vrot.slane %v7300_v59, 1  ;;  %v2257_v25 = vsel %vm7337_vm7, %v2113_v57, 0.0  ;;  %v1363_v44 = vadd.f32 %v1347_v7, %v7138_v23  ;;  %v7435_v27 = vld [vmem:[#allocation2 + $0x70] sm:$0xff] }
 0x168   :  { %11906 = vst [vmem:[#allocation23_spill] sm:$0xff] %v11905_v36  ;;  %v7419_v56 = vsel %vm11665_vm2, %v11908_v31, %v11907_v49  ;;  %v7433_v39 = vadd.s32 440, %v6996_v10  ;;  %vm1344_vm14 = vcmp.ge.f32.partialorder %v1340_v55, 1.0  ;;  %vm1345_vm0 = vcmp.ge.f32.partialorder %v1341_v0, 1.0  ;;  %11910 = vst [vmem:[#allocation24_spill] sm:$0xff] %v7435_v27 }
 0x169   :  { %v2116_v3 = vsel %vm11677_vm1, %v11909_v18, %v2007_v19  ;;  %vm1366_vm8 = vcmp.ge.f32.partialorder %v1362_v61, 1.0  ;;  %v6429_v24 = vpack.i.bf16 %v2257_v25, %v2114_v30  ;;  %v1349_v59 = vsel %vm1345_vm0, 0.0, %v1341_v0 }
 0x16a   :  { %v6419_v51 = vpack.i.bf16 %v2255_v60, %v2116_v3  ;;  %v5914_v19 = vsel %vm1344_vm14, 1.0, %v11895_v37  ;;  %v5915_v49 = vsel %vm1345_vm0, 1.0, %v11895_v37  ;;  %v2011_v57 = vrot.slane %v7429_v20, 1  ;;  %v7447_v0 = vld [vmem:[#allocation2 + $0x78] sm:$0xff]  ;;  %v7449_v30 = vld [vmem:[#allocation2 + $0x80] sm:$0xff] }
 0x16b   :  { %v2012_v31 = vrot.slane %v7435_v27, 1  ;;  %1360 = vst.msk [vmem:[#allocation2 + $0x90] sm:$0xff] %vm11678_vm10, %v5914_v19  ;;  %1361 = vst.msk [vmem:[#allocation2 + $0x98] sm:$0xff] %vm11678_vm10, %v5915_v49  ;;  %v1348_v60 = vsel %vm1344_vm14, 0.0, %v1340_v55  ;;  %v5916_v7 = vsel %vm1366_vm8, 1.0, %v11895_v37  ;;  %6430 = vrot.lane.b32.xlu1 %v6429_v24, %s6923_s4  ;;  %v11911_v18 = vand.u32 15, %v7089_v1 }
 0x16c   :  { %6420 = vrot.lane.b32.xlu0 %v6419_v51, %s6923_s4  ;;  %v11912_v3 = vmov 0  ;;  %v11915_v25 = vand.u32 15, %v7092_v2  ;;  %v11916_v55 = vmov 0  ;;  %1382 = vst.msk [vmem:[#allocation2 + $0xa0] sm:$0xff] %vm11678_vm10, %v5916_v7  ;;  %vm1367_vm2 = vcmp.ge.f32.partialorder %v1363_v44, 1.0  ;;  %v7493_v33 = vld [vmem:[#allocation2 + $0x88] sm:$0xff] }
 0x16d   :  { %vm7453_vm0 = vcmp.ne.s32.totalorder %v11911_v18, 15  ;;  %v1364_v51 = vadd.f32 %v1348_v60, %v7175_v54  ;;  %v1365_v24 = vadd.f32 %v1349_v59, %v7156_v45  ;;  %v6424_v1 = vpack.i.bf16 %v7429_v20, %v7389_v63 }
 0x16e   :  { %v11913_v3 = vsel %vm7453_vm0, 4294967295, %v11912_v3  ;;  %vm7459_vm14 = vcmp.ne.s32.totalorder %v11915_v25, 15  ;;  %v2013_v49 = vrot.slane %v7447_v0, 1  ;;  %v2111_v2 = vsel %vm11677_vm1, %v2011_v57, %v2012_v31 }
 0x16f   :  { %11914 = vst [vmem:[#allocation25_spill] sm:$0xff] %v11913_v3  ;;  %v11917_v55 = vsel %vm7459_vm14, 4294967295, %v11916_v55  ;;  %v6434_v7 = vpack.i.bf16 %v7447_v0, %v7435_v27  ;;  %v2259_v60 = vsel %vm7381_vm15, %v2111_v2, 0.0  ;;  %v2014_v59 = vrot.slane %v7449_v30, 1 }
 0x170   :  { %11918 = vst [vmem:[#allocation26_spill] sm:$0xff] %v11917_v55  ;;  %v5917_v25 = vsel %vm1367_vm2, 1.0, %v11895_v37  ;;  %v2112_v63 = vsel %vm11677_vm1, %v2010_v58, %v2011_v57  ;;  %v2110_v19 = vsel %vm11677_vm1, %v2012_v31, %v2013_v49  ;;  %v1370_v62 = vsel %vm1366_vm8, 0.0, %v1362_v61  ;;  %6425 = vrot.lane.b32.xlu0 %v6424_v1, %s6922_s16 }
 0x171   :  { %1383 = vst.msk [vmem:[#allocation2 + $0xa8] sm:$0xff] %vm11678_vm10, %v5917_v25  ;;  %v7487_v18 = vadd.s32 48, %v6996_v10  ;;  %6435 = vrot.lane.b32.xlu1 %v6434_v7, %s6922_s16  ;;  %v2109_v2 = vsel %vm11677_vm1, %v2013_v49, %v2014_v59  ;;  %v1371_v58 = vsel %vm1367_vm2, 0.0, %v1363_v44  ;;  %vm1368_vm15 = vcmp.ge.f32.partialorder %v1364_v51, 1.0 }
 0x172   :  { %vm1369_vm7 = vcmp.ge.f32.partialorder %v1365_v24, 1.0  ;;  %v6439_v57 = vpack.i.bf16 %v2259_v60, %v2112_v63  ;;  %v2261_v61 = vsel %vm7400_vm11, %v2109_v2, 0.0  ;;  %v5918_v25 = vsel %vm1368_vm15, 1.0, %v11895_v37  ;;  %v7499_v1 = vld [vmem:[#allocation2 + $0x90] sm:$0xff]  ;;  %v7501_v7 = vld [vmem:[#allocation2 + $0x98] sm:$0xff] }
 0x173   :  { %v1373_v31 = vsel %vm1369_vm7, 0.0, %v1365_v24  ;;  %v6449_v34 = vpack.i.bf16 %v2261_v61, %v2110_v19  ;;  %v5919_v49 = vsel %vm1369_vm7, 1.0, %v11895_v37  ;;  %1384 = vst.msk [vmem:[#allocation2 + $0xb0] sm:$0xff] %vm11678_vm10, %v5918_v25  ;;  %v1372_v26 = vsel %vm1368_vm15, 0.0, %v1364_v51  ;;  %v7509_v2 = vld [vmem:[#allocation2 + $0xa0] sm:$0xff] }
 0x174   :  { %v1386_v44 = vadd.f32 %v1370_v62, %v7147_v35  ;;  %v2015_v63 = vrot.slane %v7493_v33, 1  ;;  %v2017_v24 = vrot.slane %v7501_v7, 1  ;;  %1385 = vst.msk [vmem:[#allocation2 + $0xb8] sm:$0xff] %vm11678_vm10, %v5919_v49  ;;  %v11919_v19 = vand.u32 15, %v7096_v4  ;;  %6440 = vrot.lane.b32.xlu0 %v6439_v57, %s6923_s4 }
 0x175   :  { %v11920_v61 = vmov 0  ;;  %6450 = vrot.lane.b32.xlu1 %v6449_v34, %s6923_s4  ;;  %v2016_v62 = vrot.slane %v7499_v1, 1  ;;  %v11675_v25 = vrot.slane %v7509_v2, 1  ;;  %v1387_v60 = vadd.f32 %v1371_v58, %v7138_v23 }
 0x176   :  { %vm7514_vm2 = vcmp.ne.s32.totalorder %v11919_v19, 15  ;;  %vm1390_vm7 = vcmp.ge.f32.partialorder %v1386_v44, 1.0  ;;  %v6444_v4 = vpack.i.bf16 %v7493_v33, %v7449_v30  ;;  %v1388_v19 = vadd.f32 %v1372_v26, %v7175_v54 }
 0x177   :  { %v11921_v61 = vsel %vm7514_vm2, 4294967295, %v11920_v61  ;;  %v5920_v49 = vsel %vm1390_vm7, 1.0, %v11895_v37  ;;  %v1389_v51 = vadd.f32 %v1373_v31, %v7156_v45  ;;  %v6454_v34 = vpack.i.bf16 %v7501_v7, %v7499_v1 }
 0x178   :  { %11922 = vst [vmem:[#allocation27_spill] sm:$0xff] %v11921_v61  ;;  %v2107_v57 = vsel %vm11677_vm1, %v2015_v63, %v2016_v62  ;;  %v2105_v58 = vsel %vm11677_vm1, %v2017_v24, %v11675_v25  ;;  %v7538_v36 = vld [vmem:[#allocation2 + $0xa8] sm:$0xff]  ;;  %v11923_v30 = vand.u32 15, %v7099_v5  ;;  %v11924_v48 = vmov 0  ;;  %1406 = vst.msk [vmem:[#allocation2 + $0xc0] sm:$0xff] %vm11678_vm10, %v5920_v49  ;;  %6445 = vrot.lane.b32.xlu0 %v6444_v4, %s6922_s16 }
 0x179   :  { %vm1391_vm8 = vcmp.ge.f32.partialorder %v1387_v60, 1.0  ;;  %v2108_v26 = vsel %vm11677_vm1, %v2014_v59, %v2015_v63  ;;  %v2263_v31 = vsel %vm7453_vm0, %v2107_v57, 0.0  ;;  %v2106_v25 = vsel %vm11677_vm1, %v2016_v62, %v2017_v24  ;;  %6455 = vrot.lane.b32.xlu1 %v6454_v34, %s6922_s16 }
 0x17a   :  { %vm7542_vm15 = vcmp.ne.s32.totalorder %v11923_v30, 15  ;;  %v2265_v50 = vsel %vm7459_vm14, %v2105_v58, 0.0  ;;  %v6459_v5 = vpack.i.bf16 %v2263_v31, %v2108_v26  ;;  %v2019_v49 = vrot.slane %v7538_v36, 1  ;;  %v7562_v63 = vld [vmem:[#allocation2 + $0xb0] sm:$0xff] }
 0x17b   :  { %v11925_v48 = vsel %vm7542_vm15, 4294967295, %v11924_v48  ;;  %v1394_v30 = vsel %vm1390_vm7, 0.0, %v1386_v44  ;;  %v7560_v59 = vadd.s32 456, %v6996_v10  ;;  %v1395_v57 = vsel %vm1391_vm8, 0.0, %v1387_v60  ;;  %v7565_v58 = vld [vmem:[#allocation2 + $0xb8] sm:$0xff] }
 0x17c   :  { %11926 = vst [vmem:[#allocation28_spill] sm:$0xff] %v11925_v48  ;;  %v5921_v24 = vsel %vm1391_vm8, 1.0, %v11895_v37  ;;  %vm1392_vm1 = vcmp.ge.f32.partialorder %v1388_v19, 1.0  ;;  %vm1393_vm10 = vcmp.ge.f32.partialorder %v1389_v51, 1.0  ;;  %v6469_v62 = vpack.i.bf16 %v2265_v50, %v2106_v25  ;;  %6460 = vrot.lane.b32.xlu0 %v6459_v5, %s6923_s4 }
 0x17d   :  { %v2020_v4 = vrot.slane %v7562_v63, 1  ;;  %vm11927_vm14 = vcmask 261120   ;;  %v1397_v34 = vsel %vm1393_vm10, 0.0, %v1389_v51  ;;  %v5922_v44 = vsel %vm1392_vm1, 1.0, %v11895_v37 }
 0x17e   :  { %1407 = vst.msk [vmem:[#allocation2 + $0xc8] sm:$0xff] %vm11927_vm14, %v5921_v24  ;;  %v6464_v60 = vpack.i.bf16 %v7538_v36, %v7509_v2  ;;  %v5923_v55 = vsel %vm1393_vm10, 1.0, %v11895_v37  ;;  %vm11928_vm7 = vmmov %vm11927_vm14  ;;  %6470 = vrot.lane.b32.xlu1 %v6469_v62, %s6923_s4  ;;  %vm11929_vm14 = vcmp.lt.s32.totalorder %v6996_v10, 7  ;;  %v1396_v51 = vsel %vm1392_vm1, 0.0, %v1388_v19 }
 0x17f   :  { %1408 = vst.msk [vmem:[#allocation2 + $0xd0] sm:$0xff] %vm11928_vm7, %v5922_v44  ;;  %v2103_v50 = vsel %vm11929_vm14, %v2019_v49, %v2020_v4  ;;  %vm11930_vm8 = vmmov %vm11928_vm7  ;;  %v11931_v25 = vand.u32 15, %v7102_v6  ;;  %v11932_v24 = vmov 0  ;;  %v1410_v26 = vadd.f32 %v1394_v30, %v7147_v35  ;;  %v7594_v31 = vld [vmem:[#allocation2 + $0xc0] sm:$0xff] }
 0x180   :  { %1409 = vst.msk [vmem:[#allocation2 + $0xd8] sm:$0xff] %vm11930_vm8, %v5923_v55  ;;  %v1411_v44 = vadd.f32 %v1395_v57, %v7138_v23  ;;  %v2021_v5 = vrot.slane %v7565_v58, 1  ;;  %v6474_v62 = vpack.i.bf16 %v7565_v58, %v7562_v63  ;;  %v1412_v55 = vadd.f32 %v1396_v51, %v7175_v54  ;;  %vm11935_vm7 = vmmov %vm11929_vm14  ;;  %6465 = vrot.lane.b32.xlu0 %v6464_v60, %s6922_s16 }
 0x181   :  { %vm7585_vm0 = vcmp.ne.s32.totalorder %v11931_v25, 15  ;;  %v1413_v19 = vadd.f32 %v1397_v34, %v7156_v45  ;;  %v2267_v6 = vsel %vm7514_vm2, %v2103_v50, 0.0  ;;  %v2022_v25 = vrot.slane %v7594_v31, 1  ;;  %vm11936_vm14 = vmmov %vm11935_vm7 }
 0x182   :  { %v11933_v24 = vsel %vm7585_vm0, 4294967295, %v11932_v24  ;;  %vm1414_vm1 = vcmp.ge.f32.partialorder %v1410_v26, 1.0  ;;  %vm11686_vm10 = vcmp.ge.f32.partialorder %v1411_v44, 1.0  ;;  %v2102_v30 = vsel %vm11935_vm7, %v2020_v4, %v2021_v5  ;;  %6475 = vrot.lane.b32.xlu1 %v6474_v62, %s6922_s16 }
 0x183   :  { %11934 = vst [vmem:[#allocation29_spill] sm:$0xff] %v11933_v24  ;;  %v5924_v57 = vsel %vm1414_vm1, 1.0, %v11895_v37  ;;  %v1418_v3 = vsel %vm1414_vm1, 0.0, %v1410_v26  ;;  %v5925_v17 = vsel %vm11686_vm10, 1.0, %v11895_v37  ;;  %v2101_v34 = vsel %vm11936_vm14, %v2021_v5, %v2022_v25  ;;  %vm11944_vm10 = vmmov %vm11936_vm14 }
 0x184   :  { %v11937_v50 = vand.u32 15, %v7108_v8  ;;  %v11938_v51 = vmov 0  ;;  %vm11941_vm7 = vcmask 261120   ;;  %vm1416_vm1 = vcmp.ge.f32.partialorder %v1412_v55, 1.0 }
 0x185   :  { %1430 = vst.msk [vmem:[#allocation2 + $0xe0] sm:$0xff] %vm11941_vm7, %v5924_v57  ;;  %vm11942_vm2 = vmmov %vm11941_vm7  ;;  %vm1417_vm11 = vcmp.ge.f32.partialorder %v1413_v19, 1.0  ;;  %v1434_v4 = vadd.f32 %v1418_v3, %v7147_v35  ;;  %v11943_v26 = vrot.slane %v7509_v2, 1  ;;  %v2269_v8 = vsel %vm7542_vm15, %v2101_v34, 0.0  ;;  %v7625_v5 = vld [vmem:[#allocation2 + $0xc8] sm:$0xff] }
 0x186   :  { %vm7612_vm8 = vcmp.ne.s32.totalorder %v11937_v50, 15  ;;  %1431 = vst.msk [vmem:[#allocation2 + $0xe8] sm:$0xff] %vm11942_vm2, %v5925_v17  ;;  %v5926_v62 = vsel %vm1416_vm1, 1.0, %v11895_v37  ;;  %v5927_v57 = vsel %vm1417_vm11, 1.0, %v11895_v37  ;;  %v6489_v50 = vpack.i.bf16 %v2269_v8, %v2102_v30  ;;  %v7630_v61 = vld [vmem:[#allocation2 + $0xd0] sm:$0xff]  ;;  %vm11947_vm14 = vmmov %vm11941_vm7 }
 0x187   :  { %v11939_v51 = vsel %vm7612_vm8, 4294967295, %v11938_v51  ;;  %v2104_v60 = vsel %vm11944_vm10, %v11943_v26, %v2019_v49  ;;  %11945 = vst [vmem:[#allocation31_spill] sm:$0xff] %v7630_v61  ;;  %vm11946_vm2 = vcmp.ge.f32.partialorder %v1411_v44, 1.0  ;;  %v1421_v2 = vsel %vm1417_vm11, 0.0, %v1413_v19  ;;  %1432 = vst.msk [vmem:[#allocation2 + $0xf0] sm:$0xff] %vm11947_vm14, %v5926_v62  ;;  %v7636_v34 = vld [vmem:[#allocation2 + $0xd8] sm:$0xff] }
 0x188   :  { %11940 = vst [vmem:[#allocation30_spill] sm:$0xff] %v11939_v51  ;;  %v6479_v17 = vpack.i.bf16 %v2267_v6, %v2104_v60  ;;  %v1419_v3 = vsel %vm11946_vm2, 0.0, %v1411_v44  ;;  %vm11948_vm10 = vmmov %vm11941_vm7  ;;  %v2023_v49 = vrot.slane %v7625_v5, 1  ;;  %v2024_v26 = vrot.slane %v7630_v61, 1  ;;  %6490 = vrot.lane.b32.xlu1 %v6489_v50, %s6923_s4 }
 0x189   :  { %1433 = vst.msk [vmem:[#allocation2 + $0xf8] sm:$0xff] %vm11948_vm10, %v5927_v57  ;;  %v1420_v48 = vsel %vm1416_vm1, 0.0, %v1412_v55  ;;  %vm1438_vm7 = vcmp.ge.f32.partialorder %v1434_v4, 1.0  ;;  %v6484_v19 = vpack.i.bf16 %v7625_v5, %v7594_v31  ;;  %v11949_v60 = vand.u32 15, %v7111_v9  ;;  %vm11958_vm14 = vmmov %vm11948_vm10 }
 0x18a   :  { %6480 = vrot.lane.b32.xlu0 %v6479_v17, %s6923_s4  ;;  %v11950_v8 = vmov 0  ;;  %v2025_v55 = vrot.slane %v7636_v34, 1  ;;  %vm11953_vm1 = vcmp.lt.s32.totalorder %v6996_v10, 7  ;;  %v5928_v57 = vsel %vm1438_vm7, 1.0, %v11895_v37 }
 0x18b   :  { %vm7649_vm11 = vcmp.ne.s32.totalorder %v11949_v60, 15  ;;  %v2099_v62 = vsel %vm11953_vm1, %v2023_v49, %v2024_v26  ;;  %v1435_v17 = vadd.f32 %v1419_v3, %v7138_v23  ;;  %v6494_v50 = vpack.i.bf16 %v7636_v34, %v7630_v61  ;;  %1454 = vst.msk [vmem:[#allocation2 + $0x100] sm:$0xff] %vm11958_vm14, %v5928_v57 }
 0x18c   :  { %v11951_v8 = vsel %vm7649_vm11, 4294967295, %v11950_v8  ;;  %v11954_v31 = vand.u32 15, %v7114_v11  ;;  %v11955_v9 = vmov 0  ;;  %v1442_v60 = vsel %vm1438_vm7, 0.0, %v1434_v4  ;;  %v1650_v41 = vld [vmem:[#allocation2 + $0xe0] sm:$0xff]  ;;  %vm11960_vm7 = vmmov %vm11953_vm1 }
 0x18d   :  { %11952 = vst [vmem:[#allocation32_spill] sm:$0xff] %v11951_v8  ;;  %v1436_v44 = vadd.f32 %v1420_v48, %v7175_v54  ;;  %v1437_v30 = vadd.f32 %v1421_v2, %v7156_v45  ;;  %v2271_v40 = vsel %vm7585_vm0, %v2099_v62, 0.0  ;;  %v7673_v11 = vld [vmem:[#allocation2 + $0xe8] sm:$0xff]  ;;  %vm1439_vm10 = vcmp.ge.f32.partialorder %v1435_v17, 1.0  ;;  %6495 = vrot.lane.b32.xlu1 %v6494_v50, %s6922_s16 }
 0x18e   :  { %vm7662_vm2 = vcmp.ne.s32.totalorder %v11954_v31, 15  ;;  %11959 = vst [vmem:[#allocation34_spill] sm:$0xff] %v7673_v11  ;;  %6485 = vrot.lane.b32.xlu0 %v6484_v19, %s6922_s16  ;;  %v2100_v48 = vsel %vm11960_vm7, %v2022_v25, %v2023_v49  ;;  %v2026_v4 = vrot.slane %v1650_v41, 1  ;;  %v2098_v2 = vsel %vm11953_vm1, %v2024_v26, %v2025_v55  ;;  %v7682_v57 = vld [vmem:[#allocation2 + $0xf0] sm:$0xff]  ;;  %vm11961_vm7 = vmmov %vm11953_vm1 }
 0x18f   :  { %v11956_v9 = vsel %vm7662_vm2, 4294967295, %v11955_v9  ;;  %v5929_v3 = vsel %vm1439_vm10, 1.0, %v11895_v37  ;;  %vm1440_vm14 = vcmp.ge.f32.partialorder %v1436_v44, 1.0  ;;  %vm1441_vm0 = vcmp.ge.f32.partialorder %v1437_v30, 1.0 }
 0x190   :  { %11957 = vst [vmem:[#allocation33_spill] sm:$0xff] %v11956_v9  ;;  %v7684_v62 = vld [vmem:[#allocation2 + $0xf8] sm:$0xff]  ;;  %v1458_v19 = vadd.f32 %v1442_v60, %v7147_v35  ;;  %v6499_v31 = vpack.i.bf16 %v2271_v40, %v2100_v48  ;;  %v2097_v25 = vsel %vm11961_vm7, %v2025_v55, %v2026_v4  ;;  %v2027_v49 = vrot.slane %v7673_v11, 1 }
 0x191   :  { %vm11962_vm1 = vcmask 261120   ;;  %v2273_v26 = vsel %vm7612_vm8, %v2097_v25, 0.0  ;;  %v2029_v6 = vrot.slane %v7684_v62, 1  ;;  %v2028_v24 = vrot.slane %v7682_v57, 1 }
 0x192   :  { %1455 = vst.msk [vmem:[#allocation2 + $0x108] sm:$0xff] %vm11962_vm1, %v5929_v3  ;;  %v1443_v27 = vsel %vm1439_vm10, 0.0, %v1435_v17  ;;  %6500 = vrot.lane.b32.xlu0 %v6499_v31, %s6923_s4  ;;  %v6509_v60 = vpack.i.bf16 %v2273_v26, %v2098_v2  ;;  %v1445_v40 = vsel %vm1441_vm0, 0.0, %v1437_v30  ;;  %v5930_v55 = vsel %vm1440_vm14, 1.0, %v11895_v37  ;;  %v7706_v50 = vld [vmem:[#allocation2 + $0x100] sm:$0xff]  ;;  %vm11963_vm8 = vmmov %vm11962_vm1 }
 0x193   :  { %v5931_v48 = vsel %vm1441_vm0, 1.0, %v11895_v37  ;;  %v6504_v3 = vpack.i.bf16 %v7673_v11, %v1650_v41  ;;  %v2095_v25 = vsel %vm11961_vm7, %v2027_v49, %v2028_v24  ;;  %1456 = vst.msk [vmem:[#allocation2 + $0x110] sm:$0xff] %vm11962_vm1, %v5930_v55  ;;  %v1444_v17 = vsel %vm1440_vm14, 0.0, %v1436_v44  ;;  %vm11964_vm0 = vmmov %vm11961_vm7 }
 0x194   :  { %1457 = vst.msk [vmem:[#allocation2 + $0x118] sm:$0xff] %vm11963_vm8, %v5931_v48  ;;  %vm1462_vm10 = vcmp.ge.f32.partialorder %v1458_v19, 1.0  ;;  %6510 = vrot.lane.b32.xlu1 %v6509_v60, %s6923_s4  ;;  %v2030_v30 = vrot.slane %v7706_v50, 1  ;;  %v2094_v31 = vsel %vm11964_vm0, %v2028_v24, %v2029_v6  ;;  %v11965_v41 = vand.u32 15, %v7122_v15  ;;  %vm11973_vm14 = vmmov %vm11962_vm1 }
 0x195   :  { %v11966_v2 = vmov 0  ;;  %v5932_v26 = vsel %vm1462_vm10, 1.0, %v11895_v37  ;;  %v1466_v55 = vsel %vm1462_vm10, 0.0, %v1458_v19  ;;  %v2275_v44 = vsel %vm7649_vm11, %v2095_v25, 0.0  ;;  %vm11974_vm7 = vmmov %vm11964_vm0 }
 0x196   :  { %vm7717_vm15 = vcmp.ne.s32.totalorder %v11965_v41, 15  ;;  %v11969_v48 = vand.u32 15, %v7125_v16  ;;  %v11970_v60 = vmov 0  ;;  %1478 = vst.msk [vmem:[#allocation2 + $0x120] sm:$0xff] %vm11973_vm14, %v5932_v26  ;;  %v1459_v15 = vadd.f32 %v1443_v27, %v7138_v23  ;;  %6505 = vrot.lane.b32.xlu0 %v6504_v3, %s6922_s16  ;;  %vm11975_vm1 = vmmov %vm11964_vm0 }
 0x197   :  { %v11967_v2 = vsel %vm7717_vm15, 4294967295, %v11966_v2  ;;  %v1460_v24 = vadd.f32 %v1444_v17, %v7175_v54  ;;  %v1461_v41 = vadd.f32 %v1445_v40, %v7156_v45  ;;  %v6514_v19 = vpack.i.bf16 %v7684_v62, %v7682_v57 }
 0x198   :  { %11968 = vst [vmem:[#allocation35_spill] sm:$0xff] %v11967_v2  ;;  %vm7726_vm8 = vcmp.ne.s32.totalorder %v11969_v48, 15  ;;  %v2096_v16 = vsel %vm11974_vm7, %v2026_v4, %v2027_v49  ;;  %v2093_v25 = vsel %vm11975_vm1, %v2029_v6, %v2030_v30  ;;  %v1482_v48 = vadd.f32 %v1466_v55, %v7147_v35 }
 0x199   :  { %v11971_v60 = vsel %vm7726_vm8, 4294967295, %v11970_v60  ;;  %v2277_v27 = vsel %vm7662_vm2, %v2093_v25, 0.0  ;;  %v7744_v26 = vld [vmem:[#allocation2 + $0x108] sm:$0xff]  ;;  %vm1463_vm10 = vcmp.ge.f32.partialorder %v1459_v15, 1.0  ;;  %vm1464_vm0 = vcmp.ge.f32.partialorder %v1460_v24, 1.0  ;;  %6515 = vrot.lane.b32.xlu1 %v6514_v19, %s6922_s16 }
 0x19a   :  { %11972 = vst [vmem:[#allocation36_spill] sm:$0xff] %v11971_v60  ;;  %vm1465_vm14 = vcmp.ge.f32.partialorder %v1461_v41, 1.0  ;;  %v6519_v4 = vpack.i.bf16 %v2275_v44, %v2096_v16  ;;  %v6529_v49 = vpack.i.bf16 %v2277_v27, %v2094_v31  ;;  %v2031_v6 = vrot.slane %v7744_v26, 1  ;;  %v7754_v9 = vld [vmem:[#allocation2 + $0x110] sm:$0xff] }
 0x19b   :  { %v1467_v17 = vsel %vm1463_vm10, 0.0, %v1459_v15  ;;  %v5933_v55 = vsel %vm1463_vm10, 1.0, %v11895_v37  ;;  %v5934_v25 = vsel %vm1464_vm0, 1.0, %v11895_v37  ;;  %v7756_v8 = vld [vmem:[#allocation2 + $0x118] sm:$0xff]  ;;  %vm11976_vm7 = vcmask 261120  }
 0x19c   :  { %6520 = vrot.lane.b32.xlu0 %v6519_v4, %s6923_s4  ;;  %1479 = vst.msk [vmem:[#allocation2 + $0x128] sm:$0xff] %vm11976_vm7, %v5933_v55  ;;  %v1469_v40 = vsel %vm1465_vm14, 0.0, %v1461_v41  ;;  %v5935_v44 = vsel %vm1465_vm14, 1.0, %v11895_v37  ;;  %vm11977_vm1 = vmmov %vm11976_vm7  ;;  %v1468_v31 = vsel %vm1464_vm0, 0.0, %v1460_v24  ;;  %vm1486_vm2 = vcmp.ge.f32.partialorder %v1482_v48, 1.0 }
 0x19d   :  { %1480 = vst.msk [vmem:[#allocation2 + $0x130] sm:$0xff] %vm11977_vm1, %v5934_v25  ;;  %v6524_v16 = vpack.i.bf16 %v7744_v26, %v7706_v50  ;;  %vm11978_vm10 = vcmp.lt.s32.totalorder %v6996_v10, 7  ;;  %vm11979_vm11 = vmmov %vm11977_vm1  ;;  %v11980_v41 = vand.u32 15, %v7133_v21  ;;  %v11981_v4 = vmov 0  ;;  %6530 = vrot.lane.b32.xlu1 %v6529_v49, %s6923_s4  ;;  %v7777_v55 = vld [vmem:[#allocation2 + $0x120] sm:$0xff] }
 0x19e   :  { %v2092_v27 = vsel %vm11978_vm10, %v2030_v30, %v2031_v6  ;;  %1481 = vst.msk [vmem:[#allocation2 + $0x138] sm:$0xff] %vm11979_vm11, %v5935_v44  ;;  %v2032_v24 = vrot.slane %v7754_v9, 1  ;;  %v5936_v25 = vsel %vm1486_vm2, 1.0, %v11895_v37  ;;  %v1490_v50 = vsel %vm1486_vm2, 0.0, %v1482_v48  ;;  %vm11988_vm0 = vmmov %vm11977_vm1 }
 0x19f   :  { %vm7771_vm14 = vcmp.ne.s32.totalorder %v11980_v41, 15  ;;  %v1483_v19 = vadd.f32 %v1467_v17, %v7138_v23  ;;  %v2033_v30 = vrot.slane %v7756_v8, 1  ;;  %v2034_v44 = vrot.slane %v7777_v55, 1  ;;  %1502 = vst.msk [vmem:[#allocation2 + $0x140] sm:$0xff] %vm11988_vm0, %v5936_v25  ;;  %vm11989_vm2 = vmmov %vm11978_vm10 }
 0x1a0   :  { %v11982_v4 = vsel %vm7771_vm14, 4294967295, %v11981_v4  ;;  %v11984_v21 = vand.u32 15, %v7136_v22  ;;  %v11985_v41 = vmov 0  ;;  %v1484_v49 = vadd.f32 %v1468_v31, %v7175_v54  ;;  %6525 = vrot.lane.b32.xlu0 %v6524_v16, %s6922_s16  ;;  %vm11990_vm1 = vmmov %vm11989_vm2 }
 0x1a1   :  { %11983 = vst [vmem:[#allocation37_spill] sm:$0xff] %v11982_v4  ;;  %v1485_v15 = vadd.f32 %v1469_v40, %v7156_v45  ;;  %v6534_v48 = vpack.i.bf16 %v7756_v8, %v7754_v9  ;;  %v2091_v17 = vsel %vm11989_vm2, %v2031_v6, %v2032_v24  ;;  %vm1487_vm7 = vcmp.ge.f32.partialorder %v1483_v19, 1.0  ;;  %vm11991_vm10 = vmmov %vm11990_vm1 }
 0x1a2   :  { %vm7785_vm11 = vcmp.ne.s32.totalorder %v11984_v21, 15  ;;  %v1506_v22 = vadd.f32 %v1490_v50, %v7147_v35  ;;  %v2279_v21 = vsel %vm7717_vm15, %v2091_v17, 0.0  ;;  %v2089_v25 = vsel %vm11990_vm1, %v2033_v30, %v2034_v44  ;;  %vm11992_vm1 = vmmov %vm11988_vm0 }
 0x1a3   :  { %v11986_v41 = vsel %vm7785_vm11, 4294967295, %v11985_v41  ;;  %v2090_v40 = vsel %vm11991_vm10, %v2032_v24, %v2033_v30  ;;  %v5937_v31 = vsel %vm1487_vm7, 1.0, %v11895_v37  ;;  %6535 = vrot.lane.b32.xlu1 %v6534_v48, %s6922_s16  ;;  %v6539_v16 = vpack.i.bf16 %v2279_v21, %v2092_v27  ;;  %v7810_v17 = vld [vmem:[#allocation2 + $0x128] sm:$0xff] }
 0x1a4   :  { %11987 = vst [vmem:[#allocation38_spill] sm:$0xff] %v11986_v41  ;;  %v2281_v6 = vsel %vm7726_vm8, %v2089_v25, 0.0  ;;  %1503 = vst.msk [vmem:[#allocation2 + $0x148] sm:$0xff] %vm11988_vm0, %v5937_v31  ;;  %vm1488_vm2 = vcmp.ge.f32.partialorder %v1484_v49, 1.0  ;;  %vm1489_vm6 = vcmp.ge.f32.partialorder %v1485_v15, 1.0  ;;  %v7812_v3 = vld [vmem:[#allocation2 + $0x130] sm:$0xff]  ;;  %v6544_v50 = vpack.i.bf16 %v7810_v17, %v7777_v55 }
 0x1a5   :  { %v1491_v2 = vsel %vm1487_vm7, 0.0, %v1483_v19  ;;  %v5938_v24 = vsel %vm1488_vm2, 1.0, %v11895_v37  ;;  %v5939_v27 = vsel %vm1489_vm6, 1.0, %v11895_v37  ;;  %6540 = vrot.lane.b32.xlu0 %v6539_v16, %s6923_s4  ;;  %v6549_v25 = vpack.i.bf16 %v2281_v6, %v2090_v40  ;;  %v7822_v31 = vld [vmem:[#allocation2 + $0x138] sm:$0xff]  ;;  %vm11993_vm7 = vmmov %vm11988_vm0 }
 0x1a6   :  { %1504 = vst.msk [vmem:[#allocation2 + $0x150] sm:$0xff] %vm11992_vm1, %v5938_v24  ;;  %v2035_v19 = vrot.slane %v7810_v17, 1  ;;  %v2036_v30 = vrot.slane %v7812_v3, 1  ;;  %v1493_v48 = vsel %vm1489_vm6, 0.0, %v1485_v15  ;;  %v11994_v21 = vand.u32 15, %v7162_v47  ;;  %v7839_v6 = vld [vmem:[#allocation2 + $0x140] sm:$0xff] }
 0x1a7   :  { %1505 = vst.msk [vmem:[#allocation2 + $0x158] sm:$0xff] %vm11993_vm7, %v5939_v27  ;;  %v11995_v16 = vmov 0  ;;  %6550 = vrot.lane.b32.xlu1 %v6549_v25, %s6923_s4  ;;  %v2037_v40 = vrot.slane %v7822_v31, 1  ;;  %v1492_v24 = vsel %vm1488_vm2, 0.0, %v1484_v49  ;;  %vm1510_vm0 = vcmp.ge.f32.partialorder %v1506_v22, 1.0 }
 0x1a8   :  { %vm7833_vm10 = vcmp.ne.s32.totalorder %v11994_v21, 15  ;;  %v1507_v55 = vadd.f32 %v1491_v2, %v7138_v23  ;;  %v6554_v15 = vpack.i.bf16 %v7822_v31, %v7812_v3  ;;  %vm11998_vm6 = vcmp.lt.s32.totalorder %v6996_v10, 7 }
 0x1a9   :  { %v11996_v16 = vsel %vm7833_vm10, 4294967295, %v11995_v16  ;;  %v2087_v47 = vsel %vm11998_vm6, %v2035_v19, %v2036_v30  ;;  %v2038_v27 = vrot.slane %v7839_v6, 1  ;;  %v5940_v21 = vsel %vm1510_vm0, 1.0, %v11895_v37  ;;  %6545 = vrot.lane.b32.xlu0 %v6544_v50, %s6922_s16  ;;  %vm12003_vm8 = vmmov %vm11998_vm6 }
 0x1aa   :  { %11997 = vst [vmem:[#allocation39_spill] sm:$0xff] %v11996_v16  ;;  %v2283_v25 = vsel %vm7771_vm14, %v2087_v47, 0.0  ;;  %v11999_v49 = vand.u32 15, %v7170_v52  ;;  %v12000_v60 = vmov 0  ;;  %1526 = vst.msk [vmem:[#allocation2 + $0x160] sm:$0xff] %vm11992_vm1, %v5940_v21  ;;  %v1514_v2 = vsel %vm1510_vm0, 0.0, %v1506_v22 }
 0x1ab   :  { %vm1511_vm7 = vcmp.ge.f32.partialorder %v1507_v55, 1.0  ;;  %v1508_v51 = vadd.f32 %v1492_v24, %v7175_v54  ;;  %v2088_v61 = vsel %vm11998_vm6, %v2034_v44, %v2035_v19  ;;  %v2085_v50 = vsel %vm12003_vm8, %v2037_v40, %v2038_v27  ;;  %vm12004_vm14 = vmmov %vm11998_vm6  ;;  %v7866_v52 = vld [vmem:[#allocation2 + $0x148] sm:$0xff]  ;;  %6555 = vrot.lane.b32.xlu1 %v6554_v15, %s6922_s16 }
 0x1ac   :  { %vm7854_vm2 = vcmp.ne.s32.totalorder %v11999_v49, 15  ;;  %v2086_v47 = vsel %vm12004_vm14, %v2036_v30, %v2037_v40  ;;  %v5941_v49 = vsel %vm1511_vm7, 1.0, %v11895_v37  ;;  %v6559_v22 = vpack.i.bf16 %v2283_v25, %v2088_v61  ;;  %vm12005_vm0 = vmmov %vm11992_vm1 }
 0x1ad   :  { %v12001_v60 = vsel %vm7854_vm2, 4294967295, %v12000_v60  ;;  %v2285_v24 = vsel %vm7785_vm11, %v2085_v50, 0.0  ;;  %1527 = vst.msk [vmem:[#allocation2 + $0x168] sm:$0xff] %vm12005_vm0, %v5941_v49  ;;  %v7879_v19 = vld [vmem:[#allocation2 + $0x150] sm:$0xff]  ;;  %v1509_v21 = vadd.f32 %v1493_v48, %v7156_v45  ;;  %vm1512_vm8 = vcmp.ge.f32.partialorder %v1508_v51, 1.0  ;;  %vm12006_vm1 = vmmov %vm12005_vm0 }
 0x1ae   :  { %12002 = vst [vmem:[#allocation40_spill] sm:$0xff] %v12001_v60  ;;  %v7881_v40 = vld [vmem:[#allocation2 + $0x158] sm:$0xff]  ;;  %v1530_v61 = vadd.f32 %v1514_v2, %v7147_v35  ;;  %6560 = vrot.lane.b32.xlu0 %v6559_v22, %s6923_s4  ;;  %v6569_v15 = vpack.i.bf16 %v2285_v24, %v2086_v47  ;;  %v2039_v25 = vrot.slane %v7866_v52, 1  ;;  %v6564_v50 = vpack.i.bf16 %v7866_v52, %v7839_v6  ;;  %vm12012_vm11 = vmmov %vm12006_vm1 }
 0x1af   :  { %v1515_v49 = vsel %vm1511_vm7, 0.0, %v1507_v55  ;;  %v2041_v30 = vrot.slane %v7881_v40, 1  ;;  %v2040_v44 = vrot.slane %v7879_v19, 1  ;;  %vm1513_vm14 = vcmp.ge.f32.partialorder %v1509_v21, 1.0 }
 0x1b0   :  { %v5942_v48 = vsel %vm1512_vm8, 1.0, %v11895_v37  ;;  %6570 = vrot.lane.b32.xlu1 %v6569_v15, %s6923_s4  ;;  %v1517_v2 = vsel %vm1513_vm14, 0.0, %v1509_v21  ;;  %v5943_v22 = vsel %vm1513_vm14, 1.0, %v11895_v37  ;;  %v1516_v47 = vsel %vm1512_vm8, 0.0, %v1508_v51  ;;  %vm12017_vm14 = vmmov %vm12006_vm1 }
 0x1b1   :  { %1528 = vst.msk [vmem:[#allocation2 + $0x170] sm:$0xff] %vm12006_vm1, %v5942_v48  ;;  %v12007_v24 = vand.u32 15, %v7173_v53  ;;  %v12008_v6 = vmov 0  ;;  %vm1534_vm7 = vcmp.ge.f32.partialorder %v1530_v61, 1.0  ;;  %v6574_v55 = vpack.i.bf16 %v7881_v40, %v7879_v19  ;;  %v1666_v15 = vld [vmem:[#allocation2 + $0x160] sm:$0xff] }
 0x1b2   :  { %vm12011_vm0 = vcmp.lt.s32.totalorder %v6996_v10, 7  ;;  %1529 = vst.msk [vmem:[#allocation2 + $0x178] sm:$0xff] %vm12012_vm11, %v5943_v22  ;;  %v5944_v21 = vsel %vm1534_vm7, 1.0, %v11895_v37  ;;  %v1538_v48 = vsel %vm1534_vm7, 0.0, %v1530_v61  ;;  %6565 = vrot.lane.b32.xlu0 %v6564_v50, %s6922_s16  ;;  %v2042_v51 = vrot.slane %v1666_v15, 1 }
 0x1b3   :  { %vm7898_vm6 = vcmp.ne.s32.totalorder %v12007_v24, 15  ;;  %v2083_v41 = vsel %vm12011_vm0, %v2039_v25, %v2040_v44  ;;  %v12013_v24 = vand.u32 15, %v7202_v29  ;;  %v12014_v4 = vmov 0  ;;  %1550 = vst.msk [vmem:[#allocation2 + $0x180] sm:$0xff] %vm12017_vm14, %v5944_v21  ;;  %vm12018_vm11 = vmmov %vm12011_vm0 }
 0x1b4   :  { %v12009_v6 = vsel %vm7898_vm6, 4294967295, %v12008_v6  ;;  %v2287_v53 = vsel %vm7833_vm10, %v2083_v41, 0.0  ;;  %v1531_v11 = vadd.f32 %v1515_v49, %v7138_v23  ;;  %v1532_v22 = vadd.f32 %v1516_v47, %v7175_v54  ;;  %vm12019_vm1 = vmmov %vm12011_vm0  ;;  %v7925_v16 = vld [vmem:[#allocation2 + $0x168] sm:$0xff]  ;;  %6575 = vrot.lane.b32.xlu1 %v6574_v55, %s6922_s16 }
 0x1b5   :  { %12010 = vst [vmem:[#allocation41_spill] sm:$0xff] %v12009_v6  ;;  %vm7913_vm8 = vcmp.ne.s32.totalorder %v12013_v24, 15  ;;  %v2084_v50 = vsel %vm12018_vm11, %v2038_v27, %v2039_v25  ;;  %v2082_v41 = vsel %vm12019_vm1, %v2040_v44, %v2041_v30  ;;  %v1533_v29 = vadd.f32 %v1517_v2, %v7156_v45  ;;  %vm12020_vm7 = vmmov %vm12011_vm0 }
 0x1b6   :  { %v12015_v4 = vsel %vm7913_vm8, 4294967295, %v12014_v4  ;;  %v6579_v24 = vpack.i.bf16 %v2287_v53, %v2084_v50  ;;  %v2081_v49 = vsel %vm12020_vm7, %v2041_v30, %v2042_v51  ;;  %v2043_v47 = vrot.slane %v7925_v16, 1 }
 0x1b7   :  { %12016 = vst [vmem:[#allocation42_spill] sm:$0xff] %v12015_v4  ;;  %v1554_v21 = vadd.f32 %v1538_v48, %v7147_v35  ;;  %v2289_v27 = vsel %vm7854_vm2, %v2081_v49, 0.0  ;;  %vm1535_vm0 = vcmp.ge.f32.partialorder %v1531_v11, 1.0  ;;  %vm1536_vm14 = vcmp.ge.f32.partialorder %v1532_v22, 1.0  ;;  %v12106_v4 = vld [vmem:[#allocation11_spill] sm:$0xff] }
 0x1b8   :  { %vm1537_vm11 = vcmp.ge.f32.partialorder %v1533_v29, 1.0  ;;  %6580 = vrot.lane.b32.xlu0 %v6579_v24, %s6923_s4  ;;  %v6589_v25 = vpack.i.bf16 %v2289_v27, %v2082_v41  ;;  %v1539_v2 = vsel %vm1535_vm0, 0.0, %v1531_v11  ;;  %v5945_v55 = vsel %vm1535_vm0, 1.0, %v11895_v37  ;;  %v1668_v53 = vld [vmem:[#allocation2 + $0x170] sm:$0xff] }
 0x1b9   :  { %v6584_v30 = vpack.i.bf16 %v7925_v16, %v1666_v15  ;;  %v2080_v48 = vsel %vm12019_vm1, %v2042_v51, %v2043_v47  ;;  %vm12021_vm7 = vcmask 261120   ;;  %v5946_v50 = vsel %vm1536_vm14, 1.0, %v11895_v37  ;;  %v1669_v24 = vld [vmem:[#allocation2 + $0x178] sm:$0xff] }
 0x1ba   :  { %1551 = vst.msk [vmem:[#allocation2 + $0x188] sm:$0xff] %vm12021_vm7, %v5945_v55  ;;  %v5947_v49 = vsel %vm1537_vm11, 1.0, %v11895_v37  ;;  %6590 = vrot.lane.b32.xlu1 %v6589_v25, %s6923_s4  ;;  %v2044_v41 = vrot.slane %v1668_v53, 1  ;;  %v1541_v11 = vsel %vm1537_vm11, 0.0, %v1533_v29  ;;  %vm12022_vm2 = vmmov %vm12021_vm7  ;;  %vm1558_vm10 = vcmp.ge.f32.partialorder %v1554_v21, 1.0  ;;  %v1670_v55 = vld [vmem:[#allocation2 + $0x180] sm:$0xff] }
 0x1bb   :  { %1552 = vst.msk [vmem:[#allocation2 + $0x190] sm:$0xff] %vm12022_vm2, %v5946_v50  ;;  %vm12023_vm0 = vmmov %vm12022_vm2  ;;  %v1555_v15 = vadd.f32 %v1539_v2, %v7138_v23  ;;  %v2045_v51 = vrot.slane %v1669_v24, 1  ;;  %v6594_v27 = vpack.i.bf16 %v1669_v24, %v1668_v53  ;;  %v1540_v44 = vsel %vm1536_vm14, 0.0, %v1532_v22 }
 0x1bc   :  { %1553 = vst.msk [vmem:[#allocation2 + $0x198] sm:$0xff] %vm12023_vm0, %v5947_v49  ;;  %v12024_v61 = vand.u32 15, %v7205_v38  ;;  %v12025_v60 = vmov 0  ;;  %v5948_v29 = vsel %vm1558_vm10, 1.0, %v11895_v37  ;;  %6585 = vrot.lane.b32.xlu0 %v6584_v30, %s6922_s16  ;;  %vm12028_vm2 = vcmp.lt.s32.totalorder %v6996_v10, 7  ;;  %vm12033_vm14 = vmmov %vm12023_vm0 }
 0x1bd   :  { %v2079_v25 = vsel %vm12028_vm2, %v2043_v47, %v2044_v41  ;;  %v2046_v50 = vrot.slane %v1670_v55, 1  ;;  %v12029_v2 = vand.u32 15, %v7210_v46  ;;  %v12030_v53 = vmov 0  ;;  %1574 = vst.msk [vmem:[#allocation2 + $0x1a0] sm:$0xff] %vm12033_vm14, %v5948_v29  ;;  %vm12034_vm0 = vmmov %vm12028_vm2 }
 0x1be   :  { %vm7952_vm1 = vcmp.ne.s32.totalorder %v12024_v61, 15  ;;  %v1562_v38 = vsel %vm1558_vm10, 0.0, %v1554_v21  ;;  %vm1559_vm7 = vcmp.ge.f32.partialorder %v1555_v15, 1.0  ;;  %v2291_v22 = vsel %vm7898_vm6, %v2079_v25, 0.0  ;;  %6595 = vrot.lane.b32.xlu1 %v6594_v27, %s6922_s16  ;;  %vm12035_vm2 = vmmov %vm12034_vm0 }
 0x1bf   :  { %v12026_v60 = vsel %vm7952_vm1, 4294967295, %v12025_v60  ;;  %vm7962_vm11 = vcmp.ne.s32.totalorder %v12029_v2, 15  ;;  %v2078_v61 = vsel %vm12034_vm0, %v2044_v41, %v2045_v51  ;;  %v1563_v30 = vsel %vm1559_vm7, 0.0, %v1555_v15  ;;  %vm12036_vm15 = vmmov %vm12033_vm14 }
 0x1c0   :  { %12027 = vst [vmem:[#allocation43_spill] sm:$0xff] %v12026_v60  ;;  %v12031_v53 = vsel %vm7962_vm11, 4294967295, %v12030_v53  ;;  %v5949_v47 = vsel %vm1559_vm7, 1.0, %v11895_v37  ;;  %v6599_v46 = vpack.i.bf16 %v2291_v22, %v2080_v48  ;;  %v2077_v49 = vsel %vm12035_vm2, %v2045_v51, %v2046_v50  ;;  %vm12037_vm7 = vmmov %vm12033_vm14 }
 0x1c1   :  { %12032 = vst [vmem:[#allocation44_spill] sm:$0xff] %v12031_v53  ;;  %1575 = vst.msk [vmem:[#allocation2 + $0x1a8] sm:$0xff] %vm12036_vm15, %v5949_v47  ;;  %v1556_v21 = vadd.f32 %v1540_v44, %v7175_v54  ;;  %v1557_v24 = vadd.f32 %v1541_v11, %v7156_v45  ;;  %v2293_v29 = vsel %vm7913_vm8, %v2077_v49, 0.0  ;;  %v1578_v41 = vadd.f32 %v1562_v38, %v7147_v35  ;;  %v1671_v51 = vld [vmem:[#allocation2 + $0x188] sm:$0xff] }
 0x1c2   :  { %v7983_v25 = vadd.s32 472, %v6996_v10  ;;  %6600 = vrot.lane.b32.xlu0 %v6599_v46, %s6923_s4  ;;  %v6609_v48 = vpack.i.bf16 %v2293_v29, %v2078_v61  ;;  %v1579_v44 = vadd.f32 %v1563_v30, %v7138_v23  ;;  %v1672_v22 = vld [vmem:[#allocation2 + $0x190] sm:$0xff]  ;;  %v2047_v61 = vrot.slane %v1671_v51, 1 }
 0x1c3   :  { %vm1560_vm10 = vcmp.ge.f32.partialorder %v1556_v21, 1.0  ;;  %vm1561_vm15 = vcmp.ge.f32.partialorder %v1557_v24, 1.0  ;;  %v1673_v47 = vld [vmem:[#allocation2 + $0x198] sm:$0xff]  ;;  %v6604_v46 = vpack.i.bf16 %v1671_v51, %v1670_v55  ;;  %v2048_v30 = vrot.slane %v1672_v22, 1 }
 0x1c4   :  { %6610 = vrot.lane.b32.xlu1 %v6609_v48, %s6923_s4  ;;  %v1565_v29 = vsel %vm1561_vm15, 0.0, %v1557_v24  ;;  %v2049_v15 = vrot.slane %v1673_v47, 1  ;;  %v1674_v6 = vld [vmem:[#allocation2 + $0x1a0] sm:$0xff]  ;;  %v5950_v11 = vsel %vm1560_vm10, 1.0, %v11895_v37  ;;  %v5951_v2 = vsel %vm1561_vm15, 1.0, %v11895_v37 }
 0x1c5   :  { %v6614_v38 = vpack.i.bf16 %v1673_v47, %v1672_v22  ;;  %v2050_v27 = vrot.slane %v1674_v6, 1  ;;  %1576 = vst.msk [vmem:[#allocation2 + $0x1b0] sm:$0xff] %vm12033_vm14, %v5950_v11  ;;  %vm1582_vm0 = vcmp.ge.f32.partialorder %v1578_v41, 1.0  ;;  %vm1583_vm2 = vcmp.ge.f32.partialorder %v1579_v44, 1.0 }
 0x1c6   :  { %6605 = vrot.lane.b32.xlu0 %v6604_v46, %s6922_s16  ;;  %1577 = vst.msk [vmem:[#allocation2 + $0x1b8] sm:$0xff] %vm12037_vm7, %v5951_v2  ;;  %vm12038_vm6 = vcmp.lt.s32.totalorder %v6996_v10, 7  ;;  %v1564_v51 = vsel %vm1560_vm10, 0.0, %v1556_v21  ;;  %v12040_v24 = vand.u32 15, %v7276_v28  ;;  %v12041_v46 = vmov 0  ;;  %vm12049_vm10 = vmmov %vm12037_vm7 }
 0x1c7   :  { %v2075_v55 = vsel %vm12038_vm6, %v2047_v61, %v2048_v30  ;;  %vm12039_vm8 = vmmov %vm12038_vm6  ;;  %v5952_v11 = vsel %vm1582_vm0, 1.0, %v11895_v37  ;;  %v2073_v47 = vsel %vm12038_vm6, %v2049_v15, %v2050_v27  ;;  %v12045_v28 = vand.u32 15, %v7433_v39 }
 0x1c8   :  { %v2074_v48 = vsel %vm12039_vm8, %v2048_v30, %v2049_v15  ;;  %vm8008_vm15 = vcmp.ne.s32.totalorder %v12040_v24, 15  ;;  %6615 = vrot.lane.b32.xlu1 %v6614_v38, %s6922_s16  ;;  %vm12044_vm14 = vmmov %vm12038_vm6  ;;  %v2295_v22 = vsel %vm7952_vm1, %v2075_v55, 0.0  ;;  %v1675_v21 = vld [vmem:[#allocation2 + $0x1a8] sm:$0xff]  ;;  %v12046_v30 = vmov 0  ;;  %1598 = vst.msk [vmem:[#allocation2 + $0x1c0] sm:$0xff] %vm12049_vm10, %v5952_v11 }
 0x1c9   :  { %v12042_v46 = vsel %vm8008_vm15, 4294967295, %v12041_v46  ;;  %v2076_v2 = vsel %vm12044_vm14, %v2046_v50, %v2047_v61  ;;  %vm8022_vm8 = vcmp.ne.s32.totalorder %v12045_v28, 15  ;;  %v1586_v24 = vsel %vm1582_vm0, 0.0, %v1578_v41 }
 0x1ca   :  { %12043 = vst [vmem:[#allocation45_spill] sm:$0xff] %v12042_v46  ;;  %v12047_v30 = vsel %vm8022_vm8, 4294967295, %v12046_v30  ;;  %v6619_v49 = vpack.i.bf16 %v2295_v22, %v2076_v2  ;;  %v2297_v50 = vsel %vm7962_vm11, %v2073_v47, 0.0  ;;  %v1587_v61 = vsel %vm1583_vm2, 0.0, %v1579_v44 }
 0x1cb   :  { %12048 = vst [vmem:[#allocation46_spill] sm:$0xff] %v12047_v30  ;;  %v6629_v55 = vpack.i.bf16 %v2297_v50, %v2074_v48  ;;  %v5953_v39 = vsel %vm1583_vm2, 1.0, %v11895_v37  ;;  %v1580_v28 = vadd.f32 %v1564_v51, %v7175_v54  ;;  %v2051_v11 = vrot.slane %v1675_v21, 1 }
 0x1cc   :  { %6620 = vrot.lane.b32.xlu0 %v6619_v49, %s6923_s4  ;;  %v6624_v41 = vpack.i.bf16 %v1675_v21, %v1674_v6  ;;  %1599 = vst.msk [vmem:[#allocation2 + $0x1c8] sm:$0xff] %vm12037_vm7, %v5953_v39  ;;  %v1581_v2 = vadd.f32 %v1565_v29, %v7156_v45  ;;  %v1602_v22 = vadd.f32 %v1586_v24, %v7147_v35  ;;  %v12050_v44 = vrot.slane %v7286_v14, 7  ;;  %v1676_v29 = vld [vmem:[#allocation2 + $0x1b0] sm:$0xff] }
 0x1cd   :  { %6630 = vrot.lane.b32.xlu1 %v6629_v55, %s6923_s4  ;;  %vm1584_vm0 = vcmp.ge.f32.partialorder %v1580_v28, 1.0  ;;  %v1603_v48 = vadd.f32 %v1587_v61, %v7138_v23  ;;  %v12051_v47 = vrot.slane %v7298_v13, 7  ;;  %vm12052_vm2 = vcmp.lt.s32.totalorder %v6996_v10, 1  ;;  %v1677_v21 = vld [vmem:[#allocation2 + $0x1b8] sm:$0xff] }
 0x1ce   :  { %v12054_v51 = vrot.slane %v7267_v32, 7  ;;  %vm12055_vm14 = vmmov %vm12052_vm2  ;;  %vm1585_vm6 = vcmp.ge.f32.partialorder %v1581_v2, 1.0  ;;  %v5954_v23 = vsel %vm1584_vm0, 1.0, %v11895_v37  ;;  %v1588_v24 = vsel %vm1584_vm0, 0.0, %v1580_v28 }
 0x1cf   :  { %v8047_v49 = vsel %vm12052_vm2, %v12051_v47, %v12050_v44  ;;  %v12053_v6 = vmov %v12051_v47  ;;  %vm1606_vm10 = vcmp.ge.f32.partialorder %v1602_v22, 1.0  ;;  %v2053_v50 = vrot.slane %v1677_v21, 1  ;;  %v1678_v28 = vld [vmem:[#allocation2 + $0x1c0] sm:$0xff] }
 0x1d0   :  { %v8055_v35 = vsel %vm12055_vm14, %v12054_v51, %v12053_v6  ;;  %v6634_v61 = vpack.i.bf16 %v1677_v21, %v1676_v29  ;;  %vm12056_vm7 = vcmp.lt.s32.totalorder %v6996_v10, 7  ;;  %vm12057_vm2 = vcmask 261120   ;;  %6625 = vrot.lane.b32.xlu0 %v6624_v41, %s6922_s16 }
 0x1d1   :  { %v2072_v55 = vsel %vm12056_vm7, %v2050_v27, %v2051_v11  ;;  %1600 = vst.msk [vmem:[#allocation2 + $0x1d0] sm:$0xff] %vm12057_vm2, %v5954_v23  ;;  %v12058_v13 = vand.u32 15, %v7560_v59  ;;  %v12059_v39 = vmov 0  ;;  %v598_v44 = vand.u32 15, %v7983_v25  ;;  %vm12066_vm14 = vmmov %vm12057_vm2  ;;  %v6867_v23 = vld [vmem:[#allocation2 + $0x20] sm:$0xff] }
 0x1d2   :  { %v2052_v47 = vrot.slane %v1676_v29, 1  ;;  %v1589_v22 = vsel %vm1585_vm6, 0.0, %v1581_v2  ;;  %v5955_v6 = vsel %vm1585_vm6, 1.0, %v11895_v37  ;;  %v5956_v51 = vsel %vm1606_vm10, 1.0, %v11895_v37  ;;  %6635 = vrot.lane.b32.xlu1 %v6634_v61, %s6922_s16  ;;  %vm12067_vm7 = vmmov %vm12057_vm2 }
 0x1d3   :  { %vm8063_vm11 = vcmp.ne.s32.totalorder %v12058_v13, 15  ;;  %v12062_v27 = vand.u32 15, %v7117_v12  ;;  %v12063_v21 = vmov 0  ;;  %v2054_v59 = vrot.slane %v1678_v28, 1  ;;  %1601 = vst.msk [vmem:[#allocation2 + $0x1d8] sm:$0xff] %vm12066_vm14, %v5955_v6  ;;  %v1679_v6 = vld [vmem:[#allocation2 + $0x1c8] sm:$0xff] }
 0x1d4   :  { %v12060_v39 = vsel %vm8063_vm11, 4294967295, %v12059_v39  ;;  %1618 = vst.msk [vmem:[#allocation2 + $0x1e0] sm:$0xff] %vm12067_vm7, %v5956_v51  ;;  %vm1607_vm2 = vcmp.ge.f32.partialorder %v1603_v48, 1.0  ;;  %v1604_v25 = vadd.f32 %v1588_v24, %v7175_v54  ;;  %v1605_v41 = vadd.f32 %v1589_v22, %v7156_v45  ;;  %v8096_v22 = vpop.permute.xlu0 %6370  ;;  %v6376_v45 = vpop.permute.xlu1 %6375 }
 0x1d5   :  { %12061 = vst [vmem:[#allocation47_spill] sm:$0xff] %v12060_v39  ;;  %vm8073_vm0 = vcmp.ne.s32.totalorder %v12062_v27, 0  ;;  %vm12068_vm6 = vcmp.lt.s32.totalorder %v6996_v10, 7  ;;  %v5957_v29 = vsel %vm1607_vm2, 1.0, %v11895_v37  ;;  %v1690_v61 = vrot.slane %v6867_v23, 7 }
 0x1d6   :  { %v12064_v21 = vsel %vm8073_vm0, 4294967295, %v12063_v21  ;;  %v2071_v2 = vsel %vm12068_vm6, %v2051_v11, %v2052_v47  ;;  %vm12069_vm10 = vmmov %vm12068_vm6  ;;  %1619 = vst.msk [vmem:[#allocation2 + $0x1e8] sm:$0xff] %vm12067_vm7, %v5957_v29  ;;  %vm1608_vm1 = vcmp.ge.f32.partialorder %v1604_v25, 1.0  ;;  %vm1609_vm13 = vcmp.ge.f32.partialorder %v1605_v41, 1.0 }
 0x1d7   :  { %12065 = vst [vmem:[#allocation48_spill] sm:$0xff] %v12064_v21  ;;  %v2070_v12 = vsel %vm12069_vm10, %v2052_v47, %v2053_v50  ;;  %v2299_v13 = vsel %vm8008_vm15, %v2071_v2, 0.0  ;;  %vm12070_vm14 = vmmov %vm12068_vm6  ;;  %vm8098_vm2 = vcmp.ne.s32.totalorder %v598_v44, 15  ;;  %v12071_v51 = vmov 0 }
 0x1d8   :  { %v2069_v48 = vsel %vm12070_vm14, %v2053_v50, %v2054_v59  ;;  %v6639_v11 = vpack.i.bf16 %v2299_v13, %v2072_v55  ;;  %v12072_v51 = vsel %vm8098_vm2, 4294967295, %v12071_v51  ;;  %v5958_v50 = vsel %vm1608_vm1, 1.0, %v11895_v37  ;;  %v8105_v41 = vld [vmem:[#allocation2 + $0x1d0] sm:$0xff]  ;;  %vm12074_vm10 = vmmov %vm12067_vm7  ;;  %v6391_v39 = vpop.permute.xlu1 %6390 }
 0x1d9   :  { %v2301_v24 = vsel %vm8022_vm8, %v2069_v48, 0.0  ;;  %12073 = vst [vmem:[#allocation49_spill] sm:$0xff] %v12072_v51  ;;  %v5959_v27 = vsel %vm1609_vm13, 1.0, %v11895_v37  ;;  %v2055_v25 = vrot.slane %v1679_v6, 1  ;;  %vm11738_vm6 = vcmask 523264   ;;  %1620 = vst.msk [vmem:[#allocation2 + $0x1f0] sm:$0xff] %vm12074_vm10, %v5958_v50 }
 0x1da   :  { %v6649_v47 = vpack.i.bf16 %v2301_v24, %v2070_v12  ;;  %6640 = vrot.lane.b32.xlu0 %v6639_v11, %s6923_s4  ;;  %vm12075_vm14 = vmmov %vm12067_vm7  ;;  %v12076_v55 = vrot.slane %v7267_v32, 7  ;;  %vm12077_vm7 = vcmp.lt.s32.totalorder %v6996_v10, 1  ;;  %v12078_v2 = vand.u32 15, %v7487_v18  ;;  %v1681_v32 = vld [vmem:[#allocation2 + $0x1d8] sm:$0xff]  ;;  %v12083_v18 = vld [vmem:[#allocation14_spill] sm:$0xff] }
 0x1db   :  { %1621 = vst.msk [vmem:[#allocation2 + $0x1f8] sm:$0xff] %vm12075_vm14, %v5959_v27  ;;  %v12079_v12 = vmov 0  ;;  %v6373_v29 = vunpack.i.h.bf16 %v8096_v22  ;;  %v6644_v13 = vpack.i.bf16 %v1679_v6, %v1678_v28  ;;  %v2056_v48 = vrot.slane %v8105_v41, 1  ;;  %v8127_v24 = vld [vmem:[#allocation2 + $0x1e0] sm:$0xff]  ;;  %vm12085_vm10 = vmmov %vm12077_vm7 }
 0x1dc   :  { %v8113_v44 = vsel %vm12077_vm7, %v1690_v61, %v12076_v55  ;;  %vm8117_vm1 = vcmp.ne.s32.totalorder %v12078_v2, 0  ;;  %6650 = vrot.lane.b32.xlu1 %v6649_v47, %s6923_s4  ;;  %vm12082_vm13 = vcmp.lt.s32.totalorder %v6996_v10, 7  ;;  %v12084_v50 = vrot.slane %v12083_v18, 7  ;;  %v12086_v47 = vld [vmem:[#allocation13_spill] sm:$0xff]  ;;  %v12088_v2 = vld [vmem:[#allocation12_spill] sm:$0xff]  ;;  %vm12090_vm14 = vmmov %vm12077_vm7 }
 0x1dd   :  { %v12080_v12 = vsel %vm8117_vm1, 4294967295, %v12079_v12  ;;  %v2068_v11 = vsel %vm12082_vm13, %v2054_v59, %v2055_v25  ;;  %v12087_v55 = vrot.slane %v12086_v47, 7  ;;  %v12089_v15 = vrot.slane %v12088_v2, 7  ;;  %vm12091_vm7 = vmmov %vm12082_vm13 }
 0x1de   :  { %12081 = vst [vmem:[#allocation50_spill] sm:$0xff] %v12080_v12  ;;  %v8133_v27 = vsel %vm12085_vm10, %v12084_v50, %v1690_v61  ;;  %v208_v6 = vadd.s32 504, %v6996_v10  ;;  %v2057_v54 = vrot.slane %v1681_v32, 1  ;;  %v6654_v59 = vpack.i.bf16 %v1681_v32, %v8105_v41  ;;  %6645 = vrot.lane.b32.xlu0 %v6644_v13, %s6922_s16  ;;  %vm12092_vm13 = vmmov %vm12091_vm7 }
 0x1df   :  { %v1812_v28 = vsel %vm12090_vm14, %v12089_v15, %v12087_v55  ;;  %v2067_v18 = vsel %vm12091_vm7, %v2055_v25, %v2056_v48  ;;  %v206_v38 = vadd.s32 488, %v6996_v10  ;;  %v6378_v61 = vunpack.i.h.bf16 %v6376_v45  ;;  %v8150_v55 = vld [vmem:[#allocation2 + $0x1e8] sm:$0xff] }
 0x1e0   :  { %v6377_v50 = vunpack.i.l.bf16 %v6376_v45  ;;  %v2303_v47 = vsel %vm8063_vm11, %v2067_v18, 0.0  ;;  %6655 = vrot.lane.b32.xlu1 %v6654_v59, %s6922_s16  ;;  %v2066_v23 = vsel %vm12092_vm13, %v2056_v48, %v2057_v54  ;;  %v1938_v25 = vsel %vm8073_vm0, %v8133_v27, 0.0  ;;  %v12095_v15 = vld [vmem:[#allocation21_spill] sm:$0xff]  ;;  %v8177_v30 = vld [vmem:[#allocation2 + $0x1f0] sm:$0xff] }
 0x1e1   :  { %v6659_v32 = vpack.i.bf16 %v2303_v47, %v2068_v11  ;;  %v1940_v45 = vsel %vm8117_vm1, %v8055_v35, 0.0  ;;  %v12093_v13 = vsel %vm7048_vm9, %v7419_v56, 0.0  ;;  %vm12094_vm10 = vcmask 261120   ;;  %v6381_v35 = vpop.permute.xlu0 %6380 }
 0x1e2   :  { %v2824_v18 = vsel %vm12094_vm10, %v12093_v13, %v6377_v50  ;;  %vm12096_vm14 = vmmov %vm12094_vm10  ;;  %v12097_v59 = vrot.slane %v8127_v24, 1  ;;  %v2059_v27 = vrot.slane %v8150_v55, 1  ;;  %v6664_v56 = vpack.i.bf16 %v8150_v55, %v8127_v24  ;;  %v8179_v50 = vld [vmem:[#allocation2 + $0x1f8] sm:$0xff] }
 0x1e3   :  { %v2825_v11 = vsel %vm12096_vm14, %v12095_v15, %v6378_v61  ;;  %vm12098_vm13 = vmmov %vm12094_vm10  ;;  %v626_v15 = vand.u32 15, %v208_v6  ;;  %6660 = vrot.lane.b32.xlu0 %v6659_v32, %s6923_s4  ;;  %v6383_v13 = vunpack.i.h.bf16 %v6381_v35  ;;  %v612_v51 = vand.u32 15, %v206_v38  ;;  %v6396_v32 = vpop.permute.xlu1 %6395 }
 0x1e4   :  { %v2065_v48 = vsel %vm12091_vm7, %v2057_v54, %v12097_v59  ;;  %v2823_v61 = vsel %vm12098_vm13, %v1812_v28, %v6373_v29  ;;  %v6393_v59 = vunpack.i.h.bf16 %v6391_v39  ;;  %v6392_v46 = vunpack.i.l.bf16 %v6391_v39 }
 0x1e5   :  { %v2305_v47 = vsel %vm8098_vm2, %v2065_v48, 0.0  ;;  %v6382_v48 = vunpack.i.l.bf16 %v6381_v35  ;;  %v11763_v53 = vrot.slane %v8179_v50, 7  ;;  %v2061_v60 = vrot.slane %v8179_v50, 1  ;;  %v6386_v38 = vpop.permute.xlu0 %6385 }
 0x1e6   :  { %v6669_v54 = vpack.i.bf16 %v2305_v47, %v2066_v23  ;;  %v2890_v12 = vsel %vm11738_vm6, %v2825_v11, %v6393_v59  ;;  %v6674_v29 = vpack.i.bf16 %v8179_v50, %v8177_v30  ;;  %v2060_v28 = vrot.slane %v8177_v30, 1 }
 0x1e7   :  { %v2888_v23 = vsel %vm11738_vm6, %v2823_v61, %v6383_v13  ;;  %v2889_v6 = vsel %vm11738_vm6, %v2824_v18, %v6392_v46  ;;  %v12099_v39 = vrot.slane %v12088_v2, 7  ;;  %vm12100_vm14 = vcmp.lt.s32.totalorder %v6996_v10, 1  ;;  %6665 = vrot.lane.b32.xlu0 %v6664_v56, %s6922_s16  ;;  %vm12109_vm6 = vmmov %vm12094_vm10 }
 0x1e8   :  { %6670 = vrot.lane.b32.xlu1 %v6669_v54, %s6923_s4  ;;  %vm8198_vm7 = vcmp.ne.s32.totalorder %v626_v15, 15  ;;  %v12101_v11 = vmov 0  ;;  %v12104_v35 = vrot.slane %v12088_v2, 1  ;;  %vm12105_vm13 = vcmp.lt.s32.totalorder %v6996_v10, 7  ;;  %vm12111_vm2 = vmmov %vm12109_vm6 }
 0x1e9   :  { %v1813_v47 = vsel %vm12100_vm14, %v11763_v53, %v12099_v39  ;;  %v12102_v11 = vsel %vm8198_vm7, 4294967295, %v12101_v11  ;;  %v2952_v54 = vpack.c.bf16 %v2890_v12, %v2889_v6  ;;  %v6388_v46 = vunpack.i.h.bf16 %v6386_v38  ;;  %vm12107_vm14 = vmmov %vm12105_vm13 }
 0x1ea   :  { %12103 = vst [vmem:[#allocation14_spill] sm:$0xff] %v12102_v11  ;;  %v2125_v61 = vsel %vm12105_vm13, %v2061_v60, %v12104_v35  ;;  %v6387_v18 = vunpack.i.l.bf16 %v6386_v38  ;;  %v6398_v13 = vunpack.i.h.bf16 %v6396_v32  ;;  %v6397_v59 = vunpack.i.l.bf16 %v6396_v32  ;;  %vm12108_vm13 = vmmov %vm12094_vm10 }
 0x1eb   :  { %v1934_v21 = vsel %vm7040_vm5, %v1813_v47, 0.0  ;;  %v2062_v15 = vsel %vm12107_vm14, %v2060_v28, %v2061_v60  ;;  %v2309_v39 = vsel %vm8198_vm7, %v2125_v61, 0.0  ;;  %v2827_v12 = vsel %vm12108_vm13, %v8113_v44, %v6388_v46  ;;  %vm12112_vm11 = vmmov %vm12111_vm2 }
 0x1ec   :  { %6675 = vrot.lane.b32.xlu1 %v6674_v29, %s6922_s16  ;;  %v2826_v2 = vsel %vm12094_vm10, %v1938_v25, %v6387_v18  ;;  %v2829_v56 = vsel %vm12109_vm6, %v8047_v49, %v6398_v13  ;;  %v12110_v6 = vunpack.i.l.bf16 %v8096_v22  ;;  %v2828_v32 = vsel %vm12112_vm11, %v1940_v45, %v6397_v59  ;;  %v6401_v25 = vpop.permute.xlu0 %6400  ;;  %v6411_v29 = vpop.permute.xlu1 %6410 }
 0x1ed   :  { %vm12113_vm14 = vcmask 523264   ;;  %v6684_v47 = vpack.i.bf16 %v2309_v39, %v2062_v15  ;;  %vm8224_vm7 = vcmp.ne.s32.totalorder %v612_v51, 15  ;;  %v12114_v35 = vmov 0 }
 0x1ee   :  { %v2822_v38 = vsel %vm12111_vm2, %v1934_v21, %v12110_v6  ;;  %v12115_v35 = vsel %vm8224_vm7, 4294967295, %v12114_v35  ;;  %vm12117_vm10 = vcmp.lt.s32.totalorder %v6996_v10, 7  ;;  %v12118_v49 = vrot.slane %v8127_v24, 1  ;;  %vm12121_vm2 = vmmov %vm12113_vm14  ;;  %v6868_v24 = vld [vmem:[#allocation2 + $0x40] sm:$0xff] }
 0x1ef   :  { %v2887_v60 = vsel %vm12113_vm14, %v2822_v38, %v6382_v48  ;;  %12116 = vst [vmem:[#allocation13_spill] sm:$0xff] %v12115_v35  ;;  %v2063_v44 = vsel %vm12117_vm10, %v2059_v27, %v2060_v28  ;;  %vm12119_vm6 = vmmov %vm12117_vm10  ;;  %v6403_v22 = vunpack.i.h.bf16 %v6401_v25  ;;  %v6402_v48 = vunpack.i.l.bf16 %v6401_v25 }
 0x1f0   :  { %v2951_v61 = vpack.c.bf16 %v2888_v23, %v2887_v60  ;;  %v2064_v21 = vsel %vm12119_vm6, %v12118_v49, %v2059_v27  ;;  %v2307_v45 = vsel %vm8224_vm7, %v2063_v44, 0.0  ;;  %v6413_v51 = vunpack.i.h.bf16 %v6411_v29  ;;  %6685 = vrot.lane.b32.xlu1 %v6684_v47, %s6923_s4  ;;  %vm12123_vm14 = vmmov %vm12121_vm2  ;;  %v6406_v39 = vpop.permute.xlu0 %6405  ;;  %v6416_v38 = vpop.permute.xlu1 %6415 }
 0x1f1   :  { %v6412_v46 = vunpack.i.l.bf16 %v6411_v29  ;;  %vm12120_vm11 = vcmask 785408   ;;  %v6679_v23 = vpack.i.bf16 %v2307_v45, %v2064_v21  ;;  %v2892_v18 = vsel %vm12121_vm2, %v2827_v12, %v6403_v22  ;;  %vm12124_vm10 = vmmov %vm12121_vm2  ;;  %v12134_v22 = vld [vmem:[#allocation20_spill] sm:$0xff] }
 0x1f2   :  { %6251 = vmatprep.mubr.msk.bf16.mxu1 %vm12120_vm11, %v2951_v61  ;;  %v153_v28 = vadd.s32 64, %v6996_v10  ;;  %v1694_v13 = vrot.slane %v6868_v24, 7  ;;  %vm12122_vm13 = vmmov %vm12120_vm11  ;;  %v2891_v27 = vsel %vm12123_vm14, %v2826_v2, %v6402_v48  ;;  %v2894_v59 = vsel %vm12124_vm10, %v2829_v56, %v6413_v51  ;;  %v12126_v61 = vld [vmem:[#allocation18_spill] sm:$0xff] }
 0x1f3   :  { %6252 = vmatmul.mubr.msk.bf16.vlgmr.msra.gmra.mxu1 %vm12122_vm13, %v2952_v54  ;;  %vm12125_vm6 = vmmov %vm12121_vm2  ;;  %v155_v6 = vadd.s32 80, %v6996_v10  ;;  %6680 = vrot.lane.b32.xlu0 %v6679_v23, %s6923_s4  ;;  %v2953_v60 = vpack.c.bf16 %v2892_v18, %v2891_v27  ;;  %v6408_v25 = vunpack.i.h.bf16 %v6406_v39  ;;  %v6407_v29 = vunpack.i.l.bf16 %v6406_v39 }
 0x1f4   :  { %v2893_v15 = vsel %vm12125_vm6, %v2828_v32, %v6412_v46  ;;  %v241_v47 = vand.u32 15, %v153_v28  ;;  %v12127_v44 = vrot.slane %v12126_v61, 7  ;;  %vm12128_vm11 = vcmp.lt.s32.totalorder %v6996_v10, 1  ;;  %v6421_v27 = vpop.permute.xlu0 %6420 }
 0x1f5   :  { %v2954_v12 = vpack.c.bf16 %v2894_v59, %v2893_v15  ;;  %v12129_v2 = vrot.slane %v7286_v14, 7  ;;  %vm12130_vm2 = vmmov %vm12128_vm11  ;;  %v255_v32 = vand.u32 15, %v155_v6  ;;  %vm12133_vm14 = vcmask 261120   ;;  %v6431_v59 = vpop.permute.xlu1 %6430 }
 0x1f6   :  { %v1804_v54 = vsel %vm12128_vm11, %v1694_v13, %v12127_v44  ;;  %vm8254_vm13 = vcmp.ne.s32.totalorder %v241_v47, 0  ;;  %v12135_v45 = vrot.slane %v12134_v22, 7  ;;  %v12136_v48 = vrot.slane %v7351_v42, 7  ;;  %vm12137_vm10 = vmmov %vm12130_vm2 }
 0x1f7   :  { %v1805_v56 = vsel %vm12130_vm2, %v12129_v2, %v1694_v13  ;;  %v2831_v21 = vsel %vm12133_vm14, %v1804_v54, %v6408_v25  ;;  %v12139_v14 = vmov %v12127_v44  ;;  %vm12140_vm6 = vmmov %vm12130_vm2  ;;  %vm12141_vm11 = vcmask 785408   ;;  %v6869_v2 = vld [vmem:[#allocation2 + $0x60] sm:$0xff] }
 0x1f8   :  { %v1802_v51 = vsel %vm12137_vm10, %v12136_v48, %v12135_v45  ;;  %v12138_v46 = vmov %v12136_v48  ;;  %6255 = vmatprep.mubr.msk.bf16.mxu1 %vm12141_vm11, %v2953_v60  ;;  %v1942_v18 = vsel %vm8254_vm13, %v1805_v56, 0.0  ;;  %vm8274_vm2 = vcmp.ne.s32.totalorder %v255_v32, 0  ;;  %vm12144_vm10 = vmmov %vm12133_vm14  ;;  %v6426_v48 = vpop.permute.xlu0 %6425 }
 0x1f9   :  { %v1803_v23 = vsel %vm12140_vm6, %v12139_v14, %v12138_v46  ;;  %v12142_v28 = vmov 0  ;;  %v6418_v24 = vunpack.i.h.bf16 %v6416_v38  ;;  %v6417_v13 = vunpack.i.l.bf16 %v6416_v38  ;;  %vm12145_vm6 = vmmov %vm12144_vm10  ;;  %v6436_v46 = vpop.permute.xlu1 %6435 }
 0x1fa   :  { %v12143_v28 = vsel %vm8274_vm2, 4294967295, %v12142_v28  ;;  %v2830_v42 = vsel %vm12133_vm14, %v1942_v18, %v6407_v29  ;;  %v1944_v15 = vsel %vm8274_vm2, %v1803_v23, 0.0  ;;  %v6423_v39 = vunpack.i.h.bf16 %v6421_v27 }
 0x1fb   :  { %v6422_v6 = vunpack.i.l.bf16 %v6421_v27  ;;  %v2833_v60 = vsel %vm12144_vm10, %v1802_v51, %v6418_v24  ;;  %v2832_v47 = vsel %vm12145_vm6, %v1944_v15, %v6417_v13  ;;  %v6433_v25 = vunpack.i.h.bf16 %v6431_v59  ;;  %v12156_v15 = vld [vmem:[#allocation24_spill] sm:$0xff] }
 0x1fc   :  { %v6432_v61 = vunpack.i.l.bf16 %v6431_v59  ;;  %vm12146_vm11 = vcmask 523264   ;;  %v157_v38 = vadd.s32 96, %v6996_v10  ;;  %v1698_v56 = vrot.slane %v6869_v2, 7 }
 0x1fd   :  { %v2895_v44 = vsel %vm12146_vm11, %v2830_v42, %v6422_v6  ;;  %vm12147_vm7 = vmmov %vm12146_vm11  ;;  %vm12148_vm14 = vcmask 785408   ;;  %v159_v51 = vadd.s32 112, %v6996_v10  ;;  %v6428_v18 = vunpack.i.h.bf16 %v6426_v48 }
 0x1fe   :  { %v2896_v54 = vsel %vm12147_vm7, %v2831_v21, %v6423_v39  ;;  %6256 = vmatmul.mubr.msk.bf16.gmra.mxu1 %vm12148_vm14, %v2954_v12  ;;  %vm12149_vm8 = vmmov %vm12147_vm7  ;;  %v269_v23 = vand.u32 15, %v157_v38  ;;  %v6427_v24 = vunpack.i.l.bf16 %v6426_v48  ;;  %v12151_v21 = vrot.slane %v7429_v20, 7 }
 0x1ff   :  { %v2955_v29 = vpack.c.bf16 %v2896_v54, %v2895_v44  ;;  %v2898_v32 = vsel %vm12149_vm8, %v2833_v60, %v6433_v25  ;;  %vm12150_vm15 = vmmov %vm12147_vm7  ;;  %vm12152_vm7 = vcmp.lt.s32.totalorder %v6996_v10, 1  ;;  %v12153_v12 = vrot.slane %v12134_v22, 7 }
 0x200   :  { %v2897_v45 = vsel %vm12150_vm15, %v2832_v47, %v6432_v61  ;;  %v1800_v13 = vsel %vm12152_vm7, %v1698_v56, %v12151_v21  ;;  %vm12154_vm10 = vmmov %vm12152_vm7  ;;  %v283_v59 = vand.u32 15, %v159_v51  ;;  %v12155_v42 = vrot.slane %v7447_v0, 7 }
 0x201   :  { %v2956_v14 = vpack.c.bf16 %v2898_v32, %v2897_v45  ;;  %v1801_v27 = vsel %vm12154_vm10, %v12153_v12, %v1698_v56  ;;  %v12157_v39 = vrot.slane %v12156_v15, 7  ;;  %vm12158_vm15 = vmmov %vm12152_vm7  ;;  %vm8305_vm6 = vcmp.ne.s32.totalorder %v269_v23, 0  ;;  %v6441_v56 = vpop.permute.xlu0 %6440 }
 0x202   :  { %vm12159_vm8 = vmmov %vm12148_vm14  ;;  %v12160_v60 = vmov 0  ;;  %vm12163_vm11 = vcmask 261120   ;;  %v12165_v25 = vmov %v12151_v21  ;;  %v6438_v44 = vunpack.i.h.bf16 %v6436_v46 }
 0x203   :  { %v1798_v6 = vsel %vm12158_vm15, %v12157_v39, %v12155_v42  ;;  %6259 = vmatprep.mubr.msk.bf16.mxu1 %vm12159_vm8, %v2955_v29  ;;  %v12161_v60 = vsel %vm8305_vm6, 4294967295, %v12160_v60  ;;  %v2835_v47 = vsel %vm12163_vm11, %v1800_v13, %v6428_v18  ;;  %v12164_v22 = vmov %v12157_v39  ;;  %vm12166_vm14 = vmmov %vm12152_vm7  ;;  %v6451_v29 = vpop.permute.xlu1 %6450 }
 0x204   :  { %12162 = vst [vmem:[#allocation12_spill] sm:$0xff] %v12161_v60  ;;  %v1799_v61 = vsel %vm12166_vm14, %v12165_v25, %v12164_v22  ;;  %v1946_v54 = vsel %vm8305_vm6, %v1801_v27, 0.0  ;;  %vm8318_vm7 = vcmp.ne.s32.totalorder %v283_v59, 0  ;;  %v12167_v38 = vmov 0  ;;  %vm12170_vm10 = vmmov %vm12163_vm11  ;;  %v6870_v27 = vld [vmem:[#allocation2 + $0x80] sm:$0xff] }
 0x205   :  { %v12168_v38 = vsel %vm8318_vm7, 4294967295, %v12167_v38  ;;  %v6437_v2 = vunpack.i.l.bf16 %v6436_v46  ;;  %v161_v32 = vadd.s32 128, %v6996_v10  ;;  %v2834_v45 = vsel %vm12170_vm10, %v1946_v54, %v6427_v24  ;;  %vm12171_vm15 = vmmov %vm12170_vm10 }
 0x206   :  { %12169 = vst [vmem:[#allocation21_spill] sm:$0xff] %v12168_v38  ;;  %v1948_v20 = vsel %vm8318_vm7, %v1799_v61, 0.0  ;;  %v2837_v48 = vsel %vm12171_vm15, %v1798_v6, %v6438_v44  ;;  %v6443_v51 = vunpack.i.h.bf16 %v6441_v56  ;;  %vm12172_vm8 = vmmov %vm12170_vm10  ;;  %v6442_v18 = vunpack.i.l.bf16 %v6441_v56  ;;  %v6446_v6 = vpop.permute.xlu0 %6445 }
 0x207   :  { %v2836_v23 = vsel %vm12172_vm8, %v1948_v20, %v6437_v2  ;;  %v6453_v21 = vunpack.i.h.bf16 %v6451_v29  ;;  %v6452_v13 = vunpack.i.l.bf16 %v6451_v29  ;;  %vm12173_vm11 = vcmask 523264   ;;  %v6456_v61 = vpop.permute.xlu1 %6455 }
 0x208   :  { %v2900_v12 = vsel %vm12173_vm11, %v2835_v47, %v6443_v51  ;;  %v297_v46 = vand.u32 15, %v161_v32  ;;  %v1702_v59 = vrot.slane %v6870_v27, 7  ;;  %v163_v42 = vadd.s32 144, %v6996_v10  ;;  %vm12175_vm10 = vmmov %vm12173_vm11 }
 0x209   :  { %vm12174_vm14 = vcmask 785408   ;;  %v2899_v24 = vsel %vm12175_vm10, %v2834_v45, %v6442_v18  ;;  %vm12176_vm7 = vmmov %vm12175_vm10  ;;  %v12178_v22 = vrot.slane %v7501_v7, 7  ;;  %v12179_v25 = vrot.slane %v7499_v1, 7 }
 0x20a   :  { %6260 = vmatmul.mubr.msk.bf16.gmra.mxu1 %vm12174_vm14, %v2956_v14  ;;  %v2902_v15 = vsel %vm12176_vm7, %v2837_v48, %v6453_v21  ;;  %vm12177_vm15 = vmmov %vm12176_vm7  ;;  %vm12180_vm8 = vcmp.lt.s32.totalorder %v6996_v10, 1  ;;  %v2957_v44 = vpack.c.bf16 %v2900_v12, %v2899_v24  ;;  %vm8340_vm11 = vcmp.ne.s32.totalorder %v297_v46, 0 }
 0x20b   :  { %v2901_v39 = vsel %vm12177_vm15, %v2836_v23, %v6452_v13  ;;  %v1794_v47 = vsel %vm12180_vm8, %v12179_v25, %v12178_v22  ;;  %v12181_v2 = vmov 0  ;;  %v6448_v14 = vunpack.i.h.bf16 %v6446_v6  ;;  %vm12185_vm7 = vmmov %vm12180_vm8 }
 0x20c   :  { %v2958_v54 = vpack.c.bf16 %v2902_v15, %v2901_v39  ;;  %v12182_v2 = vsel %vm8340_vm11, 4294967295, %v12181_v2  ;;  %v6447_v56 = vunpack.i.l.bf16 %v6446_v6  ;;  %v12184_v29 = vrot.slane %v7493_v33, 7  ;;  %vm12187_vm14 = vmmov %vm12185_vm7 }
 0x20d   :  { %12183 = vst [vmem:[#allocation11_spill] sm:$0xff] %v12182_v2  ;;  %v12186_v45 = vrot.slane %v7447_v0, 7  ;;  %v311_v48 = vand.u32 15, %v163_v42  ;;  %vm12188_vm10 = vcmask 261120   ;;  %v12189_v18 = vmov %v12179_v25  ;;  %vm12191_vm15 = vmmov %vm12185_vm7  ;;  %v6471_v42 = vpop.permute.xlu1 %6470 }
 0x20e   :  { %v1796_v32 = vsel %vm12185_vm7, %v1702_v59, %v12184_v29  ;;  %v12190_v21 = vmov %v12184_v29  ;;  %v6458_v12 = vunpack.i.h.bf16 %v6456_v61  ;;  %vm12192_vm8 = vcmask 785408   ;;  %vm12193_vm7 = vmmov %vm12188_vm10 }
 0x20f   :  { %v1797_v20 = vsel %vm12187_vm14, %v12186_v45, %v1702_v59  ;;  %v2839_v23 = vsel %vm12188_vm10, %v1796_v32, %v6448_v14  ;;  %v1795_v13 = vsel %vm12191_vm15, %v12190_v21, %v12189_v18  ;;  %6263 = vmatprep.mubr.msk.bf16.mxu1 %vm12192_vm8, %v2957_v44  ;;  %vm8363_vm6 = vcmp.ne.s32.totalorder %v311_v48, 0  ;;  %v6461_v59 = vpop.permute.xlu0 %6460  ;;  %vm12197_vm14 = vmmov %vm12193_vm7 }
 0x210   :  { %v1950_v51 = vsel %vm8340_vm11, %v1797_v20, 0.0  ;;  %v12194_v46 = vmov 0  ;;  %v6457_v27 = vunpack.i.l.bf16 %v6456_v61  ;;  %v165_v24 = vadd.s32 160, %v6996_v10  ;;  %vm12198_vm10 = vmmov %vm12193_vm7 }
 0x211   :  { %v2838_v0 = vsel %vm12193_vm7, %v1950_v51, %v6447_v56  ;;  %v12195_v46 = vsel %vm8363_vm6, 4294967295, %v12194_v46  ;;  %v1952_v33 = vsel %vm8363_vm6, %v1795_v13, 0.0  ;;  %v2841_v1 = vsel %vm12197_vm14, %v1794_v47, %v6458_v12  ;;  %v6871_v56 = vld [vmem:[#allocation2 + $0xa0] sm:$0xff]  ;;  %v6476_v18 = vpop.permute.xlu1 %6475 }
 0x212   :  { %12196 = vst [vmem:[#allocation18_spill] sm:$0xff] %v12195_v46  ;;  %v6463_v15 = vunpack.i.h.bf16 %v6461_v59  ;;  %v6462_v39 = vunpack.i.l.bf16 %v6461_v59  ;;  %v2840_v6 = vsel %vm12198_vm10, %v1952_v33, %v6457_v27  ;;  %v6473_v22 = vunpack.i.h.bf16 %v6471_v42 }
 0x213   :  { %v6472_v25 = vunpack.i.l.bf16 %v6471_v42  ;;  %v325_v44 = vand.u32 15, %v165_v24  ;;  %vm12199_vm15 = vcmask 523264   ;;  %v1706_v29 = vrot.slane %v6871_v56, 7  ;;  %v6466_v51 = vpop.permute.xlu0 %6465  ;;  %v6872_v56 = vld [vmem:[#allocation2 + $0xc0] sm:$0xff] }
 0x214   :  { %v2903_v14 = vsel %vm12199_vm15, %v2838_v0, %v6462_v39  ;;  %vm12200_vm8 = vmmov %vm12199_vm15  ;;  %v167_v32 = vadd.s32 176, %v6996_v10  ;;  %vm12201_vm7 = vcmask 785408   ;;  %v12204_v48 = vmov 0 }
 0x215   :  { %v2904_v61 = vsel %vm12200_vm8, %v2839_v23, %v6463_v15  ;;  %6264 = vmatmul.mubr.msk.bf16.gmra.mxu1 %vm12201_vm7, %v2958_v54  ;;  %vm12202_vm6 = vmmov %vm12200_vm8  ;;  %vm8378_vm11 = vcmp.ne.s32.totalorder %v325_v44, 0  ;;  %v6468_v13 = vunpack.i.h.bf16 %v6466_v51  ;;  %v6467_v23 = vunpack.i.l.bf16 %v6466_v51 }
 0x216   :  { %v2959_v45 = vpack.c.bf16 %v2904_v61, %v2903_v14  ;;  %v2906_v47 = vsel %vm12202_vm6, %v2841_v1, %v6473_v22  ;;  %vm12203_vm14 = vmmov %vm12202_vm6  ;;  %v12205_v48 = vsel %vm8378_vm11, 4294967295, %v12204_v48  ;;  %v12207_v12 = vrot.slane %v7538_v36, 7  ;;  %v6491_v36 = vpop.permute.xlu1 %6490 }
 0x217   :  { %v2905_v20 = vsel %vm12203_vm14, %v2840_v6, %v6472_v25  ;;  %12206 = vst [vmem:[#allocation20_spill] sm:$0xff] %v12205_v48  ;;  %vm12208_vm10 = vcmp.lt.s32.totalorder %v6996_v10, 1  ;;  %v12209_v54 = vrot.slane %v7501_v7, 7  ;;  %v339_v59 = vand.u32 15, %v167_v32 }
 0x218   :  { %v2960_v21 = vpack.c.bf16 %v2906_v47, %v2905_v20  ;;  %v1792_v0 = vsel %vm12208_vm10, %v1706_v29, %v12207_v12  ;;  %vm12210_vm6 = vmmov %vm12208_vm10  ;;  %v12211_v42 = vrot.slane %v7565_v58, 7  ;;  %v12212_v24 = vrot.slane %v7562_v63, 7  ;;  %6267 = vmatprep.mubr.msk.bf16.mxu1 %vm12201_vm7, %v2959_v45  ;;  %v6481_v63 = vpop.permute.xlu0 %6480 }
 0x219   :  { %v1793_v27 = vsel %vm12210_vm6, %v12209_v54, %v1706_v29  ;;  %vm12213_vm15 = vmmov %vm12210_vm6  ;;  %v12215_v15 = vmov %v12207_v12  ;;  %vm12217_vm14 = vcmask 261120   ;;  %v6478_v22 = vunpack.i.h.bf16 %v6476_v18 }
 0x21a   :  { %v1790_v33 = vsel %vm12213_vm15, %v12212_v24, %v12211_v42  ;;  %v12214_v1 = vmov %v12212_v24  ;;  %vm12216_vm8 = vmmov %vm12210_vm6  ;;  %v1954_v7 = vsel %vm8378_vm11, %v1793_v27, 0.0  ;;  %v2843_v6 = vsel %vm12217_vm14, %v1792_v0, %v6468_v13 }
 0x21b   :  { %v1791_v39 = vsel %vm12216_vm8, %v12215_v15, %v12214_v1  ;;  %v6477_v25 = vunpack.i.l.bf16 %v6476_v18  ;;  %vm12218_vm10 = vmmov %vm12217_vm14  ;;  %vm8407_vm6 = vcmp.ne.s32.totalorder %v339_v59, 0  ;;  %v12219_v14 = vmov 0 }
 0x21c   :  { %v2842_v44 = vsel %vm12218_vm10, %v1954_v7, %v6467_v23  ;;  %v12220_v14 = vsel %vm8407_vm6, 4294967295, %v12219_v14  ;;  %v169_v61 = vadd.s32 192, %v6996_v10  ;;  %v1710_v29 = vrot.slane %v6872_v56, 7  ;;  %vm12222_vm15 = vmmov %vm12218_vm10  ;;  %v6496_v7 = vpop.permute.xlu1 %6495 }
 0x21d   :  { %12221 = vst [vmem:[#allocation24_spill] sm:$0xff] %v12220_v14  ;;  %v1956_v32 = vsel %vm8407_vm6, %v1791_v39, 0.0  ;;  %v2845_v45 = vsel %vm12222_vm15, %v1790_v33, %v6478_v22  ;;  %v6483_v47 = vunpack.i.h.bf16 %v6481_v63  ;;  %v6482_v20 = vunpack.i.l.bf16 %v6481_v63  ;;  %vm12223_vm8 = vmmov %vm12218_vm10  ;;  %v6486_v39 = vpop.permute.xlu0 %6485  ;;  %v12237_v63 = vld [vmem:[#allocation31_spill] sm:$0xff] }
 0x21e   :  { %v2844_v51 = vsel %vm12223_vm8, %v1956_v32, %v6477_v25  ;;  %v6493_v18 = vunpack.i.h.bf16 %v6491_v36  ;;  %v6492_v13 = vunpack.i.l.bf16 %v6491_v36  ;;  %v353_v23 = vand.u32 15, %v169_v61 }
 0x21f   :  { %vm12224_vm7 = vcmask 523264   ;;  %v12226_v54 = vrot.slane %v7625_v5, 7  ;;  %vm12227_vm10 = vcmp.lt.s32.totalorder %v6996_v10, 1  ;;  %v12228_v59 = vmov %v12211_v42 }
 0x220   :  { %v2907_v12 = vsel %vm12224_vm7, %v2842_v44, %v6482_v20  ;;  %vm12225_vm14 = vmmov %vm12224_vm7  ;;  %vm12230_vm11 = vcmask 785408   ;;  %v12233_v15 = vmov 0  ;;  %v6488_v22 = vunpack.i.h.bf16 %v6486_v39 }
 0x221   :  { %v2908_v0 = vsel %vm12225_vm14, %v2843_v6, %v6483_v47  ;;  %v1788_v27 = vsel %vm12227_vm10, %v1710_v29, %v12226_v54  ;;  %vm12229_vm15 = vmmov %vm12227_vm10  ;;  %6268 = vmatmul.mubr.msk.bf16.gmra.mxu1 %vm12230_vm11, %v2960_v21  ;;  %v6487_v25 = vunpack.i.l.bf16 %v6486_v39  ;;  %v171_v44 = vadd.s32 208, %v6996_v10 }
 0x222   :  { %v1789_v42 = vsel %vm12229_vm15, %v12228_v59, %v1710_v29  ;;  %v2961_v24 = vpack.c.bf16 %v2908_v0, %v2907_v12  ;;  %vm12231_vm8 = vmmov %vm12224_vm7  ;;  %v12236_v21 = vrot.slane %v7636_v34, 7  ;;  %v12238_v36 = vrot.slane %v12237_v63, 7  ;;  %v6501_v12 = vpop.permute.xlu0 %6500  ;;  %v6873_v0 = vld [vmem:[#allocation2 + $0xe0] sm:$0xff] }
 0x223   :  { %v2910_v33 = vsel %vm12231_vm8, %v2845_v45, %v6493_v18  ;;  %vm12232_vm6 = vmmov %vm12224_vm7  ;;  %vm8429_vm7 = vcmp.ne.s32.totalorder %v353_v23, 0  ;;  %v12241_v29 = vmov %v12226_v54  ;;  %v6498_v45 = vunpack.i.h.bf16 %v6496_v7 }
 0x224   :  { %v2909_v1 = vsel %vm12232_vm6, %v2844_v51, %v6492_v13  ;;  %v12234_v15 = vsel %vm8429_vm7, 4294967295, %v12233_v15  ;;  %v1958_v58 = vsel %vm8429_vm7, %v1789_v42, 0.0  ;;  %vm12239_vm11 = vmmov %vm12227_vm10  ;;  %v12240_v56 = vmov %v12238_v36 }
 0x225   :  { %12235 = vst [vmem:[#allocation51_spill] sm:$0xff] %v12234_v15  ;;  %v2962_v6 = vpack.c.bf16 %v2910_v33, %v2909_v1  ;;  %v1786_v61 = vsel %vm12239_vm11, %v12238_v36, %v12236_v21  ;;  %vm12242_vm6 = vmmov %vm12227_vm10  ;;  %vm12243_vm14 = vcmask 785408   ;;  %vm12244_vm10 = vcmask 261120  }
 0x226   :  { %v1787_v32 = vsel %vm12242_vm6, %v12241_v29, %v12240_v56  ;;  %6271 = vmatprep.mubr.msk.bf16.mxu1 %vm12243_vm14, %v2961_v24  ;;  %v2846_v47 = vsel %vm12244_vm10, %v1958_v58, %v6487_v25  ;;  %vm12245_vm15 = vmmov %vm12244_vm10  ;;  %v6497_v51 = vunpack.i.l.bf16 %v6496_v7  ;;  %v173_v18 = vadd.s32 224, %v6996_v10  ;;  %v6511_v7 = vpop.permute.xlu1 %6510 }
 0x227   :  { %v2847_v20 = vsel %vm12245_vm15, %v1788_v27, %v6488_v22  ;;  %v367_v13 = vand.u32 15, %v171_v44  ;;  %vm12246_vm8 = vmmov %vm12244_vm10  ;;  %v1714_v54 = vrot.slane %v6873_v0, 7  ;;  %v175_v5 = vadd.s32 240, %v6996_v10  ;;  %v12253_v22 = vld [vmem:[#allocation34_spill] sm:$0xff] }
 0x228   :  { %v2849_v23 = vsel %vm12246_vm8, %v1786_v61, %v6498_v45  ;;  %v6503_v59 = vunpack.i.h.bf16 %v6501_v12  ;;  %v6502_v42 = vunpack.i.l.bf16 %v6501_v12  ;;  %v381_v33 = vand.u32 15, %v173_v18  ;;  %vm12249_vm11 = vmmov %vm12242_vm6  ;;  %v6506_v12 = vpop.permute.xlu0 %6505 }
 0x229   :  { %v12247_v24 = vrot.slane %v7684_v62, 7  ;;  %v12248_v1 = vrot.slane %v7682_v57, 7  ;;  %vm8460_vm6 = vcmp.ne.s32.totalorder %v367_v13, 0  ;;  %v12250_v39 = vmov 0  ;;  %vm12255_vm14 = vmmov %vm12249_vm11 }
 0x22a   :  { %v12251_v39 = vsel %vm8460_vm6, 4294967295, %v12250_v39  ;;  %v12254_v25 = vrot.slane %v12253_v22, 7  ;;  %v12256_v44 = vmov %v12236_v21  ;;  %vm12257_vm10 = vmmov %vm12249_vm11  ;;  %v395_v63 = vand.u32 15, %v175_v5 }
 0x22b   :  { %v1782_v27 = vsel %vm12249_vm11, %v12248_v1, %v12247_v24  ;;  %12252 = vst [vmem:[#allocation31_spill] sm:$0xff] %v12251_v39  ;;  %v1785_v21 = vsel %vm12257_vm10, %v12256_v44, %v1714_v54  ;;  %v1960_v36 = vsel %vm8460_vm6, %v1787_v32, 0.0  ;;  %vm12258_vm15 = vcmask 523264  }
 0x22c   :  { %v1784_v58 = vsel %vm12255_vm14, %v1714_v54, %v12254_v25  ;;  %v2911_v61 = vsel %vm12258_vm15, %v2846_v47, %v6502_v42  ;;  %vm12259_vm8 = vmmov %vm12258_vm15  ;;  %v6513_v29 = vunpack.i.h.bf16 %v6511_v7  ;;  %vm12260_vm11 = vcmask 261120   ;;  %v6516_v42 = vpop.permute.xlu1 %6515  ;;  %v6521_v44 = vpop.permute.xlu0 %6520 }
 0x22d   :  { %v2912_v56 = vsel %vm12259_vm8, %v2847_v20, %v6503_v59  ;;  %v2848_v45 = vsel %vm12260_vm11, %v1960_v36, %v6497_v51  ;;  %vm12261_vm7 = vcmask 785408   ;;  %v6512_v13 = vunpack.i.l.bf16 %v6511_v7  ;;  %vm12265_vm10 = vmmov %vm12259_vm8 }
 0x22e   :  { %6272 = vmatmul.mubr.msk.bf16.gmra.mxu1 %vm12261_vm7, %v2962_v6  ;;  %v2963_v18 = vpack.c.bf16 %v2912_v56, %v2911_v61  ;;  %vm8478_vm14 = vcmp.ne.s32.totalorder %v381_v33, 0  ;;  %v12262_v34 = vmov 0  ;;  %v2914_v0 = vsel %vm12265_vm10, %v2849_v23, %v6513_v29  ;;  %vm12266_vm15 = vmmov %vm12259_vm8 }
 0x22f   :  { %v12263_v34 = vsel %vm8478_vm14, 4294967295, %v12262_v34  ;;  %v6508_v54 = vunpack.i.h.bf16 %v6506_v12  ;;  %v6507_v32 = vunpack.i.l.bf16 %v6506_v12  ;;  %v1962_v47 = vsel %vm8478_vm14, %v1785_v21, 0.0  ;;  %v6874_v21 = vld [vmem:[#allocation2 + $0x100] sm:$0xff] }
 0x230   :  { %12264 = vst [vmem:[#allocation34_spill] sm:$0xff] %v12263_v34  ;;  %v2913_v20 = vsel %vm12266_vm15, %v2848_v45, %v6512_v13  ;;  %vm8486_vm8 = vcmp.ne.s32.totalorder %v395_v63, 0  ;;  %v12267_v51 = vmov 0  ;;  %v12270_v6 = vmov %v12248_v1  ;;  %v6531_v12 = vpop.permute.xlu1 %6530 }
 0x231   :  { %v12268_v51 = vsel %vm8486_vm8, 4294967295, %v12267_v51  ;;  %v12271_v5 = vmov %v12254_v25  ;;  %vm12272_vm7 = vcmp.lt.s32.totalorder %v6996_v10, 1  ;;  %vm12273_vm11 = vcmask 785408  }
 0x232   :  { %12269 = vst [vmem:[#allocation52_spill] sm:$0xff] %v12268_v51  ;;  %v1783_v59 = vsel %vm12272_vm7, %v12271_v5, %v12270_v6  ;;  %6275 = vmatprep.mubr.msk.bf16.mxu1 %vm12273_vm11, %v2963_v18  ;;  %v177_v23 = vadd.s32 256, %v6996_v10  ;;  %v2964_v33 = vpack.c.bf16 %v2914_v0, %v2913_v20  ;;  %vm12274_vm10 = vcmask 261120   ;;  %vm12283_vm14 = vmmov %vm12272_vm7 }
 0x233   :  { %v2850_v24 = vsel %vm12274_vm10, %v1962_v47, %v6507_v32  ;;  %vm12275_vm15 = vmmov %vm12274_vm10  ;;  %v1964_v7 = vsel %vm8486_vm8, %v1783_v59, 0.0  ;;  %v6518_v25 = vunpack.i.h.bf16 %v6516_v42  ;;  %v6517_v57 = vunpack.i.l.bf16 %v6516_v42  ;;  %v6526_v59 = vpop.permute.xlu0 %6525 }
 0x234   :  { %v2851_v1 = vsel %vm12275_vm15, %v1784_v58, %v6508_v54  ;;  %v409_v22 = vand.u32 15, %v177_v23  ;;  %v1718_v63 = vrot.slane %v6874_v21, 7  ;;  %v6523_v36 = vunpack.i.h.bf16 %v6521_v44  ;;  %vm12278_vm11 = vmmov %vm12274_vm10 }
 0x235   :  { %v6522_v61 = vunpack.i.l.bf16 %v6521_v44  ;;  %v179_v56 = vadd.s32 272, %v6996_v10  ;;  %v12276_v29 = vrot.slane %v7756_v8, 7  ;;  %v12277_v45 = vrot.slane %v7754_v9, 7  ;;  %v6536_v9 = vpop.permute.xlu1 %6535 }
 0x236   :  { %v2853_v18 = vsel %vm12278_vm11, %v1782_v27, %v6518_v25  ;;  %v2852_v13 = vsel %vm12274_vm10, %v1964_v7, %v6517_v57  ;;  %vm8511_vm15 = vcmp.ne.s32.totalorder %v409_v22, 0  ;;  %v12279_v0 = vmov 0  ;;  %vm12288_vm11 = vmmov %vm12283_vm14 }
 0x237   :  { %v1778_v58 = vsel %vm12272_vm7, %v12277_v45, %v12276_v29  ;;  %v12280_v0 = vsel %vm8511_vm15, 4294967295, %v12279_v0  ;;  %v12282_v54 = vrot.slane %v7744_v26, 7  ;;  %vm12284_vm8 = vcmask 523264  }
 0x238   :  { %12281 = vst [vmem:[#allocation53_spill] sm:$0xff] %v12280_v0  ;;  %v2915_v47 = vsel %vm12284_vm8, %v2850_v24, %v6522_v61  ;;  %vm12285_vm6 = vmmov %vm12284_vm8  ;;  %v6533_v6 = vunpack.i.h.bf16 %v6531_v12  ;;  %v6532_v5 = vunpack.i.l.bf16 %v6531_v12  ;;  %vm12286_vm7 = vcmask 785408   ;;  %v6875_v12 = vld [vmem:[#allocation2 + $0x120] sm:$0xff] }
 0x239   :  { %v1780_v32 = vsel %vm12283_vm14, %v1718_v63, %v12282_v54  ;;  %v2916_v20 = vsel %vm12285_vm6, %v2851_v1, %v6523_v36  ;;  %6276 = vmatmul.mubr.msk.bf16.gmra.mxu1 %vm12286_vm7, %v2964_v33  ;;  %v12287_v42 = vrot.slane %v7684_v62, 7  ;;  %v423_v7 = vand.u32 15, %v179_v56  ;;  %vm12291_vm14 = vmmov %vm12288_vm11 }
 0x23a   :  { %v2965_v27 = vpack.c.bf16 %v2916_v20, %v2915_v47  ;;  %v12289_v25 = vmov %v12277_v45  ;;  %v12290_v57 = vmov %v12282_v54  ;;  %v2918_v1 = vsel %vm12285_vm6, %v2853_v18, %v6533_v6  ;;  %vm12292_vm8 = vmmov %vm12285_vm6  ;;  %v6541_v18 = vpop.permute.xlu0 %6540 }
 0x23b   :  { %v1781_v23 = vsel %vm12288_vm11, %v12287_v42, %v1718_v63  ;;  %v1779_v24 = vsel %vm12291_vm14, %v12290_v57, %v12289_v25  ;;  %v2917_v44 = vsel %vm12292_vm8, %v2852_v13, %v6532_v5  ;;  %v6528_v33 = vunpack.i.h.bf16 %v6526_v59 }
 0x23c   :  { %v6527_v22 = vunpack.i.l.bf16 %v6526_v59  ;;  %v2966_v21 = vpack.c.bf16 %v2918_v1, %v2917_v44  ;;  %v1966_v62 = vsel %vm8511_vm15, %v1781_v23, 0.0  ;;  %vm8536_vm10 = vcmp.ne.s32.totalorder %v423_v7, 0  ;;  %6279 = vmatprep.mubr.msk.bf16.mxu1 %vm12286_vm7, %v2965_v27  ;;  %v6551_v7 = vpop.permute.xlu1 %6550 }
 0x23d   :  { %v12293_v63 = vmov 0  ;;  %v181_v26 = vadd.s32 288, %v6996_v10  ;;  %v1731_v36 = vrot.slane %v7925_v16, 7  ;;  %vm12296_vm11 = vcmask 261120  }
 0x23e   :  { %v12294_v63 = vsel %vm8536_vm10, 4294967295, %v12293_v63  ;;  %v2854_v61 = vsel %vm12296_vm11, %v1966_v62, %v6527_v22  ;;  %vm12297_vm14 = vmmov %vm12296_vm11  ;;  %v6538_v29 = vunpack.i.h.bf16 %v6536_v9  ;;  %v6537_v45 = vunpack.i.l.bf16 %v6536_v9  ;;  %v6546_v62 = vpop.permute.xlu0 %6545 }
 0x23f   :  { %12295 = vst [vmem:[#allocation54_spill] sm:$0xff] %v12294_v63  ;;  %v2855_v56 = vsel %vm12297_vm14, %v1780_v32, %v6528_v33  ;;  %v437_v13 = vand.u32 15, %v181_v26  ;;  %v1722_v54 = vrot.slane %v6875_v12, 7  ;;  %v183_v47 = vadd.s32 304, %v6996_v10  ;;  %vm12301_vm8 = vmmov %vm12296_vm11 }
 0x240   :  { %v1968_v20 = vsel %vm8536_vm10, %v1779_v24, 0.0  ;;  %v6543_v6 = vunpack.i.h.bf16 %v6541_v18  ;;  %v6542_v5 = vunpack.i.l.bf16 %v6541_v18  ;;  %v12298_v27 = vrot.slane %v7822_v31, 7  ;;  %vm12302_vm7 = vmmov %vm12301_vm8 }
 0x241   :  { %v12299_v59 = vrot.slane %v7812_v3, 7  ;;  %vm12300_vm6 = vcmp.lt.s32.totalorder %v6996_v10, 1  ;;  %v2857_v42 = vsel %vm12301_vm8, %v1778_v58, %v6538_v29  ;;  %v2856_v23 = vsel %vm12302_vm7, %v1968_v20, %v6537_v45  ;;  %v6556_v20 = vpop.permute.xlu1 %6555 }
 0x242   :  { %vm8556_vm11 = vcmp.ne.s32.totalorder %v437_v13, 0  ;;  %v12303_v25 = vmov 0  ;;  %v12306_v57 = vrot.slane %v7756_v8, 7  ;;  %vm12307_vm14 = vmmov %vm12300_vm6  ;;  %vm12308_vm10 = vcmask 523264  }
 0x243   :  { %v1774_v32 = vsel %vm12300_vm6, %v12299_v59, %v12298_v27  ;;  %v12304_v25 = vsel %vm8556_vm11, 4294967295, %v12303_v25  ;;  %v2919_v1 = vsel %vm12308_vm10, %v2854_v61, %v6542_v5  ;;  %vm12309_vm15 = vmmov %vm12308_vm10  ;;  %v6553_v33 = vunpack.i.h.bf16 %v6551_v7  ;;  %v6877_v5 = vld [vmem:[#allocation2 + $0x170] sm:$0xff] }
 0x244   :  { %12305 = vst [vmem:[#allocation55_spill] sm:$0xff] %v12304_v25  ;;  %v1777_v24 = vsel %vm12307_vm14, %v12306_v57, %v1722_v54  ;;  %v2920_v44 = vsel %vm12309_vm15, %v2855_v56, %v6543_v6  ;;  %v6552_v22 = vunpack.i.l.bf16 %v6551_v7  ;;  %vm12310_vm6 = vcmask 785408   ;;  %vm12313_vm8 = vmmov %vm12307_vm14 }
 0x245   :  { %6280 = vmatmul.mubr.msk.bf16.gmra.mxu1 %vm12310_vm6, %v2966_v21  ;;  %v2967_v58 = vpack.c.bf16 %v2920_v44, %v2919_v1  ;;  %v1970_v9 = vsel %vm8556_vm11, %v1777_v24, 0.0  ;;  %v451_v26 = vand.u32 15, %v183_v47  ;;  %v12311_v29 = vmov %v12299_v59  ;;  %vm12314_vm15 = vmmov %vm12308_vm10  ;;  %v6876_v47 = vld [vmem:[#allocation2 + $0x140] sm:$0xff]  ;;  %v6561_v44 = vpop.permute.xlu0 %6560 }
 0x246   :  { %v12312_v8 = vrot.slane %v7810_v17, 7  ;;  %v2922_v61 = vsel %vm12308_vm10, %v2857_v42, %v6553_v33  ;;  %v2921_v56 = vsel %vm12314_vm15, %v2856_v23, %v6552_v22  ;;  %v6548_v18 = vunpack.i.h.bf16 %v6546_v62  ;;  %vm12318_vm14 = vmmov %vm12310_vm6 }
 0x247   :  { %v6547_v13 = vunpack.i.l.bf16 %v6546_v62  ;;  %v2968_v21 = vpack.c.bf16 %v2922_v61, %v2921_v56  ;;  %vm8577_vm7 = vcmp.ne.s32.totalorder %v451_v26, 0  ;;  %v12315_v12 = vmov 0  ;;  %6283 = vmatprep.mubr.msk.bf16.mxu1 %vm12318_vm14, %v2967_v58  ;;  %vm12320_vm6 = vmmov %vm12313_vm8 }
 0x248   :  { %v1775_v45 = vsel %vm12313_vm8, %v12312_v8, %v12311_v29  ;;  %v12316_v12 = vsel %vm8577_vm7, 4294967295, %v12315_v12  ;;  %v185_v3 = vadd.s32 320, %v6996_v10  ;;  %v1726_v6 = vrot.slane %v6876_v47, 7  ;;  %vm12324_vm15 = vmmov %vm12320_vm6  ;;  %v6571_v29 = vpop.permute.xlu1 %6570 }
 0x249   :  { %12317 = vst [vmem:[#allocation56_spill] sm:$0xff] %v12316_v12  ;;  %v1732_v27 = vrot.slane %v6877_v5, 7  ;;  %v12319_v59 = vmov %v12312_v8  ;;  %vm12321_vm8 = vcmask 261120   ;;  %v6558_v7 = vunpack.i.h.bf16 %v6556_v20 }
 0x24a   :  { %v1776_v42 = vsel %vm12320_vm6, %v1722_v54, %v12319_v59  ;;  %v2858_v23 = vsel %vm12321_vm8, %v1970_v9, %v6547_v13  ;;  %vm12322_vm10 = vmmov %vm12321_vm8  ;;  %v1972_v24 = vsel %vm8577_vm7, %v1775_v45, 0.0  ;;  %v6557_v1 = vunpack.i.l.bf16 %v6556_v20  ;;  %v6566_v59 = vpop.permute.xlu0 %6565 }
 0x24b   :  { %v2859_v57 = vsel %vm12322_vm10, %v1776_v42, %v6548_v18  ;;  %v465_v33 = vand.u32 15, %v185_v3  ;;  %v6563_v22 = vunpack.i.h.bf16 %v6561_v44  ;;  %v6562_v58 = vunpack.i.l.bf16 %v6561_v44  ;;  %vm12325_vm14 = vmmov %vm12321_vm8 }
 0x24c   :  { %v12323_v62 = vrot.slane %v7822_v31, 7  ;;  %v187_v54 = vadd.s32 336, %v6996_v10  ;;  %v2861_v9 = vsel %vm12325_vm14, %v1774_v32, %v6558_v7  ;;  %vm12326_vm6 = vmmov %vm12321_vm8  ;;  %v12327_v8 = vrot.slane %v7881_v40, 7 }
 0x24d   :  { %v2860_v26 = vsel %vm12326_vm6, %v1972_v24, %v6557_v1  ;;  %v12328_v45 = vrot.slane %v7879_v19, 7  ;;  %vm12329_vm8 = vmmov %vm12324_vm15  ;;  %v12331_v31 = vrot.slane %v7866_v52, 7  ;;  %v6573_v20 = vunpack.i.h.bf16 %v6571_v29 }
 0x24e   :  { %v1773_v17 = vsel %vm12324_vm15, %v12323_v62, %v1726_v6  ;;  %vm12332_vm10 = vmmov %vm12329_vm8  ;;  %vm12333_vm15 = vcmask 523264   ;;  %v6572_v3 = vunpack.i.l.bf16 %v6571_v29  ;;  %vm12335_vm6 = vcmask 785408   ;;  %v8625_v62 = vld [vmem:[#allocation2 + $0x178] sm:$0xff] }
 0x24f   :  { %v1770_v61 = vsel %vm12329_vm8, %v12328_v45, %v12327_v8  ;;  %v12330_v56 = vmov %v12328_v45  ;;  %v2923_v13 = vsel %vm12333_vm15, %v2858_v23, %v6562_v58  ;;  %vm12334_vm14 = vmmov %vm12333_vm15  ;;  %6284 = vmatmul.mubr.msk.bf16.gmra.mxu1 %vm12335_vm6, %v2968_v21  ;;  %vm8613_vm7 = vcmp.ne.s32.totalorder %v465_v33, 0  ;;  %v6576_v21 = vpop.permute.xlu1 %6575 }
 0x250   :  { %v1771_v18 = vsel %vm12332_vm10, %v12331_v31, %v12330_v56  ;;  %v2924_v32 = vsel %vm12334_vm14, %v2859_v57, %v6563_v22  ;;  %v12336_v5 = vmov 0  ;;  %v479_v19 = vand.u32 15, %v187_v54  ;;  %vm12339_vm8 = vmmov %vm12334_vm14  ;;  %v6878_v22 = vld [vmem:[#allocation2 + $0x160] sm:$0xff] }
 0x251   :  { %v2969_v47 = vpack.c.bf16 %v2924_v32, %v2923_v13  ;;  %v12337_v5 = vsel %vm8613_vm7, 4294967295, %v12336_v5  ;;  %v189_v42 = vadd.s32 352, %v6996_v10  ;;  %v2926_v7 = vsel %vm12339_vm8, %v2861_v9, %v6573_v20  ;;  %vm12340_vm10 = vmmov %vm12339_vm8  ;;  %v6581_v32 = vpop.permute.xlu0 %6580 }
 0x252   :  { %12338 = vst [vmem:[#allocation57_spill] sm:$0xff] %v12337_v5  ;;  %v2925_v24 = vsel %vm12340_vm10, %v2860_v26, %v6572_v3  ;;  %v6568_v23 = vunpack.i.h.bf16 %v6566_v59  ;;  %v6567_v1 = vunpack.i.l.bf16 %v6566_v59  ;;  %vm8620_vm15 = vcmp.ne.s32.totalorder %v479_v19, 0  ;;  %vm12344_vm14 = vmmov %vm12335_vm6 }
 0x253   :  { %v2970_v57 = vpack.c.bf16 %v2926_v7, %v2925_v24  ;;  %v12341_v44 = vmov 0  ;;  %6287 = vmatprep.mubr.msk.bf16.mxu1 %vm12344_vm14, %v2969_v47  ;;  %v493_v33 = vand.u32 15, %v189_v42  ;;  %v1730_v58 = vrot.slane %v6878_v22, 7  ;;  %v6591_v59 = vpop.permute.xlu1 %6590 }
 0x254   :  { %v12342_v44 = vsel %vm8620_vm15, 4294967295, %v12341_v44  ;;  %v1733_v54 = vrot.slane %v8625_v62, 7  ;;  %v12345_v9 = vmov %v12331_v31  ;;  %vm12346_vm6 = vcmp.lt.s32.totalorder %v6996_v10, 1 }
 0x255   :  { %12343 = vst [vmem:[#allocation58_spill] sm:$0xff] %v12342_v44  ;;  %v1772_v26 = vsel %vm12346_vm6, %v1726_v6, %v12345_v9  ;;  %v1974_v29 = vsel %vm8613_vm7, %v1773_v17, 0.0  ;;  %v6578_v8 = vunpack.i.h.bf16 %v6576_v21  ;;  %vm12347_vm8 = vcmask 261120  }
 0x256   :  { %v2862_v45 = vsel %vm12347_vm8, %v1974_v29, %v6567_v1  ;;  %vm12348_vm10 = vmmov %vm12347_vm8  ;;  %v1976_v31 = vsel %vm8620_vm15, %v1771_v18, 0.0  ;;  %v6577_v13 = vunpack.i.l.bf16 %v6576_v21  ;;  %v6583_v20 = vunpack.i.h.bf16 %v6581_v32  ;;  %v6586_v21 = vpop.permute.xlu0 %6585 }
 0x257   :  { %v2863_v56 = vsel %vm12348_vm10, %v1772_v26, %v6568_v23  ;;  %v6582_v3 = vunpack.i.l.bf16 %v6581_v32  ;;  %vm8638_vm14 = vcmp.ne.s32.totalorder %v493_v33, 0  ;;  %v12349_v52 = vmov 0  ;;  %vm12353_vm7 = vmmov %vm12347_vm8 }
 0x258   :  { %v12350_v52 = vsel %vm8638_vm14, 4294967295, %v12349_v52  ;;  %v12352_v6 = vrot.slane %v7881_v40, 7  ;;  %v2865_v47 = vsel %vm12353_vm7, %v1770_v61, %v6578_v8  ;;  %v191_v19 = vadd.s32 368, %v6996_v10  ;;  %vm12354_vm8 = vmmov %vm12346_vm6  ;;  %v6880_v8 = vld [vmem:[#allocation2 + $0x188] sm:$0xff] }
 0x259   :  { %12351 = vst [vmem:[#allocation59_spill] sm:$0xff] %v12350_v52  ;;  %v1766_v18 = vsel %vm12354_vm8, %v1732_v27, %v1733_v54  ;;  %vm12355_vm10 = vmmov %vm12346_vm6  ;;  %vm12356_vm15 = vcmask 523264   ;;  %v6593_v24 = vunpack.i.h.bf16 %v6591_v59  ;;  %v6592_v23 = vunpack.i.l.bf16 %v6591_v59  ;;  %v6883_v59 = vld [vmem:[#allocation2 + $0x180] sm:$0xff] }
 0x25a   :  { %v1769_v17 = vsel %vm12346_vm6, %v12352_v6, %v1730_v58  ;;  %v1767_v42 = vsel %vm12355_vm10, %v1731_v36, %v1732_v27  ;;  %v2927_v40 = vsel %vm12356_vm15, %v2862_v45, %v6582_v3  ;;  %vm12357_vm11 = vmmov %vm12356_vm15  ;;  %v2864_v61 = vsel %vm12353_vm7, %v1976_v31, %v6577_v13  ;;  %v6882_v31 = vld [vmem:[#allocation2 + $0x190] sm:$0xff] }
 0x25b   :  { %v2928_v7 = vsel %vm12357_vm11, %v2863_v56, %v6583_v20  ;;  %vm12358_vm6 = vcmask 785408   ;;  %v507_v33 = vand.u32 15, %v191_v19  ;;  %v193_v22 = vadd.s32 384, %v6996_v10  ;;  %vm12359_vm8 = vmmov %vm12357_vm11  ;;  %v8663_v56 = vld [vmem:[#allocation2 + $0x198] sm:$0xff]  ;;  %v6596_v20 = vpop.permute.xlu1 %6595 }
 0x25c   :  { %6288 = vmatmul.mubr.msk.bf16.gmra.mxu1 %vm12358_vm6, %v2970_v57  ;;  %v2971_v1 = vpack.c.bf16 %v2928_v7, %v2927_v40  ;;  %v2930_v9 = vsel %vm12359_vm8, %v2865_v47, %v6593_v24  ;;  %vm12360_vm2 = vmmov %vm12359_vm8  ;;  %v6588_v27 = vunpack.i.h.bf16 %v6586_v21  ;;  %v6587_v29 = vunpack.i.l.bf16 %v6586_v21  ;;  %v6601_v24 = vpop.permute.xlu0 %6600 }
 0x25d   :  { %v2929_v26 = vsel %vm12360_vm2, %v2864_v61, %v6592_v23  ;;  %v1735_v45 = vrot.slane %v6880_v8, 7  ;;  %v11770_v32 = vrot.slane %v8663_v56, 7  ;;  %v1736_v13 = vrot.slane %v6882_v31, 7  ;;  %vm12361_vm11 = vmmov %vm12358_vm6  ;;  %v6884_v31 = vld [vmem:[#allocation2 + $0x1b0] sm:$0xff] }
 0x25e   :  { %v2972_v57 = vpack.c.bf16 %v2930_v9, %v2929_v26  ;;  %6291 = vmatprep.mubr.msk.bf16.mxu1 %vm12361_vm11, %v2971_v1  ;;  %vm12362_vm15 = vmmov %vm12355_vm10  ;;  %v1978_v6 = vsel %vm8638_vm14, %v1769_v17, 0.0  ;;  %vm8673_vm2 = vcmp.ne.s32.totalorder %v507_v33, 0  ;;  %v12363_v47 = vmov 0 }
 0x25f   :  { %v1768_v3 = vsel %vm12362_vm15, %v1730_v58, %v1731_v36  ;;  %v12364_v47 = vsel %vm8673_vm2, 4294967295, %v12363_v47  ;;  %v1734_v19 = vrot.slane %v6883_v59, 7  ;;  %v6598_v40 = vunpack.i.h.bf16 %v6596_v20  ;;  %vm12366_vm10 = vmmov %vm12353_vm7  ;;  %v6611_v21 = vpop.permute.xlu1 %6610 }
 0x260   :  { %12365 = vst [vmem:[#allocation60_spill] sm:$0xff] %v12364_v47  ;;  %v6597_v7 = vunpack.i.l.bf16 %v6596_v20  ;;  %v521_v23 = vand.u32 15, %v193_v22  ;;  %v195_v61 = vadd.s32 400, %v6996_v10  ;;  %v2866_v16 = vsel %vm12366_vm10, %v1978_v6, %v6587_v29  ;;  %vm12367_vm6 = vmmov %vm12362_vm15  ;;  %v6606_v59 = vpop.permute.xlu0 %6605 }
 0x261   :  { %v2867_v1 = vsel %vm12353_vm7, %v1768_v3, %v6588_v27  ;;  %v6603_v36 = vunpack.i.h.bf16 %v6601_v24  ;;  %v6602_v58 = vunpack.i.l.bf16 %v6601_v24  ;;  %v1980_v17 = vsel %vm8673_vm2, %v1767_v42, 0.0  ;;  %vm12368_vm8 = vmmov %vm12367_vm6  ;;  %v8693_v24 = vld [vmem:[#allocation2 + $0x1a8] sm:$0xff] }
 0x262   :  { %v535_v33 = vand.u32 15, %v195_v61  ;;  %v1762_v9 = vsel %vm12367_vm6, %v1736_v13, %v11770_v32  ;;  %v1763_v22 = vsel %vm12368_vm8, %v1735_v45, %v1736_v13  ;;  %vm12369_vm11 = vcmask 523264   ;;  %vm12371_vm10 = vmmov %vm12353_vm7  ;;  %v8696_v61 = vld [vmem:[#allocation2 + $0x1b8] sm:$0xff] }
 0x263   :  { %v2931_v26 = vsel %vm12369_vm11, %v2866_v16, %v6602_v58  ;;  %vm12370_vm15 = vmmov %vm12369_vm11  ;;  %v6613_v27 = vunpack.i.h.bf16 %v6611_v21  ;;  %v6612_v8 = vunpack.i.l.bf16 %v6611_v21  ;;  %v1740_v20 = vrot.slane %v6884_v31, 7  ;;  %v6887_v31 = vld [vmem:[#allocation2 + $0x1a0] sm:$0xff] }
 0x264   :  { %v2932_v29 = vsel %vm12370_vm15, %v2867_v1, %v6603_v36  ;;  %v2869_v42 = vsel %vm12371_vm10, %v1766_v18, %v6598_v40  ;;  %v2868_v3 = vsel %vm12353_vm7, %v1980_v17, %v6597_v7  ;;  %vm12372_vm14 = vcmask 785408   ;;  %vm12373_vm6 = vmmov %vm12369_vm11  ;;  %v6616_v40 = vpop.permute.xlu1 %6615 }
 0x265   :  { %6292 = vmatmul.mubr.msk.bf16.gmra.mxu1 %vm12372_vm14, %v2972_v57  ;;  %v2973_v6 = vpack.c.bf16 %v2932_v29, %v2931_v26  ;;  %v11767_v13 = vrot.slane %v8693_v24, 7  ;;  %v11764_v16 = vrot.slane %v8696_v61, 7  ;;  %v2934_v1 = vsel %vm12373_vm6, %v2869_v42, %v6613_v27  ;;  %vm12374_vm8 = vmmov %vm12373_vm6 }
 0x266   :  { %v2933_v36 = vsel %vm12374_vm8, %v2868_v3, %v6612_v8  ;;  %vm8701_vm11 = vcmp.ne.s32.totalorder %v521_v23, 0  ;;  %v12375_v18 = vmov 0  ;;  %vm12378_vm14 = vcmp.lt.s32.totalorder %v6996_v10, 1  ;;  %v6621_v8 = vpop.permute.xlu0 %6620 }
 0x267   :  { %v2974_v58 = vpack.c.bf16 %v2934_v1, %v2933_v36  ;;  %v12376_v18 = vsel %vm8701_vm11, 4294967295, %v12375_v18  ;;  %v1765_v57 = vsel %vm12378_vm14, %v1733_v54, %v1734_v19  ;;  %vm12379_vm15 = vcmask 785408   ;;  %vm12383_vm7 = vmmov %vm12378_vm14 }
 0x268   :  { %12377 = vst [vmem:[#allocation61_spill] sm:$0xff] %v12376_v18  ;;  %6295 = vmatprep.mubr.msk.bf16.mxu1 %vm12379_vm15, %v2973_v6  ;;  %v197_v7 = vadd.s32 416, %v6996_v10  ;;  %v1744_v17 = vrot.slane %v8105_v41, 7  ;;  %v6608_v21 = vunpack.i.h.bf16 %v6606_v59  ;;  %v6607_v26 = vunpack.i.l.bf16 %v6606_v59  ;;  %vm12384_vm6 = vmmov %vm12383_vm7  ;;  %v6631_v59 = vpop.permute.xlu1 %6630 }
 0x269   :  { %vm8712_vm10 = vcmp.ne.s32.totalorder %v535_v33, 0  ;;  %v12380_v29 = vmov 0  ;;  %v1764_v23 = vsel %vm12383_vm7, %v1734_v19, %v1735_v45  ;;  %v6618_v62 = vunpack.i.h.bf16 %v6616_v40  ;;  %vm12385_vm8 = vmmov %vm12384_vm6 }
 0x26a   :  { %v12381_v29 = vsel %vm8712_vm10, 4294967295, %v12380_v29  ;;  %v6617_v27 = vunpack.i.l.bf16 %v6616_v40  ;;  %v8722_v54 = vsel %vm12384_vm6, %v1740_v20, %v11764_v16  ;;  %v1982_v41 = vsel %vm8701_vm11, %v1765_v57, 0.0 }
 0x26b   :  { %12382 = vst [vmem:[#allocation62_spill] sm:$0xff] %v12381_v29  ;;  %v1738_v33 = vrot.slane %v6887_v31, 7  ;;  %v199_v42 = vadd.s32 432, %v6996_v10  ;;  %v1759_v45 = vsel %vm12385_vm8, %v11767_v13, %v1740_v20  ;;  %v1984_v19 = vsel %vm8712_vm10, %v1763_v22, 0.0 }
 0x26c   :  { %v6623_v3 = vunpack.i.h.bf16 %v6621_v8  ;;  %v6622_v6 = vunpack.i.l.bf16 %v6621_v8  ;;  %v549_v1 = vand.u32 15, %v197_v7  ;;  %vm12386_vm14 = vcmask 261120   ;;  %v6636_v32 = vpop.permute.xlu1 %6635 }
 0x26d   :  { %v2870_v36 = vsel %vm12386_vm14, %v1982_v41, %v6607_v26  ;;  %vm12387_vm15 = vmmov %vm12386_vm14  ;;  %v6633_v40 = vunpack.i.h.bf16 %v6631_v59  ;;  %v6632_v31 = vunpack.i.l.bf16 %v6631_v59  ;;  %vm12390_vm11 = vcmask 785408   ;;  %v6626_v26 = vpop.permute.xlu0 %6625 }
 0x26e   :  { %v2871_v57 = vsel %vm12387_vm15, %v1764_v23, %v6608_v21  ;;  %vm12388_vm7 = vmmov %vm12386_vm14  ;;  %6296 = vmatmul.mubr.msk.bf16.gmra.mxu1 %vm12390_vm11, %v2974_v58  ;;  %vm12391_vm8 = vcmask 523264   ;;  %v563_v41 = vand.u32 15, %v199_v42  ;;  %v6888_v21 = vld [vmem:[#allocation2 + $0x1c8] sm:$0xff]  ;;  %v11772_v58 = vrot.slane %v8150_v55, 7 }
 0x26f   :  { %v2873_v53 = vsel %vm12388_vm7, %v1762_v9, %v6618_v62  ;;  %vm12389_vm6 = vmmov %vm12388_vm7  ;;  %v2935_v20 = vsel %vm12391_vm8, %v2870_v36, %v6622_v6  ;;  %v1743_v23 = vrot.slane %v6888_v21, 7  ;;  %v8742_v9 = vld [vmem:[#allocation2 + $0x1d8] sm:$0xff]  ;;  %v6627_v42 = vunpack.i.l.bf16 %v6626_v26 }
 0x270   :  { %v2872_v16 = vsel %vm12389_vm6, %v1984_v19, %v6617_v27  ;;  %vm12392_vm2 = vmmov %vm12391_vm8  ;;  %v11771_v62 = vrot.slane %v8742_v9, 7  ;;  %v11773_v27 = vrot.slane %v8177_v30, 7  ;;  %v12399_v19 = vrot.slane %v8663_v56, 7 }
 0x271   :  { %v2936_v22 = vsel %vm12392_vm2, %v2871_v57, %v6623_v3  ;;  %vm12393_vm10 = vmmov %vm12392_vm2  ;;  %v203_v6 = vadd.s32 464, %v6996_v10  ;;  %v6628_v36 = vunpack.i.h.bf16 %v6626_v26  ;;  %v12401_v57 = vmov 0  ;;  %v6890_v26 = vld [vmem:[#allocation2 + $0x1c0] sm:$0xff] }
 0x272   :  { %v2975_v13 = vpack.c.bf16 %v2936_v22, %v2935_v20  ;;  %v2938_v8 = vsel %vm12393_vm10, %v2873_v53, %v6633_v40  ;;  %vm12394_vm5 = vmmov %vm12392_vm2  ;;  %v201_v53 = vadd.s32 448, %v6996_v10  ;;  %vm8758_vm10 = vcmp.ne.s32.totalorder %v563_v41, 0 }
 0x273   :  { %v2937_v7 = vsel %vm12394_vm5, %v2872_v16, %v6632_v31  ;;  %vm12395_vm2 = vmmov %vm12390_vm11  ;;  %vm8749_vm11 = vcmp.ne.s32.totalorder %v549_v1, 0  ;;  %v12396_v16 = vmov 0  ;;  %vm12400_vm5 = vcmp.lt.s32.totalorder %v6996_v10, 1 }
 0x274   :  { %v2976_v59 = vpack.c.bf16 %v2938_v8, %v2937_v7  ;;  %6299 = vmatprep.mubr.msk.bf16.mxu1 %vm12395_vm2, %v2975_v13  ;;  %v12397_v16 = vsel %vm8749_vm11, 4294967295, %v12396_v16  ;;  %v1761_v3 = vsel %vm12400_vm5, %v12399_v19, %v1738_v33  ;;  %v12402_v57 = vsel %vm8758_vm10, 4294967295, %v12401_v57  ;;  %vm12404_vm14 = vmmov %vm12400_vm5  ;;  %v6641_v8 = vpop.permute.xlu0 %6640 }
 0x275   :  { %12398 = vst [vmem:[#allocation63_spill] sm:$0xff] %v12397_v16  ;;  %12403 = vst [vmem:[#allocation64_spill] sm:$0xff] %v12402_v57  ;;  %v1754_v13 = vsel %vm12404_vm14, %v1744_v17, %v11771_v62  ;;  %v12406_v56 = vrot.slane %v8693_v24, 7  ;;  %v6638_v31 = vunpack.i.h.bf16 %v6636_v32  ;;  %v6637_v20 = vunpack.i.l.bf16 %v6636_v32 }
 0x276   :  { %vm12405_vm15 = vmmov %vm12400_vm5  ;;  %v1986_v22 = vsel %vm8749_vm11, %v1761_v3, 0.0  ;;  %v577_v7 = vand.u32 15, %v201_v53  ;;  %v1742_v41 = vrot.slane %v6890_v26, 7  ;;  %vm12409_vm8 = vcmask 261120   ;;  %6300 = vmatmul.mubr.msk.bf16.gmra.mxu1 %vm12395_vm2, %v2976_v59  ;;  %v6651_v53 = vpop.permute.xlu1 %6650 }
 0x277   :  { %v1755_v1 = vsel %vm12405_vm15, %v1743_v23, %v1744_v17  ;;  %vm12407_vm7 = vmmov %vm12400_vm5  ;;  %v2874_v24 = vsel %vm12409_vm8, %v1986_v22, %v6627_v42  ;;  %v1988_v32 = vsel %vm8758_vm10, %v1759_v45, 0.0  ;;  %v6642_v21 = vunpack.i.l.bf16 %v6641_v8 }
 0x278   :  { %v1760_v40 = vsel %vm12407_vm7, %v1738_v33, %v12406_v56  ;;  %vm12408_vm6 = vmmov %vm12400_vm5  ;;  %v6643_v33 = vunpack.i.h.bf16 %v6641_v8  ;;  %v6653_v3 = vunpack.i.h.bf16 %v6651_v53  ;;  %v6652_v56 = vunpack.i.l.bf16 %v6651_v53 }
 0x279   :  { %v8780_v17 = vsel %vm12408_vm6, %v11772_v58, %v11773_v27  ;;  %vm12410_vm5 = vmmov %vm12409_vm8  ;;  %v591_v26 = vand.u32 15, %v203_v6  ;;  %vm12413_vm7 = vcmask 523264   ;;  %v6646_v27 = vpop.permute.xlu0 %6645  ;;  %v205_v53 = vadd.s32 480, %v6996_v10 }
 0x27a   :  { %v2875_v19 = vsel %vm12410_vm5, %v1760_v40, %v6628_v36  ;;  %vm12411_vm14 = vmmov %vm12410_vm5  ;;  %v2939_v42 = vsel %vm12413_vm7, %v2874_v24, %v6642_v21  ;;  %v6656_v36 = vpop.permute.xlu1 %6655  ;;  %v12417_v40 = vmov 0  ;;  %v6648_v6 = vunpack.i.h.bf16 %v6646_v27 }
 0x27b   :  { %v2877_v62 = vsel %vm12411_vm14, %v8722_v54, %v6638_v31  ;;  %vm12412_vm15 = vmmov %vm12410_vm5  ;;  %vm8794_vm5 = vcmp.ne.s32.totalorder %v577_v7, 0  ;;  %v6647_v54 = vunpack.i.l.bf16 %v6646_v27  ;;  %v12420_v31 = vrot.slane %v8696_v61, 7 }
 0x27c   :  { %v2876_v58 = vsel %vm12412_vm15, %v1988_v32, %v6637_v20  ;;  %vm12414_vm6 = vmmov %vm12413_vm7  ;;  %v12418_v40 = vsel %vm8794_vm5, 4294967295, %v12417_v40  ;;  %vm12421_vm14 = vcmp.lt.s32.totalorder %v6996_v10, 1  ;;  %vm12422_vm15 = vcmask 785408  }
 0x27d   :  { %v2940_v22 = vsel %vm12414_vm6, %v2875_v19, %v6643_v33  ;;  %vm12415_vm8 = vmmov %vm12414_vm6  ;;  %12419 = vst [vmem:[#allocation65_spill] sm:$0xff] %v12418_v40  ;;  %v1757_v20 = vsel %vm12421_vm14, %v12420_v31, %v1742_v41  ;;  %vm8803_vm7 = vcmp.ne.s32.totalorder %v591_v26, 0  ;;  %v6658_v7 = vunpack.i.h.bf16 %v6656_v36  ;;  %v6661_v32 = vpop.permute.xlu0 %6660  ;;  %v6891_v31 = vld [vmem:[#allocation2 + $0x1e0] sm:$0xff] }
 0x27e   :  { %v2977_v45 = vpack.c.bf16 %v2940_v22, %v2939_v42  ;;  %v2942_v59 = vsel %vm12415_vm8, %v2877_v62, %v6653_v3  ;;  %vm12416_vm2 = vmmov %vm12414_vm6  ;;  %v12423_v62 = vmov 0  ;;  %v6657_v24 = vunpack.i.l.bf16 %v6656_v36 }
 0x27f   :  { %v2941_v8 = vsel %vm12416_vm2, %v2876_v58, %v6652_v56  ;;  %v12424_v62 = vsel %vm8803_vm7, 4294967295, %v12423_v62  ;;  %vm12426_vm6 = vmmov %vm12421_vm14  ;;  %v207_v33 = vadd.s32 496, %v6996_v10  ;;  %v1990_v61 = vsel %vm8794_vm5, %v1757_v20, 0.0 }
 0x280   :  { %v2978_v52 = vpack.c.bf16 %v2942_v59, %v2941_v8  ;;  %6303 = vmatprep.mubr.msk.bf16.mxu1 %vm12422_vm15, %v2977_v45  ;;  %12425 = vst [vmem:[#allocation66_spill] sm:$0xff] %v12424_v62  ;;  %v1756_v58 = vsel %vm12426_vm6, %v1742_v41, %v1743_v23  ;;  %vm12427_vm8 = vmmov %vm12422_vm15  ;;  %v6663_v27 = vunpack.i.h.bf16 %v6661_v32  ;;  %v6662_v21 = vunpack.i.l.bf16 %v6661_v32  ;;  %v6671_v41 = vpop.permute.xlu1 %6670 }
 0x281   :  { %vm12428_vm2 = vcmask 261120   ;;  %v1992_v23 = vsel %vm8803_vm7, %v1755_v1, 0.0  ;;  %vm12430_vm15 = vcmask 523264   ;;  %v6673_v42 = vunpack.i.h.bf16 %v6671_v41 }
 0x282   :  { %6304 = vmatmul.mubr.msk.bf16.gmra.mxu1 %vm12427_vm8, %v2978_v52  ;;  %v2878_v19 = vsel %vm12428_vm2, %v1990_v61, %v6647_v54  ;;  %vm12429_vm14 = vmmov %vm12428_vm2  ;;  %v6672_v22 = vunpack.i.l.bf16 %v6671_v41  ;;  %v619_v8 = vand.u32 15, %v207_v33  ;;  %v605_v54 = vand.u32 15, %v205_v53 }
 0x283   :  { %v2879_v3 = vsel %vm12429_vm14, %v1756_v58, %v6648_v6  ;;  %v2943_v56 = vsel %vm12430_vm15, %v2878_v19, %v6662_v21  ;;  %vm12431_vm6 = vmmov %vm12430_vm15  ;;  %v1746_v1 = vrot.slane %v6891_v31, 7  ;;  %v6666_v58 = vpop.permute.xlu0 %6665  ;;  %vm12436_vm14 = vcmask 785408  }
 0x284   :  { %v2944_v26 = vsel %vm12431_vm6, %v2879_v3, %v6663_v27  ;;  %vm12432_vm5 = vmmov %vm12428_vm2  ;;  %v6676_v32 = vpop.permute.xlu1 %6675  ;;  %vm8825_vm15 = vcmp.ne.s32.totalorder %v619_v8, 0  ;;  %v12437_v61 = vmov 0  ;;  %v12443_v33 = vrot.slane %v8742_v9, 7 }
 0x285   :  { %v2881_v52 = vsel %vm12432_vm5, %v1754_v13, %v6658_v7  ;;  %vm12433_vm8 = vmmov %vm12428_vm2  ;;  %v2979_v59 = vpack.c.bf16 %v2944_v26, %v2943_v56  ;;  %v12438_v61 = vsel %vm8825_vm15, 4294967295, %v12437_v61  ;;  %v6678_v13 = vunpack.i.h.bf16 %v6676_v32 }
 0x286   :  { %v2880_v45 = vsel %vm12433_vm8, %v1992_v23, %v6657_v24  ;;  %vm12434_vm10 = vmmov %vm12431_vm6  ;;  %12439 = vst [vmem:[#allocation67_spill] sm:$0xff] %v12438_v61  ;;  %v6677_v7 = vunpack.i.l.bf16 %v6676_v32  ;;  %vm8829_vm5 = vcmp.ne.s32.totalorder %v605_v54, 0  ;;  %v12440_v24 = vmov 0 }
 0x287   :  { %v2946_v36 = vsel %vm12434_vm10, %v2881_v52, %v6673_v42  ;;  %vm12435_vm2 = vmmov %vm12431_vm6  ;;  %6307 = vmatprep.mubr.msk.bf16.mxu1 %vm12436_vm14, %v2979_v59  ;;  %v12441_v24 = vsel %vm8829_vm5, 4294967295, %v12440_v24  ;;  %vm12444_vm10 = vcmp.lt.s32.totalorder %v6996_v10, 1  ;;  %v6668_v21 = vunpack.i.h.bf16 %v6666_v58 }
 0x288   :  { %v2945_v6 = vsel %vm12435_vm2, %v2880_v45, %v6672_v22  ;;  %12442 = vst [vmem:[#allocation68_spill] sm:$0xff] %v12441_v24  ;;  %v1753_v27 = vsel %vm12444_vm10, %v12443_v33, %v1746_v1  ;;  %vm12445_vm6 = vmmov %vm12436_vm14  ;;  %v6667_v53 = vunpack.i.l.bf16 %v6666_v58  ;;  %v6686_v19 = vpop.permute.xlu1 %6685  ;;  %v12446_v3 = vrot.slane %v8179_v50, 7  ;;  %v6681_v45 = vpop.permute.xlu0 %6680  ;;  %v6855_v58 = vld [vmem:[%s11651_s6 + $0x38] sm:$0xff]   ;;  %v8881_v33 = vld [vmem:[%s11650_s5] ss:$0 sm:$0xff] }
 0x289   :  { %v2980_v20 = vpack.c.bf16 %v2946_v36, %v2945_v6  ;;  %v12447_v23 = vrot.slane %v8177_v30, 7  ;;  %vm12448_vm8 = vmmov %vm12444_vm10  ;;  %v1996_v56 = vsel %vm8825_vm15, %v8780_v17, 0.0  ;;  %v6688_v9 = vunpack.i.h.bf16 %v6686_v19 }
 0x28a   :  { %v6687_v26 = vunpack.i.l.bf16 %v6686_v19  ;;  %v12449_v42 = vrot.slane %v8150_v55, 7  ;;  %vm12450_vm2 = vmmov %vm12448_vm8  ;;  %v1994_v52 = vsel %vm8829_vm5, %v1753_v27, 0.0  ;;  %vm12451_vm14 = vcmask 261120  }
 0x28b   :  { %6308 = vmatmul.mubr.msk.bf16.gmra.mxu1 %vm12445_vm6, %v2980_v20  ;;  %v1750_v41 = vsel %vm12448_vm8, %v12447_v23, %v12446_v3  ;;  %vm12452_vm10 = vmmov %vm12451_vm14  ;;  %vm12453_vm6 = vcmask 523264   ;;  %v6683_v17 = vunpack.i.h.bf16 %v6681_v45  ;;  %v6682_v36 = vunpack.i.l.bf16 %v6681_v45 }
 0x28c   :  { %v1752_v22 = vsel %vm12450_vm2, %v1746_v1, %v12449_v42  ;;  %v2885_v50 = vsel %vm12451_vm14, %v1750_v41, %v6678_v13  ;;  %v2884_v30 = vsel %vm12452_vm10, %v1996_v56, %v6677_v7  ;;  %vm12454_vm8 = vmmov %vm12453_vm6  ;;  %vm12459_vm14 = vcmask 785408   ;;  %v6856_v13 = vld [vmem:[%s11651_s6 + $0x30] sm:$0xff]   ;;  %v6857_v7 = vld [vmem:[%s11651_s6 + $0x28] sm:$0xff]  }
 0x28d   :  { %v2949_v59 = vsel %vm12453_vm6, %v2884_v30, %v6687_v26  ;;  %v2950_v8 = vsel %vm12454_vm8, %v2885_v50, %v6688_v9  ;;  %vm12455_vm15 = vmmov %vm12452_vm10  ;;  %v6924_v32 = vmov 0   ;;  %v6859_v30 = vld [vmem:[%s11651_s6 + $0x18] sm:$0xff]  }
 0x28e   :  { %v2882_v6 = vsel %vm12455_vm15, %v1994_v52, %v6667_v53  ;;  %vm12456_vm7 = vmmov %vm12452_vm10  ;;  %v2982_v54 = vpack.c.bf16 %v2950_v8, %v2949_v59  ;;  %4925 = vmatprep.subr.bf16.mxu0 %v6924_v32  ;;  %6337 = vmatprep.subr.bf16.mxu1 %v6924_v32  ;;  %v6858_v53 = vld [vmem:[%s11651_s6 + $0x20] sm:$0xff]  }
 0x28f   :  { %v2883_v55 = vsel %vm12456_vm7, %v1752_v22, %v6668_v21  ;;  %vm12457_vm2 = vmmov %vm12453_vm6  ;;  %4926 = vmatpush1.bf16.msra.mxu0 %v6855_v58  ;;  %6349 = vmatpush1.bf16.msra.mxu1 %v6855_v58 }
 0x290   :  { %v2947_v31 = vsel %vm12457_vm2, %v2882_v6, %v6682_v36  ;;  %vm12458_vm11 = vmmov %vm12457_vm2  ;;  %4927 = vmatprep.subr.bf16.mxu0 %v6924_v32  ;;  %6338 = vmatprep.subr.bf16.mxu1 %v6924_v32 }
 0x291   :  { %v2948_v1 = vsel %vm12458_vm11, %v2883_v55, %v6683_v17  ;;  %vm12460_vm10 = vmmov %vm12459_vm14 }
 0x292   :  { %v2981_v20 = vpack.c.bf16 %v2948_v1, %v2947_v31  ;;  %vm12461_vm11 = vmmov %vm12457_vm2  ;;  %v6860_v31 = vld [vmem:[%s11651_s6 + $0x10] sm:$0xff]  }
 0x293   :  { %4928 = vmatpush1.bf16.msra.mxu0 %v6856_v13  ;;  %6350 = vmatpush1.bf16.msra.mxu1 %v6856_v13  ;;  %vm12462_vm7 = vmmov %vm12457_vm2 }
 0x294   :  { %6311 = vmatprep.mubr.msk.bf16.mxu1 %vm12459_vm14, %v2981_v20  ;;  %4929 = vmatprep.subr.bf16.mxu0 %v6924_v32  ;;  %vm12463_vm15 = vmmov %vm12457_vm2 }
 0x295   :  { %6312 = vmatmul.mubr.msk.bf16.gmra.mxu1 %vm12460_vm10, %v2982_v54  ;;  %6339 = vmatprep.subr.bf16.mxu1 %v6924_v32  ;;  %vm12464_vm6 = vmmov %vm12457_vm2 }
 0x296   :  { %vm12465_vm14 = vmmov %vm12457_vm2 }
 0x297   :  { %4930 = vmatpush1.bf16.msra.mxu0 %v6857_v7  ;;  %6351 = vmatpush1.bf16.msra.mxu1 %v6857_v7  ;;  %v6861_v7 = vld [vmem:[%s11651_s6 + $0x8] sm:$0xff]  }
 0x298   :  { %4931 = vmatprep.subr.bf16.mxu0 %v6924_v32  ;;  %6340 = vmatprep.subr.bf16.mxu1 %v6924_v32 }
 0x29b   :  { %4932 = vmatpush1.bf16.msra.mxu0 %v6858_v53  ;;  %6352 = vmatpush1.bf16.msra.mxu1 %v6858_v53 }
 0x29c   :  { %4933 = vmatprep.subr.bf16.mxu0 %v6924_v32  ;;  %6341 = vmatprep.subr.bf16.mxu1 %v6924_v32 }
 0x29f   :  { %4934 = vmatpush1.bf16.msra.mxu0 %v6859_v30  ;;  %6353 = vmatpush1.bf16.msra.mxu1 %v6859_v30 }
 0x2a0   :  { %4935 = vmatprep.subr.bf16.mxu0 %v6924_v32  ;;  %6342 = vmatprep.subr.bf16.mxu1 %v6924_v32 }
 0x2a3   :  { %4936 = vmatpush1.bf16.msra.mxu0 %v6860_v31  ;;  %6354 = vmatpush1.bf16.msra.mxu1 %v6860_v31 }
 0x2a4   :  { %4937 = vmatprep.subr.bf16.mxu0 %v6924_v32  ;;  %6343 = vmatprep.subr.bf16.mxu1 %v6924_v32 }
 0x2a7   :  { %4938 = vmatpush1.bf16.msra.mxu0 %v6861_v7  ;;  %6355 = vmatpush1.bf16.msra.mxu1 %v6861_v7 }
 0x2a8   :  { %4939 = vmatprep.subr.bf16.mxu0 %v6924_v32  ;;  %6344 = vmatprep.subr.bf16.mxu1 %v6924_v32 }
 0x2b3   :  { %v6253_v27 = vpop.f32.mrf.mxu1 }
 0x2b4   :  { %v3165_v21 = vadd.f32 %v6253_v27, %v8881_v33 }
 0x2b5   :  { %v3156_v19 = vpop.f32.mrf.mxu1 }
 0x2b6   :  { %3413 = vst.msk [vmem:[#allocation4 + $0x10] sm:$0xff] %vm12461_vm11, %v3165_v21  ;;  %v3157_v3 = vadd.f32 %v8881_v33, %v3156_v19  ;;  %vm12466_vm11 = vmmov %vm12457_vm2 }
 0x2b7   :  { %v6254_v23 = vpop.f32.mrf.mxu1 }
 0x2b8   :  { %3411 = vst.msk [vmem:[#allocation4] sm:$0xff] %vm12462_vm7, %v3157_v3  ;;  %v3168_v41 = vadd.f32 %v6254_v23, %v8881_v33  ;;  %vm12467_vm7 = vmmov %vm12457_vm2 }
 0x2b9   :  { %v3159_v56 = vpop.f32.mrf.mxu1 }
 0x2ba   :  { %3414 = vst.msk [vmem:[#allocation4 + $0x18] sm:$0xff] %vm12463_vm15, %v3168_v41  ;;  %v3160_v9 = vadd.f32 %v8881_v33, %v3159_v56 }
 0x2bc   :  { %3412 = vst.msk [vmem:[#allocation4 + $0x8] sm:$0xff] %vm12464_vm6, %v3160_v9  ;;  %vm12468_vm6 = vmmov %vm12457_vm2 }
 0x2bd   :  { %v3477_v22 = vld [vmem:[#allocation4 + $0x10] sm:$0xff] }
 0x2be   :  { %v6257_v26 = vpop.f32.mrf.mxu1  ;;  %vm3485_vm8 = vcmp.ge.f32.partialorder %v3477_v22, 1.0 }
 0x2bf   :  { %v3181_v42 = vadd.f32 %v6257_v26, %v8881_v33  ;;  %v6001_v45 = vsel %vm3485_vm8, 1.0, %v11895_v37  ;;  %v3475_v59 = vld [vmem:[#allocation4] sm:$0xff]  ;;  %v3489_v27 = vsel %vm3485_vm8, 0.0, %v3477_v22 }
 0x2c0   :  { %v3172_v52 = vpop.f32.mrf.mxu1  ;;  %3501 = vst.msk [vmem:[#allocation3 + $0x10] sm:$0xff] %vm12465_vm14, %v6001_v45  ;;  %vm3483_vm10 = vcmp.ge.f32.partialorder %v3475_v59, 1.0  ;;  %v6862_v22 = vld [vmem:[%s11651_s6] sm:$0xff]  }
 0x2c1   :  { %3417 = vst.msk [vmem:[#allocation4 + $0x30] sm:$0xff] %vm12457_vm2, %v3181_v42  ;;  %v3173_v50 = vadd.f32 %v8881_v33, %v3172_v52  ;;  %v5999_v36 = vsel %vm3483_vm10, 1.0, %v11895_v37  ;;  %v3478_v6 = vld [vmem:[#allocation4 + $0x18] sm:$0xff]  ;;  %v3487_v41 = vsel %vm3483_vm10, 0.0, %v3475_v59  ;;  %vm12472_vm10 = vmmov %vm12457_vm2  ;;  %4940 = vmatpush1.bf16.msra.mxu0 %v6862_v22  ;;  %6356 = vmatpush1.bf16.msra.mxu1 %v6862_v22 }
 0x2c2   :  { %v6258_v8 = vpop.f32.mrf.mxu1  ;;  %3499 = vst.msk [vmem:[#allocation3] sm:$0xff] %vm12467_vm7, %v5999_v36  ;;  %vm3486_vm15 = vcmp.ge.f32.partialorder %v3478_v6, 1.0  ;;  %vm12470_vm7 = vmmov %vm12457_vm2  ;;  %4949 = vmatprep.subr.bf16.mxu0 %v6924_v32  ;;  %6345 = vmatprep.subr.bf16.mxu1 %v6924_v32 }
 0x2c3   :  { %3415 = vst.msk [vmem:[#allocation4 + $0x20] sm:$0xff] %vm12466_vm11, %v3173_v50  ;;  %v3184_v17 = vadd.f32 %v6258_v8, %v8881_v33  ;;  %v6002_v1 = vsel %vm3486_vm15, 1.0, %v11895_v37  ;;  %v3476_v20 = vld [vmem:[#allocation4 + $0x8] sm:$0xff]  ;;  %vm12469_vm11 = vmmov %vm12457_vm2  ;;  %v3490_v52 = vsel %vm3486_vm15, 0.0, %v3478_v6 }
 0x2c4   :  { %v3175_v55 = vpop.f32.mrf.mxu1  ;;  %3502 = vst.msk [vmem:[#allocation3 + $0x18] sm:$0xff] %vm12457_vm2, %v6002_v1  ;;  %vm3484_vm14 = vcmp.ge.f32.partialorder %v3476_v20, 1.0  ;;  %vm12475_vm15 = vmmov %vm12457_vm2 }
 0x2c5   :  { %3418 = vst.msk [vmem:[#allocation4 + $0x38] sm:$0xff] %vm12468_vm6, %v3184_v17  ;;  %v3176_v54 = vadd.f32 %v8881_v33, %v3175_v55  ;;  %v6000_v21 = vsel %vm3484_vm14, 1.0, %v11895_v37  ;;  %vm12471_vm6 = vmmov %vm12457_vm2  ;;  %v3488_v6 = vsel %vm3484_vm14, 0.0, %v3476_v20 }
 0x2c6   :  { %3500 = vst.msk [vmem:[#allocation3 + $0x8] sm:$0xff] %vm12470_vm7, %v6000_v21  ;;  %vm12473_vm7 = vmmov %vm12457_vm2 }
 0x2c7   :  { %3416 = vst.msk [vmem:[#allocation4 + $0x28] sm:$0xff] %vm12469_vm11, %v3176_v54  ;;  %v8949_v17 = vld [vmem:[#allocation3 + $0x10] sm:$0xff]  ;;  %vm12476_vm14 = vmmov %vm12457_vm2 }
 0x2c8   :  { %v3505_v53 = vld [vmem:[#allocation4 + $0x30] sm:$0xff] }
 0x2c9   :  { %v3509_v3 = vadd.f32 %v3505_v53, %v3489_v27  ;;  %v8951_v36 = vld [vmem:[#allocation3] sm:$0xff]  ;;  %v6863_v27 = vld [vmem:[%s11651_s6 + $0x58] sm:$0xff]  }
 0x2ca   :  { %v6261_v58 = vpop.f32.mrf.mxu1  ;;  %v3503_v56 = vld [vmem:[#allocation4 + $0x20] sm:$0xff]  ;;  %12474 = vst [vmem:[#allocation69_spill] sm:$0xff] %v8951_v36  ;;  %4950 = vmatpush2.bf16.msra.mxu0 %v6863_v27  ;;  %6357 = vmatpush2.bf16.msra.mxu1 %v6863_v27 }
 0x2cb   :  { %v3197_v13 = vadd.f32 %v6261_v58, %v8881_v33  ;;  %v3507_v26 = vadd.f32 %v3503_v56, %v3487_v41  ;;  %vm3513_vm8 = vcmp.ge.f32.partialorder %v3509_v3, 1.0  ;;  %v8957_v58 = vld [vmem:[#allocation3 + $0x18] sm:$0xff]  ;;  %v11781_v56 = vrot.slane %v8951_v36, 7  ;;  %4951 = vmatprep.subr.bf16.mxu0 %v6924_v32  ;;  %6346 = vmatprep.subr.bf16.mxu1 %v6924_v32 }
 0x2cc   :  { %v3188_v19 = vpop.f32.mrf.mxu1  ;;  %v3506_v50 = vld [vmem:[#allocation4 + $0x38] sm:$0xff]  ;;  %v6005_v30 = vsel %vm3513_vm8, 1.0, %v11895_v37  ;;  %v3517_v54 = vsel %vm3513_vm8, 0.0, %v3509_v3  ;;  %v6694_v20 = vpack.i.bf16 %v8957_v58, %v8949_v17 }
 0x2cd   :  { %3421 = vst.msk [vmem:[#allocation4 + $0x50] sm:$0xff] %vm12471_vm6, %v3197_v13  ;;  %v3189_v23 = vadd.f32 %v8881_v33, %v3188_v19  ;;  %v3510_v59 = vadd.f32 %v3506_v50, %v3490_v52  ;;  %vm3511_vm11 = vcmp.ge.f32.partialorder %v3507_v26, 1.0  ;;  %v8971_v41 = vld [vmem:[#allocation3 + $0x8] sm:$0xff] }
 0x2ce   :  { %v6262_v9 = vpop.f32.mrf.mxu1  ;;  %3529 = vst.msk [vmem:[#allocation3 + $0x30] sm:$0xff] %vm12472_vm10, %v6005_v30  ;;  %v3504_v55 = vld [vmem:[#allocation4 + $0x28] sm:$0xff]  ;;  %v6003_v31 = vsel %vm3511_vm11, 1.0, %v11895_v37  ;;  %v3515_v53 = vsel %vm3511_vm11, 0.0, %v3507_v26  ;;  %vm12477_vm10 = vmmov %vm12457_vm2  ;;  %6695 = vrot.lane.b32.xlu1 %v6694_v20, %s6923_s4  ;;  %v4176_v30 = vrot.slane %v8971_v41, 1 }
 0x2cf   :  { %3419 = vst.msk [vmem:[#allocation4 + $0x40] sm:$0xff] %vm12457_vm2, %v3189_v23  ;;  %v3200_v42 = vadd.f32 %v6262_v9, %v8881_v33  ;;  %v3508_v13 = vadd.f32 %v3504_v55, %v3488_v6  ;;  %vm3514_vm6 = vcmp.ge.f32.partialorder %v3510_v59, 1.0  ;;  %v4177_v23 = vrot.slane %v8949_v17, 1  ;;  %vm12478_vm11 = vmmov %vm12457_vm2 }
 0x2d0   :  { %v3191_v45 = vpop.f32.mrf.mxu1  ;;  %3527 = vst.msk [vmem:[#allocation3 + $0x20] sm:$0xff] %vm12475_vm15, %v6003_v31  ;;  %v6006_v19 = vsel %vm3514_vm6, 1.0, %v11895_v37  ;;  %vm12479_vm15 = vmmov %vm12457_vm2 }
 0x2d1   :  { %3422 = vst.msk [vmem:[#allocation4 + $0x58] sm:$0xff] %vm12473_vm7, %v3200_v42  ;;  %v3192_v8 = vadd.f32 %v8881_v33, %v3191_v45  ;;  %vm3512_vm8 = vcmp.ge.f32.partialorder %v3508_v13, 1.0  ;;  %v11782_v42 = vrot.slane %v8971_v41, 7  ;;  %v6689_v45 = vpack.i.bf16 %v8971_v41, %v8951_v36 }
 0x2d2   :  { %3530 = vst.msk [vmem:[#allocation3 + $0x38] sm:$0xff] %vm12476_vm14, %v6006_v19  ;;  %v6004_v52 = vsel %vm3512_vm8, 1.0, %v11895_v37  ;;  %vm12481_vm14 = vcmp.lt.s32.totalorder %v6996_v10, 7 }
 0x2d3   :  { %3420 = vst.msk [vmem:[#allocation4 + $0x48] sm:$0xff] %vm12457_vm2, %v3192_v8  ;;  %v11780_v8 = vrot.slane %v8951_v36, 1  ;;  %vm12480_vm2 = vcmp.lt.s32.totalorder %v6996_v10, 1  ;;  %6690 = vrot.lane.b32.xlu0 %v6689_v45, %s6923_s4 }
 0x2d4   :  { %v3533_v21 = vld [vmem:[#allocation4 + $0x50] sm:$0xff]  ;;  %3528 = vst.msk [vmem:[#allocation3 + $0x28] sm:$0xff] %vm12478_vm11, %v6004_v52  ;;  %v8999_v31 = vsel %vm12480_vm2, %v11781_v56, %v11782_v42 }
 0x2d5   :  { %v6265_v1 = vpop.f32.mrf.mxu1  ;;  %v3537_v9 = vadd.f32 %v3533_v21, %v3517_v54  ;;  %v6864_v54 = vld [vmem:[%s11651_s6 + $0x50] sm:$0xff]  }
 0x2d6   :  { %v3213_v7 = vadd.f32 %v6265_v1, %v8881_v33  ;;  %v3531_v22 = vld [vmem:[#allocation4 + $0x40] sm:$0xff]  ;;  %v3518_v1 = vsel %vm3514_vm6, 0.0, %v3510_v59  ;;  %vm12483_vm6 = vmmov %vm12478_vm11  ;;  %4952 = vmatpush2.bf16.msra.mxu0 %v6864_v54  ;;  %6358 = vmatpush2.bf16.msra.mxu1 %v6864_v54 }
 0x2d7   :  { %v3204_v3 = vpop.f32.mrf.mxu1  ;;  %v3535_v6 = vadd.f32 %v3531_v22, %v3515_v53  ;;  %vm3541_vm7 = vcmp.ge.f32.partialorder %v3537_v9, 1.0  ;;  %v4300_v53 = vsel %vm12481_vm14, %v4176_v30, %v4177_v23  ;;  %v3516_v22 = vsel %vm3512_vm8, 0.0, %v3508_v13  ;;  %vm12486_vm2 = vmmov %vm12483_vm6  ;;  %v6865_v13 = vld [vmem:[%s11651_s6 + $0x48] sm:$0xff]   ;;  %4953 = vmatprep.subr.bf16.mxu0 %v6924_v32  ;;  %6347 = vmatprep.subr.bf16.mxu1 %v6924_v32 }
 0x2d8   :  { %3425 = vst.msk [vmem:[#allocation4 + $0x70] sm:$0xff] %vm12477_vm10, %v3213_v7  ;;  %v3205_v26 = vadd.f32 %v8881_v33, %v3204_v3  ;;  %v3534_v7 = vld [vmem:[#allocation4 + $0x58] sm:$0xff]  ;;  %v6009_v20 = vsel %vm3541_vm7, 1.0, %v11895_v37  ;;  %vm12482_vm10 = vmmov %vm12481_vm14 }
 0x2d9   :  { %v6266_v50 = vpop.f32.mrf.mxu1  ;;  %v4301_v19 = vsel %vm12482_vm10, %v11780_v8, %v4176_v30  ;;  %v3538_v59 = vadd.f32 %v3534_v7, %v3518_v1  ;;  %3557 = vst.msk [vmem:[#allocation3 + $0x50] sm:$0xff] %vm12483_vm6, %v6009_v20  ;;  %vm3539_vm11 = vcmp.ge.f32.partialorder %v3535_v6, 1.0  ;;  %vm12487_vm10 = vmmov %vm12486_vm2  ;;  %v9026_v7 = vld [vmem:[#allocation3 + $0x20] sm:$0xff]  ;;  %v3545_v20 = vsel %vm3541_vm7, 0.0, %v3537_v9  ;;  %v9037_v3 = vld [vmem:[#allocation3 + $0x38] sm:$0xff] }
 0x2da   :  { %3423 = vst.msk [vmem:[#allocation4 + $0x60] sm:$0xff] %vm12479_vm15, %v3205_v26  ;;  %v3216_v55 = vadd.f32 %v6266_v50, %v8881_v33  ;;  %vm12484_vm15 = vmmov %vm12483_vm6  ;;  %v4304_v26 = vsel %vm7019_vm3, %v4300_v53, 0.0  ;;  %v3532_v52 = vld [vmem:[#allocation4 + $0x48] sm:$0xff]  ;;  %v6007_v50 = vsel %vm3539_vm11, 1.0, %v11895_v37  ;;  %4954 = vmatpush2.bf16.msra.mxu0 %v6865_v13  ;;  %6359 = vmatpush2.bf16.msra.mxu1 %v6865_v13 }
 0x2db   :  { %v3207_v21 = vpop.f32.mrf.mxu1  ;;  %v4688_v45 = vpack.c.bf16 %v4304_v26, %v4301_v19  ;;  %v3536_v1 = vadd.f32 %v3532_v52, %v3516_v22  ;;  %3555 = vst.msk [vmem:[#allocation3 + $0x40] sm:$0xff] %vm12486_vm2, %v6007_v50  ;;  %vm3542_vm14 = vcmp.ge.f32.partialorder %v3538_v59, 1.0  ;;  %vm12488_vm3 = vmmov %vm12486_vm2  ;;  %v3543_v22 = vsel %vm3539_vm11, 0.0, %v3535_v6  ;;  %v6866_v6 = vld [vmem:[%s11651_s6 + $0x40] sm:$0xff]   ;;  %4955 = vmatprep.subr.bf16.mxu0 %v6924_v32  ;;  %6348 = vmatprep.subr.bf16.mxu1 %v6924_v32 }
 0x2dc   :  { %3426 = vst.msk [vmem:[#allocation4 + $0x78] sm:$0xff] %vm12484_vm15, %v3216_v55  ;;  %v3208_v27 = vadd.f32 %v8881_v33, %v3207_v21  ;;  %v6010_v53 = vsel %vm3542_vm14, 1.0, %v11895_v37  ;;  %vm12489_vm8 = vmmov %vm12486_vm2 }
 0x2dd   :  { %6076 = vmatprep.mubr.msk.bf16.mxu0 %vm12488_vm3, %v4688_v45  ;;  %3558 = vst.msk [vmem:[#allocation3 + $0x58] sm:$0xff] %vm12489_vm8, %v6010_v53  ;;  %vm3540_vm6 = vcmp.ge.f32.partialorder %v3536_v1, 1.0  ;;  %vm12490_vm15 = vmmov %vm12486_vm2  ;;  %v9049_v45 = vld [vmem:[#allocation3 + $0x28] sm:$0xff]  ;;  %v4178_v53 = vrot.slane %v8957_v58, 1 }
 0x2de   :  { %3424 = vst.msk [vmem:[#allocation4 + $0x68] sm:$0xff] %vm12487_vm10, %v3208_v27  ;;  %v9035_v27 = vld [vmem:[#allocation3 + $0x30] sm:$0xff]  ;;  %v6008_v50 = vsel %vm3540_vm6, 1.0, %v11895_v37  ;;  %vm12491_vm7 = vmmov %vm12486_vm2  ;;  %4956 = vmatpush2.bf16.msra.mxu0 %v6866_v6  ;;  %6360 = vmatpush2.bf16.msra.mxu1 %v6866_v6 }
 0x2df   :  { %v3561_v21 = vld [vmem:[#allocation4 + $0x70] sm:$0xff]  ;;  %v6704_v54 = vpack.i.bf16 %v9037_v3, %v9035_v27  ;;  %3556 = vst.msk [vmem:[#allocation3 + $0x48] sm:$0xff] %vm12491_vm7, %v6008_v50  ;;  %vm12492_vm10 = vmmov %vm12488_vm3  ;;  %6315 = vmatprep.subr.mxu1 %v11895_v37 }
 0x2e0   :  { %v3565_v26 = vadd.f32 %v3561_v21, %v3545_v20  ;;  %v11783_v20 = vrot.slane %v9026_v7, 1  ;;  %vm12493_vm11 = vmmov %vm12488_vm3 }
 0x2e1   :  { %v6269_v30 = vpop.f32.mrf.mxu1  ;;  %v3559_v52 = vld [vmem:[#allocation4 + $0x60] sm:$0xff]  ;;  %6705 = vrot.lane.b32.xlu1 %v6704_v54, %s6923_s4  ;;  %vm12494_vm8 = vmmov %vm12491_vm7 }
 0x2e2   :  { %v3229_v55 = vadd.f32 %v6269_v30, %v8881_v33  ;;  %v3563_v21 = vadd.f32 %v3559_v52, %v3543_v22  ;;  %vm3569_vm2 = vcmp.ge.f32.partialorder %v3565_v26, 1.0 }
 0x2e3   :  { %v3220_v19 = vpop.f32.mrf.mxu1  ;;  %v3562_v8 = vld [vmem:[#allocation4 + $0x78] sm:$0xff]  ;;  %v6013_v22 = vsel %vm3569_vm2, 1.0, %v11895_v37 }
 0x2e4   :  { %3429 = vst.msk [vmem:[#allocation4 + $0x90] sm:$0xff] %vm12490_vm15, %v3229_v55  ;;  %v3221_v9 = vadd.f32 %v8881_v33, %v3220_v19  ;;  %v3546_v19 = vsel %vm3542_vm14, 0.0, %v3538_v59  ;;  %vm3567_vm3 = vcmp.ge.f32.partialorder %v3563_v21, 1.0  ;;  %v3544_v59 = vsel %vm3540_vm6, 0.0, %v3536_v1  ;;  %vm12496_vm15 = vmmov %vm12491_vm7 }
 0x2e5   :  { %v6270_v30 = vpop.f32.mrf.mxu1  ;;  %v3566_v54 = vadd.f32 %v3562_v8, %v3546_v19  ;;  %3585 = vst.msk [vmem:[#allocation3 + $0x70] sm:$0xff] %vm12493_vm11, %v6013_v22  ;;  %v6011_v56 = vsel %vm3567_vm3, 1.0, %v11895_v37  ;;  %vm12495_vm14 = vcmp.lt.s32.totalorder %v6996_v10, 7  ;;  %v3573_v1 = vsel %vm3569_vm2, 0.0, %v3565_v26  ;;  %vm12499_vm11 = vmmov %vm12494_vm8 }
 0x2e6   :  { %3427 = vst.msk [vmem:[#allocation4 + $0x80] sm:$0xff] %vm12492_vm10, %v3221_v9  ;;  %v3232_v55 = vadd.f32 %v6270_v30, %v8881_v33  ;;  %v6699_v9 = vpack.i.bf16 %v9049_v45, %v9026_v7  ;;  %v3560_v30 = vld [vmem:[#allocation4 + $0x68] sm:$0xff]  ;;  %v9078_v8 = vsel %vm12495_vm14, %v4178_v53, %v11783_v20  ;;  %vm12497_vm10 = vmmov %vm12494_vm8 }
 0x2e7   :  { %v3223_v52 = vpop.f32.mrf.mxu1  ;;  %v3564_v13 = vadd.f32 %v3560_v30, %v3544_v59  ;;  %3583 = vst.msk [vmem:[#allocation3 + $0x60] sm:$0xff] %vm12496_vm15, %v6011_v56  ;;  %vm3570_vm7 = vcmp.ge.f32.partialorder %v3566_v54, 1.0  ;;  %vm12498_vm6 = vmmov %vm12495_vm14 }
 0x2e8   :  { %3430 = vst.msk [vmem:[#allocation4 + $0x98] sm:$0xff] %vm12494_vm8, %v3232_v55  ;;  %v3224_v50 = vadd.f32 %v8881_v33, %v3223_v52  ;;  %6700 = vrot.lane.b32.xlu0 %v6699_v9, %s6923_s4  ;;  %v6014_v19 = vsel %vm3570_vm7, 1.0, %v11895_v37  ;;  %v9086_v52 = vld [vmem:[#allocation3 + $0x50] sm:$0xff]  ;;  %v9088_v9 = vld [vmem:[#allocation3 + $0x58] sm:$0xff]  ;;  %v4299_v56 = vsel %vm12498_vm6, %v4177_v23, %v4178_v53  ;;  %vm12500_vm2 = vmmov %vm12497_vm10  ;;  %v3571_v23 = vsel %vm3567_vm3, 0.0, %v3563_v21 }
 0x2e9   :  { %3586 = vst.msk [vmem:[#allocation3 + $0x78] sm:$0xff] %vm12499_vm11, %v6014_v19  ;;  %vm3568_vm8 = vcmp.ge.f32.partialorder %v3564_v13, 1.0  ;;  %v6714_v26 = vpack.i.bf16 %v9088_v9, %v9086_v52  ;;  %vm12501_vm14 = vmmov %vm12500_vm2  ;;  %v9112_v21 = vld [vmem:[#allocation3 + $0x40] sm:$0xff]  ;;  %v3574_v20 = vsel %vm3570_vm7, 0.0, %v3566_v54 }
 0x2ea   :  { %3428 = vst.msk [vmem:[#allocation4 + $0x88] sm:$0xff] %vm12497_vm10, %v3224_v50  ;;  %v6012_v53 = vsel %vm3568_vm8, 1.0, %v11895_v37  ;;  %vm12502_vm10 = vmmov %vm12500_vm2 }
 0x2eb   :  { %v3589_v55 = vld [vmem:[#allocation4 + $0x90] sm:$0xff]  ;;  %3584 = vst.msk [vmem:[#allocation3 + $0x68] sm:$0xff] %vm12501_vm14, %v6012_v53  ;;  %6715 = vrot.lane.b32.xlu1 %v6714_v26, %s6923_s4  ;;  %vm12503_vm3 = vmmov %vm12500_vm2 }
 0x2ec   :  { %v3593_v50 = vadd.f32 %v3589_v55, %v3573_v1  ;;  %v9105_v55 = vld [vmem:[#allocation3 + $0x48] sm:$0xff]  ;;  %vm12504_vm11 = vmmov %vm12500_vm2 }
 0x2ed   :  { %v3587_v6 = vld [vmem:[#allocation4 + $0x80] sm:$0xff]  ;;  %v6709_v53 = vpack.i.bf16 %v9105_v55, %v9112_v21  ;;  %vm12506_vm7 = vmmov %vm12500_vm2 }
 0x2ee   :  { %v6273_v42 = vpop.f32.mrf.mxu1  ;;  %vm3597_vm15 = vcmp.ge.f32.partialorder %v3593_v50, 1.0  ;;  %vm12507_vm14 = vmmov %vm12503_vm3 }
 0x2ef   :  { %v3245_v32 = vadd.f32 %v6273_v42, %v8881_v33  ;;  %v3590_v59 = vld [vmem:[#allocation4 + $0x98] sm:$0xff]  ;;  %6710 = vrot.lane.b32.xlu0 %v6709_v53, %s6923_s4  ;;  %v3601_v26 = vsel %vm3597_vm15, 0.0, %v3593_v50 }
 0x2f0   :  { %v3236_v22 = vpop.f32.mrf.mxu1  ;;  %v3594_v19 = vadd.f32 %v3590_v59, %v3574_v20 }
 0x2f1   :  { %3433 = vst.msk [vmem:[#allocation4 + $0xb0] sm:$0xff] %vm12500_vm2, %v3245_v32  ;;  %v3237_v42 = vadd.f32 %v8881_v33, %v3236_v22  ;;  %v3591_v32 = vadd.f32 %v3587_v6, %v3571_v23  ;;  %v6017_v23 = vsel %vm3597_vm15, 1.0, %v11895_v37  ;;  %v3588_v30 = vld [vmem:[#allocation4 + $0x88] sm:$0xff]  ;;  %vm12510_vm15 = vmmov %vm12503_vm3 }
 0x2f2   :  { %v6274_v1 = vpop.f32.mrf.mxu1  ;;  %3613 = vst.msk [vmem:[#allocation3 + $0x90] sm:$0xff] %vm12503_vm3, %v6017_v23  ;;  %v4306_v23 = vsel %vm7023_vm4, %v9078_v8, 0.0  ;;  %vm3598_vm2 = vcmp.ge.f32.partialorder %v3594_v19, 1.0  ;;  %v9140_v8 = vld [vmem:[#allocation3 + $0x70] sm:$0xff]  ;;  %vm12508_vm4 = vmmov %vm12503_vm3 }
 0x2f3   :  { %3431 = vst.msk [vmem:[#allocation4 + $0xa0] sm:$0xff] %vm12502_vm10, %v3237_v42  ;;  %v3248_v22 = vadd.f32 %v6274_v1, %v8881_v33  ;;  %vm3595_vm6 = vcmp.ge.f32.partialorder %v3591_v32, 1.0  ;;  %v3572_v1 = vsel %vm3568_vm8, 0.0, %v3564_v13  ;;  %v6018_v24 = vsel %vm3598_vm2, 1.0, %v11895_v37  ;;  %v9142_v42 = vld [vmem:[#allocation3 + $0x78] sm:$0xff]  ;;  %vm12509_vm10 = vmmov %vm12503_vm3 }
 0x2f4   :  { %v3239_v6 = vpop.f32.mrf.mxu1  ;;  %v6015_v44 = vsel %vm3595_vm6, 1.0, %v11895_v37  ;;  %3614 = vst.msk [vmem:[#allocation3 + $0x98] sm:$0xff] %vm12508_vm4, %v6018_v24  ;;  %v6724_v50 = vpack.i.bf16 %v9142_v42, %v9140_v8  ;;  %v9156_v24 = vld [vmem:[#allocation3 + $0x68] sm:$0xff] }
 0x2f5   :  { %3434 = vst.msk [vmem:[#allocation4 + $0xb8] sm:$0xff] %vm12504_vm11, %v3248_v22  ;;  %v3240_v54 = vadd.f32 %v8881_v33, %v3239_v6  ;;  %v3592_v22 = vadd.f32 %v3588_v30, %v3572_v1  ;;  %v9144_v30 = vpack.c.bf16 %v4306_v23, %v4299_v56  ;;  %vm12511_vm11 = vmmov %vm12508_vm4 }
 0x2f6   :  { %3611 = vst.msk [vmem:[#allocation3 + $0x80] sm:$0xff] %vm12506_vm7, %v6015_v44  ;;  %6725 = vrot.lane.b32.xlu1 %v6724_v50, %s6923_s4 }
 0x2f7   :  { %3432 = vst.msk [vmem:[#allocation4 + $0xa8] sm:$0xff] %vm12507_vm14, %v3240_v54  ;;  %vm3596_vm8 = vcmp.ge.f32.partialorder %v3592_v22, 1.0  ;;  %vm12513_vm14 = vmmov %vm12508_vm4 }
 0x2f8   :  { %v3617_v53 = vld [vmem:[#allocation4 + $0xb0] sm:$0xff]  ;;  %v6016_v56 = vsel %vm3596_vm8, 1.0, %v11895_v37 }
 0x2f9   :  { %v6277_v20 = vpop.f32.mrf.mxu1  ;;  %v3621_v44 = vadd.f32 %v3617_v53, %v3601_v26  ;;  %3612 = vst.msk [vmem:[#allocation3 + $0x88] sm:$0xff] %vm12510_vm15, %v6016_v56 }
 0x2fa   :  { %v3261_v13 = vadd.f32 %v6277_v20, %v8881_v33  ;;  %v3599_v20 = vsel %vm3595_vm6, 0.0, %v3591_v32  ;;  %v3615_v6 = vld [vmem:[#allocation4 + $0xa0] sm:$0xff]  ;;  %vm12512_vm6 = vmmov %vm12508_vm4 }
 0x2fb   :  { %v3252_v59 = vpop.f32.mrf.mxu1  ;;  %v3619_v23 = vadd.f32 %v3615_v6, %v3599_v20  ;;  %vm3625_vm3 = vcmp.ge.f32.partialorder %v3621_v44, 1.0  ;;  %v9163_v32 = vld [vmem:[#allocation3 + $0x60] sm:$0xff] }
 0x2fc   :  { %3437 = vst.msk [vmem:[#allocation4 + $0xd0] sm:$0xff] %vm12509_vm10, %v3261_v13  ;;  %v3253_v54 = vadd.f32 %v8881_v33, %v3252_v59  ;;  %v3602_v59 = vsel %vm3598_vm2, 0.0, %v3594_v19  ;;  %v3618_v61 = vld [vmem:[#allocation4 + $0xb8] sm:$0xff]  ;;  %v6021_v6 = vsel %vm3625_vm3, 1.0, %v11895_v37  ;;  %v6719_v56 = vpack.i.bf16 %v9156_v24, %v9163_v32  ;;  %vm12517_vm10 = vmmov %vm12508_vm4 }
 0x2fd   :  { %v6278_v26 = vpop.f32.mrf.mxu1  ;;  %v3622_v13 = vadd.f32 %v3618_v61, %v3602_v59  ;;  %3641 = vst.msk [vmem:[#allocation3 + $0xb0] sm:$0xff] %vm12512_vm6, %v6021_v6  ;;  %vm3623_vm7 = vcmp.ge.f32.partialorder %v3619_v23, 1.0  ;;  %v12514_v59 = vrot.slane %v8957_v58, 7  ;;  %v12515_v6 = vrot.slane %v8949_v17, 7  ;;  %vm12522_vm6 = vmmov %vm12508_vm4 }
 0x2fe   :  { %3435 = vst.msk [vmem:[#allocation4 + $0xc0] sm:$0xff] %vm12511_vm11, %v3253_v54  ;;  %v3264_v53 = vadd.f32 %v6278_v26, %v8881_v33  ;;  %v3600_v26 = vsel %vm3596_vm8, 0.0, %v3592_v22  ;;  %v3616_v1 = vld [vmem:[#allocation4 + $0xa8] sm:$0xff]  ;;  %v6019_v62 = vsel %vm3623_vm7, 1.0, %v11895_v37  ;;  %6720 = vrot.lane.b32.xlu0 %v6719_v56, %s6923_s4  ;;  %vm12516_vm2 = vcmp.lt.s32.totalorder %v6996_v10, 1  ;;  %vm12521_vm11 = vmmov %vm12508_vm4 }
 0x2ff   :  { %v3255_v20 = vpop.f32.mrf.mxu1  ;;  %v3620_v50 = vadd.f32 %v3616_v1, %v3600_v26  ;;  %3639 = vst.msk [vmem:[#allocation3 + $0xa0] sm:$0xff] %vm12508_vm4, %v6019_v62  ;;  %vm3626_vm8 = vcmp.ge.f32.partialorder %v3622_v13, 1.0  ;;  %v3629_v54 = vsel %vm3625_vm3, 0.0, %v3621_v44  ;;  %v12518_v62 = vrot.slane %v8949_v17, 7  ;;  %vm12520_vm15 = vmmov %vm12516_vm2 }
 0x300   :  { %3438 = vst.msk [vmem:[#allocation4 + $0xd8] sm:$0xff] %vm12513_vm14, %v3264_v53  ;;  %v3256_v19 = vadd.f32 %v8881_v33, %v3255_v20  ;;  %v9186_v53 = vsel %vm12516_vm2, %v12515_v6, %v12514_v59  ;;  %v6022_v57 = vsel %vm3626_vm8, 1.0, %v11895_v37  ;;  %v9196_v6 = vld [vmem:[#allocation3 + $0x90] sm:$0xff]  ;;  %v9198_v20 = vld [vmem:[#allocation3 + $0x98] sm:$0xff]  ;;  %v12519_v1 = vrot.slane %v8971_v41, 7  ;;  %vm12523_vm14 = vmmov %vm12508_vm4 }
 0x301   :  { %3642 = vst.msk [vmem:[#allocation3 + $0xb8] sm:$0xff] %vm12521_vm11, %v6022_v57  ;;  %vm3624_vm3 = vcmp.ge.f32.partialorder %v3620_v50, 1.0  ;;  %v3627_v17 = vsel %vm3623_vm7, 0.0, %v3619_v23  ;;  %v9218_v57 = vld [vmem:[#allocation3 + $0x88] sm:$0xff]  ;;  %v9225_v23 = vld [vmem:[#allocation3 + $0x80] sm:$0xff]  ;;  %vm12524_vm7 = vmmov %vm12508_vm4 }
 0x302   :  { %3436 = vst.msk [vmem:[#allocation4 + $0xc8] sm:$0xff] %vm12517_vm10, %v3256_v19  ;;  %v9206_v19 = vsel %vm12520_vm15, %v12519_v1, %v12518_v62  ;;  %v3630_v1 = vsel %vm3626_vm8, 0.0, %v3622_v13  ;;  %vm12525_vm15 = vmmov %vm12508_vm4  ;;  %v3628_v56 = vsel %vm3624_vm3, 0.0, %v3620_v50 }
 0x303   :  { %v3645_v40 = vld [vmem:[#allocation4 + $0xd0] sm:$0xff]  ;;  %vm12526_vm8 = vmmov %vm12508_vm4 }
 0x304   :  { %v3649_v26 = vadd.f32 %v3645_v40, %v3629_v54  ;;  %v6020_v40 = vsel %vm3624_vm3, 1.0, %v11895_v37  ;;  %vm12530_vm3 = vcmp.lt.s32.totalorder %v6996_v10, 7 }
 0x305   :  { %v6281_v61 = vpop.f32.mrf.mxu1  ;;  %v3643_v41 = vld [vmem:[#allocation4 + $0xc0] sm:$0xff]  ;;  %3640 = vst.msk [vmem:[#allocation3 + $0xa8] sm:$0xff] %vm12523_vm14, %v6020_v40  ;;  %v6729_v40 = vpack.i.bf16 %v9218_v57, %v9225_v23  ;;  %vm12531_vm14 = vmmov %vm12508_vm4 }
 0x306   :  { %v3277_v22 = vadd.f32 %v6281_v61, %v8881_v33  ;;  %v6734_v61 = vpack.i.bf16 %v9198_v20, %v9196_v6  ;;  %v3647_v62 = vadd.f32 %v3643_v41, %v3627_v17  ;;  %vm3653_vm2 = vcmp.ge.f32.partialorder %v3649_v26, 1.0 }
 0x307   :  { %v3268_v59 = vpop.f32.mrf.mxu1  ;;  %v3646_v16 = vld [vmem:[#allocation4 + $0xd8] sm:$0xff]  ;;  %v6025_v17 = vsel %vm3653_vm2, 1.0, %v11895_v37  ;;  %6730 = vrot.lane.b32.xlu0 %v6729_v40, %s6923_s4  ;;  %v3657_v50 = vsel %vm3653_vm2, 0.0, %v3649_v26 }
 0x308   :  { %3441 = vst.msk [vmem:[#allocation4 + $0xf0] sm:$0xff] %vm12522_vm6, %v3277_v22  ;;  %v3269_v44 = vadd.f32 %v8881_v33, %v3268_v59  ;;  %6735 = vrot.lane.b32.xlu1 %v6734_v61, %s6923_s4  ;;  %v3650_v22 = vadd.f32 %v3646_v16, %v3630_v1  ;;  %vm3651_vm10 = vcmp.ge.f32.partialorder %v3647_v62, 1.0  ;;  %vm12527_vm6 = vmmov %vm12508_vm4 }
 0x309   :  { %v6282_v54 = vpop.f32.mrf.mxu1  ;;  %3669 = vst.msk [vmem:[#allocation3 + $0xd0] sm:$0xff] %vm12524_vm7, %v6025_v17  ;;  %v3644_v29 = vld [vmem:[#allocation4 + $0xc8] sm:$0xff]  ;;  %v6023_v18 = vsel %vm3651_vm10, 1.0, %v11895_v37  ;;  %vm12532_vm7 = vmmov %vm12508_vm4 }
 0x30a   :  { %3439 = vst.msk [vmem:[#allocation4 + $0xe0] sm:$0xff] %vm12508_vm4, %v3269_v44  ;;  %v3280_v59 = vadd.f32 %v6282_v54, %v8881_v33  ;;  %v3648_v1 = vadd.f32 %v3644_v29, %v3628_v56  ;;  %vm3654_vm11 = vcmp.ge.f32.partialorder %v3650_v22, 1.0  ;;  %v9251_v44 = vld [vmem:[#allocation3 + $0xb0] sm:$0xff]  ;;  %v9253_v29 = vld [vmem:[#allocation3 + $0xb8] sm:$0xff]  ;;  %v12529_v56 = vrot.slane %v9049_v45, 1 }
 0x30b   :  { %v3271_v41 = vpop.f32.mrf.mxu1  ;;  %3667 = vst.msk [vmem:[#allocation3 + $0xc0] sm:$0xff] %vm12526_vm8, %v6023_v18  ;;  %v6026_v54 = vsel %vm3654_vm11, 1.0, %v11895_v37  ;;  %v12528_v18 = vrot.slane %v9035_v27, 1  ;;  %v6744_v17 = vpack.i.bf16 %v9253_v29, %v9251_v44  ;;  %vm12533_vm8 = vmmov %vm12508_vm4 }
 0x30c   :  { %3442 = vst.msk [vmem:[#allocation4 + $0xf8] sm:$0xff] %vm12525_vm15, %v3280_v59  ;;  %v3272_v13 = vadd.f32 %v8881_v33, %v3271_v41  ;;  %vm3652_vm2 = vcmp.ge.f32.partialorder %v3648_v1, 1.0  ;;  %v3655_v41 = vsel %vm3651_vm10, 0.0, %v3647_v62  ;;  %vm12534_vm10 = vmmov %vm12508_vm4 }
 0x30d   :  { %3670 = vst.msk [vmem:[#allocation3 + $0xd8] sm:$0xff] %vm12531_vm14, %v6026_v54  ;;  %v9273_v54 = vld [vmem:[#allocation3 + $0xa8] sm:$0xff]  ;;  %6745 = vrot.lane.b32.xlu1 %v6744_v17, %s6923_s4 }
 0x30e   :  { %3440 = vst.msk [vmem:[#allocation4 + $0xe8] sm:$0xff] %vm12527_vm6, %v3272_v13  ;;  %v9261_v13 = vsel %vm12530_vm3, %v12529_v56, %v12528_v18  ;;  %v3658_v56 = vsel %vm3654_vm11, 0.0, %v3650_v22  ;;  %vm12535_vm3 = vmmov %vm12508_vm4  ;;  %vm12538_vm11 = vcmp.lt.s32.totalorder %v6996_v10, 7 }
 0x30f   :  { %v6285_v16 = vpop.f32.mrf.mxu1  ;;  %v3673_v61 = vld [vmem:[#allocation4 + $0xf0] sm:$0xff]  ;;  %vm12539_vm14 = vmmov %vm12535_vm3 }
 0x310   :  { %v3293_v59 = vadd.f32 %v6285_v16, %v8881_v33  ;;  %v3677_v16 = vadd.f32 %v3673_v61, %v3657_v50  ;;  %v6024_v61 = vsel %vm3652_vm2, 1.0, %v11895_v37 }
 0x311   :  { %v3284_v40 = vpop.f32.mrf.mxu1  ;;  %v3671_v47 = vld [vmem:[#allocation4 + $0xe0] sm:$0xff]  ;;  %3668 = vst.msk [vmem:[#allocation3 + $0xc8] sm:$0xff] %vm12532_vm7, %v6024_v61  ;;  %vm12543_vm7 = vmmov %vm12535_vm3 }
 0x312   :  { %3445 = vst.msk [vmem:[#allocation4 + $0x110] sm:$0xff] %vm12508_vm4, %v3293_v59  ;;  %v3285_v26 = vadd.f32 %v8881_v33, %v3284_v40  ;;  %v3675_v18 = vadd.f32 %v3671_v47, %v3655_v41  ;;  %vm3681_vm15 = vcmp.ge.f32.partialorder %v3677_v16, 1.0  ;;  %v9280_v40 = vld [vmem:[#allocation3 + $0xa0] sm:$0xff]  ;;  %vm12540_vm4 = vmmov %vm12535_vm3 }
 0x313   :  { %v6286_v50 = vpop.f32.mrf.mxu1  ;;  %v3674_v5 = vld [vmem:[#allocation4 + $0xf8] sm:$0xff]  ;;  %v6029_v47 = vsel %vm3681_vm15, 1.0, %v11895_v37  ;;  %v6739_v61 = vpack.i.bf16 %v9273_v54, %v9280_v40  ;;  %v3685_v17 = vsel %vm3681_vm15, 0.0, %v3677_v16  ;;  %vm12546_vm15 = vmmov %vm12535_vm3 }
 0x314   :  { %3443 = vst.msk [vmem:[#allocation4 + $0x100] sm:$0xff] %vm12533_vm8, %v3285_v26  ;;  %v3296_v62 = vadd.f32 %v6286_v50, %v8881_v33  ;;  %v3678_v59 = vadd.f32 %v3674_v5, %v3658_v56  ;;  %vm3679_vm6 = vcmp.ge.f32.partialorder %v3675_v18, 1.0  ;;  %v3656_v50 = vsel %vm3652_vm2, 0.0, %v3648_v1 }
 0x315   :  { %v3287_v41 = vpop.f32.mrf.mxu1  ;;  %3697 = vst.msk [vmem:[#allocation3 + $0xf0] sm:$0xff] %vm12534_vm10, %v6029_v47  ;;  %v3672_v12 = vld [vmem:[#allocation4 + $0xe8] sm:$0xff]  ;;  %v6027_v25 = vsel %vm3679_vm6, 1.0, %v11895_v37  ;;  %6740 = vrot.lane.b32.xlu0 %v6739_v61, %s6923_s4  ;;  %v12536_v56 = vrot.slane %v9049_v45, 1  ;;  %v12537_v47 = vrot.slane %v9026_v7, 1  ;;  %vm12544_vm10 = vmmov %vm12535_vm3 }
 0x316   :  { %3446 = vst.msk [vmem:[#allocation4 + $0x118] sm:$0xff] %vm12535_vm3, %v3296_v62  ;;  %v3288_v22 = vadd.f32 %v8881_v33, %v3287_v41  ;;  %v3676_v26 = vadd.f32 %v3672_v12, %v3656_v50  ;;  %vm3682_vm2 = vcmp.ge.f32.partialorder %v3678_v59, 1.0  ;;  %v9313_v12 = vld [vmem:[#allocation3 + $0xd8] sm:$0xff] }
 0x317   :  { %v4297_v62 = vsel %vm12538_vm11, %v12537_v47, %v12536_v56  ;;  %3695 = vst.msk [vmem:[#allocation3 + $0xe0] sm:$0xff] %vm12539_vm14, %v6027_v25  ;;  %v6030_v0 = vsel %vm3682_vm2, 1.0, %v11895_v37  ;;  %v9311_v56 = vld [vmem:[#allocation3 + $0xd0] sm:$0xff]  ;;  %12542 = vst [vmem:[#allocation10_spill] sm:$0xff] %v9313_v12  ;;  %v4308_v47 = vsel %vm7233_vm12, %v9261_v13, 0.0  ;;  %v3686_v41 = vsel %vm3682_vm2, 0.0, %v3678_v59 }
 0x318   :  { %3444 = vst.msk [vmem:[#allocation4 + $0x108] sm:$0xff] %vm12540_vm4, %v3288_v22  ;;  %12541 = vst [vmem:[#allocation9_spill] sm:$0xff] %v9311_v56  ;;  %vm3680_vm8 = vcmp.ge.f32.partialorder %v3676_v26, 1.0  ;;  %v6754_v16 = vpack.i.bf16 %v9313_v12, %v9311_v56  ;;  %v3683_v22 = vsel %vm3679_vm6, 0.0, %v3675_v18  ;;  %v9331_v18 = vld [vmem:[#allocation3 + $0xc0] sm:$0xff] }
 0x319   :  { %v3701_v63 = vld [vmem:[#allocation4 + $0x110] sm:$0xff]  ;;  %3698 = vst.msk [vmem:[#allocation3 + $0xf8] sm:$0xff] %vm12543_vm7, %v6030_v0  ;;  %v9325_v0 = vld [vmem:[#allocation3 + $0xc8] sm:$0xff]  ;;  %vm12547_vm11 = vmmov %vm12540_vm4  ;;  %v3684_v59 = vsel %vm3680_vm8, 0.0, %v3676_v26 }
 0x31a   :  { %v3705_v50 = vadd.f32 %v3701_v63, %v3685_v17  ;;  %v6028_v63 = vsel %vm3680_vm8, 1.0, %v11895_v37  ;;  %12545 = vst [vmem:[#allocation70_spill] sm:$0xff] %v9325_v0  ;;  %6755 = vrot.lane.b32.xlu1 %v6754_v16, %s6923_s4  ;;  %vm12549_vm6 = vmmov %vm12540_vm4  ;;  %vm12558_vm8 = vcmp.lt.s32.totalorder %v6996_v10, 1 }
 0x31b   :  { %3696 = vst.msk [vmem:[#allocation3 + $0xe8] sm:$0xff] %vm12546_vm15, %v6028_v63  ;;  %vm12550_vm14 = vmmov %vm12540_vm4 }
 0x31c   :  { %v6289_v5 = vpop.f32.mrf.mxu1  ;;  %vm3709_vm3 = vcmp.ge.f32.partialorder %v3705_v50, 1.0  ;;  %vm12552_vm2 = vmmov %vm12540_vm4 }
 0x31d   :  { %v3309_v1 = vadd.f32 %v6289_v5, %v8881_v33  ;;  %v3699_v5 = vld [vmem:[#allocation4 + $0x100] sm:$0xff]  ;;  %v3702_v51 = vld [vmem:[#allocation4 + $0x118] sm:$0xff]  ;;  %vm12553_vm7 = vmmov %vm12552_vm2 }
 0x31e   :  { %v3300_v34 = vpop.f32.mrf.mxu1  ;;  %v3703_v61 = vadd.f32 %v3699_v5, %v3683_v22  ;;  %v6033_v22 = vsel %vm3709_vm3, 1.0, %v11895_v37  ;;  %v3706_v63 = vadd.f32 %v3702_v51, %v3686_v41  ;;  %v9353_v41 = vpack.c.bf16 %v4308_v47, %v4297_v62  ;;  %v9363_v47 = vld [vmem:[#allocation3 + $0xf0] sm:$0xff] }
 0x31f   :  { %3449 = vst.msk [vmem:[#allocation4 + $0x130] sm:$0xff] %vm12544_vm10, %v3309_v1  ;;  %v3301_v25 = vadd.f32 %v8881_v33, %v3300_v34  ;;  %v3700_v1 = vld [vmem:[#allocation4 + $0x108] sm:$0xff]  ;;  %12554 = vst [vmem:[#allocation71_spill] sm:$0xff] %v9363_v47 }
 0x320   :  { %v6290_v17 = vpop.f32.mrf.mxu1  ;;  %3725 = vst.msk [vmem:[#allocation3 + $0x110] sm:$0xff] %vm12549_vm6, %v6033_v22  ;;  %vm3707_vm12 = vcmp.ge.f32.partialorder %v3703_v61, 1.0  ;;  %12551 = vst [vmem:[#allocation15_spill] sm:$0xff] %v9353_v41  ;;  %vm3710_vm4 = vcmp.ge.f32.partialorder %v3706_v63, 1.0  ;;  %v9365_v22 = vld [vmem:[#allocation3 + $0xf8] sm:$0xff] }
 0x321   :  { %3447 = vst.msk [vmem:[#allocation4 + $0x120] sm:$0xff] %vm12547_vm11, %v3301_v25  ;;  %v3312_v34 = vadd.f32 %v6290_v17, %v8881_v33  ;;  %v6749_v25 = vpack.i.bf16 %v9325_v0, %v9331_v18  ;;  %v6031_v15 = vsel %vm3707_vm12, 1.0, %v11895_v37  ;;  %v3704_v17 = vadd.f32 %v3700_v1, %v3684_v59  ;;  %12555 = vst [vmem:[#allocation72_spill] sm:$0xff] %v9365_v22 }
 0x322   :  { %v3303_v5 = vpop.f32.mrf.mxu1  ;;  %3723 = vst.msk [vmem:[#allocation3 + $0x100] sm:$0xff] %vm12552_vm2, %v6031_v15  ;;  %v12556_v15 = vrot.slane %v9049_v45, 7  ;;  %v12557_v59 = vrot.slane %v9026_v7, 7  ;;  %vm12559_vm10 = vmmov %vm12552_vm2  ;;  %v3711_v39 = vsel %vm3707_vm12, 0.0, %v3703_v61 }
 0x323   :  { %3450 = vst.msk [vmem:[#allocation4 + $0x138] sm:$0xff] %vm12550_vm14, %v3312_v34  ;;  %v3304_v13 = vadd.f32 %v8881_v33, %v3303_v5  ;;  %6750 = vrot.lane.b32.xlu0 %v6749_v25, %s6923_s4  ;;  %v3713_v5 = vsel %vm3709_vm3, 0.0, %v3705_v50  ;;  %v6034_v25 = vsel %vm3710_vm4, 1.0, %v11895_v37  ;;  %vm3708_vm15 = vcmp.ge.f32.partialorder %v3704_v17, 1.0  ;;  %vm12560_vm3 = vmmov %vm12552_vm2 }
 0x324   :  { %3726 = vst.msk [vmem:[#allocation3 + $0x118] sm:$0xff] %vm12559_vm10, %v6034_v25  ;;  %v9385_v25 = vld [vmem:[#allocation3 + $0xe8] sm:$0xff]  ;;  %vm12562_vm11 = vmmov %vm12552_vm2 }
 0x325   :  { %v6293_v51 = vpop.f32.mrf.mxu1  ;;  %3448 = vst.msk [vmem:[#allocation4 + $0x128] sm:$0xff] %vm12553_vm7, %v3304_v13  ;;  %v9373_v13 = vsel %vm12558_vm8, %v12557_v59, %v12556_v15  ;;  %12561 = vst [vmem:[#allocation73_spill] sm:$0xff] %v9385_v25 }
 0x326   :  { %v3325_v26 = vadd.f32 %v6293_v51, %v8881_v33  ;;  %v3729_v11 = vld [vmem:[#allocation4 + $0x130] sm:$0xff]  ;;  %v6764_v51 = vpack.i.bf16 %v9365_v22, %v9363_v47  ;;  %vm12563_vm14 = vmmov %vm12552_vm2 }
 0x327   :  { %v3316_v62 = vpop.f32.mrf.mxu1  ;;  %v3733_v1 = vadd.f32 %v3729_v11, %v3713_v5  ;;  %v6032_v11 = vsel %vm3708_vm15, 1.0, %v11895_v37  ;;  %vm12565_vm12 = vmmov %vm12552_vm2 }
 0x328   :  { %3453 = vst.msk [vmem:[#allocation4 + $0x150] sm:$0xff] %vm12560_vm3, %v3325_v26  ;;  %v3317_v50 = vadd.f32 %v8881_v33, %v3316_v62  ;;  %v3727_v35 = vld [vmem:[#allocation4 + $0x120] sm:$0xff]  ;;  %6765 = vrot.lane.b32.xlu1 %v6764_v51, %s6923_s4  ;;  %vm12566_vm7 = vmmov %vm12560_vm3  ;;  %v3712_v51 = vsel %vm3708_vm15, 0.0, %v3704_v17 }
 0x329   :  { %v6294_v5 = vpop.f32.mrf.mxu1  ;;  %v3731_v15 = vadd.f32 %v3727_v35, %v3711_v39  ;;  %3724 = vst.msk [vmem:[#allocation3 + $0x108] sm:$0xff] %vm12562_vm11, %v6032_v11  ;;  %vm3737_vm6 = vcmp.ge.f32.partialorder %v3733_v1, 1.0  ;;  %v9393_v33 = vld [vmem:[%s11650_s5] ss:$0 sm:$0xff]  ;;  %v3714_v35 = vsel %vm3710_vm4, 0.0, %v3706_v63  ;;  %vm12569_vm4 = vmmov %vm12558_vm8 }
 0x32a   :  { %3451 = vst.msk [vmem:[#allocation4 + $0x140] sm:$0xff] %vm12563_vm14, %v3317_v50  ;;  %v3328_v61 = vadd.f32 %v9393_v33, %v6294_v5  ;;  %v9397_v62 = vld [vmem:[#allocation3 + $0xe0] sm:$0xff]  ;;  %v3730_v39 = vld [vmem:[#allocation4 + $0x138] sm:$0xff]  ;;  %v6037_v11 = vsel %vm3737_vm6, 1.0, %v11895_v37  ;;  %vm12570_vm8 = vmmov %vm12560_vm3 }
 0x32b   :  { %12564 = vst [vmem:[#allocation74_spill] sm:$0xff] %v9397_v62  ;;  %v3319_v50 = vpop.f32.mrf.mxu1  ;;  %v6759_v26 = vpack.i.bf16 %v9385_v25, %v9397_v62  ;;  %v3734_v34 = vadd.f32 %v3730_v39, %v3714_v35  ;;  %3753 = vst.msk [vmem:[#allocation3 + $0x130] sm:$0xff] %vm12565_vm12, %v6037_v11  ;;  %vm3735_vm2 = vcmp.ge.f32.partialorder %v3731_v15, 1.0  ;;  %v12567_v39 = vmov %v12557_v59 }
 0x32c   :  { %3454 = vst.msk [vmem:[#allocation4 + $0x158] sm:$0xff] %vm12566_vm7, %v3328_v61  ;;  %v3320_v63 = vadd.f32 %v9393_v33, %v3319_v50  ;;  %v3728_v5 = vld [vmem:[#allocation4 + $0x128] sm:$0xff]  ;;  %v6035_v48 = vsel %vm3735_vm2, 1.0, %v11895_v37  ;;  %v12568_v11 = vrot.slane %v8957_v58, 7  ;;  %vm12571_vm15 = vmmov %vm12560_vm3  ;;  %v3741_v58 = vsel %vm3737_vm6, 0.0, %v3733_v1 }
 0x32d   :  { %6760 = vrot.lane.b32.xlu0 %v6759_v26, %s6923_s4  ;;  %v3732_v17 = vadd.f32 %v3728_v5, %v3712_v51  ;;  %3751 = vst.msk [vmem:[#allocation3 + $0x120] sm:$0xff] %vm12570_vm8, %v6035_v48  ;;  %vm3738_vm10 = vcmp.ge.f32.partialorder %v3734_v34, 1.0  ;;  %vm12572_vm14 = vmmov %vm12560_vm3 }
 0x32e   :  { %v6297_v35 = vpop.f32.mrf.mxu1  ;;  %v9420_v61 = vsel %vm12569_vm4, %v12568_v11, %v12567_v39  ;;  %3452 = vst.msk [vmem:[#allocation4 + $0x148] sm:$0xff] %vm12571_vm15, %v3320_v63  ;;  %v6038_v39 = vsel %vm3738_vm10, 1.0, %v11895_v37  ;;  %v3739_v63 = vsel %vm3735_vm2, 0.0, %v3731_v15  ;;  %vm12574_vm6 = vmmov %vm12560_vm3 }
 0x32f   :  { %v3341_v16 = vadd.f32 %v9393_v33, %v6297_v35  ;;  %v3757_v59 = vld [vmem:[#allocation4 + $0x150] sm:$0xff]  ;;  %3754 = vst.msk [vmem:[#allocation3 + $0x138] sm:$0xff] %vm12560_vm3, %v6038_v39  ;;  %vm3736_vm11 = vcmp.ge.f32.partialorder %v3732_v17, 1.0  ;;  %vm12575_vm7 = vmmov %vm12560_vm3  ;;  %v3742_v39 = vsel %vm3738_vm10, 0.0, %v3734_v34  ;;  %vm12582_vm10 = vcmp.lt.s32.totalorder %v6996_v10, 7 }
 0x330   :  { %v3332_v11 = vpop.f32.mrf.mxu1  ;;  %v3761_v5 = vadd.f32 %v3757_v59, %v3741_v58  ;;  %v6036_v26 = vsel %vm3736_vm11, 1.0, %v11895_v37  ;;  %v9440_v51 = vld [vmem:[#allocation3 + $0x108] sm:$0xff]  ;;  %v9446_v58 = vld [vmem:[#allocation3 + $0x100] sm:$0xff]  ;;  %vm12577_vm2 = vmmov %vm12560_vm3  ;;  %v3740_v1 = vsel %vm3736_vm11, 0.0, %v3732_v17 }
 0x331   :  { %3457 = vst.msk [vmem:[#allocation4 + $0x170] sm:$0xff] %vm12572_vm14, %v3341_v16  ;;  %v3333_v48 = vadd.f32 %v9393_v33, %v3332_v11  ;;  %v3755_v35 = vld [vmem:[#allocation4 + $0x140] sm:$0xff]  ;;  %12573 = vst [vmem:[#allocation75_spill] sm:$0xff] %v9440_v51 }
 0x332   :  { %v6298_v7 = vpop.f32.mrf.mxu1  ;;  %v3759_v59 = vadd.f32 %v3755_v35, %v3739_v63  ;;  %3752 = vst.msk [vmem:[#allocation3 + $0x128] sm:$0xff] %vm12574_vm6, %v6036_v26  ;;  %vm3765_vm12 = vcmp.ge.f32.partialorder %v3761_v5, 1.0  ;;  %12576 = vst [vmem:[#allocation76_spill] sm:$0xff] %v9446_v58  ;;  %v6774_v26 = vpack.i.bf16 %v9440_v51, %v9446_v58 }
 0x333   :  { %3455 = vst.msk [vmem:[#allocation4 + $0x160] sm:$0xff] %vm12575_vm7, %v3333_v48  ;;  %v3344_v15 = vadd.f32 %v9393_v33, %v6298_v7  ;;  %v3758_v11 = vld [vmem:[#allocation4 + $0x158] sm:$0xff]  ;;  %v6041_v50 = vsel %vm3765_vm12, 1.0, %v11895_v37  ;;  %vm12578_vm8 = vmmov %vm12577_vm2  ;;  %v3769_v48 = vsel %vm3765_vm12, 0.0, %v3761_v5 }
 0x334   :  { %v3335_v63 = vpop.f32.mrf.mxu1  ;;  %v3762_v35 = vadd.f32 %v3758_v11, %v3742_v39  ;;  %3781 = vst.msk [vmem:[#allocation3 + $0x150] sm:$0xff] %vm12577_vm2, %v6041_v50  ;;  %vm3763_vm4 = vcmp.ge.f32.partialorder %v3759_v59, 1.0  ;;  %v9458_v7 = vld [vmem:[#allocation3 + $0x118] sm:$0xff]  ;;  %6775 = vrot.lane.b32.xlu1 %v6774_v26, %s6923_s4  ;;  %v12580_v50 = vrot.slane %v9112_v21, 1  ;;  %v12581_v11 = vrot.slane %v9037_v3, 1  ;;  %vm12583_vm15 = vmmov %vm12577_vm2  ;;  %v9477_v26 = vld [vmem:[#allocation3 + $0x110] sm:$0xff] }
 0x335   :  { %3458 = vst.msk [vmem:[#allocation4 + $0x178] sm:$0xff] %vm12578_vm8, %v3344_v15  ;;  %v3336_v34 = vadd.f32 %v9393_v33, %v3335_v63  ;;  %12579 = vst [vmem:[#allocation77_spill] sm:$0xff] %v9458_v7  ;;  %v3756_v14 = vld [vmem:[#allocation4 + $0x148] sm:$0xff]  ;;  %v6039_v46 = vsel %vm3763_vm4, 1.0, %v11895_v37  ;;  %v3767_v16 = vsel %vm3763_vm4, 0.0, %v3759_v59 }
 0x336   :  { %v6301_v39 = vpop.f32.mrf.mxu1  ;;  %v9471_v15 = vsel %vm12582_vm10, %v12581_v11, %v12580_v50  ;;  %v3760_v63 = vadd.f32 %v3756_v14, %v3740_v1  ;;  %3779 = vst.msk [vmem:[#allocation3 + $0x140] sm:$0xff] %vm12583_vm15, %v6039_v46  ;;  %vm3766_vm3 = vcmp.ge.f32.partialorder %v3762_v35, 1.0  ;;  %vm12584_vm11 = vmmov %vm12577_vm2  ;;  %v6784_v14 = vpack.i.bf16 %v9458_v7, %v9477_v26 }
 0x337   :  { %3456 = vst.msk [vmem:[#allocation4 + $0x168] sm:$0xff] %vm12584_vm11, %v3336_v34  ;;  %v3357_v17 = vadd.f32 %v9393_v33, %v6301_v39  ;;  %12585 = vst [vmem:[#allocation78_spill] sm:$0xff] %v9477_v26  ;;  %v6042_v2 = vsel %vm3766_vm3, 1.0, %v11895_v37  ;;  %v12586_v1 = vmov %v12581_v11  ;;  %v12587_v46 = vrot.slane %v9035_v27, 1 }
 0x338   :  { %v3785_v22 = vld [vmem:[#allocation4 + $0x170] sm:$0xff]  ;;  %v3348_v50 = vpop.f32.mrf.mxu1  ;;  %vm12588_vm14 = vmmov %vm12582_vm10  ;;  %vm3764_vm12 = vcmp.ge.f32.partialorder %v3760_v63, 1.0  ;;  %6785 = vrot.lane.b32.xlu1 %v6784_v14, %s6923_s4 }
 0x339   :  { %v4295_v34 = vsel %vm12588_vm14, %v12587_v46, %v12586_v1  ;;  %v3789_v11 = vadd.f32 %v3785_v22, %v3769_v48  ;;  %vm12589_vm6 = vmmov %vm12577_vm2  ;;  %v3349_v5 = vadd.f32 %v9393_v33, %v3348_v50  ;;  %v6040_v38 = vsel %vm3764_vm12, 1.0, %v11895_v37  ;;  %v9500_v48 = vld [vmem:[#allocation3 + $0x128] sm:$0xff]  ;;  %v9506_v50 = vld [vmem:[#allocation3 + $0x120] sm:$0xff] }
 0x33a   :  { %3782 = vst.msk [vmem:[#allocation3 + $0x158] sm:$0xff] %vm12589_vm6, %v6042_v2  ;;  %vm12590_vm7 = vmmov %vm12577_vm2  ;;  %v3783_v47 = vld [vmem:[#allocation4 + $0x160] sm:$0xff]  ;;  %v6302_v22 = vpop.f32.mrf.mxu1  ;;  %v3770_v46 = vsel %vm3766_vm3, 0.0, %v3762_v35  ;;  %v3768_v14 = vsel %vm3764_vm12, 0.0, %v3760_v63  ;;  %vm12602_vm14 = vcmp.lt.s32.totalorder %v6996_v10, 1 }
 0x33b   :  { %3461 = vst.msk [vmem:[#allocation4 + $0x190] sm:$0xff] %vm12590_vm7, %v3357_v17  ;;  %12591 = vst [vmem:[#allocation79_spill] sm:$0xff] %v9500_v48  ;;  %v3787_v2 = vadd.f32 %v3783_v47, %v3767_v16  ;;  %vm3793_vm8 = vcmp.ge.f32.partialorder %v3789_v11, 1.0  ;;  %v3360_v59 = vadd.f32 %v9393_v33, %v6302_v22  ;;  %v9517_v22 = vld [vmem:[#allocation3 + $0x138] sm:$0xff] }
 0x33c   :  { %3780 = vst.msk [vmem:[#allocation3 + $0x148] sm:$0xff] %vm12577_vm2, %v6040_v38  ;;  %vm12592_vm4 = vmmov %vm12577_vm2  ;;  %v3786_v60 = vld [vmem:[#allocation4 + $0x178] sm:$0xff]  ;;  %v6045_v1 = vsel %vm3793_vm8, 1.0, %v11895_v37  ;;  %v3351_v47 = vpop.f32.mrf.mxu1  ;;  %v6794_v38 = vpack.i.bf16 %v9500_v48, %v9506_v50 }
 0x33d   :  { %3459 = vst.msk [vmem:[#allocation4 + $0x180] sm:$0xff] %vm12592_vm4, %v3349_v5  ;;  %12593 = vst [vmem:[#allocation80_spill] sm:$0xff] %v9506_v50  ;;  %v3790_v16 = vadd.f32 %v3786_v60, %v3770_v46  ;;  %vm3791_vm15 = vcmp.ge.f32.partialorder %v3787_v2, 1.0  ;;  %v3352_v5 = vadd.f32 %v9393_v33, %v3351_v47  ;;  %v12600_v46 = vrot.slane %v9037_v3, 7 }
 0x33e   :  { %vm12594_vm10 = vmmov %vm12577_vm2  ;;  %12596 = vst [vmem:[#allocation81_spill] sm:$0xff] %v9517_v22  ;;  %v3784_v39 = vld [vmem:[#allocation4 + $0x168] sm:$0xff]  ;;  %v6043_v26 = vsel %vm3791_vm15, 1.0, %v11895_v37  ;;  %6795 = vrot.lane.b32.xlu1 %v6794_v38, %s6923_s4  ;;  %v12601_v47 = vrot.slane %v9035_v27, 7 }
 0x33f   :  { %3809 = vst.msk [vmem:[#allocation3 + $0x170] sm:$0xff] %vm12594_vm10, %v6045_v1  ;;  %vm12595_vm11 = vmmov %vm12577_vm2  ;;  %v12598_v1 = vld [vmem:[#allocation16_spill] sm:$0xff]  ;;  %v3788_v63 = vadd.f32 %v3784_v39, %v3768_v14  ;;  %vm3794_vm12 = vcmp.ge.f32.partialorder %v3790_v16, 1.0 }
 0x340   :  { %3462 = vst.msk [vmem:[#allocation4 + $0x198] sm:$0xff] %vm12595_vm11, %v3360_v59  ;;  %vm12599_vm3 = vnez %v12598_v1  ;;  %v9535_v17 = vsel %vm12602_vm14, %v12601_v47, %v12600_v46  ;;  %vm12603_vm6 = vmmov %vm12577_vm2  ;;  %v9541_v1 = vld [vmem:[#allocation3 + $0x130] sm:$0xff]  ;;  %v6046_v41 = vsel %vm3794_vm12, 1.0, %v11895_v37  ;;  %v3798_v27 = vsel %vm3794_vm12, 0.0, %v3790_v16 }
 0x341   :  { %v4310_v59 = vsel %vm12599_vm3, %v9471_v15, 0.0  ;;  %3807 = vst.msk [vmem:[#allocation3 + $0x160] sm:$0xff] %vm12603_vm6, %v6043_v26  ;;  %vm12604_vm7 = vmmov %vm12577_vm2  ;;  %v3797_v15 = vsel %vm3793_vm8, 0.0, %v3789_v11  ;;  %v6804_v39 = vpack.i.bf16 %v9517_v22, %v9541_v1  ;;  %vm3792_vm4 = vcmp.ge.f32.partialorder %v3788_v63, 1.0 }
 0x342   :  { %v6305_v60 = vpop.f32.mrf.mxu1  ;;  %3460 = vst.msk [vmem:[#allocation4 + $0x188] sm:$0xff] %vm12604_vm7, %v3352_v5  ;;  %12605 = vst [vmem:[#allocation48_spill] sm:$0xff] %v9541_v1  ;;  %v3813_v25 = vld [vmem:[#allocation4 + $0x190] sm:$0xff]  ;;  %v9548_v26 = vpack.c.bf16 %v4310_v59, %v4295_v34  ;;  %v6044_v12 = vsel %vm3792_vm4, 1.0, %v11895_v37  ;;  %v12610_v59 = vrot.slane %v9049_v45, 7 }
 0x343   :  { %v3373_v38 = vadd.f32 %v9393_v33, %v6305_v60  ;;  %v3817_v14 = vadd.f32 %v3813_v25, %v3797_v15  ;;  %3810 = vst.msk [vmem:[#allocation3 + $0x178] sm:$0xff] %vm12577_vm2, %v6046_v41  ;;  %vm12607_vm10 = vmmov %vm12577_vm2  ;;  %v3795_v60 = vsel %vm3791_vm15, 0.0, %v3787_v2  ;;  %6805 = vrot.lane.b32.xlu1 %v6804_v39, %s6923_s4  ;;  %v9559_v34 = vld [vmem:[#allocation3 + $0x148] sm:$0xff]  ;;  %v12609_v41 = vmov %v12601_v47  ;;  %v9573_v39 = vld [vmem:[#allocation3 + $0x140] sm:$0xff] }
 0x344   :  { %v3364_v46 = vpop.f32.mrf.mxu1  ;;  %12606 = vst [vmem:[#allocation16_spill] sm:$0xff] %v9548_v26  ;;  %v3811_v58 = vld [vmem:[#allocation4 + $0x180] sm:$0xff]  ;;  %12608 = vst [vmem:[#allocation82_spill] sm:$0xff] %v9559_v34 }
 0x345   :  { %3465 = vst.msk [vmem:[#allocation4 + $0x1b0] sm:$0xff] %vm12607_vm10, %v3373_v38  ;;  %v3365_v11 = vadd.f32 %v9393_v33, %v3364_v46  ;;  %vm12611_vm8 = vmmov %vm12602_vm14  ;;  %v3815_v2 = vadd.f32 %v3811_v58, %v3795_v60  ;;  %vm3821_vm11 = vcmp.ge.f32.partialorder %v3817_v14, 1.0  ;;  %v6814_v58 = vpack.i.bf16 %v9559_v34, %v9573_v39 }
 0x346   :  { %v6306_v25 = vpop.f32.mrf.mxu1  ;;  %v9567_v38 = vsel %vm12611_vm8, %v12610_v59, %v12609_v41  ;;  %vm12612_vm15 = vmmov %vm12577_vm2  ;;  %12614 = vst [vmem:[#allocation83_spill] sm:$0xff] %v9573_v39  ;;  %v6049_v45 = vsel %vm3821_vm11, 1.0, %v11895_v37  ;;  %v9600_v15 = vld [vmem:[#allocation3 + $0x170] sm:$0xff] }
 0x347   :  { %3808 = vst.msk [vmem:[#allocation3 + $0x168] sm:$0xff] %vm12612_vm15, %v6044_v12  ;;  %vm12613_vm3 = vmmov %vm12577_vm2  ;;  %v3376_v46 = vadd.f32 %v9393_v33, %v6306_v25  ;;  %v3814_v47 = vld [vmem:[#allocation4 + $0x198] sm:$0xff]  ;;  %vm3819_vm6 = vcmp.ge.f32.partialorder %v3815_v2, 1.0  ;;  %v3796_v25 = vsel %vm3792_vm4, 0.0, %v3788_v63  ;;  %6815 = vrot.lane.b32.xlu1 %v6814_v58, %s6923_s4  ;;  %vm12623_vm4 = vcmp.lt.s32.totalorder %v6996_v10, 7 }
 0x348   :  { %3463 = vst.msk [vmem:[#allocation4 + $0x1a0] sm:$0xff] %vm12613_vm3, %v3365_v11  ;;  %v3367_v59 = vpop.f32.mrf.mxu1  ;;  %v3962_v12 = vld [vmem:[#allocation3 + $0x158] sm:$0xff]  ;;  %v3818_v60 = vadd.f32 %v3814_v47, %v3798_v27  ;;  %vm12615_vm14 = vmmov %vm12577_vm2  ;;  %v6047_v34 = vsel %vm3819_vm6, 1.0, %v11895_v37  ;;  %v9591_v27 = vld [vmem:[#allocation3 + $0x150] sm:$0xff] }
 0x349   :  { %3837 = vst.msk [vmem:[#allocation3 + $0x190] sm:$0xff] %vm12615_vm14, %v6049_v45  ;;  %vm12616_vm7 = vmmov %vm12577_vm2  ;;  %v3368_v16 = vadd.f32 %v9393_v33, %v3367_v59  ;;  %v3812_v5 = vld [vmem:[#allocation4 + $0x188] sm:$0xff]  ;;  %v3825_v59 = vsel %vm3821_vm11, 0.0, %v3817_v14  ;;  %v12625_v14 = vrot.slane %v9112_v21, 1 }
 0x34a   :  { %3466 = vst.msk [vmem:[#allocation4 + $0x1b8] sm:$0xff] %vm12616_vm7, %v3376_v46  ;;  %12617 = vst [vmem:[#allocation84_spill] sm:$0xff] %v9591_v27  ;;  %v3816_v45 = vadd.f32 %v3812_v5, %v3796_v25  ;;  %v6824_v46 = vpack.i.bf16 %v3962_v12, %v9591_v27  ;;  %v9602_v1 = vld [vmem:[#allocation3 + $0x178] sm:$0xff]  ;;  %v12621_v5 = vrot.slane %v9086_v52, 1 }
 0x34b   :  { %v6309_v47 = vpop.f32.mrf.mxu1  ;;  %vm12618_vm12 = vmmov %vm12577_vm2  ;;  %vm3822_vm2 = vcmp.ge.f32.partialorder %v3818_v60, 1.0  ;;  %12620 = vst [vmem:[#allocation85_spill] sm:$0xff] %v9600_v15 }
 0x34c   :  { %3835 = vst.msk [vmem:[#allocation3 + $0x180] sm:$0xff] %vm12618_vm12, %v6047_v34  ;;  %vm12619_vm10 = vmmov %vm12613_vm3  ;;  %v3389_v63 = vadd.f32 %v9393_v33, %v6309_v47  ;;  %v3841_v41 = vld [vmem:[#allocation4 + $0x1b0] sm:$0xff]  ;;  %v6050_v11 = vsel %vm3822_vm2, 1.0, %v11895_v37  ;;  %v12622_v34 = vrot.slane %v9105_v55, 1  ;;  %vm3820_vm11 = vcmp.ge.f32.partialorder %v3816_v45, 1.0  ;;  %6825 = vrot.lane.b32.xlu1 %v6824_v46, %s6923_s4 }
 0x34d   :  { %3464 = vst.msk [vmem:[#allocation4 + $0x1a8] sm:$0xff] %vm12619_vm10, %v3368_v16  ;;  %v3380_v58 = vpop.f32.mrf.mxu1  ;;  %vm12626_vm8 = vmmov %vm12623_vm4  ;;  %v3845_v47 = vadd.f32 %v3841_v41, %v3825_v59  ;;  %v6048_v41 = vsel %vm3820_vm11, 1.0, %v11895_v37  ;;  %v3826_v46 = vsel %vm3822_vm2, 0.0, %v3818_v60 }
 0x34e   :  { %v9610_v16 = vsel %vm12623_vm4, %v12622_v34, %v12621_v5  ;;  %v12624_v12 = vmov %v12622_v34  ;;  %vm12627_vm15 = vmmov %vm12613_vm3  ;;  %3469 = vst.msk [vmem:[#allocation4 + $0x1d0] sm:$0xff] %vm12613_vm3, %v3389_v63  ;;  %v3381_v7 = vadd.f32 %v9393_v33, %v3380_v58  ;;  %v6769_v5 = vpack.i.bf16 %v9602_v1, %v9600_v15  ;;  %v9631_v59 = vld [vmem:[#allocation3 + $0x168] sm:$0xff] }
 0x34f   :  { %v9618_v25 = vsel %vm12626_vm8, %v12625_v14, %v12624_v12  ;;  %3838 = vst.msk [vmem:[#allocation3 + $0x198] sm:$0xff] %vm12627_vm15, %v6050_v11  ;;  %v3823_v34 = vsel %vm3819_vm6, 0.0, %v3815_v2  ;;  %v3839_v50 = vld [vmem:[#allocation4 + $0x1a0] sm:$0xff]  ;;  %v6310_v11 = vpop.f32.mrf.mxu1  ;;  %12628 = vst [vmem:[#allocation86_spill] sm:$0xff] %v9631_v59  ;;  %vm3849_vm7 = vcmp.ge.f32.partialorder %v3845_v47, 1.0 }
 0x350   :  { %v3843_v58 = vadd.f32 %v3839_v50, %v3823_v34  ;;  %vm12629_vm14 = vmmov %vm12613_vm3  ;;  %v3392_v2 = vadd.f32 %v9393_v33, %v6310_v11  ;;  %6770 = vrot.lane.b32.xlu0 %v6769_v5, %s6923_s4  ;;  %v3963_v12 = vld [vmem:[#allocation3 + $0x160] sm:$0xff]  ;;  %v6053_v26 = vsel %vm3849_vm7, 1.0, %v11895_v37 }
 0x351   :  { %3836 = vst.msk [vmem:[#allocation3 + $0x188] sm:$0xff] %vm12629_vm14, %v6048_v41  ;;  %vm12630_vm6 = vmmov %vm12613_vm3  ;;  %v3842_v51 = vld [vmem:[#allocation4 + $0x1b8] sm:$0xff]  ;;  %v3383_v63 = vpop.f32.mrf.mxu1  ;;  %v6834_v50 = vpack.i.bf16 %v9631_v59, %v3963_v12  ;;  %v3824_v41 = vsel %vm3820_vm11, 0.0, %v3816_v45  ;;  %vm12637_vm11 = vcmp.lt.s32.totalorder %v6996_v10, 1 }
 0x352   :  { %3467 = vst.msk [vmem:[#allocation4 + $0x1c0] sm:$0xff] %vm12630_vm6, %v3381_v7  ;;  %v3846_v34 = vadd.f32 %v3842_v51, %v3826_v46  ;;  %vm12631_vm12 = vmmov %vm12613_vm3  ;;  %vm3847_vm10 = vcmp.ge.f32.partialorder %v3843_v58, 1.0  ;;  %v3384_v5 = vadd.f32 %v9393_v33, %v3383_v63  ;;  %v4222_v63 = vrot.slane %v9602_v1, 1 }
 0x353   :  { %3865 = vst.msk [vmem:[#allocation3 + $0x1b0] sm:$0xff] %vm12631_vm12, %v6053_v26  ;;  %vm12632_vm4 = vmmov %vm12613_vm3  ;;  %v6051_v12 = vsel %vm3847_vm10, 1.0, %v11895_v37  ;;  %6835 = vrot.lane.b32.xlu1 %v6834_v50, %s6923_s4  ;;  %v9653_v51 = vld [vmem:[#allocation3 + $0x180] sm:$0xff]  ;;  %v3851_v50 = vsel %vm3847_vm10, 0.0, %v3843_v58 }
 0x354   :  { %3470 = vst.msk [vmem:[#allocation4 + $0x1d8] sm:$0xff] %vm12632_vm4, %v3392_v2  ;;  %v3840_v60 = vld [vmem:[#allocation4 + $0x1a8] sm:$0xff]  ;;  %vm12633_vm2 = vmmov %vm12613_vm3  ;;  %vm3850_vm8 = vcmp.ge.f32.partialorder %v3846_v34, 1.0  ;;  %v11837_v45 = vrot.slane %v9653_v51, 1  ;;  %v3853_v2 = vsel %vm3849_vm7, 0.0, %v3845_v47  ;;  %vm12640_vm7 = vcmp.lt.s32.totalorder %v6996_v10, 7 }
 0x355   :  { %v3844_v26 = vadd.f32 %v3840_v60, %v3824_v41  ;;  %3863 = vst.msk [vmem:[#allocation3 + $0x1a0] sm:$0xff] %vm12633_vm2, %v6051_v12  ;;  %vm12634_vm15 = vmmov %vm12633_vm2  ;;  %v3869_v46 = vld [vmem:[#allocation4 + $0x1d0] sm:$0xff]  ;;  %v6054_v11 = vsel %vm3850_vm8, 1.0, %v11895_v37  ;;  %v6313_v7 = vpop.f32.mrf.mxu1  ;;  %v12635_v41 = vrot.slane %v9105_v55, 7  ;;  %v12636_v60 = vrot.slane %v9112_v21, 7 }
 0x356   :  { %3468 = vst.msk [vmem:[#allocation4 + $0x1c8] sm:$0xff] %vm12634_vm15, %v3384_v5  ;;  %v3873_v5 = vadd.f32 %v3869_v46, %v3853_v2  ;;  %vm12639_vm3 = vmmov %vm12633_vm2  ;;  %v3405_v47 = vadd.f32 %v9393_v33, %v6313_v7  ;;  %v4254_v14 = vsel %vm12640_vm7, %v4222_v63, %v11837_v45  ;;  %v3854_v39 = vsel %vm3850_vm8, 0.0, %v3846_v34  ;;  %v9705_v22 = vld [vmem:[#allocation3 + $0x198] sm:$0xff] }
 0x357   :  { %v9669_v12 = vsel %vm12637_vm11, %v12636_v60, %v12635_v41  ;;  %3866 = vst.msk [vmem:[#allocation3 + $0x1b8] sm:$0xff] %vm12639_vm3, %v6054_v11  ;;  %vm3848_vm14 = vcmp.ge.f32.partialorder %v3844_v26, 1.0  ;;  %v3396_v60 = vpop.f32.mrf.mxu1  ;;  %v12641_v11 = vld [vmem:[#allocation42_spill] sm:$0xff]  ;;  %vm12643_vm12 = vmmov %vm12633_vm2 }
 0x358   :  { %12638 = vst [vmem:[#allocation87_spill] sm:$0xff] %v9669_v12  ;;  %v6052_v41 = vsel %vm3848_vm14, 1.0, %v11895_v37  ;;  %v9681_v2 = vld [vmem:[#allocation3 + $0x188] sm:$0xff]  ;;  %vm12642_vm6 = vnez %v12641_v11  ;;  %vm12644_vm4 = vmmov %vm12633_vm2  ;;  %vm3877_vm2 = vcmp.ge.f32.partialorder %v3873_v5, 1.0  ;;  %v3397_v58 = vadd.f32 %v9393_v33, %v3396_v60  ;;  %v9703_v60 = vld [vmem:[#allocation3 + $0x190] sm:$0xff] }
 0x359   :  { %v3867_v27 = vld [vmem:[#allocation4 + $0x1c0] sm:$0xff]  ;;  %v4350_v46 = vsel %vm12642_vm6, %v4254_v14, 0.0  ;;  %3864 = vst.msk [vmem:[#allocation3 + $0x1a8] sm:$0xff] %vm12643_vm12, %v6052_v41  ;;  %v6057_v12 = vsel %vm3877_vm2, 1.0, %v11895_v37  ;;  %v6314_v11 = vpop.f32.mrf.mxu1  ;;  %v12646_v14 = vrot.slane %v9600_v15, 1  ;;  %vm12647_vm10 = vmmov %vm12640_vm7  ;;  %v3852_v0 = vsel %vm3848_vm14, 0.0, %v3844_v26 }
 0x35a   :  { %v3871_v7 = vadd.f32 %v3867_v27, %v3851_v50  ;;  %3473 = vst.msk [vmem:[#allocation4 + $0x1f0] sm:$0xff] %vm12644_vm4, %v3405_v47  ;;  %v6779_v27 = vpack.i.bf16 %v9681_v2, %v9653_v51  ;;  %vm12648_vm15 = vmmov %vm12639_vm3  ;;  %v3408_v34 = vadd.f32 %v9393_v33, %v6314_v11  ;;  %v12653_v26 = vld [vmem:[#allocation17_spill] sm:$0xff] }
 0x35b   :  { %v3870_v48 = vld [vmem:[#allocation4 + $0x1d8] sm:$0xff]  ;;  %v4255_v50 = vsel %vm12647_vm10, %v12646_v14, %v4222_v63  ;;  %3893 = vst.msk [vmem:[#allocation3 + $0x1d0] sm:$0xff] %vm12648_vm15, %v6057_v12  ;;  %vm12649_vm11 = vmmov %vm12639_vm3  ;;  %vm12654_vm14 = vnez %v12653_v26 }
 0x35c   :  { %v3874_v47 = vadd.f32 %v3870_v48, %v3854_v39  ;;  %3471 = vst.msk [vmem:[#allocation4 + $0x1e0] sm:$0xff] %vm12649_vm11, %v3397_v58  ;;  %vm3875_vm3 = vcmp.ge.f32.partialorder %v3871_v7, 1.0  ;;  %v4734_v41 = vpack.c.bf16 %v4350_v46, %v4255_v50  ;;  %v3399_v39 = vpop.f32.mrf.mxu1  ;;  %6780 = vrot.lane.b32.xlu0 %v6779_v27, %s6923_s4  ;;  %vm12650_vm8 = vmmov %vm12644_vm4  ;;  %v4312_v58 = vsel %vm12654_vm14, %v9610_v16, 0.0 }
 0x35d   :  { %v3868_v56 = vld [vmem:[#allocation4 + $0x1c8] sm:$0xff]  ;;  %v6055_v48 = vsel %vm3875_vm3, 1.0, %v11895_v37  ;;  %vm12651_vm7 = vmmov %vm12644_vm4  ;;  %v3400_v46 = vadd.f32 %v9393_v33, %v3399_v39  ;;  %v3881_v27 = vsel %vm3877_vm2, 0.0, %v3873_v5  ;;  %v9736_v5 = vld [vmem:[#allocation3 + $0x1a0] sm:$0xff]  ;;  %vm12660_vm11 = vcmp.lt.s32.totalorder %v6996_v10, 1 }
 0x35e   :  { %v3872_v12 = vadd.f32 %v3868_v56, %v3852_v0  ;;  %3891 = vst.msk [vmem:[#allocation3 + $0x1c0] sm:$0xff] %vm12650_vm8, %v6055_v48  ;;  %vm3878_vm6 = vcmp.ge.f32.partialorder %v3874_v47, 1.0  ;;  %vm12652_vm12 = vmmov %vm12644_vm4  ;;  %v6789_v0 = vpack.i.bf16 %v9705_v22, %v9703_v60  ;;  %v9748_v33 = vld [vmem:[#allocation3 + $0x1b8] sm:$0xff]  ;;  %v12659_v48 = vrot.slane %v9037_v3, 7 }
 0x35f   :  { %3474 = vst.msk [vmem:[#allocation4 + $0x1f8] sm:$0xff] %vm12651_vm7, %v3408_v34  ;;  %6099 = vmatprep.mubr.msk.bf16.mxu1 %vm12652_vm12, %v4734_v41  ;;  %v6058_v11 = vsel %vm3878_vm6, 1.0, %v11895_v37  ;;  %vm12655_vm10 = vmmov %vm12644_vm4  ;;  %v3879_v34 = vsel %vm3875_vm3, 0.0, %v3871_v7  ;;  %vm12663_vm3 = vcmp.lt.s32.totalorder %v6996_v10, 7  ;;  %v12667_v3 = vrot.slane %v9088_v9, 7 }
 0x360   :  { %3894 = vst.msk [vmem:[#allocation3 + $0x1d8] sm:$0xff] %vm12644_vm4, %v6058_v11  ;;  %vm3876_vm15 = vcmp.ge.f32.partialorder %v3872_v12, 1.0  ;;  %6790 = vrot.lane.b32.xlu0 %v6789_v0, %s6923_s4  ;;  %v9738_v39 = vld [vmem:[#allocation3 + $0x1a8] sm:$0xff]  ;;  %vm12657_vm2 = vmmov %vm12644_vm4  ;;  %v12658_v0 = vrot.slane %v9112_v21, 7  ;;  %v12665_v11 = vrot.slane %v9086_v52, 1  ;;  %v12668_v7 = vrot.slane %v9086_v52, 7 }
 0x361   :  { %3472 = vst.msk [vmem:[#allocation4 + $0x1e8] sm:$0xff] %vm12655_vm10, %v3400_v46  ;;  %v3897_v50 = vld [vmem:[#allocation4 + $0x1f0] sm:$0xff]  ;;  %v6056_v41 = vsel %vm3876_vm15, 1.0, %v11895_v37  ;;  %v9741_v46 = vpack.c.bf16 %v4312_v58, %v9618_v25  ;;  %v6799_v14 = vpack.i.bf16 %v9738_v39, %v9736_v5  ;;  %v12661_v58 = vrot.slane %v9163_v32, 1  ;;  %vm12666_vm8 = vmmov %vm12663_vm3 }
 0x362   :  { %v3901_v26 = vadd.f32 %v3897_v50, %v3881_v27  ;;  %3892 = vst.msk [vmem:[#allocation3 + $0x1c8] sm:$0xff] %vm12657_vm2, %v6056_v41  ;;  %v9756_v25 = vsel %vm12660_vm11, %v12659_v48, %v12658_v0  ;;  %v12662_v27 = vrot.slane %v9088_v9, 1  ;;  %vm12669_vm7 = vmmov %vm12660_vm11  ;;  %v3882_v56 = vsel %vm3878_vm6, 0.0, %v3874_v47 }
 0x363   :  { %12656 = vst [vmem:[#allocation42_spill] sm:$0xff] %v9741_v46  ;;  %v3895_v16 = vld [vmem:[#allocation4 + $0x1e0] sm:$0xff]  ;;  %v9776_v48 = vsel %vm12669_vm7, %v12668_v7, %v12667_v3  ;;  %v12672_v46 = vmov %v12668_v7  ;;  %v12673_v7 = vrot.slane %v9105_v55, 7  ;;  %vm12674_vm4 = vmmov %vm12669_vm7  ;;  %v12675_v47 = vrot.slane %v9140_v8, 1 }
 0x364   :  { %v4290_v50 = vsel %vm12663_vm3, %v12662_v27, %v12661_v58  ;;  %v12664_v41 = vmov %v12662_v27  ;;  %vm3905_vm12 = vcmp.ge.f32.partialorder %v3901_v26, 1.0  ;;  %v3899_v0 = vadd.f32 %v3895_v16, %v3879_v34  ;;  %6800 = vrot.lane.b32.xlu0 %v6799_v14, %s6923_s4  ;;  %vm12677_vm6 = vmmov %vm12663_vm3 }
 0x365   :  { %v4291_v21 = vsel %vm12666_vm8, %v12665_v11, %v12664_v41  ;;  %v6061_v27 = vsel %vm3905_vm12, 1.0, %v11895_v37  ;;  %v9782_v11 = vld [vmem:[#allocation3 + $0x1b0] sm:$0xff]  ;;  %v9792_v16 = vsel %vm12674_vm4, %v12673_v7, %v12672_v46  ;;  %v12676_v34 = vrot.slane %v9156_v24, 1  ;;  %vm12678_vm10 = vmmov %vm12657_vm2 }
 0x366   :  { %v3898_v63 = vld [vmem:[#allocation4 + $0x1f8] sm:$0xff]  ;;  %3917 = vst.msk [vmem:[#allocation3 + $0x1f0] sm:$0xff] %vm12678_vm10, %v6061_v27  ;;  %vm3903_vm2 = vcmp.ge.f32.partialorder %v3899_v0, 1.0  ;;  %v6809_v52 = vpack.i.bf16 %v9748_v33, %v9782_v11  ;;  %v3880_v46 = vsel %vm3876_vm15, 0.0, %v3872_v12  ;;  %v12681_v7 = vmov %v12661_v58  ;;  %vm12682_vm11 = vmmov %vm12663_vm3  ;;  %v12683_v27 = vld [vmem:[#allocation22_spill] sm:$0xff] }
 0x367   :  { %v12670_v41 = vld [vmem:[#allocation19_spill] sm:$0xff]  ;;  %v4288_v14 = vsel %vm12677_vm6, %v12676_v34, %v12675_v47  ;;  %v3902_v26 = vadd.f32 %v3898_v63, %v3882_v56  ;;  %v6059_v55 = vsel %vm3903_vm2, 1.0, %v11895_v37  ;;  %vm12684_vm3 = vnez %v12683_v27  ;;  %vm12685_vm8 = vmmov %vm12678_vm10  ;;  %v9820_v0 = vld [vmem:[#allocation3 + $0x1c0] sm:$0xff]  ;;  %v6696_v27 = vpop.permute.xlu1 %6695 }
 0x368   :  { %vm12671_vm14 = vnez %v12670_v41  ;;  %v3896_v3 = vld [vmem:[#allocation4 + $0x1e8] sm:$0xff]  ;;  %v12680_v41 = vmov %v12676_v34  ;;  %v4316_v63 = vsel %vm12684_vm3, %v4288_v14, 0.0  ;;  %3915 = vst.msk [vmem:[#allocation3 + $0x1e0] sm:$0xff] %vm12685_vm8, %v6059_v55  ;;  %6810 = vrot.lane.b32.xlu0 %v6809_v52, %s6923_s4  ;;  %v12687_v14 = vrot.slane %v9156_v24, 7  ;;  %vm12689_vm15 = vmmov %vm12674_vm4  ;;  %v12700_v58 = vld [vmem:[#allocation23_spill] sm:$0xff] }
 0x369   :  { %v4314_v62 = vsel %vm12671_vm14, %v4290_v50, 0.0  ;;  %v4289_v47 = vsel %vm12682_vm11, %v12681_v7, %v12680_v41  ;;  %vm3906_vm7 = vcmp.ge.f32.partialorder %v3902_v26, 1.0  ;;  %v9822_v34 = vld [vmem:[#allocation3 + $0x1c8] sm:$0xff]  ;;  %v12688_v55 = vrot.slane %v9163_v32, 7  ;;  %vm12692_vm12 = vmmov %vm12674_vm4 }
 0x36a   :  { %v9803_v50 = vpack.c.bf16 %v4314_v62, %v4291_v21  ;;  %v3900_v62 = vadd.f32 %v3896_v3, %v3880_v46  ;;  %v6062_v12 = vsel %vm3906_vm7, 1.0, %v11895_v37  ;;  %v9824_v41 = vpack.c.bf16 %v4316_v63, %v4289_v47  ;;  %vm12693_vm14 = vmmov %vm12685_vm8 }
 0x36b   :  { %v9832_v26 = vsel %vm12689_vm15, %v12688_v55, %v12687_v14  ;;  %v12690_v46 = vmov %v12688_v55  ;;  %v12691_v3 = vrot.slane %v9088_v9, 7  ;;  %3918 = vst.msk [vmem:[#allocation3 + $0x1f8] sm:$0xff] %vm12693_vm14, %v6062_v12  ;;  %v6819_v63 = vpack.i.bf16 %v9822_v34, %v9820_v0  ;;  %v9848_v9 = vld [vmem:[#allocation3 + $0x1d8] sm:$0xff]  ;;  %vm12696_vm10 = vmmov %vm12685_vm8 }
 0x36c   :  { %12679 = vst [vmem:[#allocation50_spill] sm:$0xff] %v9803_v50  ;;  %12686 = vst [vmem:[#allocation17_spill] sm:$0xff] %v9824_v41  ;;  %vm3904_vm4 = vcmp.ge.f32.partialorder %v3900_v62, 1.0  ;;  %v6698_v32 = vunpack.i.h.bf16 %v6696_v27  ;;  %v6697_v55 = vunpack.i.l.bf16 %v6696_v27  ;;  %v12698_v21 = vrot.slane %v9140_v8, 1 }
 0x36d   :  { %v9840_v52 = vsel %vm12692_vm12, %v12691_v3, %v12690_v46  ;;  %v6060_v14 = vsel %vm3904_vm4, 1.0, %v11895_v37  ;;  %v12694_v46 = vrot.slane %v9225_v23, 1  ;;  %v12695_v3 = vrot.slane %v9142_v42, 1  ;;  %vm12699_vm2 = vmmov %vm12677_vm6  ;;  %6820 = vrot.lane.b32.xlu0 %v6819_v63, %s6923_s4 }
 0x36e   :  { %3916 = vst.msk [vmem:[#allocation3 + $0x1e8] sm:$0xff] %vm12696_vm10, %v6060_v14  ;;  %vm12701_vm11 = vnez %v12700_v58  ;;  %v12702_v7 = vrot.slane %v9142_v42, 7  ;;  %v12703_v56 = vrot.slane %v9140_v8, 7  ;;  %vm12704_vm3 = vmmov %vm12692_vm12  ;;  %v6691_v58 = vpop.permute.xlu0 %6690  ;;  %v12723_v63 = vrot.slane %v9142_v42, 7 }
 0x36f   :  { %v4286_v62 = vsel %vm12677_vm6, %v12695_v3, %v12694_v46  ;;  %v12697_v12 = vmov %v12695_v3  ;;  %v12706_v46 = vrot.slane %v9156_v24, 7  ;;  %vm12707_vm8 = vmmov %vm12704_vm3  ;;  %v6692_v50 = vunpack.i.l.bf16 %v6691_v58 }
 0x370   :  { %v4287_v47 = vsel %vm12699_vm2, %v12698_v21, %v12697_v12  ;;  %v4318_v27 = vsel %vm12701_vm11, %v4286_v62, 0.0  ;;  %v9871_v37 = vsel %vm12704_vm3, %v12703_v56, %v12702_v7  ;;  %v12705_v14 = vmov %v12703_v56  ;;  %v9883_v62 = vld [vmem:[#allocation3 + $0x1d0] sm:$0xff]  ;;  %vm12709_vm7 = vmmov %vm12696_vm10 }
 0x371   :  { %v9879_v3 = vsel %vm12707_vm8, %v12706_v46, %v12705_v14  ;;  %v12708_v56 = vsel %vm7048_vm9, %v9206_v19, 0.0  ;;  %vm12710_vm15 = vmmov %vm12709_vm7  ;;  %v9896_v24 = vpack.c.bf16 %v4318_v27, %v4287_v47  ;;  %v6829_v14 = vpack.i.bf16 %v9848_v9, %v9883_v62 }
 0x372   :  { %v9890_v7 = vsel %vm12709_vm7, %v12708_v56, %v6697_v55  ;;  %v9894_v8 = vsel %vm12710_vm15, %v9186_v53, %v6698_v32  ;;  %v12712_v19 = vrot.slane %v9196_v6, 1  ;;  %v12713_v55 = vrot.slane %v9218_v57, 1  ;;  %vm12714_vm9 = vmmov %vm12699_vm2 }
 0x373   :  { %12711 = vst [vmem:[#allocation19_spill] sm:$0xff] %v9896_v24  ;;  %v12716_v32 = vrot.slane %v9225_v23, 1  ;;  %vm12717_vm12 = vmmov %vm12699_vm2  ;;  %v12718_v46 = vrot.slane %v9218_v57, 7  ;;  %v12719_v56 = vrot.slane %v9225_v23, 7  ;;  %6830 = vrot.lane.b32.xlu0 %v6829_v14, %s6923_s4  ;;  %v9941_v23 = vld [vmem:[#allocation3 + $0x1f0] sm:$0xff]  ;;  %v12733_v14 = vrot.slane %v9198_v20, 7 }
 0x374   :  { %v4284_v53 = vsel %vm12714_vm9, %v12713_v55, %v12712_v19  ;;  %v12715_v47 = vmov %v12713_v55  ;;  %vm12720_vm14 = vmmov %vm12704_vm3  ;;  %v6693_v55 = vunpack.i.h.bf16 %v6691_v58  ;;  %vm12749_vm9 = vcmask 523264  }
 0x375   :  { %v4285_v27 = vsel %vm12717_vm12, %v12716_v32, %v12715_v47  ;;  %v9922_v21 = vsel %vm12720_vm14, %v12719_v56, %v12718_v46  ;;  %v12722_v12 = vmov %v12719_v56  ;;  %vm12724_vm4 = vmmov %vm12704_vm3  ;;  %v12725_v32 = vld [vmem:[#allocation25_spill] sm:$0xff]  ;;  %v9938_v46 = vld [vmem:[#allocation3 + $0x1f8] sm:$0xff]  ;;  %v12734_v47 = vrot.slane %v9196_v6, 7 }
 0x376   :  { %12721 = vst [vmem:[#allocation22_spill] sm:$0xff] %v9922_v21  ;;  %v9930_v19 = vsel %vm12724_vm4, %v12723_v63, %v12722_v12  ;;  %vm12726_vm6 = vnez %v12725_v32  ;;  %v12728_v12 = vrot.slane %v9280_v40, 1  ;;  %v12729_v63 = vrot.slane %v9198_v20, 1  ;;  %vm12730_vm10 = vmmov %vm12699_vm2  ;;  %v9978_v21 = vld [vmem:[#allocation3 + $0x1e0] sm:$0xff] }
 0x377   :  { %v4320_v24 = vsel %vm12726_vm6, %v4284_v53, 0.0  ;;  %v12732_v32 = vrot.slane %v9196_v6, 1  ;;  %vm12735_vm11 = vmmov %vm12704_vm3  ;;  %v12739_v41 = vmov %v12734_v47  ;;  %v4624_v58 = vsel %vm12749_vm9, %v8999_v31, %v6693_v55 }
 0x378   :  { %v9943_v42 = vpack.c.bf16 %v4320_v24, %v4285_v27  ;;  %v4282_v56 = vsel %vm12730_vm10, %v12729_v63, %v12728_v12  ;;  %v12731_v43 = vmov %v12729_v63  ;;  %v9963_v24 = vsel %vm12735_vm11, %v12734_v47, %v12733_v14  ;;  %v12737_v63 = vld [vmem:[#allocation26_spill] sm:$0xff]  ;;  %vm12741_vm8 = vmmov %vm12724_vm4 }
 0x379   :  { %v4283_v53 = vsel %vm12699_vm2, %v12732_v32, %v12731_v43  ;;  %12736 = vst [vmem:[#allocation25_spill] sm:$0xff] %v9963_v24  ;;  %v6844_v12 = vpack.i.bf16 %v9938_v46, %v9941_v23  ;;  %vm12738_vm3 = vnez %v12737_v63  ;;  %v12740_v43 = vrot.slane %v9218_v57, 7  ;;  %v9980_v47 = vld [vmem:[#allocation3 + $0x1e8] sm:$0xff]  ;;  %vm12745_vm7 = vmmov %vm12699_vm2 }
 0x37a   :  { %12727 = vst [vmem:[#allocation23_spill] sm:$0xff] %v9943_v42  ;;  %v4322_v42 = vsel %vm12738_vm3, %v4282_v56, 0.0  ;;  %v12743_v27 = vrot.slane %v9251_v44, 1  ;;  %v12744_v63 = vrot.slane %v9273_v54, 1  ;;  %v12747_v56 = vrot.slane %v9280_v40, 1  ;;  %vm12748_vm15 = vmmov %vm12699_vm2 }
 0x37b   :  { %v9976_v32 = vsel %vm12741_vm8, %v12740_v43, %v12739_v41  ;;  %v9982_v14 = vpack.c.bf16 %v4322_v42, %v4283_v53  ;;  %v12750_v42 = vrot.slane %v8951_v36, 7  ;;  %v12751_v53 = vrot.slane %v9938_v46, 7  ;;  %vm12752_vm12 = vmmov %vm12724_vm4  ;;  %6845 = vrot.lane.b32.xlu1 %v6844_v12, %s6923_s4 }
 0x37c   :  { %v4280_v6 = vsel %vm12745_vm7, %v12744_v63, %v12743_v27  ;;  %v12746_v57 = vmov %v12744_v63  ;;  %v6706_v27 = vpop.permute.xlu1 %6705  ;;  %v6839_v63 = vpack.i.bf16 %v9980_v47, %v9978_v21  ;;  %vm12755_vm4 = vnez %v12106_v4  ;;  %vm12756_vm6 = vmmov %vm12749_vm9 }
 0x37d   :  { %12742 = vst [vmem:[#allocation26_spill] sm:$0xff] %v9982_v14  ;;  %v4281_v41 = vsel %vm12748_vm15, %v12747_v56, %v12746_v57  ;;  %v4110_v43 = vsel %vm12752_vm12, %v12751_v53, %v12750_v42  ;;  %v12753_v14 = vld [vmem:[#allocation27_spill] sm:$0xff]  ;;  %v6708_v31 = vunpack.i.h.bf16 %v6706_v27  ;;  %v6707_v55 = vunpack.i.l.bf16 %v6706_v27  ;;  %vm12759_vm10 = vmmov %vm12741_vm8 }
 0x37e   :  { %vm12754_vm14 = vnez %v12753_v14  ;;  %v4111_v57 = vsel %vm12755_vm4, %v4110_v43, 0.0  ;;  %6840 = vrot.lane.b32.xlu0 %v6839_v63, %s6923_s4  ;;  %v12757_v12 = vrot.slane %v9602_v1, 7  ;;  %v12758_v42 = vrot.slane %v9600_v15, 7  ;;  %vm12762_vm2 = vmmov %vm12741_vm8  ;;  %v6701_v63 = vpop.permute.xlu0 %6700 }
 0x37f   :  { %v4324_v24 = vsel %vm12754_vm14, %v4280_v6, 0.0  ;;  %v4623_v36 = vsel %vm12756_vm6, %v4111_v57, %v6692_v50  ;;  %v12761_v4 = vrot.slane %v9631_v59, 7  ;;  %v12763_v50 = vrot.slane %v9273_v54, 7  ;;  %vm12765_vm11 = vmmov %vm12762_vm2 }
 0x380   :  { %v10011_v56 = vpack.c.bf16 %v4324_v24, %v4281_v41  ;;  %v10021_v53 = vsel %vm12759_vm10, %v12758_v42, %v12757_v12  ;;  %v12760_v14 = vmov %v12758_v42  ;;  %v12764_v6 = vrot.slane %v9280_v40, 7  ;;  %vm12767_vm3 = vmmov %vm12756_vm6 }
 0x381   :  { %v10029_v24 = vsel %vm12762_vm2, %v12761_v4, %v12760_v14  ;;  %v4687_v27 = vpack.c.bf16 %v4624_v58, %v4623_v36  ;;  %v12766_v57 = vsel %vm8117_vm1, %v9567_v38, 0.0  ;;  %vm12768_vm8 = vmmov %vm12767_vm3  ;;  %v6703_v14 = vunpack.i.h.bf16 %v6701_v63 }
 0x382   :  { %v10037_v41 = vsel %vm12765_vm11, %v12764_v6, %v12763_v50  ;;  %v10045_v12 = vsel %vm12767_vm3, %v12766_v57, %v6707_v55  ;;  %v10049_v42 = vsel %vm12768_vm8, %v9535_v17, %v6708_v31  ;;  %v6702_v4 = vunpack.i.l.bf16 %v6701_v63  ;;  %vm12770_vm7 = vmmov %vm12762_vm2 }
 0x383   :  { %v12769_v36 = vrot.slane %v9198_v20, 7  ;;  %4958 = vmatmul.mubr.bf16.vlgmr.msra.gmra.mxu0 %v4687_v27  ;;  %vm12771_vm1 = vnez %v12143_v28  ;;  %v12772_v17 = vrot.slane %v9331_v18, 1  ;;  %v12773_v58 = vrot.slane %v9253_v29, 1  ;;  %vm12776_vm9 = vmmov %vm12748_vm15 }
 0x384   :  { %v4121_v38 = vsel %vm12771_vm1, %v9792_v16, 0.0  ;;  %v12775_v20 = vrot.slane %v9251_v44, 1  ;;  %v12777_v27 = vrot.slane %v9703_v60, 1  ;;  %v12778_v63 = vrot.slane %v9681_v2, 1  ;;  %vm12779_vm12 = vmmov %vm12776_vm9 }
 0x385   :  { %v10059_v45 = vsel %vm12770_vm7, %v12769_v36, %v12764_v6  ;;  %v4278_v31 = vsel %vm12748_vm15, %v12773_v58, %v12772_v17  ;;  %v12774_v40 = vmov %v12773_v58  ;;  %vm12780_vm14 = vmmov %vm12767_vm3  ;;  %v12781_v16 = vsel %vm8073_vm0, %v9420_v61, 0.0  ;;  %v12784_v36 = vld [vmem:[#allocation28_spill] sm:$0xff] }
 0x386   :  { %v4279_v55 = vsel %vm12776_vm9, %v12775_v20, %v12774_v40  ;;  %v4252_v28 = vsel %vm12779_vm12, %v12778_v63, %v12777_v27  ;;  %6077 = vmatprep.mubr.msk.bf16.mxu0 %vm12780_vm14, %v9144_v30  ;;  %vm12782_vm4 = vmmov %vm12767_vm3  ;;  %vm12785_vm10 = vnez %v12784_v36  ;;  %v12786_v58 = vmov %v12778_v63  ;;  %v6716_v27 = vpop.permute.xlu1 %6715  ;;  %v12799_v36 = vld [vmem:[#allocation70_spill] sm:$0xff] }
 0x387   :  { %v10089_v57 = vsel %vm12782_vm4, %v12781_v16, %v6702_v4  ;;  %vm12783_vm6 = vmmov %vm12767_vm3  ;;  %v4326_v17 = vsel %vm12785_vm10, %v4278_v31, 0.0  ;;  %v12787_v40 = vrot.slane %v9653_v51, 1  ;;  %v12789_v4 = vld [vmem:[#allocation43_spill] sm:$0xff]  ;;  %v12871_v15 = vrot.slane %v12799_v36, 7 }
 0x388   :  { %v10093_v6 = vsel %vm12783_vm6, %v9373_v13, %v6703_v14  ;;  %vm12788_vm2 = vmmov %vm12776_vm9  ;;  %v10105_v35 = vpack.c.bf16 %v4326_v17, %v4279_v55  ;;  %vm12790_vm0 = vnez %v12789_v4  ;;  %v12791_v13 = vrot.slane %v9253_v29, 7 }
 0x389   :  { %v4253_v30 = vsel %vm12788_vm2, %v12787_v40, %v12786_v58  ;;  %v4691_v61 = vpack.c.bf16 %v10093_v6, %v10089_v57  ;;  %v4352_v20 = vsel %vm12790_vm0, %v4252_v28, 0.0  ;;  %v12792_v14 = vrot.slane %v9251_v44, 7  ;;  %vm12793_vm11 = vmmov %vm12770_vm7  ;;  %v12797_v28 = vld [vmem:[#allocation9_spill] sm:$0xff] }
 0x38a   :  { %v10117_v63 = vpack.c.bf16 %v4352_v20, %v4253_v30  ;;  %v12795_v57 = vmov %v12763_v50  ;;  %vm12796_vm3 = vmmov %vm12770_vm7  ;;  %v12798_v6 = vrot.slane %v12797_v28, 1  ;;  %v12800_v17 = vrot.slane %v12799_v36, 1 }
 0x38b   :  { %v10115_v31 = vsel %vm12793_vm11, %v12792_v14, %v12791_v13  ;;  %v12794_v16 = vmov %v12792_v14  ;;  %vm12801_vm8 = vmmov %vm12788_vm2  ;;  %v12803_v30 = vrot.slane %v9331_v18, 1  ;;  %v6718_v4 = vunpack.i.h.bf16 %v6716_v27  ;;  %v12805_v13 = vld [vmem:[#allocation29_spill] sm:$0xff] }
 0x38c   :  { %v10125_v55 = vsel %vm12796_vm3, %v12795_v57, %v12794_v16  ;;  %v4276_v58 = vsel %vm12801_vm8, %v12800_v17, %v12798_v6  ;;  %v12802_v40 = vmov %v12800_v17  ;;  %vm12804_vm7 = vmmov %vm12788_vm2  ;;  %v6717_v20 = vunpack.i.l.bf16 %v6716_v27 }
 0x38d   :  { %v4277_v44 = vsel %vm12804_vm7, %v12803_v30, %v12802_v40  ;;  %vm12806_vm1 = vnez %v12805_v13  ;;  %v12807_v57 = vrot.slane %v9681_v2, 7  ;;  %v12808_v6 = vrot.slane %v9653_v51, 7  ;;  %vm12809_vm15 = vmmov %vm12796_vm3 }
 0x38e   :  { %v4328_v14 = vsel %vm12806_vm1, %v4276_v58, 0.0  ;;  %v12811_v40 = vrot.slane %v9602_v1, 7  ;;  %vm12812_vm9 = vmmov %vm12796_vm3  ;;  %v12813_v58 = vrot.slane %v9736_v5, 1  ;;  %v12814_v30 = vrot.slane %v9705_v22, 1 }
 0x38f   :  { %v10142_v16 = vpack.c.bf16 %v4328_v14, %v4277_v44  ;;  %v10150_v17 = vsel %vm12809_vm15, %v12808_v6, %v12807_v57  ;;  %v12810_v50 = vmov %v12808_v6  ;;  %vm12815_vm12 = vmmov %vm12788_vm2  ;;  %v6711_v14 = vpop.permute.xlu0 %6710  ;;  %v10172_v1 = vsel %vm12782_vm4, %v9776_v48, %v6718_v4 }
 0x390   :  { %v10158_v27 = vsel %vm12812_vm9, %v12811_v40, %v12810_v50  ;;  %v4250_v44 = vsel %vm12815_vm12, %v12814_v30, %v12813_v58  ;;  %vm12816_vm14 = vmmov %vm12782_vm4  ;;  %v12817_v51 = vmov %v12814_v30  ;;  %v12818_v50 = vrot.slane %v9703_v60, 1  ;;  %v12820_v30 = vld [vmem:[#allocation44_spill] sm:$0xff] }
 0x391   :  { %v10168_v57 = vsel %vm12816_vm14, %v4121_v38, %v6717_v20  ;;  %vm12819_vm6 = vmmov %vm12788_vm2  ;;  %v6713_v40 = vunpack.i.h.bf16 %v6711_v14  ;;  %v6712_v54 = vunpack.i.l.bf16 %v6711_v14  ;;  %vm12821_vm10 = vnez %v12820_v30 }
 0x392   :  { %v4251_v6 = vsel %vm12819_vm6, %v12818_v50, %v12817_v51  ;;  %v4354_v38 = vsel %vm12821_vm10, %v4250_v44, 0.0  ;;  %v12822_v20 = vpack.c.bf16 %v9894_v8, %v9890_v7  ;;  %v12824_v4 = vrot.slane %v12799_v36, 7  ;;  %vm12826_vm2 = vmmov %vm12796_vm3  ;;  %v12830_v7 = vld [vmem:[#allocation74_spill] sm:$0xff] }
 0x393   :  { %v10187_v48 = vpack.c.bf16 %v4354_v38, %v4251_v6  ;;  %v12825_v13 = vrot.slane %v9331_v18, 7  ;;  %v12828_v50 = vrot.slane %v9253_v29, 7  ;;  %vm12829_vm0 = vmmov %vm12826_vm2  ;;  %v12831_v8 = vrot.slane %v12830_v7, 1  ;;  %v12832_v6 = vld [vmem:[#allocation10_spill] sm:$0xff] }
 0x394   :  { %4966 = vmatmul.mubr.bf16.gmra.mxu0 %v12822_v20  ;;  %v12833_v30 = vrot.slane %v12832_v6, 1  ;;  %vm12834_vm11 = vmmov %vm12819_vm6  ;;  %v12835_v20 = vld [vmem:[#allocation15_spill] sm:$0xff]  ;;  %v12837_v18 = vsel %vm8254_vm13, %v9756_v25, 0.0  ;;  %v12858_v25 = vrot.slane %v9782_v11, 1 }
 0x395   :  { %12823 = vst [vmem:[#allocation27_spill] sm:$0xff] %v10187_v48  ;;  %v10195_v51 = vsel %vm12826_vm2, %v12825_v13, %v12824_v4  ;;  %v12827_v14 = vmov %v12825_v13  ;;  %vm12836_vm3 = vmmov %vm12782_vm4  ;;  %v12839_v13 = vld [vmem:[#allocation87_spill] sm:$0xff] }
 0x396   :  { %v10203_v44 = vsel %vm12829_vm0, %v12828_v50, %v12827_v14  ;;  %v4274_v38 = vsel %vm12834_vm11, %v12833_v30, %v12831_v8  ;;  %6078 = vmatprep.mubr.msk.bf16.mxu0 %vm12836_vm3, %v12835_v20  ;;  %vm12838_vm8 = vmmov %vm12836_vm3  ;;  %v12841_v14 = vld [vmem:[#allocation12_spill] sm:$0xff]  ;;  %v12843_v8 = vmov %v12833_v30  ;;  %v12844_v30 = vrot.slane %v12797_v28, 1 }
 0x397   :  { %v10218_v29 = vsel %vm12838_vm8, %v12837_v18, %v6712_v54  ;;  %vm12840_vm7 = vmmov %vm12836_vm3  ;;  %vm12842_vm1 = vnez %v12841_v14  ;;  %v12846_v54 = vld [vmem:[#allocation30_spill] sm:$0xff]  ;;  %v12849_v18 = vrot.slane %v9703_v60, 7  ;;  %v12853_v14 = vrot.slane %v9681_v2, 7 }
 0x398   :  { %v10222_v4 = vsel %vm12840_vm7, %v12839_v13, %v6713_v40  ;;  %v4123_v50 = vsel %vm12842_vm1, %v9840_v52, 0.0  ;;  %vm12845_vm15 = vmmov %vm12819_vm6  ;;  %vm12847_vm13 = vnez %v12846_v54  ;;  %v12848_v40 = vrot.slane %v9705_v22, 7  ;;  %v12855_v54 = vld [vmem:[#allocation21_spill] sm:$0xff] }
 0x399   :  { %v4275_v49 = vsel %vm12845_vm15, %v12844_v30, %v12843_v8  ;;  %v4330_v20 = vsel %vm12847_vm13, %v4274_v38, 0.0  ;;  %vm12850_vm9 = vmmov %vm12829_vm0  ;;  %v12852_v13 = vmov %v12849_v18  ;;  %v6726_v30 = vpop.permute.xlu1 %6725  ;;  %vm12856_vm14 = vnez %v12855_v54  ;;  %v12864_v54 = vld [vmem:[#allocation45_spill] sm:$0xff] }
 0x39a   :  { %v10243_v52 = vsel %vm12850_vm9, %v12849_v18, %v12848_v40  ;;  %vm12854_vm12 = vmmov %vm12829_vm0  ;;  %v4125_v38 = vsel %vm12856_vm14, %v9879_v3, 0.0  ;;  %v10256_v58 = vpack.c.bf16 %v4330_v20, %v4275_v49  ;;  %v12859_v40 = vrot.slane %v9738_v39, 1 }
 0x39b   :  { %12851 = vst [vmem:[#allocation28_spill] sm:$0xff] %v10243_v52  ;;  %v10251_v8 = vsel %vm12854_vm12, %v12853_v14, %v12852_v13  ;;  %vm12860_vm4 = vmmov %vm12819_vm6  ;;  %v12862_v18 = vrot.slane %v9736_v5, 1  ;;  %v6728_v14 = vunpack.i.h.bf16 %v6726_v30  ;;  %v6727_v43 = vunpack.i.l.bf16 %v6726_v30  ;;  %v12913_v52 = vld [vmem:[#allocation72_spill] sm:$0xff] }
 0x39c   :  { %12857 = vst [vmem:[#allocation43_spill] sm:$0xff] %v10256_v58  ;;  %v4248_v60 = vsel %vm12860_vm4, %v12859_v40, %v12858_v25  ;;  %v12861_v2 = vmov %v12859_v40  ;;  %vm12863_vm6 = vmmov %vm12860_vm4  ;;  %vm12865_vm10 = vnez %v12864_v54  ;;  %v12866_v49 = vrot.slane %v12832_v6, 7  ;;  %4974 = vmatmul.mubr.bf16.gmra.mxu0 %v4691_v61 }
 0x39d   :  { %v4249_v13 = vsel %vm12863_vm6, %v12862_v18, %v12861_v2  ;;  %v4356_v3 = vsel %vm12865_vm10, %v4248_v60, 0.0  ;;  %v12867_v20 = vrot.slane %v12797_v28, 7  ;;  %vm12868_vm2 = vmmov %vm12829_vm0  ;;  %v12872_v2 = vld [vmem:[#allocation71_spill] sm:$0xff]  ;;  %v12874_v18 = vld [vmem:[#allocation73_spill] sm:$0xff]  ;;  %v12892_v61 = vrot.slane %v9748_v33, 1 }
 0x39e   :  { %v10280_v25 = vpack.c.bf16 %v4356_v3, %v4249_v13  ;;  %v12873_v60 = vrot.slane %v12872_v2, 1  ;;  %v12875_v54 = vrot.slane %v12874_v18, 1  ;;  %vm12876_vm11 = vmmov %vm12860_vm4  ;;  %v12878_v13 = vrot.slane %v12830_v7, 1  ;;  %v6721_v3 = vpop.permute.xlu0 %6720 }
 0x39f   :  { %v10278_v59 = vsel %vm12868_vm2, %v12867_v20, %v12866_v49  ;;  %v12870_v40 = vmov %v12867_v20  ;;  %vm12879_vm3 = vmmov %vm12860_vm4  ;;  %v10308_v20 = vsel %vm12840_vm7, %v9871_v37, %v6728_v14 }
 0x3a0   :  { %12869 = vst [vmem:[#allocation9_spill] sm:$0xff] %v10280_v25  ;;  %v10288_v30 = vsel %vm12829_vm0, %v12871_v15, %v12870_v40  ;;  %v4272_v58 = vsel %vm12876_vm11, %v12875_v54, %v12873_v60  ;;  %v12877_v49 = vmov %v12875_v54  ;;  %vm12880_vm8 = vmmov %vm12840_vm7  ;;  %v12881_v40 = vld [vmem:[#allocation32_spill] sm:$0xff]  ;;  %v6723_v54 = vunpack.i.h.bf16 %v6721_v3 }
 0x3a1   :  { %v4273_v28 = vsel %vm12879_vm3, %v12878_v13, %v12877_v49  ;;  %v10304_v15 = vsel %vm12880_vm8, %v4125_v38, %v6727_v43  ;;  %vm12882_vm1 = vnez %v12881_v40  ;;  %v6722_v25 = vunpack.i.l.bf16 %v6721_v3  ;;  %vm12886_vm15 = vmmov %vm12829_vm0 }
 0x3a2   :  { %v4332_v60 = vsel %vm12882_vm1, %v4272_v58, 0.0  ;;  %v12884_v49 = vrot.slane %v9738_v39, 7  ;;  %v12885_v43 = vrot.slane %v9736_v5, 7  ;;  %v12889_v58 = vrot.slane %v9705_v22, 7  ;;  %vm12890_vm13 = vmmov %vm12829_vm0  ;;  %v12922_v22 = vld [vmem:[#allocation33_spill] sm:$0xff] }
 0x3a3   :  { %v10314_v48 = vpack.c.bf16 %v4332_v60, %v4273_v28  ;;  %v12891_v13 = vrot.slane %v9820_v0, 1  ;;  %vm12893_vm9 = vmmov %vm12879_vm3  ;;  %v12894_v3 = vmov %v12892_v61  ;;  %v12895_v40 = vrot.slane %v9782_v11, 1  ;;  %v12897_v60 = vld [vmem:[#allocation16_spill] sm:$0xff] }
 0x3a4   :  { %v10322_v38 = vsel %vm12886_vm15, %v12885_v43, %v12884_v49  ;;  %v12888_v37 = vmov %v12885_v43  ;;  %vm12896_vm12 = vmmov %vm12879_vm3  ;;  %vm12923_vm1 = vnez %v12922_v22 }
 0x3a5   :  { %12883 = vst [vmem:[#allocation70_spill] sm:$0xff] %v10314_v48  ;;  %12887 = vst [vmem:[#allocation29_spill] sm:$0xff] %v10322_v38  ;;  %v10330_v14 = vsel %vm12890_vm13, %v12889_v58, %v12888_v37  ;;  %v4246_v28 = vsel %vm12893_vm9, %v12892_v61, %v12891_v13  ;;  %v4247_v5 = vsel %vm12896_vm12, %v12895_v40, %v12894_v3  ;;  %v12901_v37 = vld [vmem:[#allocation46_spill] sm:$0xff]  ;;  %v12904_v3 = vrot.slane %v12874_v18, 7 }
 0x3a6   :  { %vm12898_vm14 = vmmov %vm12840_vm7  ;;  %vm12902_vm10 = vnez %v12901_v37  ;;  %v12905_v40 = vrot.slane %v12830_v7, 7  ;;  %v12911_v37 = vld [vmem:[#allocation76_spill] sm:$0xff]  ;;  %v12914_v13 = vrot.slane %v12913_v52, 1 }
 0x3a7   :  { %6079 = vmatprep.mubr.msk.bf16.mxu0 %vm12898_vm14, %v12897_v60  ;;  %vm12899_vm4 = vmmov %vm12840_vm7  ;;  %v4358_v58 = vsel %vm12902_vm10, %v4246_v28, 0.0  ;;  %v6736_v28 = vpop.permute.xlu1 %6735 }
 0x3a8   :  { %v10348_v49 = vsel %vm12899_vm4, %v4123_v50, %v6722_v25  ;;  %vm12900_vm6 = vmmov %vm12899_vm4  ;;  %v10358_v61 = vpack.c.bf16 %v4358_v58, %v4247_v5  ;;  %v12907_v25 = vmov %v12905_v40  ;;  %v12909_v5 = vld [vmem:[#allocation11_spill] sm:$0xff]  ;;  %v12912_v58 = vrot.slane %v12911_v37, 1 }
 0x3a9   :  { %v10352_v43 = vsel %vm12900_vm6, %v9832_v26, %v6723_v54  ;;  %vm12906_vm2 = vmmov %vm12829_vm0  ;;  %v12908_v26 = vrot.slane %v12832_v6, 7  ;;  %vm12910_vm11 = vnez %v12909_v5  ;;  %v12915_v7 = vmov %v12914_v13 }
 0x3aa   :  { %12903 = vst [vmem:[#allocation44_spill] sm:$0xff] %v10358_v61  ;;  %v10366_v50 = vsel %vm12906_vm2, %v12905_v40, %v12904_v3  ;;  %v4127_v60 = vsel %vm12910_vm11, %v9930_v19, 0.0  ;;  %v4270_v3 = vsel %vm12879_vm3, %v12914_v13, %v12912_v58  ;;  %v12916_v6 = vrot.slane %v12872_v2, 1  ;;  %vm12917_vm8 = vmmov %vm12879_vm3 }
 0x3ab   :  { %v10374_v54 = vsel %vm12829_vm0, %v12908_v26, %v12907_v25  ;;  %v12918_v25 = vrot.slane %v9748_v33, 7  ;;  %v12919_v26 = vrot.slane %v9782_v11, 7  ;;  %vm12920_vm7 = vmmov %vm12829_vm0  ;;  %v6738_v5 = vunpack.i.h.bf16 %v6736_v28 }
 0x3ac   :  { %v4271_v40 = vsel %vm12917_vm8, %v12916_v6, %v12915_v7  ;;  %v6737_v36 = vunpack.i.l.bf16 %v6736_v28  ;;  %v4334_v13 = vsel %vm12923_vm1, %v4270_v3, 0.0  ;;  %v12925_v61 = vrot.slane %v9738_v39, 7  ;;  %vm12926_vm15 = vmmov %vm12829_vm0  ;;  %v12928_v6 = vld [vmem:[#allocation18_spill] sm:$0xff]  ;;  %v6731_v3 = vpop.permute.xlu0 %6730 }
 0x3ad   :  { %v10397_v19 = vsel %vm12920_vm7, %v12919_v26, %v12918_v25  ;;  %v12924_v58 = vmov %v12919_v26  ;;  %vm12929_vm13 = vnez %v12928_v6  ;;  %v10412_v38 = vpack.c.bf16 %v4334_v13, %v4271_v40  ;;  %vm12933_vm9 = vmmov %vm12879_vm3  ;;  %v12939_v13 = vld [vmem:[#allocation47_spill] sm:$0xff] }
 0x3ae   :  { %12921 = vst [vmem:[#allocation74_spill] sm:$0xff] %v10397_v19  ;;  %v10407_v7 = vsel %vm12926_vm15, %v12925_v61, %v12924_v58  ;;  %v4129_v48 = vsel %vm12929_vm13, %v9976_v32, 0.0  ;;  %v12931_v25 = vrot.slane %v9883_v62, 1  ;;  %v12932_v28 = vrot.slane %v9822_v34, 1  ;;  %vm12936_vm12 = vmmov %vm12879_vm3  ;;  %v12938_v32 = vld [vmem:[#allocation25_spill] sm:$0xff] }
 0x3af   :  { %12927 = vst [vmem:[#allocation10_spill] sm:$0xff] %v10407_v7  ;;  %12930 = vst [vmem:[#allocation15_spill] sm:$0xff] %v10412_v38  ;;  %v12935_v39 = vrot.slane %v9820_v0, 1  ;;  %v10431_v40 = vsel %vm12899_vm4, %v12938_v32, %v6738_v5  ;;  %vm12940_vm6 = vnez %v12939_v13  ;;  %v12941_v6 = vrot.slane %v12913_v52, 7 }
 0x3b0   :  { %v4244_v22 = vsel %vm12933_vm9, %v12932_v28, %v12931_v25  ;;  %v12934_v11 = vmov %v12932_v28  ;;  %vm12937_vm14 = vmmov %vm12899_vm4  ;;  %v12942_v25 = vrot.slane %v12872_v2, 7  ;;  %v12945_v5 = vpack.c.bf16 %v10049_v42, %v10045_v12 }
 0x3b1   :  { %v4245_v61 = vsel %vm12936_vm12, %v12935_v39, %v12934_v11  ;;  %v10427_v26 = vsel %vm12937_vm14, %v4129_v48, %v6737_v36  ;;  %v4360_v58 = vsel %vm12940_vm6, %v4244_v22, 0.0  ;;  %vm12943_vm10 = vmmov %vm12829_vm0  ;;  %v6733_v11 = vunpack.i.h.bf16 %v6731_v3 }
 0x3b2   :  { %v10441_v28 = vsel %vm12943_vm10, %v12942_v25, %v12941_v6  ;;  %v6732_v39 = vunpack.i.l.bf16 %v6731_v3  ;;  %v10445_v36 = vpack.c.bf16 %v4360_v58, %v4245_v61  ;;  %4982 = vmatmul.mubr.bf16.gmra.mxu0 %v12945_v5  ;;  %v12946_v22 = vmov %v12942_v25  ;;  %vm12948_vm2 = vmmov %vm12829_vm0  ;;  %v12949_v6 = vld [vmem:[#allocation78_spill] sm:$0xff]  ;;  %v12951_v3 = vld [vmem:[#allocation75_spill] sm:$0xff] }
 0x3b3   :  { %v12947_v32 = vrot.slane %v12874_v18, 7  ;;  %v12950_v25 = vrot.slane %v12949_v6, 1  ;;  %v12952_v38 = vrot.slane %v12951_v3, 1  ;;  %vm12953_vm0 = vmmov %vm12879_vm3  ;;  %v12955_v12 = vrot.slane %v12911_v37, 1  ;;  %v12957_v5 = vld [vmem:[#allocation42_spill] sm:$0xff] }
 0x3b4   :  { %12944 = vst [vmem:[#allocation87_spill] sm:$0xff] %v10445_v36  ;;  %vm12956_vm11 = vmmov %vm12953_vm0  ;;  %v4039_v2 = vrot.slane %v9820_v0, 7  ;;  %v4236_v18 = vrot.slane %v9980_v47, 1  ;;  %v4040_v0 = vrot.slane %v9822_v34, 7  ;;  %v12965_v36 = vrot.slane %v9748_v33, 7 }
 0x3b5   :  { %v10456_v13 = vsel %vm12948_vm2, %v12947_v32, %v12946_v22  ;;  %v4268_v61 = vsel %vm12953_vm0, %v12952_v38, %v12950_v25  ;;  %v12954_v58 = vmov %v12952_v38  ;;  %vm12958_vm3 = vmmov %vm12899_vm4  ;;  %v12960_v32 = vld [vmem:[#allocation22_spill] sm:$0xff]  ;;  %v12962_v25 = vld [vmem:[#allocation35_spill] sm:$0xff]  ;;  %v12974_v33 = vrot.slane %v9883_v62, 1 }
 0x3b6   :  { %v4269_v42 = vsel %vm12956_vm11, %v12955_v12, %v12954_v58  ;;  %6080 = vmatprep.mubr.msk.bf16.mxu0 %vm12958_vm3, %v12957_v5  ;;  %vm12959_vm8 = vmmov %vm12958_vm3  ;;  %vm12963_vm1 = vnez %v12962_v25  ;;  %v12977_v25 = vrot.slane %v12911_v37, 7 }
 0x3b7   :  { %v10475_v22 = vsel %vm12959_vm8, %v4127_v60, %v6732_v39  ;;  %vm12961_vm7 = vmmov %vm12958_vm3  ;;  %v4336_v48 = vsel %vm12963_vm1, %v4268_v61, 0.0  ;;  %v6746_v39 = vpop.permute.xlu1 %6745  ;;  %v12970_v61 = vrot.slane %v9978_v21, 1 }
 0x3b8   :  { %v10479_v38 = vsel %vm12961_vm7, %v12960_v32, %v6733_v11  ;;  %v10485_v12 = vpack.c.bf16 %v4336_v48, %v4269_v42  ;;  %vm12966_vm15 = vmmov %vm12948_vm2  ;;  %v12968_v11 = vld [vmem:[#allocation24_spill] sm:$0xff]  ;;  %v12971_v32 = vrot.slane %v9848_v9, 1  ;;  %v12976_v42 = vrot.slane %v12951_v3, 7 }
 0x3b9   :  { %v10492_v60 = vsel %vm12966_vm15, %v12965_v36, %v4039_v2  ;;  %vm12969_vm13 = vnez %v12968_v11  ;;  %vm12972_vm9 = vmmov %vm12953_vm0  ;;  %v6748_v11 = vunpack.i.h.bf16 %v6746_v39  ;;  %v6747_v58 = vunpack.i.l.bf16 %v6746_v39  ;;  %v12989_v39 = vld [vmem:[#allocation77_spill] sm:$0xff] }
 0x3ba   :  { %12964 = vst [vmem:[#allocation12_spill] sm:$0xff] %v10485_v12  ;;  %12967 = vst [vmem:[#allocation30_spill] sm:$0xff] %v10492_v60  ;;  %v4133_v5 = vsel %vm12969_vm13, %v10125_v55, 0.0  ;;  %v4242_v48 = vsel %vm12972_vm9, %v12971_v32, %v12970_v61  ;;  %v12973_v34 = vmov %v12971_v32  ;;  %v12981_v32 = vld [vmem:[#allocation49_spill] sm:$0xff]  ;;  %v12990_v7 = vrot.slane %v12989_v39, 1 }
 0x3bb   :  { %vm12975_vm12 = vmmov %vm12953_vm0  ;;  %vm12982_vm6 = vnez %v12981_v32 }
 0x3bc   :  { %v4243_v36 = vsel %vm12975_vm12, %v12974_v33, %v12973_v34  ;;  %vm12978_vm14 = vmmov %vm12948_vm2  ;;  %v4362_v12 = vsel %vm12982_vm6, %v4242_v48, 0.0  ;;  %v12984_v34 = vmov %v12977_v25  ;;  %v12985_v33 = vrot.slane %v12913_v52, 7  ;;  %v6741_v48 = vpop.permute.xlu0 %6740  ;;  %v12994_v52 = vld [vmem:[#allocation20_spill] sm:$0xff] }
 0x3bd   :  { %v10515_v55 = vsel %vm12978_vm14, %v12977_v25, %v12976_v42  ;;  %vm12979_vm4 = vmmov %vm12948_vm2  ;;  %v10523_v60 = vpack.c.bf16 %v4362_v12, %v4243_v36  ;;  %v12987_v42 = vld [vmem:[#allocation80_spill] sm:$0xff]  ;;  %v12992_v32 = vmov %v12990_v7  ;;  %v12993_v12 = vrot.slane %v12949_v6, 1 }
 0x3be   :  { %v10519_v61 = vsel %vm12979_vm4, %v4039_v2, %v4040_v0  ;;  %vm12986_vm10 = vmmov %vm12948_vm2  ;;  %v12988_v25 = vrot.slane %v12987_v42, 1  ;;  %vm12995_vm11 = vnez %v12994_v52  ;;  %v13011_v52 = vrot.slane %v12989_v39, 7 }
 0x3bf   :  { %12980 = vst [vmem:[#allocation21_spill] sm:$0xff] %v10519_v61  ;;  %12983 = vst [vmem:[#allocation45_spill] sm:$0xff] %v10523_v60  ;;  %v10531_v19 = vsel %vm12986_vm10, %v12985_v33, %v12984_v34  ;;  %v4267_v37 = vsel %vm12953_vm0, %v12993_v12, %v12992_v32  ;;  %v4131_v36 = vsel %vm12995_vm11, %v10059_v45, 0.0  ;;  %v10549_v34 = vsel %vm12958_vm3, %v4133_v5, %v6747_v58 }
 0x3c0   :  { %vm12991_vm2 = vmmov %vm12953_vm0  ;;  %v6743_v60 = vunpack.i.h.bf16 %v6741_v48  ;;  %v6742_v61 = vunpack.i.l.bf16 %v6741_v48  ;;  %v13000_v45 = vpack.c.bf16 %v10222_v4, %v10218_v29  ;;  %v4041_v58 = vrot.slane %v9883_v62, 7 }
 0x3c1   :  { %v4266_v2 = vsel %vm12991_vm2, %v12990_v7, %v12988_v25  ;;  %vm12996_vm8 = vmmov %vm12958_vm3  ;;  %v12997_v7 = vld [vmem:[#allocation36_spill] sm:$0xff]  ;;  %v4042_v5 = vrot.slane %v9848_v9, 7  ;;  %v13009_v9 = vld [vmem:[#allocation13_spill] sm:$0xff] }
 0x3c2   :  { %v10553_v33 = vsel %vm12996_vm8, %v10115_v31, %v6748_v11  ;;  %vm12998_vm7 = vnez %v12997_v7  ;;  %4990 = vmatmul.mubr.bf16.gmra.mxu0 %v13000_v45  ;;  %v13001_v31 = vrot.slane %v9941_v23, 1  ;;  %vm13002_vm1 = vmmov %vm12953_vm0  ;;  %vm13010_vm14 = vnez %v13009_v9  ;;  %v13021_v9 = vld [vmem:[#allocation48_spill] sm:$0xff] }
 0x3c3   :  { %v4338_v25 = vsel %vm12998_vm7, %v4266_v2, 0.0  ;;  %v13003_v2 = vrot.slane %v9978_v21, 1  ;;  %vm13004_vm15 = vmmov %vm12953_vm0  ;;  %v13012_v7 = vrot.slane %v12949_v6, 7 }
 0x3c4   :  { %v10559_v12 = vpack.c.bf16 %v4338_v25, %v4267_v37  ;;  %v4240_v11 = vsel %vm13002_vm1, %v4236_v18, %v13001_v31  ;;  %v13005_v37 = vld [vmem:[#allocation50_spill] sm:$0xff]  ;;  %vm13006_vm13 = vmmov %vm12958_vm3  ;;  %v6756_v31 = vpop.permute.xlu1 %6755  ;;  %v13028_v25 = vld [vmem:[#allocation31_spill] sm:$0xff] }
 0x3c5   :  { %v4241_v48 = vsel %vm13004_vm15, %v13003_v2, %v4236_v18  ;;  %6081 = vmatprep.mubr.msk.bf16.mxu0 %vm13006_vm13, %v13005_v37  ;;  %vm13007_vm9 = vmmov %vm12958_vm3  ;;  %v4364_v4 = vsel %vm13010_vm14, %v4240_v11, 0.0  ;;  %v10591_v18 = vsel %vm12979_vm4, %v13012_v7, %v13011_v52  ;;  %v13018_v11 = vmov %v13012_v7  ;;  %v13023_v7 = vld [vmem:[#allocation79_spill] sm:$0xff] }
 0x3c6   :  { %12999 = vst [vmem:[#allocation71_spill] sm:$0xff] %v10559_v12  ;;  %v10577_v29 = vsel %vm13007_vm9, %v4131_v36, %v6742_v61  ;;  %vm13008_vm12 = vmmov %vm12958_vm3  ;;  %v13017_v36 = vld [vmem:[#allocation82_spill] sm:$0xff]  ;;  %v13019_v2 = vrot.slane %v12951_v3, 7  ;;  %v13022_v52 = vrot.slane %v13021_v9, 1  ;;  %v13024_v32 = vrot.slane %v13023_v7, 1 }
 0x3c7   :  { %v10581_v62 = vsel %vm13008_vm12, %v10037_v41, %v6743_v60  ;;  %vm13013_vm6 = vmmov %vm12979_vm4  ;;  %v10603_v60 = vpack.c.bf16 %v4364_v4, %v4241_v48  ;;  %v13026_v48 = vrot.slane %v12987_v42, 1  ;;  %v6758_v4 = vunpack.i.h.bf16 %v6756_v31 }
 0x3c8   :  { %v10597_v61 = vsel %vm13013_vm6, %v4041_v58, %v4042_v5  ;;  %vm13015_vm10 = vmmov %vm12979_vm4  ;;  %v6757_v3 = vunpack.i.l.bf16 %v6756_v31  ;;  %vm13029_vm3 = vnez %v13028_v25  ;;  %v4238_v12 = vrot.slane %v9938_v46, 1 }
 0x3c9   :  { %13014 = vst [vmem:[#allocation73_spill] sm:$0xff] %v10597_v61  ;;  %v10601_v41 = vsel %vm13015_vm10, %v4040_v0, %v4041_v58  ;;  %13016 = vst [vmem:[#allocation32_spill] sm:$0xff] %v10603_v60  ;;  %v4264_v0 = vsel %vm12953_vm0, %v13024_v32, %v13022_v52  ;;  %v13025_v58 = vmov %v13024_v32  ;;  %v4043_v32 = vrot.slane %v9978_v21, 7  ;;  %v6751_v61 = vpop.permute.xlu0 %6750 }
 0x3ca   :  { %vm13020_vm2 = vmmov %vm12979_vm4  ;;  %v4044_v52 = vrot.slane %v9980_v47, 7  ;;  %v13036_v25 = vrot.slane %v12987_v42, 7  ;;  %v13039_v47 = vrot.slane %v12989_v39, 7  ;;  %v13043_v42 = vld [vmem:[#allocation51_spill] sm:$0xff] }
 0x3cb   :  { %v10612_v37 = vsel %vm13020_vm2, %v13019_v2, %v13018_v11  ;;  %vm13027_vm11 = vmmov %vm12953_vm0  ;;  %v4137_v11 = vsel %vm13029_vm3, %v10288_v30, 0.0  ;;  %v13030_v2 = vld [vmem:[#allocation37_spill] sm:$0xff]  ;;  %v13035_v30 = vrot.slane %v13023_v7, 7  ;;  %vm13044_vm12 = vnez %v13043_v42 }
 0x3cc   :  { %v4265_v6 = vsel %vm13027_vm11, %v13026_v48, %v13025_v58  ;;  %vm13031_vm8 = vnez %v13030_v2  ;;  %vm13033_vm7 = vmmov %vm13007_vm9  ;;  %v13038_v21 = vmov %v13036_v25  ;;  %v6753_v48 = vunpack.i.h.bf16 %v6751_v61 }
 0x3cd   :  { %v4340_v45 = vsel %vm13031_vm8, %v4264_v0, 0.0  ;;  %v10637_v58 = vsel %vm13033_vm7, %v4137_v11, %v6757_v3  ;;  %vm13034_vm1 = vmmov %vm13033_vm7  ;;  %v13042_v3 = vpack.c.bf16 %v10172_v1, %v10168_v57  ;;  %v4135_v39 = vsel %vm13044_vm12, %v10203_v44, 0.0  ;;  %v13051_v1 = vld [vmem:[#allocation17_spill] sm:$0xff] }
 0x3ce   :  { %v10631_v60 = vpack.c.bf16 %v4340_v45, %v4265_v6  ;;  %v10641_v31 = vsel %vm13034_vm1, %v10278_v59, %v6758_v4  ;;  %vm13037_vm15 = vmmov %vm13020_vm2  ;;  %v6752_v6 = vunpack.i.l.bf16 %v6751_v61  ;;  %v13046_v61 = vrot.slane %v9941_v23, 1 }
 0x3cf   :  { %v10649_v45 = vsel %vm13037_vm15, %v13036_v25, %v13035_v30  ;;  %vm13040_vm13 = vmmov %vm13020_vm2  ;;  %4998 = vmatmul.mubr.bf16.gmra.mxu0 %v13042_v3  ;;  %v13048_v30 = vld [vmem:[#allocation69_spill] sm:$0xff]  ;;  %v4216_v57 = vrot.slane %v13017_v36, 1  ;;  %v13069_v59 = vrot.slane %v13021_v9, 7  ;;  %v13072_v3 = vrot.slane %v13023_v7, 7  ;;  %v13079_v7 = vld [vmem:[#allocation84_spill] sm:$0xff] }
 0x3d0   :  { %13032 = vst [vmem:[#allocation16_spill] sm:$0xff] %v10631_v60  ;;  %v10657_v0 = vsel %vm13040_vm13, %v13039_v47, %v13038_v21  ;;  %vm13041_vm9 = vmmov %vm13020_vm2  ;;  %v13049_v25 = vrot.slane %v13048_v30, 1  ;;  %v13060_v30 = vld [vmem:[#allocation81_spill] sm:$0xff]  ;;  %v13076_v60 = vrot.slane %v9938_v46, 7 }
 0x3d1   :  { %v10663_v4 = vsel %vm13041_vm9, %v4043_v32, %v4044_v52  ;;  %vm13045_vm14 = vmmov %vm13020_vm2 }
 0x3d2   :  { %v10673_v11 = vsel %vm13045_vm14, %v4042_v5, %v4043_v32  ;;  %vm13047_vm4 = vmmov %vm12953_vm0  ;;  %v13055_v32 = vld [vmem:[#allocation14_spill] sm:$0xff] }
 0x3d3   :  { %v4239_v2 = vsel %vm13047_vm4, %v13046_v61, %v4238_v12  ;;  %vm13050_vm6 = vmmov %vm12953_vm0  ;;  %vm13056_vm11 = vnez %v13055_v32 }
 0x3d4   :  { %v4302_v21 = vsel %vm13050_vm6, %v4238_v12, %v13049_v25  ;;  %vm13052_vm10 = vmmov %vm13034_vm1  ;;  %v13058_v12 = vld [vmem:[#allocation83_spill] sm:$0xff]  ;;  %v13061_v25 = vrot.slane %v13060_v30, 1 }
 0x3d5   :  { %6082 = vmatprep.mubr.msk.bf16.mxu0 %vm13052_vm10, %v13051_v1  ;;  %vm13053_vm2 = vmmov %vm13034_vm1  ;;  %v4366_v47 = vsel %vm13056_vm11, %v4302_v21, 0.0  ;;  %v13059_v61 = vrot.slane %v13058_v12, 1  ;;  %v6766_v21 = vpop.permute.xlu1 %6765  ;;  %v13066_v1 = vld [vmem:[#allocation38_spill] sm:$0xff] }
 0x3d6   :  { %v10687_v44 = vsel %vm13053_vm2, %v4135_v39, %v6752_v6  ;;  %vm13054_vm0 = vmmov %vm13034_vm1  ;;  %v10697_v42 = vpack.c.bf16 %v4366_v47, %v4239_v2  ;;  %v13063_v39 = vmov %v13061_v25  ;;  %vm13067_vm7 = vnez %v13066_v1 }
 0x3d7   :  { %v10691_v5 = vsel %vm13054_vm0, %v10195_v51, %v6753_v48  ;;  %vm13062_vm3 = vmmov %vm13047_vm4  ;;  %v13064_v51 = vrot.slane %v13021_v9, 1  ;;  %v4045_v2 = vrot.slane %v9941_v23, 7  ;;  %v13068_v47 = vrot.slane %v13060_v30, 7 }
 0x3d8   :  { %13057 = vst [vmem:[#allocation46_spill] sm:$0xff] %v10697_v42  ;;  %v4262_v6 = vsel %vm13062_vm3, %v13061_v25, %v13059_v61  ;;  %vm13065_vm8 = vmmov %vm13062_vm3  ;;  %v13071_v25 = vmov %v13069_v59  ;;  %v6767_v42 = vunpack.i.l.bf16 %v6766_v21 }
 0x3d9   :  { %v4263_v48 = vsel %vm13065_vm8, %v13064_v51, %v13063_v39  ;;  %v4342_v32 = vsel %vm13067_vm7, %v4262_v6, 0.0  ;;  %vm13070_vm1 = vmmov %vm13041_vm9  ;;  %v6768_v51 = vunpack.i.h.bf16 %v6766_v21  ;;  %v13074_v6 = vld [vmem:[#allocation52_spill] sm:$0xff] }
 0x3da   :  { %v4071_v61 = vsel %vm13070_vm1, %v13069_v59, %v13068_v47  ;;  %vm13073_vm15 = vmmov %vm13070_vm1  ;;  %vm13075_vm13 = vnez %v13074_v6  ;;  %v10729_v1 = vpack.c.bf16 %v4342_v32, %v4263_v48  ;;  %v13082_v47 = vrot.slane %v13058_v12, 1  ;;  %v6761_v48 = vpop.permute.xlu0 %6760 }
 0x3db   :  { %v4072_v39 = vsel %vm13073_vm15, %v13072_v3, %v13071_v25  ;;  %v4141_v23 = vsel %vm13075_vm13, %v10456_v13, 0.0  ;;  %vm13077_vm9 = vmmov %vm13070_vm1  ;;  %v13080_v3 = vrot.slane %v13079_v7, 1  ;;  %v6762_v25 = vunpack.i.l.bf16 %v6761_v48 }
 0x3dc   :  { %v10735_v59 = vsel %vm13077_vm9, %v4045_v2, %v13076_v60  ;;  %vm13078_vm12 = vmmov %vm13070_vm1 }
 0x3dd   :  { %v10739_v9 = vsel %vm13078_vm12, %v4044_v52, %v4045_v2  ;;  %vm13081_vm14 = vmmov %vm13062_vm3  ;;  %v13086_v52 = vld [vmem:[#allocation39_spill] sm:$0xff]  ;;  %v6763_v2 = vunpack.i.h.bf16 %v6761_v48 }
 0x3de   :  { %v4260_v21 = vsel %vm13081_vm14, %v4216_v57, %v13080_v3  ;;  %vm13083_vm4 = vmmov %vm13062_vm3  ;;  %vm13087_vm2 = vnez %v13086_v52 }
 0x3df   :  { %v4261_v13 = vsel %vm13083_vm4, %v13082_v47, %v4216_v57  ;;  %vm13084_vm6 = vmmov %vm13054_vm0  ;;  %v4344_v32 = vsel %vm13087_vm2, %v4260_v21, 0.0  ;;  %v13088_v57 = vpack.c.bf16 %v10352_v43, %v10348_v49  ;;  %v13097_v49 = vld [vmem:[#allocation19_spill] sm:$0xff] }
 0x3e0   :  { %v10750_v46 = vsel %vm13084_vm6, %v4141_v23, %v6767_v42  ;;  %vm13085_vm10 = vmmov %vm13054_vm0  ;;  %v10760_v3 = vpack.c.bf16 %v4344_v32, %v4261_v13  ;;  %v13089_v42 = vld [vmem:[#allocation34_spill] sm:$0xff]  ;;  %v13095_v13 = vrot.slane %v13060_v30, 7  ;;  %v6776_v32 = vpop.permute.xlu1 %6775  ;;  %v13101_v30 = vpack.c.bf16 %v10308_v20, %v10304_v15 }
 0x3e1   :  { %v10754_v60 = vsel %vm13085_vm10, %v10441_v28, %v6768_v51  ;;  %5006 = vmatmul.mubr.bf16.gmra.mxu0 %v13088_v57  ;;  %vm13090_vm0 = vnez %v13089_v42  ;;  %v13091_v28 = vrot.slane %v13017_v36, 7  ;;  %v13092_v51 = vrot.slane %v13058_v12, 7  ;;  %vm13093_vm11 = vmmov %vm13070_vm1  ;;  %v13102_v42 = vld [vmem:[#allocation53_spill] sm:$0xff] }
 0x3e2   :  { %v4717_v6 = vpack.c.bf16 %v10754_v60, %v10750_v46  ;;  %v4139_v23 = vsel %vm13090_vm0, %v10374_v54, 0.0  ;;  %vm13096_vm3 = vmmov %vm13070_vm1  ;;  %v6778_v12 = vunpack.i.h.bf16 %v6776_v32  ;;  %v6777_v57 = vunpack.i.l.bf16 %v6776_v32  ;;  %v13198_v46 = vld [vmem:[#allocation16_spill] sm:$0xff]  ;;  %v13200_v60 = vld [vmem:[#allocation46_spill] sm:$0xff] }
 0x3e3   :  { %v4069_v21 = vsel %vm13093_vm11, %v13092_v51, %v13091_v28  ;;  %v13094_v47 = vmov %v13092_v51  ;;  %vm13098_vm8 = vmmov %vm13084_vm6  ;;  %vm13103_vm15 = vnez %v13102_v42  ;;  %v13113_v42 = vld [vmem:[#allocation55_spill] sm:$0xff] }
 0x3e4   :  { %v4070_v48 = vsel %vm13096_vm3, %v13095_v13, %v13094_v47  ;;  %6083 = vmatprep.mubr.msk.bf16.mxu0 %vm13098_vm8, %v13097_v49  ;;  %vm13099_vm7 = vmmov %vm13084_vm6  ;;  %v4143_v28 = vsel %vm13103_vm15, %v10531_v19, 0.0  ;;  %v13108_v47 = vld [vmem:[#allocation54_spill] sm:$0xff]  ;;  %vm13114_vm10 = vnez %v13113_v42  ;;  %v13124_v42 = vld [vmem:[#allocation57_spill] sm:$0xff] }
 0x3e5   :  { %v10783_v43 = vsel %vm13099_vm7, %v4139_v23, %v6762_v25  ;;  %vm13100_vm1 = vmmov %vm13084_vm6  ;;  %v13104_v25 = vld [vmem:[#allocation23_spill] sm:$0xff]  ;;  %v6786_v23 = vpop.permute.xlu1 %6785  ;;  %vm13109_vm14 = vnez %v13108_v47 }
 0x3e6   :  { %v10787_v54 = vsel %vm13100_vm1, %v10366_v50, %v6763_v2  ;;  %vm13105_vm13 = vmmov %vm13100_vm1  ;;  %v6788_v15 = vunpack.i.h.bf16 %v6786_v23  ;;  %v6787_v20 = vunpack.i.l.bf16 %v6786_v23  ;;  %v4145_v19 = vsel %vm13109_vm14, %v10612_v37, 0.0 }
 0x3e7   :  { %v4715_v52 = vpack.c.bf16 %v10787_v54, %v10783_v43  ;;  %vm13106_vm9 = vmmov %vm13100_vm1  ;;  %v4147_v37 = vsel %vm13114_vm10, %v10657_v0, 0.0  ;;  %v13188_v54 = vld [vmem:[#allocation87_spill] sm:$0xff] }
 0x3e8   :  { %v10800_v50 = vsel %vm13106_vm9, %v4143_v28, %v6777_v57  ;;  %vm13107_vm12 = vmmov %vm13100_vm1  ;;  %v13115_v28 = vld [vmem:[#allocation26_spill] sm:$0xff] }
 0x3e9   :  { %5014 = vmatmul.mubr.bf16.gmra.mxu0 %v13101_v30  ;;  %v10804_v2 = vsel %vm13107_vm12, %v10515_v55, %v6778_v12  ;;  %vm13110_vm4 = vmmov %vm13100_vm1  ;;  %v6796_v32 = vpop.permute.xlu1 %6795  ;;  %v13112_v30 = vpack.c.bf16 %v10479_v38, %v10475_v22 }
 0x3ea   :  { %6084 = vmatprep.mubr.msk.bf16.mxu0 %vm13105_vm13, %v13104_v25  ;;  %v4719_v51 = vpack.c.bf16 %v10804_v2, %v10800_v50  ;;  %v10812_v13 = vsel %vm13110_vm4, %v4145_v19, %v6787_v20  ;;  %vm13111_vm6 = vmmov %vm13100_vm1  ;;  %v6798_v12 = vunpack.i.h.bf16 %v6796_v32  ;;  %v6797_v57 = vunpack.i.l.bf16 %v6796_v32  ;;  %v13119_v20 = vld [vmem:[#allocation56_spill] sm:$0xff] }
 0x3eb   :  { %v10816_v49 = vsel %vm13111_vm6, %v10591_v18, %v6788_v15  ;;  %vm13116_vm2 = vmmov %vm13100_vm1  ;;  %vm13120_vm3 = vnez %v13119_v20  ;;  %v6894_v2 = vld [vmem:[#allocation3 + $0x158] sm:$0xff] }
 0x3ec   :  { %v4721_v55 = vpack.c.bf16 %v10816_v49, %v10812_v13  ;;  %vm13117_vm0 = vmmov %vm13100_vm1  ;;  %v4149_v47 = vsel %vm13120_vm3, %v4072_v39, 0.0  ;;  %vm13125_vm1 = vnez %v13124_v42  ;;  %v13205_v49 = vld [vmem:[#allocation40_spill] sm:$0xff] }
 0x3ed   :  { %v10829_v18 = vsel %vm13117_vm0, %v4147_v37, %v6797_v57  ;;  %vm13118_vm11 = vmmov %vm13117_vm0  ;;  %v6806_v23 = vpop.permute.xlu1 %6805  ;;  %v4151_v37 = vsel %vm13125_vm1, %v4070_v48, 0.0 }
 0x3ee   :  { %v10833_v25 = vsel %vm13118_vm11, %v10649_v45, %v6798_v12  ;;  %v6808_v22 = vunpack.i.h.bf16 %v6806_v23  ;;  %v6807_v38 = vunpack.i.l.bf16 %v6806_v23  ;;  %vm13121_vm8 = vmmov %vm13117_vm0  ;;  %v6771_v23 = vpop.permute.xlu0 %6770 }
 0x3ef   :  { %v4723_v15 = vpack.c.bf16 %v10833_v25, %v10829_v18  ;;  %vm13122_vm7 = vmmov %vm13117_vm0  ;;  %v6895_v18 = vld [vmem:[#allocation3 + $0x168] sm:$0xff]  ;;  %v6896_v25 = vld [vmem:[#allocation3 + $0x150] sm:$0xff] }
 0x3f0   :  { %v10840_v0 = vsel %vm13121_vm8, %v4149_v47, %v6807_v38  ;;  %v10843_v19 = vsel %vm13122_vm7, %v4071_v61, %v6808_v22  ;;  %vm13126_vm15 = vmmov %vm13117_vm0  ;;  %v6773_v22 = vunpack.i.h.bf16 %v6771_v23  ;;  %v6772_v38 = vunpack.i.l.bf16 %v6771_v23 }
 0x3f1   :  { %5022 = vmatmul.mubr.bf16.gmra.mxu0 %v13112_v30  ;;  %v6816_v32 = vpop.permute.xlu1 %6815  ;;  %v4725_v45 = vpack.c.bf16 %v10843_v19, %v10840_v0  ;;  %v13123_v30 = vpack.c.bf16 %v10431_v40, %v10427_v26  ;;  %vm13127_vm13 = vmmov %vm13117_vm0  ;;  %v13129_v26 = vld [vmem:[#allocation60_spill] sm:$0xff]  ;;  %v4026_v0 = vrot.slane %v6894_v2, 7 }
 0x3f2   :  { %6085 = vmatprep.mubr.msk.bf16.mxu0 %vm13116_vm2, %v13115_v28  ;;  %v6818_v12 = vunpack.i.h.bf16 %v6816_v32  ;;  %v6817_v57 = vunpack.i.l.bf16 %v6816_v32  ;;  %vm13128_vm9 = vmmov %vm13117_vm0  ;;  %vm13130_vm12 = vnez %v13129_v26  ;;  %v6781_v47 = vpop.permute.xlu0 %6780 }
 0x3f3   :  { %v4157_v40 = vsel %vm13130_vm12, %v10029_v24, 0.0  ;;  %vm13131_vm14 = vmmov %vm13117_vm0  ;;  %v6783_v32 = vunpack.i.h.bf16 %v6781_v47  ;;  %v6782_v24 = vunpack.i.l.bf16 %v6781_v47 }
 0x3f4   :  { %v10855_v39 = vsel %vm13127_vm13, %v4151_v37, %v6817_v57  ;;  %v10858_v61 = vsel %vm13128_vm9, %v4069_v21, %v6818_v12  ;;  %v4670_v48 = vsel %vm13131_vm14, %v10021_v53, %v6773_v22  ;;  %vm13132_vm4 = vmmov %vm13117_vm0  ;;  %v13133_v21 = vpack.c.bf16 %v10581_v62, %v10577_v29  ;;  %v13137_v12 = vld [vmem:[#allocation61_spill] sm:$0xff]  ;;  %v13143_v37 = vld [vmem:[#allocation27_spill] sm:$0xff] }
 0x3f5   :  { %v4727_v28 = vpack.c.bf16 %v10858_v61, %v10855_v39  ;;  %vm13134_vm6 = vmmov %vm13117_vm0  ;;  %v13136_v53 = vpack.c.bf16 %v10553_v33, %v10549_v34  ;;  %vm13138_vm2 = vnez %v13137_v12  ;;  %v13141_v34 = vld [vmem:[#allocation62_spill] sm:$0xff]  ;;  %v13220_v61 = vld [vmem:[#allocation41_spill] sm:$0xff] }
 0x3f6   :  { %vm13135_vm10 = vmmov %vm13117_vm0  ;;  %v4159_v57 = vsel %vm13138_vm2, %v10158_v27, 0.0  ;;  %vm13142_vm8 = vnez %v13141_v34 }
 0x3f7   :  { %vm13139_vm11 = vmmov %vm13117_vm0  ;;  %v4161_v33 = vsel %vm13142_vm8, %v10251_v8, 0.0 }
 0x3f8   :  { %vm13140_vm3 = vmmov %vm13117_vm0 }
 0x3f9   :  { %5030 = vmatmul.mubr.bf16.gmra.mxu0 %v13123_v30  ;;  %v4672_v29 = vsel %vm13140_vm3, %v10150_v17, %v6783_v32  ;;  %vm13144_vm7 = vmmov %vm13117_vm0 }
 0x3fa   :  { %6086 = vmatprep.mubr.msk.bf16.mxu0 %vm13126_vm15, %v10011_v56  ;;  %v4669_v56 = vsel %vm13132_vm4, %v4157_v40, %v6772_v38  ;;  %vm13145_vm1 = vmmov %vm13117_vm0  ;;  %v13148_v40 = vpack.c.bf16 %v10691_v5, %v10687_v44  ;;  %v13156_v44 = vld [vmem:[#allocation10_spill] sm:$0xff]  ;;  %v13157_v5 = vld [vmem:[#allocation64_spill] sm:$0xff] }
 0x3fb   :  { %v4733_v20 = vpack.c.bf16 %v4670_v48, %v4669_v56  ;;  %vm13147_vm15 = vmmov %vm13117_vm0  ;;  %v13149_v48 = vld [vmem:[#allocation63_spill] sm:$0xff]  ;;  %vm13158_vm4 = vnez %v13157_v5 }
 0x3fc   :  { %vm13150_vm13 = vnez %v13149_v48  ;;  %v13151_v56 = vld [vmem:[#allocation43_spill] sm:$0xff]  ;;  %vm13152_vm9 = vmmov %vm13117_vm0 }
 0x3fd   :  { %5142 = vmatmul.mubr.bf16.vlgmr.msra.gmra.mxu1 %v4733_v20  ;;  %v4163_v8 = vsel %vm13150_vm13, %v10330_v14, 0.0  ;;  %vm13153_vm12 = vmmov %vm13117_vm0  ;;  %v13159_v14 = vld [vmem:[#allocation9_spill] sm:$0xff] }
 0x3fe   :  { %6100 = vmatprep.mubr.msk.bf16.mxu1 %vm13135_vm10, %v10117_v63  ;;  %v6791_v63 = vpop.permute.xlu0 %6790  ;;  %vm13155_vm14 = vmmov %vm13117_vm0 }
 0x3ff   :  { %v6793_v30 = vunpack.i.h.bf16 %v6791_v63  ;;  %v6792_v42 = vunpack.i.l.bf16 %v6791_v63  ;;  %vm13161_vm10 = vmmov %vm13117_vm0  ;;  %v13162_v63 = vld [vmem:[#allocation74_spill] sm:$0xff] }
 0x400   :  { %vm13163_vm2 = vmmov %vm13117_vm0 }
 0x401   :  { %5038 = vmatmul.mubr.bf16.gmra.mxu0 %v13133_v21  ;;  %v4673_v27 = vsel %vm13145_vm1, %v4161_v33, %v6792_v42  ;;  %v13154_v21 = vld [vmem:[#allocation29_spill] sm:$0xff]  ;;  %vm13170_vm3 = vmmov %vm13145_vm1 }
 0x402   :  { %6087 = vmatprep.mubr.msk.bf16.mxu0 %vm13134_vm6, %v10105_v35  ;;  %v4671_v35 = vsel %vm13139_vm11, %v4159_v57, %v6782_v24  ;;  %v6801_v22 = vpop.permute.xlu0 %6800  ;;  %vm13160_vm6 = vmmov %vm13117_vm0 }
 0x403   :  { %v4735_v62 = vpack.c.bf16 %v4672_v29, %v4671_v35  ;;  %v6803_v17 = vunpack.i.h.bf16 %v6801_v22  ;;  %v6802_v26 = vunpack.i.l.bf16 %v6801_v22  ;;  %v4165_v35 = vsel %vm13158_vm4, %v13156_v44, 0.0  ;;  %vm13169_vm11 = vmmov %vm13145_vm1 }
 0x404   :  { %vm13172_vm8 = vmmov %vm13145_vm1 }
 0x405   :  { %5150 = vmatmul.mubr.bf16.gmra.mxu1 %v4735_v62  ;;  %v4675_v20 = vsel %vm13153_vm12, %v4163_v8, %v6802_v26  ;;  %v4676_v47 = vsel %vm13155_vm14, %v13154_v21, %v6803_v17  ;;  %v13171_v26 = vld [vmem:[#allocation21_spill] sm:$0xff]  ;;  %vm13178_vm13 = vmmov %vm13145_vm1 }
 0x406   :  { %6101 = vmatprep.mubr.msk.bf16.mxu1 %vm13144_vm7, %v13143_v37  ;;  %v6811_v32 = vpop.permute.xlu0 %6810  ;;  %v4739_v24 = vpack.c.bf16 %v4676_v47, %v4675_v20  ;;  %v13164_v37 = vpack.c.bf16 %v10641_v31, %v10637_v58  ;;  %v13173_v58 = vld [vmem:[#allocation66_spill] sm:$0xff]  ;;  %v13175_v47 = vld [vmem:[#allocation44_spill] sm:$0xff]  ;;  %vm13181_vm12 = vmmov %vm13145_vm1 }
 0x407   :  { %v6813_v12 = vunpack.i.h.bf16 %v6811_v32  ;;  %v6812_v57 = vunpack.i.l.bf16 %v6811_v32  ;;  %vm13174_vm7 = vnez %v13173_v58  ;;  %vm13182_vm14 = vmmov %vm13145_vm1 }
 0x408   :  { %v4169_v31 = vsel %vm13174_vm7, %v10601_v41, 0.0  ;;  %vm13184_vm4 = vmmov %vm13145_vm1 }
 0x409   :  { %5046 = vmatmul.mubr.bf16.gmra.mxu0 %v13136_v53  ;;  %v10905_v53 = vpop.permute.xlu1 %6825  ;;  %v4677_v29 = vsel %vm13161_vm10, %v4165_v35, %v6812_v57  ;;  %v4678_v62 = vsel %vm13163_vm2, %v13162_v63, %v6813_v12  ;;  %v13177_v12 = vld [vmem:[#allocation73_spill] sm:$0xff]  ;;  %vm13187_vm10 = vmmov %vm13145_vm1 }
 0x40a   :  { %6088 = vmatprep.mubr.msk.bf16.mxu0 %vm13117_vm0, %v10142_v16  ;;  %v13146_v16 = vld [vmem:[#allocation28_spill] sm:$0xff]  ;;  %v4741_v42 = vpack.c.bf16 %v4678_v62, %v4677_v29  ;;  %v13179_v29 = vld [vmem:[#allocation67_spill] sm:$0xff]  ;;  %vm13189_vm2 = vmmov %vm13145_vm1  ;;  %v6828_v19 = vunpack.i.h.bf16 %v10905_v53 }
 0x40b   :  { %v4674_v23 = vsel %vm13147_vm15, %v13146_v16, %v6793_v30  ;;  %v6821_v30 = vpop.permute.xlu0 %6820  ;;  %v13166_v16 = vld [vmem:[#allocation65_spill] sm:$0xff]  ;;  %vm13176_vm15 = vmmov %vm13145_vm1 }
 0x40c   :  { %v4737_v38 = vpack.c.bf16 %v4674_v23, %v4673_v27  ;;  %v6823_v34 = vunpack.i.h.bf16 %v6821_v30  ;;  %v6822_v33 = vunpack.i.l.bf16 %v6821_v30  ;;  %v13165_v27 = vld [vmem:[#allocation30_spill] sm:$0xff]  ;;  %vm13167_vm0 = vnez %v13166_v16 }
 0x40d   :  { %v4167_v23 = vsel %vm13167_vm0, %v13165_v27, 0.0  ;;  %v10921_v22 = vpop.permute.xlu1 %6835  ;;  %vm13191_vm0 = vmmov %vm13145_vm1 }
 0x40e   :  { %5158 = vmatmul.mubr.bf16.gmra.mxu1 %v4737_v38  ;;  %v13168_v38 = vld [vmem:[#allocation70_spill] sm:$0xff]  ;;  %v4679_v17 = vsel %vm13170_vm3, %v4167_v23, %v6822_v33  ;;  %vm13197_vm3 = vmmov %vm13191_vm0 }
 0x40f   :  { %6102 = vmatprep.mubr.msk.bf16.mxu1 %vm13160_vm6, %v13159_v14  ;;  %v6831_v48 = vpop.permute.xlu0 %6830  ;;  %vm13186_vm6 = vmmov %vm13145_vm1 }
 0x410   :  { %v6832_v20 = vunpack.i.l.bf16 %v6831_v48  ;;  %vm13201_vm7 = vmmov %vm13191_vm0 }
 0x411   :  { %5054 = vmatmul.mubr.bf16.gmra.mxu0 %v13148_v40  ;;  %v4680_v40 = vsel %vm13172_vm8, %v13171_v26, %v6823_v34  ;;  %v6846_v21 = vpop.permute.xlu1 %6845  ;;  %v13183_v34 = vld [vmem:[#allocation15_spill] sm:$0xff]  ;;  %vm13199_vm8 = vmmov %vm13191_vm0 }
 0x412   :  { %6089 = vmatprep.mubr.msk.bf16.mxu0 %vm13152_vm9, %v13151_v56  ;;  %v4743_v8 = vpack.c.bf16 %v4680_v40, %v4679_v17  ;;  %v6833_v56 = vunpack.i.h.bf16 %v6831_v48  ;;  %v4681_v32 = vsel %vm13176_vm15, %v4169_v31, %v6832_v20  ;;  %v6848_v44 = vunpack.i.h.bf16 %v6846_v21  ;;  %vm13203_vm15 = vmmov %vm13191_vm0  ;;  %v13216_v48 = vld [vmem:[#allocation58_spill] sm:$0xff] }
 0x413   :  { %v6847_v5 = vunpack.i.l.bf16 %v6846_v21  ;;  %v6841_v14 = vpop.permute.xlu0 %6840  ;;  %vm13180_vm9 = vnez %v13179_v29  ;;  %v6838_v31 = vunpack.i.h.bf16 %v10921_v22  ;;  %v6837_v21 = vunpack.i.l.bf16 %v10921_v22 }
 0x414   :  { %v4682_v57 = vsel %vm13178_vm13, %v13177_v12, %v6833_v56  ;;  %v6843_v63 = vunpack.i.h.bf16 %v6841_v14  ;;  %v6842_v62 = vunpack.i.l.bf16 %v6841_v14  ;;  %v4686_v30 = vsel %vm13182_vm14, %v10735_v59, %v6848_v44  ;;  %v13190_v59 = vld [vmem:[#allocation12_spill] sm:$0xff]  ;;  %v13224_v12 = vld [vmem:[#allocation86_spill] sm:$0xff] }
 0x415   :  { %v4745_v35 = vpack.c.bf16 %v4682_v57, %v4681_v32  ;;  %vm13204_vm13 = vcmp.lt.s32.totalorder %v6996_v10, 7  ;;  %vm13210_vm14 = vcmp.lt.s32.totalorder %v6996_v10, 1  ;;  %v13225_v57 = vrot.slane %v13224_v12, 7 }
 0x416   :  { %5166 = vmatmul.mubr.bf16.gmra.mxu1 %v4739_v24  ;;  %v4173_v24 = vsel %vm13180_vm9, %v10739_v9, 0.0  ;;  %v4684_v16 = vsel %vm13187_vm10, %v10663_v4, %v6843_v63  ;;  %v13194_v4 = vld [vmem:[#allocation71_spill] sm:$0xff]  ;;  %vm13206_vm9 = vnez %v13205_v49  ;;  %vm13215_vm10 = vmmov %vm13210_vm14 }
 0x417   :  { %6103 = vmatprep.mubr.msk.bf16.mxu1 %vm13145_vm1, %v13175_v47  ;;  %v4685_v41 = vsel %vm13181_vm12, %v4173_v24, %v6847_v5  ;;  %vm13202_vm1 = vmmov %vm13191_vm0  ;;  %v13227_v5 = vld [vmem:[#allocation59_spill] sm:$0xff]  ;;  %v11034_v24 = vld [vmem:[%s11652_s7] ss:$0 sm:$0xff] }
 0x418   :  { %v4749_v27 = vpack.c.bf16 %v4686_v30, %v4685_v41  ;;  %vm13208_vm12 = vmmov %vm13204_vm13 }
 0x419   :  { %5062 = vmatmul.mubr.bf16.gmra.mxu0 %v13164_v37  ;;  %v4171_v37 = vsel %vm8829_vm5, %v10673_v11, 0.0  ;;  %v13192_v11 = vld [vmem:[#allocation45_spill] sm:$0xff]  ;;  %vm13193_vm5 = vmmov %vm13191_vm0 }
 0x41a   :  { %6090 = vmatprep.mubr.msk.bf16.mxu0 %vm13169_vm11, %v13168_v38  ;;  %v4683_v9 = vsel %vm13186_vm6, %v4171_v37, %v6842_v62  ;;  %vm13195_vm11 = vmmov %vm13191_vm0  ;;  %v13209_v38 = vrot.slane %v13017_v36, 7 }
 0x41b   :  { %v4747_v43 = vpack.c.bf16 %v4684_v16, %v4683_v9  ;;  %vm13214_vm6 = vmmov %vm13208_vm12 }
 0x41e   :  { %5174 = vmatmul.mubr.bf16.gmra.mxu1 %v4741_v42  ;;  %v13207_v42 = vrot.slane %v13079_v7, 1  ;;  %v13212_v7 = vld [vmem:[#allocation85_spill] sm:$0xff] }
 0x41f   :  { %6104 = vmatprep.mubr.msk.bf16.mxu1 %vm13189_vm2, %v13188_v54  ;;  %v13213_v26 = vrot.slane %v13212_v7, 1  ;;  %vm13217_vm2 = vnez %v13216_v48 }
 0x421   :  { %5070 = vmatmul.mubr.bf16.gmra.mxu0 %v4715_v52  ;;  %v13196_v52 = vld [vmem:[#allocation32_spill] sm:$0xff] }
 0x422   :  { %6091 = vmatprep.mubr.msk.bf16.mxu0 %vm13184_vm4, %v13183_v34  ;;  %vm13211_vm4 = vmmov %vm13191_vm0 }
 0x426   :  { %5182 = vmatmul.mubr.bf16.gmra.mxu1 %v4743_v8 }
 0x427   :  { %6105 = vmatprep.mubr.msk.bf16.mxu1 %vm13193_vm5, %v13192_v11  ;;  %vm13218_vm5 = vmmov %vm13191_vm0 }
 0x429   :  { %5078 = vmatmul.mubr.bf16.gmra.mxu0 %v4717_v6  ;;  %v6893_v6 = vld [vmem:[#allocation3 + $0x160] sm:$0xff] }
 0x42a   :  { %6092 = vmatprep.mubr.msk.bf16.mxu0 %vm13191_vm0, %v13190_v59  ;;  %v4219_v50 = vrot.slane %v6893_v6, 1  ;;  %v4027_v20 = vrot.slane %v6893_v6, 7 }
 0x42e   :  { %5190 = vmatmul.mubr.bf16.gmra.mxu1 %v4745_v35 }
 0x42f   :  { %6106 = vmatprep.mubr.msk.bf16.mxu1 %vm13197_vm3, %v13196_v52  ;;  %vm13221_vm3 = vnez %v13220_v61 }
 0x431   :  { %5086 = vmatmul.mubr.bf16.gmra.mxu0 %v4719_v51  ;;  %v4218_v51 = vrot.slane %v6894_v2, 1 }
 0x432   :  { %6093 = vmatprep.mubr.msk.bf16.mxu0 %vm13195_vm11, %v13194_v4  ;;  %vm13219_vm11 = vmmov %vm13214_vm6 }
 0x433   :  { %v4258_v13 = vsel %vm13204_vm13, %v4218_v51, %v4219_v50  ;;  %v4259_v23 = vsel %vm13208_vm12, %v13207_v42, %v4218_v51  ;;  %vm13229_vm13 = vmmov %vm13191_vm0  ;;  %vm13231_vm12 = vcmask 261120  }
 0x436   :  { %5198 = vmatmul.mubr.bf16.gmra.mxu1 %v4747_v43 }
 0x437   :  { %6107 = vmatprep.mubr.msk.bf16.mxu1 %vm13201_vm7, %v13200_v60  ;;  %vm13223_vm7 = vmmov %vm13191_vm0 }
 0x439   :  { %5094 = vmatmul.mubr.bf16.gmra.mxu0 %v4721_v55  ;;  %v4346_v55 = vsel %vm13206_vm9, %v4258_v13, 0.0  ;;  %vm13230_vm9 = vmmov %vm13191_vm0 }
 0x43a   :  { %6094 = vmatprep.mubr.msk.bf16.mxu0 %vm13199_vm8, %v13198_v46  ;;  %vm13222_vm8 = vmmov %vm13215_vm10 }
 0x43b   :  { %v4066_v32 = vsel %vm13222_vm8, %v4026_v0, %v4027_v20 }
 0x43e   :  { %5206 = vmatmul.mubr.bf16.gmra.mxu1 %v4749_v27 }
 0x441   :  { %5102 = vmatmul.mubr.bf16.gmra.mxu0 %v4723_v15  ;;  %v4025_v15 = vrot.slane %v6896_v25, 7 }
 0x442   :  { %6095 = vmatprep.mubr.msk.bf16.mxu0 %vm13202_vm1, %v10729_v1  ;;  %v4220_v1 = vrot.slane %v6895_v18, 1  ;;  %vm13226_vm1 = vmmov %vm13222_vm8 }
 0x443   :  { %v4068_v17 = vsel %vm13210_vm14, %v13209_v38, %v4025_v15  ;;  %v4065_v44 = vsel %vm13226_vm1, %v4027_v20, %v13225_v57  ;;  %v4959_v63 = vpop.f32.mrf.mxu0  ;;  %vm13232_vm14 = vmmov %vm13231_vm12 }
 0x444   :  { %v4256_v40 = vsel %vm13214_vm6, %v4220_v1, %v13213_v26  ;;  %v4153_v36 = vsel %vm13217_vm2, %v4068_v17, 0.0  ;;  %v4257_v39 = vsel %vm13219_vm11, %v4219_v50, %v4220_v1  ;;  %v4668_v29 = vsel %vm13230_vm9, %v4065_v44, %v6838_v31 }
 0x445   :  { %v4960_v62 = vadd.f32 %v11034_v24, %v4959_v63  ;;  %v4961_v41 = vpop.f32.mrf.mxu0 }
 0x447   :  { %5214 = vst.msk [vmem:[#allocation5] sm:$0xff] %vm13231_vm12, %v4960_v62  ;;  %v4962_v10 = vpop.f32.mrf.mxu0 }
 0x448   :  { %v4963_v30 = vadd.f32 %v11034_v24, %v4962_v10 }
 0x449   :  { %5110 = vmatmul.mubr.bf16.gmra.mxu0 %v4725_v45  ;;  %v4730_v45 = vpack.c.bf16 %v4346_v55, %v4259_v23  ;;  %v4964_v34 = vpop.f32.mrf.mxu0 }
 0x44a   :  { %6096 = vmatprep.mubr.msk.bf16.mxu0 %vm13203_vm15, %v10760_v3  ;;  %v6827_v3 = vunpack.i.l.bf16 %v10905_v53  ;;  %v4067_v53 = vsel %vm13215_vm10, %v4025_v15, %v4026_v0  ;;  %vm13228_vm15 = vnez %v13227_v5  ;;  %5215 = vst.msk [vmem:[#allocation5 + $0x8] sm:$0xff] %vm13232_vm14, %v4963_v30 }
 0x44b   :  { %v4666_v56 = vsel %vm13218_vm5, %v4067_v53, %v6828_v19  ;;  %v4155_v35 = vsel %vm13228_vm15, %v4066_v32, 0.0 }
 0x44c   :  { %v4665_v8 = vsel %vm13191_vm0, %v4153_v36, %v6827_v3  ;;  %v4667_v14 = vsel %vm13229_vm13, %v4155_v35, %v6837_v21 }
 0x44d   :  { %v4729_v58 = vpack.c.bf16 %v4666_v56, %v4665_v8  ;;  %v4731_v22 = vpack.c.bf16 %v4668_v29, %v4667_v14 }
 0x451   :  { %5118 = vmatmul.mubr.bf16.gmra.mxu0 %v4727_v28  ;;  %v4348_v28 = vsel %vm13221_vm3, %v4256_v40, 0.0 }
 0x452   :  { %6097 = vmatprep.mubr.msk.bf16.mxu0 %vm13211_vm4, %v4730_v45  ;;  %v4732_v47 = vpack.c.bf16 %v4348_v28, %v4257_v39  ;;  %vm13233_vm4 = vmmov %vm13231_vm12 }
 0x453   :  { %vm13234_vm6 = vmmov %vm13233_vm4 }
 0x454   :  { %v4967_v33 = vpop.f32.mrf.mxu0  ;;  %vm13235_vm10 = vmmov %vm13233_vm4 }
 0x455   :  { %v4968_v37 = vadd.f32 %v11034_v24, %v4967_v33  ;;  %vm13236_vm2 = vmmov %vm13233_vm4 }
 0x456   :  { %v4969_v27 = vpop.f32.mrf.mxu0  ;;  %vm13237_vm0 = vmmov %vm13236_vm2 }
 0x457   :  { %5216 = vst.msk [vmem:[#allocation5 + $0x10] sm:$0xff] %vm13233_vm4, %v4968_v37  ;;  %vm13238_vm5 = vmmov %vm13237_vm0 }
 0x458   :  { %v4970_v9 = vpop.f32.mrf.mxu0  ;;  %vm13239_vm11 = vmmov %vm13237_vm0 }
 0x459   :  { %5126 = vmatmul.mubr.bf16.gmra.mxu0 %v4729_v58  ;;  %v4971_v16 = vadd.f32 %v11034_v24, %v4970_v9  ;;  %vm13240_vm3 = vmmov %vm13237_vm0 }
 0x45a   :  { %6098 = vmatprep.mubr.msk.bf16.mxu0 %vm13223_vm7, %v4732_v47  ;;  %v4972_v43 = vpop.f32.mrf.mxu0  ;;  %vm13241_vm8 = vmmov %vm13237_vm0 }
 0x45b   :  { %5217 = vst.msk [vmem:[#allocation5 + $0x18] sm:$0xff] %vm13234_vm6, %v4971_v16  ;;  %vm13242_vm7 = vmmov %vm13237_vm0 }
 0x45c   :  { %v4975_v54 = vpop.f32.mrf.mxu0  ;;  %vm13243_vm1 = vmmov %vm13237_vm0 }
 0x45d   :  { %v4976_v59 = vadd.f32 %v11034_v24, %v4975_v54  ;;  %vm13244_vm15 = vmmov %vm13237_vm0 }
 0x45e   :  { %v4977_v11 = vpop.f32.mrf.mxu0  ;;  %vm13245_vm13 = vmmov %vm13237_vm0 }
 0x45f   :  { %5218 = vst.msk [vmem:[#allocation5 + $0x20] sm:$0xff] %vm13235_vm10, %v4976_v59  ;;  %vm13246_vm9 = vmmov %vm13237_vm0 }
 0x460   :  { %v4978_v4 = vpop.f32.mrf.mxu0  ;;  %vm13247_vm12 = vmmov %vm13237_vm0 }
 0x461   :  { %5134 = vmatmul.mubr.bf16.gmra.mxu0 %v4731_v22  ;;  %v4979_v52 = vadd.f32 %v11034_v24, %v4978_v4  ;;  %vm13248_vm14 = vmmov %vm13237_vm0 }
 0x462   :  { %v4980_v46 = vpop.f32.mrf.mxu0  ;;  %vm13249_vm4 = vmmov %vm13237_vm0 }
 0x463   :  { %5219 = vst.msk [vmem:[#allocation5 + $0x28] sm:$0xff] %vm13236_vm2, %v4979_v52  ;;  %vm13250_vm6 = vmmov %vm13237_vm0  ;;  %v13255_v52 = vmov 0.0  }
 0x464   :  { %vm13251_vm10 = vmmov %vm13237_vm0 }
 0x465   :  { %vm13252_vm2 = vmmov %vm13237_vm0 }
 0x472   :  { %v4983_v60 = vpop.f32.mrf.mxu0 }
 0x473   :  { %v4984_v6 = vadd.f32 %v11034_v24, %v4983_v60 }
 0x474   :  { %v4985_v50 = vpop.f32.mrf.mxu0 }
 0x475   :  { %5220 = vst.msk [vmem:[#allocation5 + $0x30] sm:$0xff] %vm13237_vm0, %v4984_v6 }
 0x476   :  { %v4986_v2 = vpop.f32.mrf.mxu0 }
 0x477   :  { %v4987_v51 = vadd.f32 %v11034_v24, %v4986_v2 }
 0x478   :  { %v4988_v13 = vpop.f32.mrf.mxu0 }
 0x479   :  { %5221 = vst.msk [vmem:[#allocation5 + $0x38] sm:$0xff] %vm13238_vm5, %v4987_v51  ;;  %vm13253_vm5 = vmmov %vm13237_vm0 }
 0x482   :  { %v4991_v49 = vpop.f32.mrf.mxu0 }
 0x483   :  { %v4992_v55 = vadd.f32 %v11034_v24, %v4991_v49 }
 0x484   :  { %v4993_v18 = vpop.f32.mrf.mxu0 }
 0x485   :  { %5222 = vst.msk [vmem:[#allocation5 + $0x40] sm:$0xff] %vm13239_vm11, %v4992_v55  ;;  %vm13254_vm11 = vmmov %vm13237_vm0  ;;  %v11096_v55 = vld [vmem:[#allocation5 + $0x10] sm:$0xff] }
 0x486   :  { %v4994_v1 = vpop.f32.mrf.mxu0 }
 0x487   :  { %v4995_v25 = vadd.f32 %v11034_v24, %v4994_v1 }
 0x488   :  { %v4996_v15 = vpop.f32.mrf.mxu0 }
 0x489   :  { %5223 = vst.msk [vmem:[#allocation5 + $0x48] sm:$0xff] %vm13240_vm3, %v4995_v25  ;;  %vm11852_vm3 = vmmov 0   ;;  %v11098_v25 = vld [vmem:[#allocation5] sm:$0xff] }
 0x48a   :  { %6323 = vmatprep.mubr.msk.f32.mxu1 %vm11852_vm3, %v13255_v52 }
 0x48f   :  { %v4999_v42 = vpop.f32.mrf.mxu0 }
 0x490   :  { %v5000_v23 = vadd.f32 %v11034_v24, %v4999_v42 }
 0x491   :  { %v5001_v0 = vpop.f32.mrf.mxu0 }
 0x492   :  { %5224 = vst.msk [vmem:[#allocation5 + $0x50] sm:$0xff] %vm13241_vm8, %v5000_v23  ;;  %vm13256_vm8 = vmmov %vm13237_vm0 }
 0x493   :  { %v5002_v19 = vpop.f32.mrf.mxu0 }
 0x494   :  { %v5003_v3 = vadd.f32 %v11034_v24, %v5002_v19  ;;  %v11106_v19 = vld [vmem:[#allocation5 + $0x18] sm:$0xff] }
 0x495   :  { %v5004_v45 = vpop.f32.mrf.mxu0 }
 0x496   :  { %5225 = vst.msk [vmem:[#allocation5 + $0x58] sm:$0xff] %vm13242_vm7, %v5003_v3  ;;  %vm13257_vm7 = vmmov %vm13237_vm0  ;;  %v5308_v3 = vld [vmem:[#allocation5 + $0x30] sm:$0xff] }
 0x4a1   :  { %v5007_v38 = vpop.f32.mrf.mxu0 }
 0x4a2   :  { %v5008_v17 = vadd.f32 %v11034_v24, %v5007_v38 }
 0x4a3   :  { %v5009_v7 = vpop.f32.mrf.mxu0 }
 0x4a4   :  { %5226 = vst.msk [vmem:[#allocation5 + $0x60] sm:$0xff] %vm13243_vm1, %v5008_v17  ;;  %vm13258_vm1 = vmmov %vm13237_vm0  ;;  %v11108_v17 = vld [vmem:[#allocation5 + $0x8] sm:$0xff]  ;;  %v5306_v7 = vld [vmem:[#allocation5 + $0x20] sm:$0xff] }
 0x4a5   :  { %v5010_v26 = vpop.f32.mrf.mxu0 }
 0x4a6   :  { %v5011_v40 = vadd.f32 %v11034_v24, %v5010_v26 }
 0x4a7   :  { %v5012_v53 = vpop.f32.mrf.mxu0 }
 0x4a8   :  { %5227 = vst.msk [vmem:[#allocation5 + $0x68] sm:$0xff] %vm13244_vm15, %v5011_v40  ;;  %vm13259_vm15 = vmmov %vm13237_vm0 }
 0x4a9   :  { %v5015_v48 = vpop.f32.mrf.mxu0 }
 0x4aa   :  { %v5016_v36 = vadd.f32 %v11034_v24, %v5015_v48 }
 0x4ab   :  { %v5017_v8 = vpop.f32.mrf.mxu0 }
 0x4ac   :  { %5228 = vst.msk [vmem:[#allocation5 + $0x70] sm:$0xff] %vm13245_vm13, %v5016_v36  ;;  %vm5288_vm13 = vcmp.ge.f32.partialorder %v11096_v55, 1.0 }
 0x4ad   :  { %v5018_v56 = vpop.f32.mrf.mxu0  ;;  %v5292_v53 = vsel %vm5288_vm13, 0.0, %v11096_v55 }
 0x4ae   :  { %v5019_v20 = vadd.f32 %v11034_v24, %v5018_v56  ;;  %v11119_v56 = vadd.f32 %v5308_v3, %v5292_v53 }
 0x4af   :  { %v5020_v39 = vpop.f32.mrf.mxu0 }
 0x4b0   :  { %5229 = vst.msk [vmem:[#allocation5 + $0x78] sm:$0xff] %vm13246_vm9, %v5019_v20  ;;  %vm13260_vm9 = vmmov %vm13237_vm0  ;;  %v5309_v39 = vld [vmem:[#allocation5 + $0x38] sm:$0xff] }
 0x4b1   :  { %v5023_v61 = vpop.f32.mrf.mxu0 }
 0x4b2   :  { %v5024_v28 = vadd.f32 %v11034_v24, %v5023_v61 }
 0x4b3   :  { %v5025_v58 = vpop.f32.mrf.mxu0 }
 0x4b4   :  { %5230 = vst.msk [vmem:[#allocation5 + $0x80] sm:$0xff] %vm13247_vm12, %v5024_v28  ;;  %vm13261_vm12 = vmmov %vm13237_vm0  ;;  %v5307_v58 = vld [vmem:[#allocation5 + $0x28] sm:$0xff] }
 0x4b5   :  { %v5026_v31 = vpop.f32.mrf.mxu0 }
 0x4b6   :  { %v5027_v21 = vadd.f32 %v11034_v24, %v5026_v31 }
 0x4b7   :  { %v5028_v47 = vpop.f32.mrf.mxu0 }
 0x4b8   :  { %5231 = vst.msk [vmem:[#allocation5 + $0x88] sm:$0xff] %vm13248_vm14, %v5027_v21  ;;  %vm5286_vm14 = vcmp.ge.f32.partialorder %v11098_v25, 1.0 }
 0x4b9   :  { %v5031_v32 = vpop.f32.mrf.mxu0  ;;  %v5290_v8 = vsel %vm5286_vm14, 0.0, %v11098_v25 }
 0x4ba   :  { %v5032_v12 = vadd.f32 %v11034_v24, %v5031_v32  ;;  %v11124_v20 = vadd.f32 %v5306_v7, %v5290_v8 }
 0x4bb   :  { %v5033_v57 = vpop.f32.mrf.mxu0 }
 0x4bc   :  { %5232 = vst.msk [vmem:[#allocation5 + $0x90] sm:$0xff] %vm13249_vm4, %v5032_v12  ;;  %vm5289_vm4 = vcmp.ge.f32.partialorder %v11106_v19, 1.0 }
 0x4bd   :  { %v5034_v44 = vpop.f32.mrf.mxu0  ;;  %v5143_v22 = vpop.f32.mrf.mxu1  ;;  %v5293_v47 = vsel %vm5289_vm4, 0.0, %v11106_v19  ;;  %v6110_v19 = vsel %vm5288_vm13, 1.0, %v13255_v52 }
 0x4be   :  { %v5035_v5 = vadd.f32 %v11034_v24, %v5034_v44  ;;  %v5144_v62 = vadd.f32 %v11034_v24, %v5143_v22  ;;  %v11134_v44 = vadd.f32 %v5309_v39, %v5293_v47  ;;  %v5334_v22 = vld [vmem:[#allocation5 + $0x40] sm:$0xff] }
 0x4bf   :  { %v5036_v35 = vpop.f32.mrf.mxu0  ;;  %v5145_v41 = vpop.f32.mrf.mxu1 }
 0x4c0   :  { %5233 = vst.msk [vmem:[#allocation5 + $0x98] sm:$0xff] %vm13250_vm6, %v5035_v5  ;;  %vm13262_vm6 = vmmov %vm13237_vm0  ;;  %v5336_v35 = vld [vmem:[#allocation5 + $0x50] sm:$0xff] }
 0x4c1   :  { %v5039_v14 = vpop.f32.mrf.mxu0  ;;  %5260 = vst.msk [vmem:[#allocation5 + $0x170] sm:$0xff] %vm13252_vm2, %v5144_v62  ;;  %v5146_v34 = vpop.f32.mrf.mxu1  ;;  %vm5287_vm2 = vcmp.ge.f32.partialorder %v11108_v17, 1.0 }
 0x4c2   :  { %v5040_v29 = vadd.f32 %v11034_v24, %v5039_v14  ;;  %v5147_v37 = vadd.f32 %v11034_v24, %v5146_v34  ;;  %v5291_v57 = vsel %vm5287_vm2, 0.0, %v11108_v17 }
 0x4c3   :  { %v5041_v63 = vpop.f32.mrf.mxu0  ;;  %v5148_v27 = vpop.f32.mrf.mxu1  ;;  %v11139_v5 = vadd.f32 %v5307_v58, %v5291_v57  ;;  %v5390_v57 = vld [vmem:[#allocation5 + $0x80] sm:$0xff] }
 0x4c4   :  { %5234 = vst.msk [vmem:[#allocation5 + $0xa0] sm:$0xff] %vm13251_vm10, %v5040_v29  ;;  %vm13263_vm10 = vmmov %vm13237_vm0  ;;  %v5337_v27 = vld [vmem:[#allocation5 + $0x58] sm:$0xff] }
 0x4c5   :  { %v5042_v10 = vpop.f32.mrf.mxu0  ;;  %5261 = vst.msk [vmem:[#allocation5 + $0x178] sm:$0xff] %vm13253_vm5, %v5147_v37  ;;  %v5151_v59 = vpop.f32.mrf.mxu1  ;;  %vm13264_vm5 = vmmov %vm13258_vm1 }
 0x4c6   :  { %v5043_v30 = vadd.f32 %v11034_v24, %v5042_v10  ;;  %v5152_v4 = vadd.f32 %v11034_v24, %v5151_v59 }
 0x4c7   :  { %v5044_v33 = vpop.f32.mrf.mxu0  ;;  %v5153_v60 = vpop.f32.mrf.mxu1 }
 0x4c8   :  { %5235 = vst.msk [vmem:[#allocation5 + $0xa8] sm:$0xff] %vm13237_vm0, %v5043_v30  ;;  %vm5316_vm0 = vcmp.ge.f32.partialorder %v11119_v56, 1.0 }
 0x4c9   :  { %v5047_v9 = vpop.f32.mrf.mxu0  ;;  %5262 = vst.msk [vmem:[#allocation5 + $0x180] sm:$0xff] %vm13257_vm7, %v5152_v4  ;;  %v5154_v50 = vpop.f32.mrf.mxu1  ;;  %v5320_v41 = vsel %vm5316_vm0, 0.0, %v11119_v56  ;;  %vm5317_vm7 = vcmp.ge.f32.partialorder %v11134_v44, 1.0 }
 0x4ca   :  { %v5048_v16 = vadd.f32 %v11034_v24, %v5047_v9  ;;  %v5155_v51 = vadd.f32 %v11034_v24, %v5154_v50  ;;  %v11150_v33 = vadd.f32 %v5336_v35, %v5320_v41 }
 0x4cb   :  { %v5049_v43 = vpop.f32.mrf.mxu0  ;;  %v5156_v49 = vpop.f32.mrf.mxu1 }
 0x4cc   :  { %5236 = vst.msk [vmem:[#allocation5 + $0xb0] sm:$0xff] %vm13254_vm11, %v5048_v16  ;;  %vm13265_vm11 = vmmov %vm13258_vm1  ;;  %v5335_v43 = vld [vmem:[#allocation5 + $0x48] sm:$0xff]  ;;  %v5362_v49 = vld [vmem:[#allocation5 + $0x60] sm:$0xff] }
 0x4cd   :  { %v5050_v54 = vpop.f32.mrf.mxu0  ;;  %5263 = vst.msk [vmem:[#allocation5 + $0x188] sm:$0xff] %vm13259_vm15, %v5155_v51  ;;  %vm13266_vm15 = vmmov %vm13258_vm1 }
 0x4ce   :  { %v5051_v11 = vadd.f32 %v11034_v24, %v5050_v54  ;;  %v5159_v1 = vpop.f32.mrf.mxu1 }
 0x4cf   :  { %v5052_v46 = vpop.f32.mrf.mxu0  ;;  %v5160_v42 = vadd.f32 %v11034_v24, %v5159_v1 }
 0x4d0   :  { %5237 = vst.msk [vmem:[#allocation5 + $0xb8] sm:$0xff] %vm13256_vm8, %v5051_v11  ;;  %v5161_v0 = vpop.f32.mrf.mxu1  ;;  %vm5314_vm8 = vcmp.ge.f32.partialorder %v11124_v20, 1.0  ;;  %v5321_v11 = vsel %vm5317_vm7, 0.0, %v11134_v44  ;;  %v6108_v44 = vsel %vm5286_vm14, 1.0, %v13255_v52 }
 0x4d1   :  { %v5055_v6 = vpop.f32.mrf.mxu0  ;;  %5264 = vst.msk [vmem:[#allocation5 + $0x190] sm:$0xff] %vm13261_vm12, %v5160_v42  ;;  %v5318_v34 = vsel %vm5314_vm8, 0.0, %v11124_v20  ;;  %vm13267_vm12 = vmmov %vm13258_vm1  ;;  %v6114_v20 = vsel %vm5316_vm0, 1.0, %v13255_v52 }
 0x4d2   :  { %v5056_v2 = vadd.f32 %v11034_v24, %v5055_v6  ;;  %v5162_v38 = vpop.f32.mrf.mxu1  ;;  %v11155_v37 = vadd.f32 %v5334_v22, %v5318_v34  ;;  %v11166_v6 = vadd.f32 %v5337_v27, %v5321_v11 }
 0x4d3   :  { %v5057_v13 = vpop.f32.mrf.mxu0  ;;  %v5163_v40 = vadd.f32 %v11034_v24, %v5162_v38 }
 0x4d4   :  { %5238 = vst.msk [vmem:[#allocation5 + $0xc0] sm:$0xff] %vm13258_vm1, %v5056_v2  ;;  %v5164_v36 = vpop.f32.mrf.mxu1  ;;  %v5364_v2 = vld [vmem:[#allocation5 + $0x70] sm:$0xff] }
 0x4d5   :  { %v5058_v18 = vpop.f32.mrf.mxu0  ;;  %5265 = vst.msk [vmem:[#allocation5 + $0x198] sm:$0xff] %vm13263_vm10, %v5163_v40  ;;  %vm11858_vm10 = vcmp.ge.f32.partialorder %v11150_v33, 1.0  ;;  %v5363_v40 = vld [vmem:[#allocation5 + $0x68] sm:$0xff] }
 0x4d6   :  { %v5059_v15 = vadd.f32 %v11034_v24, %v5058_v18  ;;  %v5167_v28 = vpop.f32.mrf.mxu1 }
 0x4d7   :  { %v5060_v23 = vpop.f32.mrf.mxu0  ;;  %v5168_v21 = vadd.f32 %v11034_v24, %v5167_v28 }
 0x4d8   :  { %5239 = vst.msk [vmem:[#allocation5 + $0xc8] sm:$0xff] %vm13260_vm9, %v5059_v15  ;;  %v5169_v12 = vpop.f32.mrf.mxu1  ;;  %vm5315_vm9 = vcmp.ge.f32.partialorder %v11139_v5, 1.0  ;;  %v5348_v23 = vsel %vm11858_vm10, 0.0, %v11150_v33 }
 0x4d9   :  { %v5063_v45 = vpop.f32.mrf.mxu0  ;;  %5266 = vst.msk [vmem:[#allocation5 + $0x1a0] sm:$0xff] %vm13265_vm11, %v5168_v21  ;;  %v5319_v60 = vsel %vm5315_vm9, 0.0, %v11139_v5  ;;  %vm13269_vm11 = vmmov %vm13258_vm1  ;;  %v11182_v0 = vadd.f32 %v5364_v2, %v5348_v23  ;;  %v5392_v21 = vld [vmem:[#allocation5 + $0x90] sm:$0xff] }
 0x4da   :  { %v5064_v26 = vadd.f32 %v11034_v24, %v5063_v45  ;;  %v5170_v29 = vpop.f32.mrf.mxu1  ;;  %v11171_v50 = vadd.f32 %v5335_v43, %v5319_v60  ;;  %v5365_v45 = vld [vmem:[#allocation5 + $0x78] sm:$0xff]  ;;  %v5420_v60 = vld [vmem:[#allocation5 + $0xb0] sm:$0xff] }
 0x4db   :  { %v5065_v48 = vpop.f32.mrf.mxu0  ;;  %v5171_v62 = vadd.f32 %v11034_v24, %v5170_v29 }
 0x4dc   :  { %5240 = vst.msk [vmem:[#allocation5 + $0xd0] sm:$0xff] %vm13262_vm6, %v5064_v26  ;;  %v5172_v30 = vpop.f32.mrf.mxu1  ;;  %vm13268_vm6 = vmmov %vm13258_vm1  ;;  %vm13281_vm0 = vcmp.ge.f32.partialorder %v11171_v50, 1.0 }
 0x4dd   :  { %v5066_v61 = vpop.f32.mrf.mxu0  ;;  %5267 = vst.msk [vmem:[#allocation5 + $0x1a8] sm:$0xff] %vm13266_vm15, %v5171_v62  ;;  %vm5345_vm15 = vcmp.ge.f32.partialorder %v11166_v6, 1.0 }
 0x4de   :  { %v5067_v31 = vadd.f32 %v11034_v24, %v5066_v61  ;;  %v5175_v16 = vpop.f32.mrf.mxu1  ;;  %v5349_v39 = vsel %vm5345_vm15, 0.0, %v11166_v6  ;;  %v6113_v6 = vsel %vm5315_vm9, 1.0, %v13255_v52 }
 0x4df   :  { %v5068_v32 = vpop.f32.mrf.mxu0  ;;  %v5176_v59 = vadd.f32 %v11034_v24, %v5175_v16  ;;  %v11197_v61 = vadd.f32 %v5365_v45, %v5349_v39 }
 0x4e0   :  { %5241 = vst.msk [vmem:[#allocation5 + $0xd8] sm:$0xff] %vm13264_vm5, %v5067_v31  ;;  %v5177_v46 = vpop.f32.mrf.mxu1  ;;  %vm11853_vm5 = vcmp.ge.f32.partialorder %v11155_v37, 1.0 }
 0x4e1   :  { %v5071_v14 = vpop.f32.mrf.mxu0  ;;  %5268 = vst.msk [vmem:[#allocation5 + $0x1b0] sm:$0xff] %vm13268_vm6, %v5176_v59  ;;  %v5346_v3 = vsel %vm11853_vm5, 0.0, %v11155_v37  ;;  %vm13270_vm6 = vmmov %vm13258_vm1  ;;  %vm5373_vm5 = vcmp.ge.f32.partialorder %v11197_v61, 1.0 }
 0x4e2   :  { %v5072_v63 = vadd.f32 %v11034_v24, %v5071_v14  ;;  %v5178_v13 = vpop.f32.mrf.mxu1  ;;  %v11188_v26 = vadd.f32 %v5362_v49, %v5346_v3  ;;  %v5418_v49 = vld [vmem:[#allocation5 + $0xa0] sm:$0xff]  ;;  %v6123_v56 = vsel %vm5373_vm5, 1.0, %v13255_v52 }
 0x4e3   :  { %v5073_v10 = vpop.f32.mrf.mxu0  ;;  %v5179_v1 = vadd.f32 %v11034_v24, %v5178_v13 }
 0x4e4   :  { %5242 = vst.msk [vmem:[#allocation5 + $0xe0] sm:$0xff] %vm13258_vm1, %v5072_v63  ;;  %v5180_v42 = vpop.f32.mrf.mxu1  ;;  %vm11855_vm3 = vcmp.ge.f32.partialorder %v11188_v26, 1.0  ;;  %v5393_v10 = vld [vmem:[#allocation5 + $0x98] sm:$0xff] }
 0x4e5   :  { %v5074_v9 = vpop.f32.mrf.mxu0  ;;  %5269 = vst.msk [vmem:[#allocation5 + $0x1b8] sm:$0xff] %vm13258_vm1, %v5179_v1  ;;  %v5374_v63 = vsel %vm11855_vm3, 0.0, %v11188_v26 }
 0x4e6   :  { %v5075_v54 = vadd.f32 %v11034_v24, %v5074_v9  ;;  %v5183_v7 = vpop.f32.mrf.mxu1  ;;  %v11220_v30 = vadd.f32 %v5390_v57, %v5374_v63  ;;  %v5391_v9 = vld [vmem:[#allocation5 + $0x88] sm:$0xff] }
 0x4e7   :  { %v5076_v4 = vpop.f32.mrf.mxu0  ;;  %v5184_v48 = vadd.f32 %v11034_v24, %v5183_v7 }
 0x4e8   :  { %5243 = vst.msk [vmem:[#allocation5 + $0xe8] sm:$0xff] %vm13267_vm12, %v5075_v54  ;;  %vm11854_vm12 = vcmp.ge.f32.partialorder %v11171_v50, 1.0  ;;  %v5185_v8 = vpop.f32.mrf.mxu1  ;;  %v5377_v54 = vsel %vm5373_vm5, 0.0, %v11197_v61  ;;  %vm13284_vm5 = vcmp.ge.f32.partialorder %v11182_v0, 1.0 }
 0x4e9   :  { %v5079_v51 = vpop.f32.mrf.mxu0  ;;  %v5347_v28 = vsel %vm11854_vm12, 0.0, %v11171_v50  ;;  %v11229_v59 = vadd.f32 %v5393_v10, %v5377_v54 }
 0x4ea   :  { %v5080_v18 = vadd.f32 %v11034_v24, %v5079_v51  ;;  %v5186_v31 = vpop.f32.mrf.mxu1  ;;  %v11203_v47 = vadd.f32 %v5363_v40, %v5347_v28 }
 0x4eb   :  { %v5081_v15 = vpop.f32.mrf.mxu0  ;;  %v5187_v12 = vadd.f32 %v11034_v24, %v5186_v31 }
 0x4ec   :  { %5244 = vst.msk [vmem:[#allocation5 + $0xf0] sm:$0xff] %vm13269_vm11, %v5080_v18  ;;  %vm13271_vm11 = vmmov %vm13258_vm1  ;;  %vm11856_vm1 = vcmp.ge.f32.partialorder %v11182_v0, 1.0  ;;  %v5188_v14 = vpop.f32.mrf.mxu1  ;;  %vm11857_vm12 = vcmp.ge.f32.partialorder %v11203_v47, 1.0 }
 0x4ed   :  { %v5082_v38 = vpop.f32.mrf.mxu0  ;;  %5270 = vst.msk [vmem:[#allocation5 + $0x1c0] sm:$0xff] %vm13271_vm11, %v5184_v48  ;;  %v5376_v29 = vsel %vm11856_vm1, 0.0, %v11182_v0  ;;  %vm13272_vm11 = vmmov %vm13270_vm6  ;;  %v5375_v11 = vsel %vm11857_vm12, 0.0, %v11203_v47  ;;  %vm11860_vm1 = vcmp.ge.f32.partialorder %v11220_v30, 1.0  ;;  %vm11862_vm12 = vcmp.ge.f32.partialorder %v11229_v59, 1.0  ;;  %v5419_v48 = vld [vmem:[#allocation5 + $0xa8] sm:$0xff] }
 0x4ee   :  { %v5083_v53 = vadd.f32 %v11034_v24, %v5082_v38  ;;  %5271 = vst.msk [vmem:[#allocation5 + $0x1c8] sm:$0xff] %vm13272_vm11, %v5187_v12  ;;  %v11214_v22 = vadd.f32 %v5392_v21, %v5376_v29  ;;  %v5191_v41 = vpop.f32.mrf.mxu1  ;;  %vm13273_vm11 = vmmov %vm13270_vm6  ;;  %v11235_v2 = vadd.f32 %v5391_v9, %v5375_v11  ;;  %v5402_v23 = vsel %vm11860_vm1, 0.0, %v11220_v30  ;;  %v5421_v38 = vld [vmem:[#allocation5 + $0xb8] sm:$0xff]  ;;  %v5446_v14 = vld [vmem:[#allocation5 + $0xc0] sm:$0xff] }
 0x4ef   :  { %v5084_v36 = vpop.f32.mrf.mxu0  ;;  %v5192_v27 = vadd.f32 %v11034_v24, %v5191_v41  ;;  %v11252_v7 = vadd.f32 %v5418_v49, %v5402_v23  ;;  %v5405_v39 = vsel %vm11862_vm12, 0.0, %v11229_v59  ;;  %v5449_v9 = vld [vmem:[#allocation5 + $0xd8] sm:$0xff]  ;;  %v5447_v11 = vld [vmem:[#allocation5 + $0xc8] sm:$0xff] }
 0x4f0   :  { %5245 = vst.msk [vmem:[#allocation5 + $0xf8] sm:$0xff] %vm13270_vm6, %v5083_v53  ;;  %v5193_v43 = vpop.f32.mrf.mxu1  ;;  %vm11859_vm3 = vcmp.ge.f32.partialorder %v11214_v22, 1.0  ;;  %vm11861_vm10 = vcmp.ge.f32.partialorder %v11235_v2, 1.0  ;;  %v11261_v28 = vadd.f32 %v5421_v38, %v5405_v39  ;;  %v5475_v17 = vld [vmem:[#allocation5 + $0xe8] sm:$0xff] }
 0x4f1   :  { %v5087_v58 = vpop.f32.mrf.mxu0  ;;  %5272 = vst.msk [vmem:[#allocation5 + $0x1d0] sm:$0xff] %vm13273_vm11, %v5192_v27  ;;  %v5404_v15 = vsel %vm11859_vm3, 0.0, %v11214_v22  ;;  %vm13274_vm11 = vmmov %vm13270_vm6  ;;  %vm11864_vm1 = vcmp.ge.f32.partialorder %v11252_v7, 1.0 }
 0x4f2   :  { %v5088_v32 = vadd.f32 %v11034_v24, %v5087_v58  ;;  %v5194_v46 = vpop.f32.mrf.mxu1  ;;  %v11246_v42 = vadd.f32 %v5420_v60, %v5404_v15  ;;  %v5403_v58 = vsel %vm11861_vm10, 0.0, %v11235_v2  ;;  %vm11865_vm10 = vcmp.ge.f32.partialorder %v11261_v28, 1.0 }
 0x4f3   :  { %v5089_v35 = vpop.f32.mrf.mxu0  ;;  %v5195_v13 = vadd.f32 %v11034_v24, %v5194_v46  ;;  %v11267_v12 = vadd.f32 %v5419_v48, %v5403_v58  ;;  %v5430_v10 = vsel %vm11864_vm1, 0.0, %v11252_v7  ;;  %v5433_v60 = vsel %vm11865_vm10, 0.0, %v11261_v28 }
 0x4f4   :  { %5246 = vst.msk [vmem:[#allocation5 + $0x100] sm:$0xff] %vm13270_vm6, %v5088_v32  ;;  %v5196_v1 = vpop.f32.mrf.mxu1  ;;  %vm11863_vm3 = vcmp.ge.f32.partialorder %v11246_v42, 1.0  ;;  %v5448_v32 = vld [vmem:[#allocation5 + $0xd0] sm:$0xff]  ;;  %v6115_v48 = vsel %vm5317_vm7, 1.0, %v13255_v52 }
 0x4f5   :  { %v5090_v62 = vpop.f32.mrf.mxu0  ;;  %5273 = vst.msk [vmem:[#allocation5 + $0x1d8] sm:$0xff] %vm13274_vm11, %v5195_v13  ;;  %vm13275_vm11 = vmmov %vm13270_vm6  ;;  %vm5427_vm12 = vcmp.ge.f32.partialorder %v11267_v12, 1.0  ;;  %v5476_v1 = vld [vmem:[#allocation5 + $0xf0] sm:$0xff] }
 0x4f6   :  { %v5091_v34 = vadd.f32 %v11034_v24, %v5090_v62  ;;  %v5199_v45 = vpop.f32.mrf.mxu1  ;;  %v5432_v62 = vsel %vm11863_vm3, 0.0, %v11246_v42  ;;  %v5431_v13 = vsel %vm5427_vm12, 0.0, %v11267_v12 }
 0x4f7   :  { %v5092_v16 = vpop.f32.mrf.mxu0  ;;  %v5200_v53 = vadd.f32 %v11034_v24, %v5199_v45  ;;  %v11278_v41 = vadd.f32 %v5448_v32, %v5432_v62  ;;  %v11299_v15 = vadd.f32 %v5447_v11, %v5431_v13  ;;  %v5474_v45 = vld [vmem:[#allocation5 + $0xe0] sm:$0xff]  ;;  %v5477_v58 = vld [vmem:[#allocation5 + $0xf8] sm:$0xff] }
 0x4f8   :  { %5247 = vst.msk [vmem:[#allocation5 + $0x108] sm:$0xff] %vm13270_vm6, %v5091_v34  ;;  %v5201_v8 = vpop.f32.mrf.mxu1  ;;  %v11284_v16 = vadd.f32 %v5446_v14, %v5430_v10  ;;  %v6112_v14 = vsel %vm5314_vm8, 1.0, %v13255_v52  ;;  %vm13282_vm8 = vcmp.ge.f32.partialorder %v11155_v37, 1.0 }
 0x4f9   :  { %v5095_v4 = vpop.f32.mrf.mxu0  ;;  %5274 = vst.msk [vmem:[#allocation5 + $0x1e0] sm:$0xff] %vm13275_vm11, %v5200_v53  ;;  %vm13276_vm11 = vmmov %vm13270_vm6  ;;  %vm5456_vm3 = vcmp.ge.f32.partialorder %v11278_v41, 1.0  ;;  %v5330_v5 = vadd.f32 %v6112_v14, %v6108_v44  ;;  %v6116_v61 = vsel %vm13282_vm8, 1.0, %v13255_v52 }
 0x4fa   :  { %v5096_v51 = vadd.f32 %v11034_v24, %v5095_v4  ;;  %v5202_v21 = vpop.f32.mrf.mxu1  ;;  %vm5454_vm1 = vcmp.ge.f32.partialorder %v11284_v16, 1.0  ;;  %v5460_v53 = vsel %vm5456_vm3, 0.0, %v11278_v41 }
 0x4fb   :  { %v5097_v18 = vpop.f32.mrf.mxu0  ;;  %v5203_v35 = vadd.f32 %v11034_v24, %v5202_v21  ;;  %v5458_v8 = vsel %vm5454_vm1, 0.0, %v11284_v16 }
 0x4fc   :  { %5248 = vst.msk [vmem:[#allocation5 + $0x110] sm:$0xff] %vm13270_vm6, %v5096_v51  ;;  %v5204_v63 = vpop.f32.mrf.mxu1  ;;  %v11293_v51 = vadd.f32 %v5449_v9, %v5433_v60  ;;  %v11325_v21 = vadd.f32 %v5474_v45, %v5458_v8  ;;  %v5332_v60 = vadd.f32 %v6114_v20, %v6110_v19 }
 0x4fd   :  { %v5098_v3 = vpop.f32.mrf.mxu0  ;;  %5275 = vst.msk [vmem:[#allocation5 + $0x1e8] sm:$0xff] %vm13276_vm11, %v5203_v35  ;;  %vm13277_vm11 = vmmov %vm13270_vm6  ;;  %v6119_v35 = vsel %vm5345_vm15, 1.0, %v13255_v52 }
 0x4fe   :  { %v5099_v40 = vadd.f32 %v11034_v24, %v5098_v3  ;;  %v5207_v27 = vpop.f32.mrf.mxu1  ;;  %vm5457_vm10 = vcmp.ge.f32.partialorder %v11293_v51, 1.0  ;;  %vm5482_vm13 = vcmp.ge.f32.partialorder %v11325_v21, 1.0 }
 0x4ff   :  { %v5100_v36 = vpop.f32.mrf.mxu0  ;;  %v5208_v54 = vadd.f32 %v11034_v24, %v5207_v27  ;;  %v5461_v63 = vsel %vm5457_vm10, 0.0, %v11293_v51  ;;  %v6136_v51 = vsel %vm5482_vm13, 1.0, %v13255_v52 }
 0x500   :  { %5249 = vst.msk [vmem:[#allocation5 + $0x118] sm:$0xff] %vm13270_vm6, %v5099_v40  ;;  %v5209_v46 = vpop.f32.mrf.mxu1  ;;  %v11313_v36 = vadd.f32 %v5476_v1, %v5460_v53  ;;  %v11347_v62 = vadd.f32 %v5477_v58, %v5461_v63  ;;  %v5486_v1 = vsel %vm5482_vm13, 0.0, %v11325_v21  ;;  %v5503_v53 = vld [vmem:[#allocation5 + $0x108] sm:$0xff] }
 0x501   :  { %v5103_v31 = vpop.f32.mrf.mxu0  ;;  %5276 = vst.msk [vmem:[#allocation5 + $0x1f0] sm:$0xff] %vm13277_vm11, %v5208_v54  ;;  %vm13278_vm11 = vmmov %vm13270_vm6 }
 0x502   :  { %v5104_v57 = vadd.f32 %v11034_v24, %v5103_v31  ;;  %v5210_v18 = vpop.f32.mrf.mxu1  ;;  %v6109_v31 = vsel %vm5287_vm2, 1.0, %v13255_v52  ;;  %vm13279_vm14 = vmmov %vm13278_vm11  ;;  %vm13280_vm2 = vcmp.ge.f32.partialorder %v11150_v33, 1.0  ;;  %vm5485_vm9 = vcmp.ge.f32.partialorder %v11347_v62, 1.0 }
 0x503   :  { %v5105_v29 = vpop.f32.mrf.mxu0  ;;  %v5211_v3 = vadd.f32 %v11034_v24, %v5210_v18  ;;  %v5504_v27 = vld [vmem:[#allocation5 + $0x110] sm:$0xff]  ;;  %v6118_v54 = vsel %vm13280_vm2, 1.0, %v13255_v52  ;;  %v5331_v11 = vadd.f32 %v6113_v6, %v6109_v31  ;;  %vm13283_vm7 = vmmov %vm13278_vm11  ;;  %v6122_v33 = vsel %vm13284_vm5, 1.0, %v13255_v52 }
 0x504   :  { %5250 = vst.msk [vmem:[#allocation5 + $0x120] sm:$0xff] %vm13270_vm6, %v5104_v57  ;;  %v5212_v40 = vpop.f32.mrf.mxu1  ;;  %v6111_v57 = vsel %vm5289_vm4, 1.0, %v13255_v52  ;;  %vm5484_vm4 = vcmp.ge.f32.partialorder %v11313_v36, 1.0  ;;  %v5360_v45 = vadd.f32 %v6118_v54, %v5332_v60  ;;  %v5489_v58 = vsel %vm5485_vm9, 0.0, %v11347_v62 }
 0x505   :  { %v5106_v34 = vpop.f32.mrf.mxu0  ;;  %5277 = vst.msk [vmem:[#allocation5 + $0x1f8] sm:$0xff] %vm13278_vm11, %v5211_v3  ;;  %v5333_v25 = vadd.f32 %v6115_v48, %v6111_v57  ;;  %v5488_v13 = vsel %vm5484_vm4, 0.0, %v11313_v36  ;;  %vm13285_vm11 = vcmp.ge.f32.partialorder %v11203_v47, 1.0  ;;  %v5358_v48 = vadd.f32 %v6116_v61, %v5330_v5 }
 0x506   :  { %v5107_v43 = vadd.f32 %v11034_v24, %v5106_v34  ;;  %v11380_v18 = vadd.f32 %v5504_v27, %v5488_v13  ;;  %v6121_v0 = vsel %vm13285_vm11, 1.0, %v13255_v52  ;;  %v5388_v31 = vadd.f32 %v6122_v33, %v5360_v45 }
 0x507   :  { %v5108_v4 = vpop.f32.mrf.mxu0  ;;  %v5361_v34 = vadd.f32 %v6119_v35, %v5333_v25  ;;  %v5505_v3 = vld [vmem:[#allocation5 + $0x118] sm:$0xff]  ;;  %vm13287_vm2 = vcmp.ge.f32.partialorder %v11188_v26, 1.0  ;;  %vm13290_vm5 = vcmp.ge.f32.partialorder %v11220_v30, 1.0  ;;  %v6129_v25 = vsel %vm5427_vm12, 1.0, %v13255_v52 }
 0x508   :  { %5251 = vst.msk [vmem:[#allocation5 + $0x128] sm:$0xff] %vm13270_vm6, %v5107_v43  ;;  %v5502_v4 = vld [vmem:[#allocation5 + $0x100] sm:$0xff]  ;;  %v6120_v44 = vsel %vm13287_vm2, 1.0, %v13255_v52  ;;  %v11402_v47 = vadd.f32 %v5505_v3, %v5489_v58  ;;  %vm5512_vm8 = vcmp.ge.f32.partialorder %v11380_v18, 1.0  ;;  %v6124_v26 = vsel %vm13290_vm5, 1.0, %v13255_v52 }
 0x509   :  { %v5111_v49 = vpop.f32.mrf.mxu0  ;;  %v11386_v37 = vadd.f32 %v5502_v4, %v5486_v1  ;;  %v5386_v63 = vadd.f32 %v6120_v44, %v5358_v48  ;;  %v5516_v30 = vsel %vm5512_vm8, 0.0, %v11380_v18  ;;  %vm13292_vm2 = vcmp.ge.f32.partialorder %v11252_v7, 1.0 }
 0x50a   :  { %v5112_v23 = vadd.f32 %v11034_v24, %v5111_v49  ;;  %v6117_v49 = vsel %vm13281_vm0, 1.0, %v13255_v52  ;;  %vm13288_vm0 = vmmov %vm13283_vm7  ;;  %vm13293_vm5 = vcmp.ge.f32.partialorder %v11261_v28, 1.0  ;;  %v6134_v61 = vsel %vm5456_vm3, 1.0, %v13255_v52 }
 0x50b   :  { %v5113_v38 = vpop.f32.mrf.mxu0  ;;  %v5359_v40 = vadd.f32 %v6117_v49, %v5331_v11  ;;  %vm5510_vm11 = vcmp.ge.f32.partialorder %v11386_v37, 1.0  ;;  %v5530_v19 = vld [vmem:[#allocation5 + $0x120] sm:$0xff]  ;;  %v5414_v12 = vadd.f32 %v6124_v26, %v5386_v63  ;;  %v6131_v11 = vsel %vm13293_vm5, 1.0, %v13255_v52 }
 0x50c   :  { %5252 = vst.msk [vmem:[#allocation5 + $0x130] sm:$0xff] %vm13270_vm6, %v5112_v23  ;;  %vm5455_vm6 = vcmp.ge.f32.partialorder %v11299_v15, 1.0  ;;  %v5389_v23 = vadd.f32 %v6123_v56, %v5361_v34  ;;  %v5514_v34 = vsel %vm5510_vm11, 0.0, %v11386_v37  ;;  %v6135_v33 = vsel %vm5457_vm10, 1.0, %v13255_v52 }
 0x50d   :  { %v5114_v39 = vpop.f32.mrf.mxu0  ;;  %v5459_v10 = vsel %vm5455_vm6, 0.0, %v11299_v15  ;;  %v11438_v54 = vadd.f32 %v5530_v19, %v5514_v34  ;;  %v6133_v28 = vsel %vm5455_vm6, 1.0, %v13255_v52  ;;  %v6140_v26 = vsel %vm5510_vm11, 1.0, %v13255_v52 }
 0x50e   :  { %v5115_v32 = vadd.f32 %v11034_v24, %v5114_v39  ;;  %v11356_v9 = vadd.f32 %v5475_v17, %v5459_v10  ;;  %v5387_v17 = vadd.f32 %v6121_v0, %v5359_v40 }
 0x50f   :  { %v5116_v29 = vpop.f32.mrf.mxu0  ;;  %vm5538_vm3 = vcmp.ge.f32.partialorder %v11438_v54, 1.0 }
 0x510   :  { %5253 = vst.msk [vmem:[#allocation5 + $0x138] sm:$0xff] %vm13279_vm14, %v5115_v32  ;;  %vm5483_vm15 = vcmp.ge.f32.partialorder %v11356_v9, 1.0  ;;  %vm13286_vm14 = vcmp.ge.f32.partialorder %v11229_v59, 1.0 }
 0x511   :  { %v5119_v55 = vpop.f32.mrf.mxu0  ;;  %v6127_v39 = vsel %vm13286_vm14, 1.0, %v13255_v52  ;;  %v5487_v32 = vsel %vm5483_vm15, 0.0, %v11356_v9  ;;  %vm13291_vm14 = vcmp.ge.f32.partialorder %v11214_v22, 1.0  ;;  %v6137_v21 = vsel %vm5483_vm15, 1.0, %v13255_v52 }
 0x512   :  { %v5120_v43 = vadd.f32 %v11034_v24, %v5119_v55  ;;  %v11411_v14 = vadd.f32 %v5503_v53, %v5487_v32  ;;  %v5417_v20 = vadd.f32 %v6127_v39, %v5389_v23  ;;  %v6128_v55 = vsel %vm13292_vm2, 1.0, %v13255_v52  ;;  %vm13295_vm2 = vmmov %vm13288_vm0 }
 0x513   :  { %v5121_v46 = vpop.f32.mrf.mxu0  ;;  %v5532_v35 = vld [vmem:[#allocation5 + $0x130] sm:$0xff]  ;;  %v5442_v60 = vadd.f32 %v6128_v55, %v5414_v12  ;;  %vm13296_vm10 = vmmov %vm13295_vm2  ;;  %v6139_v9 = vsel %vm5485_vm9, 1.0, %v13255_v52  ;;  %v5589_v12 = vld [vmem:[#allocation5 + $0x178] sm:$0xff] }
 0x514   :  { %5254 = vst.msk [vmem:[#allocation5 + $0x140] sm:$0xff] %vm13283_vm7, %v5120_v43  ;;  %vm13289_vm7 = vcmp.ge.f32.partialorder %v11235_v2, 1.0  ;;  %v6126_v2 = vsel %vm13291_vm14, 1.0, %v13255_v52  ;;  %v11432_v22 = vadd.f32 %v5532_v35, %v5516_v30  ;;  %vm5511_vm12 = vcmp.ge.f32.partialorder %v11411_v14, 1.0  ;;  %v5531_v46 = vld [vmem:[#allocation5 + $0x128] sm:$0xff] }
 0x515   :  { %v5122_v50 = vpop.f32.mrf.mxu0  ;;  %v6125_v59 = vsel %vm13289_vm7, 1.0, %v13255_v52  ;;  %vm5513_vm7 = vcmp.ge.f32.partialorder %v11402_v47, 1.0  ;;  %v5416_v43 = vadd.f32 %v6126_v2, %v5388_v31  ;;  %vm13294_vm14 = vcmp.ge.f32.partialorder %v11246_v42, 1.0 }
 0x516   :  { %v5123_v38 = vadd.f32 %v11034_v24, %v5122_v50  ;;  %v5415_v10 = vadd.f32 %v6125_v59, %v5387_v17  ;;  %v6130_v4 = vsel %vm13294_vm14, 1.0, %v13255_v52  ;;  %v5517_v49 = vsel %vm5513_vm7, 0.0, %v11402_v47 }
 0x517   :  { %v5124_v8 = vpop.f32.mrf.mxu0  ;;  %v5533_v5 = vld [vmem:[#allocation5 + $0x138] sm:$0xff]  ;;  %v6132_v42 = vsel %vm5454_vm1, 1.0, %v13255_v52  ;;  %v5515_v41 = vsel %vm5511_vm12, 0.0, %v11411_v14  ;;  %v5445_v50 = vadd.f32 %v6131_v11, %v5417_v20  ;;  %v5444_v23 = vadd.f32 %v6130_v4, %v5416_v43 }
 0x518   :  { %5255 = vst.msk [vmem:[#allocation5 + $0x148] sm:$0xff] %vm13288_vm0, %v5123_v38  ;;  %v5443_v56 = vadd.f32 %v6129_v25, %v5415_v10  ;;  %v11463_v1 = vadd.f32 %v5533_v5, %v5517_v49  ;;  %v5535_v3 = vadd.f32 %v5531_v46, %v5515_v41  ;;  %v5470_v45 = vadd.f32 %v6132_v42, %v5442_v60  ;;  %v5588_v25 = vld [vmem:[#allocation5 + $0x170] sm:$0xff] }
 0x519   :  { %v5127_v57 = vpop.f32.mrf.mxu0  ;;  %v5473_v0 = vadd.f32 %v6135_v33, %v5445_v50  ;;  %v5472_v53 = vadd.f32 %v6134_v61, %v5444_v23  ;;  %v5542_v31 = vsel %vm5538_vm3, 0.0, %v11438_v54  ;;  %v6138_v59 = vsel %vm5484_vm4, 1.0, %v13255_v52  ;;  %vm13297_vm4 = vmmov %vm13295_vm2  ;;  %v5617_v33 = vld [vmem:[#allocation5 + $0x198] sm:$0xff] }
 0x51a   :  { %v5128_v29 = vadd.f32 %v11034_v24, %v5127_v57  ;;  %v5471_v39 = vadd.f32 %v6133_v28, %v5443_v56  ;;  %vm5541_vm1 = vcmp.ge.f32.partialorder %v11463_v1, 1.0  ;;  %vm5539_vm6 = vcmp.ge.f32.partialorder %v5535_v3, 1.0  ;;  %v5616_v56 = vld [vmem:[#allocation5 + $0x190] sm:$0xff] }
 0x51b   :  { %v5129_v6 = vpop.f32.mrf.mxu0  ;;  %v5558_v38 = vld [vmem:[#allocation5 + $0x140] sm:$0xff]  ;;  %v5498_v32 = vadd.f32 %v6136_v51, %v5470_v45  ;;  %v5545_v36 = vsel %vm5541_vm1, 0.0, %v11463_v1  ;;  %v6141_v63 = vsel %vm5511_vm12, 1.0, %v13255_v52  ;;  %v5500_v19 = vadd.f32 %v6138_v59, %v5472_v53 }
 0x51c   :  { %5256 = vst.msk [vmem:[#allocation5 + $0x150] sm:$0xff] %vm13288_vm0, %v5128_v29  ;;  %vm5540_vm0 = vcmp.ge.f32.partialorder %v11432_v22, 1.0  ;;  %v11490_v57 = vadd.f32 %v5558_v38, %v5542_v31  ;;  %v5499_v62 = vadd.f32 %v6137_v21, %v5471_v39  ;;  %v5543_v20 = vsel %vm5539_vm6, 0.0, %v5535_v3 }
 0x51d   :  { %v5130_v27 = vpop.f32.mrf.mxu0  ;;  %v5544_v48 = vsel %vm5540_vm0, 0.0, %v11432_v22  ;;  %v5501_v30 = vadd.f32 %v6139_v9, %v5473_v0  ;;  %v5526_v55 = vadd.f32 %v6140_v26, %v5498_v32  ;;  %v6142_v14 = vsel %vm5512_vm8, 1.0, %v13255_v52  ;;  %v5644_v22 = vld [vmem:[#allocation5 + $0x1b0] sm:$0xff] }
 0x51e   :  { %v5131_v7 = vadd.f32 %v11034_v24, %v5130_v27  ;;  %vm5566_vm9 = vcmp.ge.f32.partialorder %v11490_v57, 1.0  ;;  %v5527_v34 = vadd.f32 %v6141_v63, %v5499_v62  ;;  %v6143_v27 = vsel %vm5513_vm7, 1.0, %v13255_v52  ;;  %v5700_v63 = vld [vmem:[#allocation5 + $0x1f0] sm:$0xff] }
 0x51f   :  { %v5132_v13 = vpop.f32.mrf.mxu0  ;;  %v5559_v17 = vld [vmem:[#allocation5 + $0x148] sm:$0xff]  ;;  %v6145_v18 = vsel %vm5539_vm6, 1.0, %v13255_v52  ;;  %v5570_v47 = vsel %vm5566_vm9, 0.0, %v11490_v57  ;;  %v5528_v60 = vadd.f32 %v6142_v14, %v5500_v19  ;;  %v5529_v54 = vadd.f32 %v6143_v27, %v5501_v30 }
 0x520   :  { %5257 = vst.msk [vmem:[#allocation5 + $0x158] sm:$0xff] %vm13295_vm2, %v5131_v7  ;;  %v11511_v10 = vadd.f32 %v5559_v17, %v5543_v20  ;;  %v6144_v7 = vsel %vm5538_vm3, 1.0, %v13255_v52  ;;  %v6146_v13 = vsel %vm5540_vm0, 1.0, %v13255_v52  ;;  %v6147_v28 = vsel %vm5541_vm1, 1.0, %v13255_v52  ;;  %v5615_v30 = vld [vmem:[#allocation5 + $0x188] sm:$0xff] }
 0x521   :  { %v5135_v15 = vpop.f32.mrf.mxu0  ;;  %v11536_v61 = vadd.f32 %v6144_v7, %v5526_v55  ;;  %v5556_v3 = vadd.f32 %v6146_v13, %v5528_v60  ;;  %v11566_v21 = vsel %vm5566_vm9, 1.0, %v13255_v52  ;;  %v5701_v7 = vld [vmem:[#allocation5 + $0x1f8] sm:$0xff] }
 0x522   :  { %v5136_v16 = vadd.f32 %v11034_v24, %v5135_v15  ;;  %vm5567_vm8 = vcmp.ge.f32.partialorder %v11511_v10, 1.0  ;;  %v11543_v15 = vadd.f32 %v6145_v18, %v5527_v34  ;;  %v5643_v18 = vld [vmem:[#allocation5 + $0x1a8] sm:$0xff] }
 0x523   :  { %v5137_v40 = vpop.f32.mrf.mxu0  ;;  %v5560_v8 = vld [vmem:[#allocation5 + $0x150] sm:$0xff]  ;;  %v5571_v45 = vsel %vm5567_vm8, 0.0, %v11511_v10 }
 0x524   :  { %5258 = vst.msk [vmem:[#allocation5 + $0x160] sm:$0xff] %vm13296_vm10, %v5136_v16  ;;  %v11479_v58 = vadd.f32 %v5560_v8, %v5544_v48  ;;  %v5557_v40 = vadd.f32 %v6147_v28, %v5529_v54  ;;  %v5645_v48 = vld [vmem:[#allocation5 + $0x1b8] sm:$0xff] }
 0x525   :  { %v5138_v44 = vpop.f32.mrf.mxu0 }
 0x526   :  { %v5139_v35 = vadd.f32 %v11034_v24, %v5138_v44  ;;  %vm5568_vm13 = vcmp.ge.f32.partialorder %v11479_v58, 1.0 }
 0x527   :  { %v5140_v29 = vpop.f32.mrf.mxu0  ;;  %v5561_v2 = vld [vmem:[#allocation5 + $0x158] sm:$0xff]  ;;  %v5572_v24 = vsel %vm5568_vm13, 0.0, %v11479_v58  ;;  %v6150_v51 = vsel %vm5568_vm13, 1.0, %v13255_v52  ;;  %v5672_v58 = vld [vmem:[#allocation5 + $0x1d0] sm:$0xff] }
 0x528   :  { %5259 = vst.msk [vmem:[#allocation5 + $0x168] sm:$0xff] %vm13297_vm4, %v5139_v35  ;;  %v5565_v37 = vadd.f32 %v5561_v2, %v5545_v36  ;;  %v5592_v6 = vadd.f32 %v5588_v25, %v5572_v24  ;;  %v5584_v59 = vadd.f32 %v6150_v51, %v5556_v3  ;;  %v5614_v35 = vld [vmem:[#allocation5 + $0x180] sm:$0xff]  ;;  %v5673_v24 = vld [vmem:[#allocation5 + $0x1d8] sm:$0xff]  ;;  %v5671_v3 = vld [vmem:[#allocation5 + $0x1c8] sm:$0xff] }
 0x52a   :  { %vm5569_vm15 = vcmp.ge.f32.partialorder %v5565_v37, 1.0  ;;  %vm5596_vm11 = vcmp.ge.f32.partialorder %v5592_v6, 1.0 }
 0x52b   :  { %v5573_v5 = vsel %vm5569_vm15, 0.0, %v5565_v37  ;;  %v5600_v43 = vsel %vm5596_vm11, 0.0, %v5592_v6  ;;  %v5586_v11 = vld [vmem:[#allocation5 + $0x160] sm:$0xff]  ;;  %v6151_v1 = vsel %vm5569_vm15, 1.0, %v13255_v52  ;;  %v6154_v8 = vsel %vm5596_vm11, 1.0, %v13255_v52 }
 0x52c   :  { %v5593_v4 = vadd.f32 %v5589_v12, %v5573_v5  ;;  %v5620_v46 = vadd.f32 %v5616_v56, %v5600_v43  ;;  %v11534_v49 = vadd.f32 %v5586_v11, %v5570_v47  ;;  %v5585_v31 = vadd.f32 %v6151_v1, %v5557_v40  ;;  %v5642_v47 = vld [vmem:[#allocation5 + $0x1a0] sm:$0xff] }
 0x52d   :  { %v5612_v29 = vadd.f32 %v6154_v8, %v5584_v59  ;;  %v6149_v12 = vsel %vm5567_vm8, 1.0, %v13255_v52  ;;  %v5698_v59 = vld [vmem:[#allocation5 + $0x1e0] sm:$0xff] }
 0x52e   :  { %vm5597_vm7 = vcmp.ge.f32.partialorder %v5593_v4, 1.0  ;;  %vm5624_vm12 = vcmp.ge.f32.partialorder %v5620_v46, 1.0  ;;  %vm5594_vm5 = vcmp.ge.f32.partialorder %v11534_v49, 1.0  ;;  %v5583_v60 = vadd.f32 %v6149_v12, %v11543_v15  ;;  %v6173_v12 = vld [vmem:[%s11654_s9] ss:$0 sm:$0xff] }
 0x52f   :  { %v5601_v42 = vsel %vm5597_vm7, 0.0, %v5593_v4  ;;  %v5628_v41 = vsel %vm5624_vm12, 0.0, %v5620_v46  ;;  %v5587_v50 = vld [vmem:[#allocation5 + $0x168] sm:$0xff]  ;;  %v5598_v0 = vsel %vm5594_vm5, 0.0, %v11534_v49  ;;  %v6155_v9 = vsel %vm5597_vm7, 1.0, %v13255_v52 }
 0x530   :  { %v5621_v23 = vadd.f32 %v5617_v33, %v5601_v42  ;;  %v5648_v16 = vadd.f32 %v5644_v22, %v5628_v41  ;;  %v11553_v38 = vadd.f32 %v5587_v50, %v5571_v45  ;;  %v6158_v17 = vsel %vm5624_vm12, 1.0, %v13255_v52  ;;  %v5670_v45 = vld [vmem:[#allocation5 + $0x1c0] sm:$0xff] }
 0x531   :  { %v5618_v26 = vadd.f32 %v5614_v35, %v5598_v0  ;;  %v5613_v37 = vadd.f32 %v6155_v9, %v5585_v31  ;;  %v5640_v6 = vadd.f32 %v6158_v17, %v5612_v29  ;;  %v6152_v54 = vsel %vm5594_vm5, 1.0, %v13255_v52 }
 0x532   :  { %vm5625_vm14 = vcmp.ge.f32.partialorder %v5621_v23, 1.0  ;;  %vm5652_vm2 = vcmp.ge.f32.partialorder %v5648_v16, 1.0  ;;  %vm5595_vm0 = vcmp.ge.f32.partialorder %v11553_v38, 1.0 }
 0x533   :  { %v5629_v53 = vsel %vm5625_vm14, 0.0, %v5621_v23  ;;  %v5656_v39 = vsel %vm5652_vm2, 0.0, %v5648_v16  ;;  %v5599_v57 = vsel %vm5595_vm0, 0.0, %v11553_v38  ;;  %v6159_v36 = vsel %vm5625_vm14, 1.0, %v13255_v52 }
 0x534   :  { %v5649_v44 = vadd.f32 %v5645_v48, %v5629_v53  ;;  %v5676_v32 = vadd.f32 %v5672_v58, %v5656_v39  ;;  %v6162_v25 = vsel %vm5652_vm2, 1.0, %v13255_v52  ;;  %v5619_v14 = vadd.f32 %v5615_v30, %v5599_v57 }
 0x535   :  { %vm5622_vm1 = vcmp.ge.f32.partialorder %v5618_v26, 1.0  ;;  %v5641_v34 = vadd.f32 %v6159_v36, %v5613_v37  ;;  %v5668_v27 = vadd.f32 %v6162_v25, %v5640_v6  ;;  %v6153_v41 = vsel %vm5595_vm0, 1.0, %v13255_v52  ;;  %v86_v37 = vld [vmem:[%s11653_s8 + $0x18] sm:$0xff]  ;;  %v84_v6 = vld [vmem:[%s11653_s8 + $0x8] sm:$0xff] }
 0x536   :  { %vm5653_vm3 = vcmp.ge.f32.partialorder %v5649_v44, 1.0  ;;  %vm5680_vm10 = vcmp.ge.f32.partialorder %v5676_v32, 1.0  ;;  %v5626_v5 = vsel %vm5622_vm1, 0.0, %v5618_v26  ;;  %vm5623_vm13 = vcmp.ge.f32.partialorder %v5619_v14, 1.0 }
 0x537   :  { %v5657_v2 = vsel %vm5653_vm3, 0.0, %v5649_v44  ;;  %v5684_v62 = vsel %vm5680_vm10, 0.0, %v5676_v32  ;;  %v6163_v55 = vsel %vm5653_vm3, 1.0, %v13255_v52  ;;  %v6166_v11 = vsel %vm5680_vm10, 1.0, %v13255_v52  ;;  %v5699_v44 = vld [vmem:[#allocation5 + $0x1e8] sm:$0xff] }
 0x538   :  { %v5677_v19 = vadd.f32 %v5673_v24, %v5657_v2  ;;  %v5704_v20 = vadd.f32 %v5700_v63, %v5684_v62  ;;  %v5669_v4 = vadd.f32 %v6163_v55, %v5641_v34  ;;  %v5627_v10 = vsel %vm5623_vm13, 0.0, %v5619_v14  ;;  %v41_v63 = vld [vmem:[%s11646_s1] sm:$0x3] }
 0x539   :  { %v5647_v13 = vadd.f32 %v5643_v18, %v5627_v10  ;;  %v5646_v28 = vadd.f32 %v5642_v47, %v5626_v5  ;;  %v5696_v33 = vadd.f32 %v6166_v11, %v5668_v27  ;;  %v6157_v23 = vsel %vm5623_vm13, 1.0, %v13255_v52 }
 0x53a   :  { %vm5681_vm6 = vcmp.ge.f32.partialorder %v5677_v19, 1.0  ;;  %vm5708_vm4 = vcmp.ge.f32.partialorder %v5704_v20, 1.0  ;;  %v5611_v1 = vadd.f32 %v6153_v41, %v5583_v60  ;;  %v5582_v38 = vadd.f32 %v11566_v21, %v11536_v61  ;;  %v83_v20 = vld [vmem:[%s11653_s8] sm:$0xff] }
 0x53b   :  { %v5685_v43 = vsel %vm5681_vm6, 0.0, %v5677_v19  ;;  %v6167_v56 = vsel %vm5681_vm6, 1.0, %v13255_v52  ;;  %v6170_v50 = vsel %vm5708_vm4, 1.0, %v13255_v52  ;;  %vm5651_vm15 = vcmp.ge.f32.partialorder %v5647_v13, 1.0  ;;  %v85_v19 = vld [vmem:[%s11653_s8 + $0x10] sm:$0xff] }
 0x53c   :  { %v5705_v46 = vadd.f32 %v5701_v7, %v5685_v43  ;;  %v5697_v42 = vadd.f32 %v6167_v56, %v5669_v4  ;;  %vm5650_vm11 = vcmp.ge.f32.partialorder %v5646_v28, 1.0  ;;  %v5655_v49 = vsel %vm5651_vm15, 0.0, %v5647_v13 }
 0x53d   :  { %v5654_v16 = vsel %vm5650_vm11, 0.0, %v5646_v28  ;;  %v5675_v51 = vadd.f32 %v5671_v3, %v5655_v49  ;;  %v5720_v0 = vadd.f32 %v6170_v50, %v5696_v33  ;;  %v6161_v53 = vsel %vm5651_vm15, 1.0, %v13255_v52 }
 0x53e   :  { %vm5709_vm9 = vcmp.ge.f32.partialorder %v5705_v46, 1.0  ;;  %v5674_v40 = vadd.f32 %v5670_v45, %v5654_v16  ;;  %v6156_v48 = vsel %vm5622_vm1, 1.0, %v13255_v52  ;;  %v5639_v8 = vadd.f32 %v6157_v23, %v5611_v1 }
 0x53f   :  { %v6171_v22 = vsel %vm5709_vm9, 1.0, %v13255_v52  ;;  %vm5679_vm8 = vcmp.ge.f32.partialorder %v5675_v51, 1.0  ;;  %v5610_v39 = vadd.f32 %v6152_v54, %v5582_v38  ;;  %v6160_v61 = vsel %vm5650_vm11, 1.0, %v13255_v52 }
 0x540   :  { %v5721_v15 = vadd.f32 %v6171_v22, %v5697_v42  ;;  %vm5678_vm7 = vcmp.ge.f32.partialorder %v5674_v40, 1.0  ;;  %v5683_v58 = vsel %vm5679_vm8, 0.0, %v5675_v51  ;;  %v6165_v31 = vsel %vm5679_vm8, 1.0, %v13255_v52 }
 0x541   :  { %v5682_v21 = vsel %vm5678_vm7, 0.0, %v5674_v40  ;;  %v5667_v32 = vadd.f32 %v6161_v53, %v5639_v8  ;;  %v5703_v35 = vadd.f32 %v5699_v44, %v5683_v58  ;;  %v5638_v9 = vadd.f32 %v6156_v48, %v5610_v39 }
 0x542   :  { %6316 = vmatpush3.msra.mxu1 %v5721_v15  ;;  %v5702_v17 = vadd.f32 %v5698_v59, %v5682_v21  ;;  %v6164_v26 = vsel %vm5678_vm7, 1.0, %v13255_v52  ;;  %vm13298_vm14 = vcmask 261120   ;;  %vm13299_vm2 = vmmov 0  }
 0x543   :  { %6317 = vmatprep.subr.mxu1 %v13255_v52  ;;  %v5695_v29 = vadd.f32 %v6165_v31, %v5667_v32  ;;  %vm5707_vm12 = vcmp.ge.f32.partialorder %v5703_v35, 1.0  ;;  %v5666_v57 = vadd.f32 %v6160_v61, %v5638_v9  ;;  %vm13300_vm0 = vmmov %vm13298_vm14  ;;  %vm5874_vm3 = vcmask 17408  }
 0x544   :  { %6318 = vmatpush3.msra.mxu1 %v5720_v0  ;;  %vm5706_vm5 = vcmp.ge.f32.partialorder %v5702_v17, 1.0  ;;  %v6169_v36 = vsel %vm5707_vm12, 1.0, %v13255_v52 }
 0x545   :  { %6319 = vmatprep.subr.mxu1 %v13255_v52  ;;  %v6168_v2 = vsel %vm5706_vm5, 1.0, %v13255_v52  ;;  %v5719_v24 = vadd.f32 %v6169_v36, %v5695_v29  ;;  %v5694_v25 = vadd.f32 %v6164_v26, %v5666_v57 }
 0x547   :  { %6320 = vmatpush3.msra.mxu1 %v5719_v24  ;;  %v5718_v62 = vadd.f32 %v6168_v2, %v5694_v25 }
 0x548   :  { %6321 = vmatprep.subr.mxu1 %v13255_v52 }
 0x549   :  { %6322 = vmatpush3.msra.mxu1 %v5718_v62 }
 0x54a   :  { %6324 = vmatmul.mubr.msk.f32.vlgmr.msra.gmra.mxu1 %vm13298_vm14, %v41_v63  ;;  %6326 = vmatprep.subr.mxu1 %v13255_v52 }
 0x54b   :  { %6327 = vmatpush3.msra.mxu1 %v86_v37  ;;  %6334 = vmatprep.mubr.msk.f32.mxu1 %vm13299_vm2, %v13255_v52 }
 0x54c   :  { %6328 = vmatprep.subr.mxu1 %v13255_v52 }
 0x54d   :  { %6329 = vmatpush3.msra.mxu1 %v85_v19 }
 0x54e   :  { %6330 = vmatprep.subr.mxu1 %v13255_v52 }
 0x54f   :  { %6331 = vmatpush3.msra.mxu1 %v84_v6 }
 0x550   :  { %6332 = vmatprep.subr.mxu1 %v13255_v52 }
 0x551   :  { %6333 = vmatpush3.msra.mxu1 %v83_v20 }
 0x60a   :  { %v5791_v30 = vpop.f32.mrf.mxu1 }
 0x60b   :  { %6335 = vmatmul.mubr.msk.f32.vlgmr.msra.gmra.mxu1 %vm13300_vm0, %v5791_v30 }
 0x60c   :  { %v6325_v55 = vpop.f32.mrf.mxu1 }
 0x6cb   :  { %v5870_v14 = vpop.f32.mrf.mxu1 }
 0x6cc   :  { %v5871_v34 = vadd.f32 %v6173_v12, %v5870_v14 }
 0x6cd   :  { %v6336_v52 = vpop.f32.mrf.mxu1 }
 0x6ce   :  { %5875 = vst.msk [vmem:[#allocation6] sm:$0x3] %vm5874_vm3, %v5871_v34 }
 0x6cf   :  { %6908 = shalt.err (!%p6905_p4)
}
 0x6d0   :  { %5885 = dma.vmem_to_hbm [thread:$0]  %s5883_s11, 32, %s11655_s10, [#allocation7]  }
 0x6d1   :  { %6917 = dma.done.wait [#allocation7], 32  }
 0x6d2   :  { %6918 = vsyncadd [#allocation7], 4294967264 }
 0x6d3   :  { %5889 = vsyncpa [#allocation7], 1 }

</bundles_post_ra>
